<compile_context>
chip_gen: v7x
topology: tpu7x:2x2x1
jax: 0.10.0
libtpu: 0.0.40
codegen_flags: <defaults>
</compile_context>

<pallas_src>
import math

import jax
import jax.numpy as jnp
from jax.experimental import pallas as pl
from jax.experimental.pallas import tpu as pltpu

SEQ_LEN   = 20
S_PAD     = 24          # sequence rows padded to a multiple of 8 sublanes
N_HEADS   = 2
N_LAYERS  = 2
N_OUTPUT  = 2
N_OUT_PAD = 128         # output lanes padded to one full vreg lane width


def _round_up(x, m):
    return (x + m - 1) // m * m


def _layer_norm(x, g, b, eps=1e-5):
    mu  = jnp.mean(x, axis=-1, keepdims=True)
    var = jnp.mean((x - mu) ** 2, axis=-1, keepdims=True)
    return (x - mu) * jax.lax.rsqrt(var + eps) * g + b


def _mm(a, w_bf16):
    """MXU matmul: activation cast to bf16, weight already bf16, f32 accumulate."""
    return jnp.dot(a.astype(jnp.bfloat16), w_bf16,
                   preferred_element_type=jnp.float32)


def _tst_kernel(x_ref, w_in_ref, b_in_ref, pos_ref,
                wqkv_ref, bqkv_ref, wo_ref, bo_ref, ln1g_ref, ln1b_ref,
                w1_ref, b1_ref, w2_ref, b2_ref, ln2g_ref, ln2b_ref,
                wout_ref, bout_ref, o_ref):
    """One grid step == b_tile batch elements (whole sequences in VMEM)."""
    bt, s_pad, d_in = x_ref.shape
    d_model = w_in_ref.shape[1]
    d_head  = d_model // N_HEADS
    scale   = 1.0 / math.sqrt(d_head)
    n       = bt * s_pad
    bf16    = jnp.bfloat16

    # masks for the padded sequence rows (cols 20..23 are padding)
    key_bias = jnp.where(
        jax.lax.broadcasted_iota(jnp.int32, (1, 1, s_pad), 2) < SEQ_LEN,
        0.0, -1e30).astype(jnp.float32)                       # (1, 1, S_PAD)
    row_mask = jnp.where(
        jax.lax.broadcasted_iota(jnp.int32, (1, s_pad, 1), 1) < SEQ_LEN,
        1.0, 0.0).astype(jnp.float32)                         # (1, S_PAD, 1)

    # ---------------- input projection + positional encoding ----------------
    x = x_ref[...].reshape(n, d_in)                           # (B*S, D_in)
    h = _mm(x, w_in_ref[...]) + b_in_ref[...]
    h = (h.reshape(bt, s_pad, d_model) + pos_ref[...]).reshape(n, d_model)

    for l in range(N_LAYERS):                                 # static unroll
        # ------------- multi-head self-attention (fused QKV) -------------
        qkv = _mm(h, wqkv_ref[l]) + bqkv_ref[l]               # (n, 3*d_model)
        qkv = qkv.reshape(bt, s_pad, 3 * d_model)

        heads = []
        for hh in range(N_HEADS):                             # static unroll
            q0 = hh * d_head
            qh = qkv[:, :, q0:q0 + d_head]
            kh = qkv[:, :, d_model + q0:d_model + q0 + d_head]
            vh = qkv[:, :, 2 * d_model + q0:2 * d_model + q0 + d_head]

            sc = jnp.einsum('bqd,bkd->bqk', qh.astype(bf16), kh.astype(bf16),
                            preferred_element_type=jnp.float32) * scale
            sc = sc + key_bias                                # mask padded keys
            sc = sc - jnp.max(sc, axis=-1, keepdims=True)
            p = jnp.exp(sc)
            p = p * pl.reciprocal(jnp.sum(p, axis=-1, keepdims=True),
                                  approx=True)
            heads.append(
                jnp.einsum('bqk,bkd->bqd', p.astype(bf16), vh.astype(bf16),
                           preferred_element_type=jnp.float32))

        oh = jnp.concatenate(heads, axis=-1).reshape(n, d_model)
        attn = _mm(oh, wo_ref[l]) + bo_ref[l]                 # single K=d_model proj
        h = _layer_norm(h + attn, ln1g_ref[l], ln1b_ref[l])

        # ---------------- position-wise feed-forward ----------------
        f = _mm(h, w1_ref[l]) + b1_ref[l]
        f = jnp.maximum(f, 0.0)
        f = _mm(f, w2_ref[l]) + b2_ref[l]
        h = _layer_norm(h + f, ln2g_ref[l], ln2b_ref[l])

    # ---------------- masked mean-pool over sequence + head ----------------
    h3 = h.reshape(bt, s_pad, d_model) * row_mask
    pooled = jnp.sum(h3, axis=1) * (1.0 / SEQ_LEN)            # (B_TILE, D)
    out = _mm(pooled, wout_ref[...]) + bout_ref[...]          # (B_TILE, 128)
    o_ref[...] = out


def init_params(key, input_width):
    """Deterministic synthetic parameters (no checkpoint load)."""
    d_model = input_width
    assert d_model % N_HEADS == 0
    d_ff = 2 * d_model
    ks = jax.random.split(key, 16)

    def w(k, shape, fan_in):
        return jax.random.normal(k, shape, jnp.float32) / math.sqrt(fan_in)

    zeros = lambda s: jnp.zeros(s, jnp.float32)
    ones  = lambda s: jnp.ones(s, jnp.float32)
    L = N_LAYERS
    return dict(
        w_in=w(ks[0], (input_width, d_model), input_width),
        b_in=zeros((1, d_model)),
        pos=0.02 * jax.random.normal(ks[1], (SEQ_LEN, d_model), jnp.float32),
        wq=w(ks[2], (L, d_model, d_model), d_model), bq=zeros((L, 1, d_model)),
        wk=w(ks[3], (L, d_model, d_model), d_model), bk=zeros((L, 1, d_model)),
        wv=w(ks[4], (L, d_model, d_model), d_model), bv=zeros((L, 1, d_model)),
        wo=w(ks[5], (L, d_model, d_model), d_model), bo=zeros((L, 1, d_model)),
        ln1g=ones((L, 1, d_model)), ln1b=zeros((L, 1, d_model)),
        w1=w(ks[6], (L, d_model, d_ff), d_model),    b1=zeros((L, 1, d_ff)),
        w2=w(ks[7], (L, d_ff, d_model), d_ff),       b2=zeros((L, 1, d_model)),
        ln2g=ones((L, 1, d_model)), ln2b=zeros((L, 1, d_model)),
        w_out=w(ks[8], (d_model, N_OUTPUT), d_model),
        b_out=zeros((1, N_OUTPUT)),
    )


def _prepare_weight_args(params):
    """Fuse QKV, pad pos / output width, pre-cast matmul weights to bf16."""
    bf16 = jnp.bfloat16
    wqkv = jnp.concatenate([params["wq"], params["wk"], params["wv"]], axis=-1)
    bqkv = jnp.concatenate([params["bq"], params["bk"], params["bv"]], axis=-1)
    pos = jnp.pad(params["pos"], ((0, S_PAD - SEQ_LEN), (0, 0)))
    w_out = jnp.pad(params["w_out"], ((0, 0), (0, N_OUT_PAD - N_OUTPUT)))
    b_out = jnp.pad(params["b_out"], ((0, 0), (0, N_OUT_PAD - N_OUTPUT)))
    return [
        params["w_in"].astype(bf16), params["b_in"], pos,
        wqkv.astype(bf16), bqkv,
        params["wo"].astype(bf16), params["bo"],
        params["ln1g"], params["ln1b"],
        params["w1"].astype(bf16), params["b1"],
        params["w2"].astype(bf16), params["b2"],
        params["ln2g"], params["ln2b"],
        w_out.astype(bf16), b_out,
    ]


def _pick_b_tile(B, d_model, d_in):
    """Batch-tile: VMEM-budget-bounded, >=2 grid steps when B allows (dual TC)."""
    per_sample = S_PAD * (12 * max(d_model, 32) + 4 * max(d_in, 32)) * 4
    budget = 20 << 20                                 # f32 activation budget
    cap = max(8, min(512, ((budget // per_sample) // 8) * 8))
    if B <= 8:
        return 8
    half = _round_up((B + 1) // 2, 8)                 # split across 2 grid steps
    return max(8, min(cap, half))


def _vmem_limit_bytes(b_tile, d_in, d_model, weight_args):
    n = b_tile * S_PAD
    acts = n * 12 * max(d_model, 32) * 4              # f32 intermediates
    xblk = 2 * b_tile * S_PAD * d_in * 4              # double-buffered x block
    outb = 2 * b_tile * N_OUT_PAD * 4
    wts = 2 * sum(int(a.size) * a.dtype.itemsize for a in weight_args)
    total = acts + xblk + outb + wts + (2 << 20)
    return int(min(max(total, 32 << 20), 56 << 20))   # safe on v5e/v6e/v7x


def tst_logs_forward(params, x):
    B, S, d_in = x.shape
    assert S == SEQ_LEN, f"expected seq_len={SEQ_LEN}, got {S}"
    d_model = params["w_in"].shape[1]

    b_tile = _pick_b_tile(B, d_model, d_in)
    B_pad = _round_up(B, b_tile)

    # pad sequence 20 -> 24 (tile-aligned sublanes) and batch to B_pad
    x = jnp.pad(x, ((0, B_pad - B), (0, S_PAD - S), (0, 0)))
    weight_args = _prepare_weight_args(params)

    def full_spec(a):
        nd = a.ndim
        return pl.BlockSpec(a.shape, lambda i, _nd=nd: (0,) * _nd)

    in_specs = ([pl.BlockSpec((b_tile, S_PAD, d_in), lambda i: (i, 0, 0))]
                + [full_spec(a) for a in weight_args])
    out_spec = pl.BlockSpec((b_tile, N_OUT_PAD), lambda i: (i, 0))

    out = pl.pallas_call(
        _tst_kernel,
        out_shape=jax.ShapeDtypeStruct((B_pad, N_OUT_PAD), jnp.float32),
        grid_spec=pltpu.PrefetchScalarGridSpec(
            num_scalar_prefetch=0,
            grid=(B_pad // b_tile,),
            in_specs=in_specs,
            out_specs=out_spec,
        ),
        compiler_params=pltpu.CompilerParams(
            dimension_semantics=("parallel",),   # batch axis carries no state
            vmem_limit_bytes=_vmem_limit_bytes(b_tile, d_in, d_model,
                                               weight_args)),
    )(x, *weight_args)
    return out[:B, :N_OUTPUT]


class TSTLogs:
    """JAX/Pallas counterpart of the PyTorch TSTLogs module."""

    def __init__(self, input_width, n_output, num_hidden_layers,
                 hidden_layer_size, key=jax.random.PRNGKey(0)):
        # n_output / num_hidden_layers / hidden_layer_size are unused — the
        # original module ignores them and hardcodes the Transformer config.
        del n_output, num_hidden_layers, hidden_layer_size
        self.params = init_params(key, input_width)
        self._fwd = jax.jit(tst_logs_forward)

    def __call__(self, data):
        return self._fwd(self.params, data["sys_logs"])


if __name__ == "__main__":
    key = jax.random.PRNGKey(0)
    k_x, k_p = jax.random.split(key)

    B, input_width = 2, 32
    x = jax.random.normal(k_x, (B, SEQ_LEN, input_width), jnp.float32)

    model = TSTLogs(input_width, n_output=2, num_hidden_layers=2,
                    hidden_layer_size=32, key=k_p)
    out = model({"sys_logs": x})
    jax.block_until_ready(out)
    assert out.shape == (B, N_OUTPUT) and out.dtype == jnp.float32
    assert bool(jnp.all(jnp.isfinite(out)))
    print("KERNEL_OK")
</pallas_src>

<mosaic_0001>
module attributes {stable_mosaic.version = 11 : i64} {
  func.func @_tst_kernel(%arg0: i32, %arg1: memref<8x24x32xf32, #tpu.memory_space<vmem>>, %arg2: memref<32x32xbf16, #tpu.memory_space<vmem>>, %arg3: memref<1x32xf32, #tpu.memory_space<vmem>>, %arg4: memref<24x32xf32, #tpu.memory_space<vmem>>, %arg5: memref<2x32x96xbf16, #tpu.memory_space<vmem>>, %arg6: memref<2x1x96xf32, #tpu.memory_space<vmem>>, %arg7: memref<2x32x32xbf16, #tpu.memory_space<vmem>>, %arg8: memref<2x1x32xf32, #tpu.memory_space<vmem>>, %arg9: memref<2x1x32xf32, #tpu.memory_space<vmem>>, %arg10: memref<2x1x32xf32, #tpu.memory_space<vmem>>, %arg11: memref<2x32x64xbf16, #tpu.memory_space<vmem>>, %arg12: memref<2x1x64xf32, #tpu.memory_space<vmem>>, %arg13: memref<2x64x32xbf16, #tpu.memory_space<vmem>>, %arg14: memref<2x1x32xf32, #tpu.memory_space<vmem>>, %arg15: memref<2x1x32xf32, #tpu.memory_space<vmem>>, %arg16: memref<2x1x32xf32, #tpu.memory_space<vmem>>, %arg17: memref<32x128xbf16, #tpu.memory_space<vmem>>, %arg18: memref<1x128xf32, #tpu.memory_space<vmem>>, %arg19: memref<8x128xf32, #tpu.memory_space<vmem>>) attributes {dimension_semantics = [#tpu.dimension_semantics<parallel>], iteration_bounds = array<i64: 1>, scalar_prefetch = 0 : i64, scratch_operands = 0 : i64, tpu.core_type = #tpu.core_type<tc>, window_params = [{transform_indices = @transform_0, window_bounds = array<i64: 8, 24, 32>}, {pipeline_mode = #tpu.pipeline_mode<synchronous>, transform_indices = @transform_1, window_bounds = array<i64: 32, 32>}, {pipeline_mode = #tpu.pipeline_mode<synchronous>, transform_indices = @transform_2, window_bounds = array<i64: 1, 32>}, {pipeline_mode = #tpu.pipeline_mode<synchronous>, transform_indices = @transform_3, window_bounds = array<i64: 24, 32>}, {pipeline_mode = #tpu.pipeline_mode<synchronous>, transform_indices = @transform_4, window_bounds = array<i64: 2, 32, 96>}, {pipeline_mode = #tpu.pipeline_mode<synchronous>, transform_indices = @transform_5, window_bounds = array<i64: 2, 1, 96>}, {pipeline_mode = #tpu.pipeline_mode<synchronous>, transform_indices = @transform_6, window_bounds = array<i64: 2, 32, 32>}, {pipeline_mode = #tpu.pipeline_mode<synchronous>, transform_indices = @transform_7, window_bounds = array<i64: 2, 1, 32>}, {pipeline_mode = #tpu.pipeline_mode<synchronous>, transform_indices = @transform_8, window_bounds = array<i64: 2, 1, 32>}, {pipeline_mode = #tpu.pipeline_mode<synchronous>, transform_indices = @transform_9, window_bounds = array<i64: 2, 1, 32>}, {pipeline_mode = #tpu.pipeline_mode<synchronous>, transform_indices = @transform_10, window_bounds = array<i64: 2, 32, 64>}, {pipeline_mode = #tpu.pipeline_mode<synchronous>, transform_indices = @transform_11, window_bounds = array<i64: 2, 1, 64>}, {pipeline_mode = #tpu.pipeline_mode<synchronous>, transform_indices = @transform_12, window_bounds = array<i64: 2, 64, 32>}, {pipeline_mode = #tpu.pipeline_mode<synchronous>, transform_indices = @transform_13, window_bounds = array<i64: 2, 1, 32>}, {pipeline_mode = #tpu.pipeline_mode<synchronous>, transform_indices = @transform_14, window_bounds = array<i64: 2, 1, 32>}, {pipeline_mode = #tpu.pipeline_mode<synchronous>, transform_indices = @transform_15, window_bounds = array<i64: 2, 1, 32>}, {pipeline_mode = #tpu.pipeline_mode<synchronous>, transform_indices = @transform_16, window_bounds = array<i64: 32, 128>}, {pipeline_mode = #tpu.pipeline_mode<synchronous>, transform_indices = @transform_17, window_bounds = array<i64: 1, 128>}, {transform_indices = @transform_18, window_bounds = array<i64: 8, 128>}]} {
    %0 = tpu.iota {dimensions = array<i32: 2>} : vector<1x1x24xi32>
    %c20_i32 = arith.constant 20 : i32
    %1 = vector.broadcast %c20_i32 : i32 to vector<1x1x24xi32>
    %2 = arith.cmpi slt, %0, %1 : vector<1x1x24xi32>
    %cst = arith.constant 0.000000e+00 : f32
    %cst_0 = arith.constant -1.000000e+30 : f32
    %3 = vector.broadcast %cst : f32 to vector<1x1x24xf32>
    %4 = vector.broadcast %cst_0 : f32 to vector<1x1x24xf32>
    %5 = arith.select %2, %3, %4 : vector<1x1x24xi1>, vector<1x1x24xf32>
    %6 = tpu.iota {dimensions = array<i32: 1>} : vector<1x24x1xi32>
    %c20_i32_1 = arith.constant 20 : i32
    %7 = vector.broadcast %c20_i32_1 : i32 to vector<1x24x1xi32>
    %8 = arith.cmpi slt, %6, %7 : vector<1x24x1xi32>
    %cst_2 = arith.constant 1.000000e+00 : f32
    %cst_3 = arith.constant 0.000000e+00 : f32
    %9 = vector.broadcast %cst_2 : f32 to vector<1x24x1xf32>
    %10 = vector.broadcast %cst_3 : f32 to vector<1x24x1xf32>
    %11 = arith.select %8, %9, %10 : vector<1x24x1xi1>, vector<1x24x1xf32>
    %c0 = arith.constant 0 : index
    %c0_4 = arith.constant 0 : index
    %c0_5 = arith.constant 0 : index
    %12 = vector.load %arg1[%c0, %c0_4, %c0_5] : memref<8x24x32xf32, #tpu.memory_space<vmem>>, vector<8x24x32xf32>
    %13 = vector.shape_cast %12 : vector<8x24x32xf32> to vector<192x32xf32>
    %c0_6 = arith.constant 0 : index
    %c0_7 = arith.constant 0 : index
    %14 = vector.load %arg2[%c0_6, %c0_7] : memref<32x32xbf16, #tpu.memory_space<vmem>>, vector<32x32xbf16>
    %15 = arith.truncf %13 : vector<192x32xf32> to vector<192x32xbf16>
    %cst_8 = arith.constant dense<0.000000e+00> : vector<192x32xf32>
    %16 = tpu.matmul %15, %14, %cst_8 {dimension_numbers = #tpu.dot_dimension_numbers<[1], [0], [0], [1], [0, 0, 1, 1], [], []>} : vector<192x32xbf16>, vector<32x32xbf16>, vector<192x32xf32> -> vector<192x32xf32>
    %c0_9 = arith.constant 0 : index
    %c0_10 = arith.constant 0 : index
    %17 = vector.load %arg3[%c0_9, %c0_10] : memref<1x32xf32, #tpu.memory_space<vmem>>, vector<1x32xf32>
    %18 = vector.broadcast %17 : vector<1x32xf32> to vector<192x32xf32>
    %19 = arith.addf %16, %18 : vector<192x32xf32>
    %20 = vector.shape_cast %19 : vector<192x32xf32> to vector<8x24x32xf32>
    %c0_11 = arith.constant 0 : index
    %c0_12 = arith.constant 0 : index
    %21 = vector.load %arg4[%c0_11, %c0_12] : memref<24x32xf32, #tpu.memory_space<vmem>>, vector<24x32xf32>
    %22 = vector.shape_cast %21 : vector<24x32xf32> to vector<1x24x32xf32>
    %23 = vector.broadcast %22 : vector<1x24x32xf32> to vector<8x24x32xf32>
    %24 = arith.addf %20, %23 : vector<8x24x32xf32>
    %25 = vector.shape_cast %24 : vector<8x24x32xf32> to vector<192x32xf32>
    %c0_13 = arith.constant 0 : index
    %c0_14 = arith.constant 0 : index
    %c0_15 = arith.constant 0 : index
    %26 = vector.load %arg5[%c0_13, %c0_14, %c0_15] : memref<2x32x96xbf16, #tpu.memory_space<vmem>>, vector<1x32x96xbf16>
    %27 = vector.shape_cast %26 : vector<1x32x96xbf16> to vector<32x96xbf16>
    %28 = arith.truncf %25 : vector<192x32xf32> to vector<192x32xbf16>
    %cst_16 = arith.constant dense<0.000000e+00> : vector<192x96xf32>
    %29 = tpu.matmul %28, %27, %cst_16 {dimension_numbers = #tpu.dot_dimension_numbers<[1], [0], [0], [1], [0, 0, 1, 1], [], []>} : vector<192x32xbf16>, vector<32x96xbf16>, vector<192x96xf32> -> vector<192x96xf32>
    %c0_17 = arith.constant 0 : index
    %c0_18 = arith.constant 0 : index
    %c0_19 = arith.constant 0 : index
    %30 = vector.load %arg6[%c0_17, %c0_18, %c0_19] : memref<2x1x96xf32, #tpu.memory_space<vmem>>, vector<1x1x96xf32>
    %31 = vector.shape_cast %30 : vector<1x1x96xf32> to vector<1x96xf32>
    %32 = vector.broadcast %31 : vector<1x96xf32> to vector<192x96xf32>
    %33 = arith.addf %29, %32 : vector<192x96xf32>
    %34 = vector.shape_cast %33 : vector<192x96xf32> to vector<8x24x96xf32>
    %35 = vector.extract_strided_slice %34 {offsets = [0, 0, 0], sizes = [8, 24, 16], strides = [1, 1, 1]} : vector<8x24x96xf32> to vector<8x24x16xf32>
    %36 = vector.extract_strided_slice %34 {offsets = [0, 0, 32], sizes = [8, 24, 16], strides = [1, 1, 1]} : vector<8x24x96xf32> to vector<8x24x16xf32>
    %37 = vector.extract_strided_slice %34 {offsets = [0, 0, 64], sizes = [8, 24, 16], strides = [1, 1, 1]} : vector<8x24x96xf32> to vector<8x24x16xf32>
    %38 = arith.truncf %35 : vector<8x24x16xf32> to vector<8x24x16xbf16>
    %39 = arith.truncf %36 : vector<8x24x16xf32> to vector<8x24x16xbf16>
    "tpu.trace_start"() <{level = 10 : i32, message = "bqd,bkd->bqk"}> : () -> ()
    %cst_20 = arith.constant dense<0.000000e+00> : vector<8x24x24xf32>
    %40 = tpu.matmul %38, %39, %cst_20 {dimension_numbers = #tpu.dot_dimension_numbers<[2], [2], [1], [1], [0, 0, 0, 1, 1, 1], [0], [0]>} : vector<8x24x16xbf16>, vector<8x24x16xbf16>, vector<8x24x24xf32> -> vector<8x24x24xf32>
    "tpu.trace_stop"() : () -> ()
    %cst_21 = arith.constant 2.500000e-01 : f32
    %41 = vector.broadcast %cst_21 : f32 to vector<8x24x24xf32>
    %42 = arith.mulf %40, %41 : vector<8x24x24xf32>
    %43 = vector.broadcast %5 : vector<1x1x24xf32> to vector<8x24x24xf32>
    %44 = arith.addf %42, %43 : vector<8x24x24xf32>
    %cst_22 = arith.constant dense<0xFF800000> : vector<8x24xf32>
    %45 = vector.multi_reduction <maximumf>, %44, %cst_22 [2] : vector<8x24x24xf32> to vector<8x24xf32>
    %46 = vector.shape_cast %45 : vector<8x24xf32> to vector<8x24x1xf32>
    %47 = vector.broadcast %46 : vector<8x24x1xf32> to vector<8x24x24xf32>
    %48 = arith.subf %44, %47 : vector<8x24x24xf32>
    %49 = math.exp %48 : vector<8x24x24xf32>
    %cst_23 = arith.constant dense<0.000000e+00> : vector<8x24xf32>
    %50 = vector.multi_reduction <add>, %49, %cst_23 [2] : vector<8x24x24xf32> to vector<8x24xf32>
    %51 = vector.shape_cast %50 : vector<8x24xf32> to vector<8x24x1xf32>
    %52 = tpu.reciprocal %51 {approx = true} : vector<8x24x1xf32> -> vector<8x24x1xf32>
    %53 = vector.broadcast %52 : vector<8x24x1xf32> to vector<8x24x24xf32>
    %54 = arith.mulf %49, %53 : vector<8x24x24xf32>
    %55 = arith.truncf %54 : vector<8x24x24xf32> to vector<8x24x24xbf16>
    %56 = arith.truncf %37 : vector<8x24x16xf32> to vector<8x24x16xbf16>
    "tpu.trace_start"() <{level = 10 : i32, message = "bqk,bkd->bqd"}> : () -> ()
    %cst_24 = arith.constant dense<0.000000e+00> : vector<8x24x16xf32>
    %57 = tpu.matmul %55, %56, %cst_24 {dimension_numbers = #tpu.dot_dimension_numbers<[2], [1], [1], [2], [0, 0, 0, 1, 1, 2], [0], [0]>} : vector<8x24x24xbf16>, vector<8x24x16xbf16>, vector<8x24x16xf32> -> vector<8x24x16xf32>
    "tpu.trace_stop"() : () -> ()
    %58 = vector.extract_strided_slice %34 {offsets = [0, 0, 16], sizes = [8, 24, 16], strides = [1, 1, 1]} : vector<8x24x96xf32> to vector<8x24x16xf32>
    %59 = vector.extract_strided_slice %34 {offsets = [0, 0, 48], sizes = [8, 24, 16], strides = [1, 1, 1]} : vector<8x24x96xf32> to vector<8x24x16xf32>
    %60 = vector.extract_strided_slice %34 {offsets = [0, 0, 80], sizes = [8, 24, 16], strides = [1, 1, 1]} : vector<8x24x96xf32> to vector<8x24x16xf32>
    %61 = arith.truncf %58 : vector<8x24x16xf32> to vector<8x24x16xbf16>
    %62 = arith.truncf %59 : vector<8x24x16xf32> to vector<8x24x16xbf16>
    "tpu.trace_start"() <{level = 10 : i32, message = "bqd,bkd->bqk"}> : () -> ()
    %cst_25 = arith.constant dense<0.000000e+00> : vector<8x24x24xf32>
    %63 = tpu.matmul %61, %62, %cst_25 {dimension_numbers = #tpu.dot_dimension_numbers<[2], [2], [1], [1], [0, 0, 0, 1, 1, 1], [0], [0]>} : vector<8x24x16xbf16>, vector<8x24x16xbf16>, vector<8x24x24xf32> -> vector<8x24x24xf32>
    "tpu.trace_stop"() : () -> ()
    %cst_26 = arith.constant 2.500000e-01 : f32
    %64 = vector.broadcast %cst_26 : f32 to vector<8x24x24xf32>
    %65 = arith.mulf %63, %64 : vector<8x24x24xf32>
    %66 = vector.broadcast %5 : vector<1x1x24xf32> to vector<8x24x24xf32>
    %67 = arith.addf %65, %66 : vector<8x24x24xf32>
    %cst_27 = arith.constant dense<0xFF800000> : vector<8x24xf32>
    %68 = vector.multi_reduction <maximumf>, %67, %cst_27 [2] : vector<8x24x24xf32> to vector<8x24xf32>
    %69 = vector.shape_cast %68 : vector<8x24xf32> to vector<8x24x1xf32>
    %70 = vector.broadcast %69 : vector<8x24x1xf32> to vector<8x24x24xf32>
    %71 = arith.subf %67, %70 : vector<8x24x24xf32>
    %72 = math.exp %71 : vector<8x24x24xf32>
    %cst_28 = arith.constant dense<0.000000e+00> : vector<8x24xf32>
    %73 = vector.multi_reduction <add>, %72, %cst_28 [2] : vector<8x24x24xf32> to vector<8x24xf32>
    %74 = vector.shape_cast %73 : vector<8x24xf32> to vector<8x24x1xf32>
    %75 = tpu.reciprocal %74 {approx = true} : vector<8x24x1xf32> -> vector<8x24x1xf32>
    %76 = vector.broadcast %75 : vector<8x24x1xf32> to vector<8x24x24xf32>
    %77 = arith.mulf %72, %76 : vector<8x24x24xf32>
    %78 = arith.truncf %77 : vector<8x24x24xf32> to vector<8x24x24xbf16>
    %79 = arith.truncf %60 : vector<8x24x16xf32> to vector<8x24x16xbf16>
    "tpu.trace_start"() <{level = 10 : i32, message = "bqk,bkd->bqd"}> : () -> ()
    %cst_29 = arith.constant dense<0.000000e+00> : vector<8x24x16xf32>
    %80 = tpu.matmul %78, %79, %cst_29 {dimension_numbers = #tpu.dot_dimension_numbers<[2], [1], [1], [2], [0, 0, 0, 1, 1, 2], [0], [0]>} : vector<8x24x24xbf16>, vector<8x24x16xbf16>, vector<8x24x16xf32> -> vector<8x24x16xf32>
    "tpu.trace_stop"() : () -> ()
    %81 = tpu.concatenate %57, %80 in 2 : vector<8x24x16xf32>, vector<8x24x16xf32> -> vector<8x24x32xf32>
    %82 = vector.shape_cast %81 : vector<8x24x32xf32> to vector<192x32xf32>
    %c0_30 = arith.constant 0 : index
    %c0_31 = arith.constant 0 : index
    %c0_32 = arith.constant 0 : index
    %83 = vector.load %arg7[%c0_30, %c0_31, %c0_32] : memref<2x32x32xbf16, #tpu.memory_space<vmem>>, vector<1x32x32xbf16>
    %84 = vector.shape_cast %83 : vector<1x32x32xbf16> to vector<32x32xbf16>
    %85 = arith.truncf %82 : vector<192x32xf32> to vector<192x32xbf16>
    %cst_33 = arith.constant dense<0.000000e+00> : vector<192x32xf32>
    %86 = tpu.matmul %85, %84, %cst_33 {dimension_numbers = #tpu.dot_dimension_numbers<[1], [0], [0], [1], [0, 0, 1, 1], [], []>} : vector<192x32xbf16>, vector<32x32xbf16>, vector<192x32xf32> -> vector<192x32xf32>
    %c0_34 = arith.constant 0 : index
    %c0_35 = arith.constant 0 : index
    %c0_36 = arith.constant 0 : index
    %87 = vector.load %arg8[%c0_34, %c0_35, %c0_36] : memref<2x1x32xf32, #tpu.memory_space<vmem>>, vector<1x1x32xf32>
    %88 = vector.shape_cast %87 : vector<1x1x32xf32> to vector<1x32xf32>
    %89 = vector.broadcast %88 : vector<1x32xf32> to vector<192x32xf32>
    %90 = arith.addf %86, %89 : vector<192x32xf32>
    %91 = arith.addf %25, %90 : vector<192x32xf32>
    %c0_37 = arith.constant 0 : index
    %c0_38 = arith.constant 0 : index
    %c0_39 = arith.constant 0 : index
    %92 = vector.load %arg9[%c0_37, %c0_38, %c0_39] : memref<2x1x32xf32, #tpu.memory_space<vmem>>, vector<1x1x32xf32>
    %93 = vector.shape_cast %92 : vector<1x1x32xf32> to vector<1x32xf32>
    %c0_40 = arith.constant 0 : index
    %c0_41 = arith.constant 0 : index
    %c0_42 = arith.constant 0 : index
    %94 = vector.load %arg10[%c0_40, %c0_41, %c0_42] : memref<2x1x32xf32, #tpu.memory_space<vmem>>, vector<1x1x32xf32>
    %95 = vector.shape_cast %94 : vector<1x1x32xf32> to vector<1x32xf32>
    %cst_43 = arith.constant dense<0.000000e+00> : vector<192xf32>
    %96 = vector.multi_reduction <add>, %91, %cst_43 [1] : vector<192x32xf32> to vector<192xf32>
    %97 = vector.shape_cast %96 : vector<192xf32> to vector<192x1xf32>
    %cst_44 = arith.constant 3.200000e+01 : f32
    %98 = vector.broadcast %cst_44 : f32 to vector<192x1xf32>
    %99 = arith.divf %97, %98 : vector<192x1xf32>
    %100 = vector.broadcast %99 : vector<192x1xf32> to vector<192x32xf32>
    %101 = arith.subf %91, %100 : vector<192x32xf32>
    %102 = arith.mulf %101, %101 : vector<192x32xf32>
    %cst_45 = arith.constant dense<0.000000e+00> : vector<192xf32>
    %103 = vector.multi_reduction <add>, %102, %cst_45 [1] : vector<192x32xf32> to vector<192xf32>
    %104 = vector.shape_cast %103 : vector<192xf32> to vector<192x1xf32>
    %cst_46 = arith.constant 3.200000e+01 : f32
    %105 = vector.broadcast %cst_46 : f32 to vector<192x1xf32>
    %106 = arith.divf %104, %105 : vector<192x1xf32>
    %107 = vector.broadcast %99 : vector<192x1xf32> to vector<192x32xf32>
    %108 = arith.subf %91, %107 : vector<192x32xf32>
    %cst_47 = arith.constant 9.99999974E-6 : f32
    %109 = vector.broadcast %cst_47 : f32 to vector<192x1xf32>
    %110 = arith.addf %106, %109 : vector<192x1xf32>
    %111 = math.rsqrt %110 : vector<192x1xf32>
    %112 = vector.broadcast %111 : vector<192x1xf32> to vector<192x32xf32>
    %113 = arith.mulf %108, %112 : vector<192x32xf32>
    %114 = vector.broadcast %93 : vector<1x32xf32> to vector<192x32xf32>
    %115 = arith.mulf %113, %114 : vector<192x32xf32>
    %116 = vector.broadcast %95 : vector<1x32xf32> to vector<192x32xf32>
    %117 = arith.addf %115, %116 : vector<192x32xf32>
    %c0_48 = arith.constant 0 : index
    %c0_49 = arith.constant 0 : index
    %c0_50 = arith.constant 0 : index
    %118 = vector.load %arg11[%c0_48, %c0_49, %c0_50] : memref<2x32x64xbf16, #tpu.memory_space<vmem>>, vector<1x32x64xbf16>
    %119 = vector.shape_cast %118 : vector<1x32x64xbf16> to vector<32x64xbf16>
    %120 = arith.truncf %117 : vector<192x32xf32> to vector<192x32xbf16>
    %cst_51 = arith.constant dense<0.000000e+00> : vector<192x64xf32>
    %121 = tpu.matmul %120, %119, %cst_51 {dimension_numbers = #tpu.dot_dimension_numbers<[1], [0], [0], [1], [0, 0, 1, 1], [], []>} : vector<192x32xbf16>, vector<32x64xbf16>, vector<192x64xf32> -> vector<192x64xf32>
    %c0_52 = arith.constant 0 : index
    %c0_53 = arith.constant 0 : index
    %c0_54 = arith.constant 0 : index
    %122 = vector.load %arg12[%c0_52, %c0_53, %c0_54] : memref<2x1x64xf32, #tpu.memory_space<vmem>>, vector<1x1x64xf32>
    %123 = vector.shape_cast %122 : vector<1x1x64xf32> to vector<1x64xf32>
    %124 = vector.broadcast %123 : vector<1x64xf32> to vector<192x64xf32>
    %125 = arith.addf %121, %124 : vector<192x64xf32>
    %cst_55 = arith.constant 0.000000e+00 : f32
    %126 = vector.broadcast %cst_55 : f32 to vector<192x64xf32>
    %127 = arith.maximumf %125, %126 : vector<192x64xf32>
    %c0_56 = arith.constant 0 : index
    %c0_57 = arith.constant 0 : index
    %c0_58 = arith.constant 0 : index
    %128 = vector.load %arg13[%c0_56, %c0_57, %c0_58] : memref<2x64x32xbf16, #tpu.memory_space<vmem>>, vector<1x64x32xbf16>
    %129 = vector.shape_cast %128 : vector<1x64x32xbf16> to vector<64x32xbf16>
    %130 = arith.truncf %127 : vector<192x64xf32> to vector<192x64xbf16>
    %cst_59 = arith.constant dense<0.000000e+00> : vector<192x32xf32>
    %131 = tpu.matmul %130, %129, %cst_59 {dimension_numbers = #tpu.dot_dimension_numbers<[1], [0], [0], [1], [0, 0, 1, 1], [], []>} : vector<192x64xbf16>, vector<64x32xbf16>, vector<192x32xf32> -> vector<192x32xf32>
    %c0_60 = arith.constant 0 : index
    %c0_61 = arith.constant 0 : index
    %c0_62 = arith.constant 0 : index
    %132 = vector.load %arg14[%c0_60, %c0_61, %c0_62] : memref<2x1x32xf32, #tpu.memory_space<vmem>>, vector<1x1x32xf32>
    %133 = vector.shape_cast %132 : vector<1x1x32xf32> to vector<1x32xf32>
    %134 = vector.broadcast %133 : vector<1x32xf32> to vector<192x32xf32>
    %135 = arith.addf %131, %134 : vector<192x32xf32>
    %136 = arith.addf %117, %135 : vector<192x32xf32>
    %c0_63 = arith.constant 0 : index
    %c0_64 = arith.constant 0 : index
    %c0_65 = arith.constant 0 : index
    %137 = vector.load %arg15[%c0_63, %c0_64, %c0_65] : memref<2x1x32xf32, #tpu.memory_space<vmem>>, vector<1x1x32xf32>
    %138 = vector.shape_cast %137 : vector<1x1x32xf32> to vector<1x32xf32>
    %c0_66 = arith.constant 0 : index
    %c0_67 = arith.constant 0 : index
    %c0_68 = arith.constant 0 : index
    %139 = vector.load %arg16[%c0_66, %c0_67, %c0_68] : memref<2x1x32xf32, #tpu.memory_space<vmem>>, vector<1x1x32xf32>
    %140 = vector.shape_cast %139 : vector<1x1x32xf32> to vector<1x32xf32>
    %cst_69 = arith.constant dense<0.000000e+00> : vector<192xf32>
    %141 = vector.multi_reduction <add>, %136, %cst_69 [1] : vector<192x32xf32> to vector<192xf32>
    %142 = vector.shape_cast %141 : vector<192xf32> to vector<192x1xf32>
    %cst_70 = arith.constant 3.200000e+01 : f32
    %143 = vector.broadcast %cst_70 : f32 to vector<192x1xf32>
    %144 = arith.divf %142, %143 : vector<192x1xf32>
    %145 = vector.broadcast %144 : vector<192x1xf32> to vector<192x32xf32>
    %146 = arith.subf %136, %145 : vector<192x32xf32>
    %147 = arith.mulf %146, %146 : vector<192x32xf32>
    %cst_71 = arith.constant dense<0.000000e+00> : vector<192xf32>
    %148 = vector.multi_reduction <add>, %147, %cst_71 [1] : vector<192x32xf32> to vector<192xf32>
    %149 = vector.shape_cast %148 : vector<192xf32> to vector<192x1xf32>
    %cst_72 = arith.constant 3.200000e+01 : f32
    %150 = vector.broadcast %cst_72 : f32 to vector<192x1xf32>
    %151 = arith.divf %149, %150 : vector<192x1xf32>
    %152 = vector.broadcast %144 : vector<192x1xf32> to vector<192x32xf32>
    %153 = arith.subf %136, %152 : vector<192x32xf32>
    %cst_73 = arith.constant 9.99999974E-6 : f32
    %154 = vector.broadcast %cst_73 : f32 to vector<192x1xf32>
    %155 = arith.addf %151, %154 : vector<192x1xf32>
    %156 = math.rsqrt %155 : vector<192x1xf32>
    %157 = vector.broadcast %156 : vector<192x1xf32> to vector<192x32xf32>
    %158 = arith.mulf %153, %157 : vector<192x32xf32>
    %159 = vector.broadcast %138 : vector<1x32xf32> to vector<192x32xf32>
    %160 = arith.mulf %158, %159 : vector<192x32xf32>
    %161 = vector.broadcast %140 : vector<1x32xf32> to vector<192x32xf32>
    %162 = arith.addf %160, %161 : vector<192x32xf32>
    %c1 = arith.constant 1 : index
    %c0_74 = arith.constant 0 : index
    %c0_75 = arith.constant 0 : index
    %163 = vector.load %arg5[%c1, %c0_74, %c0_75] : memref<2x32x96xbf16, #tpu.memory_space<vmem>>, vector<1x32x96xbf16>
    %164 = vector.shape_cast %163 : vector<1x32x96xbf16> to vector<32x96xbf16>
    %165 = arith.truncf %162 : vector<192x32xf32> to vector<192x32xbf16>
    %cst_76 = arith.constant dense<0.000000e+00> : vector<192x96xf32>
    %166 = tpu.matmul %165, %164, %cst_76 {dimension_numbers = #tpu.dot_dimension_numbers<[1], [0], [0], [1], [0, 0, 1, 1], [], []>} : vector<192x32xbf16>, vector<32x96xbf16>, vector<192x96xf32> -> vector<192x96xf32>
    %c1_77 = arith.constant 1 : index
    %c0_78 = arith.constant 0 : index
    %c0_79 = arith.constant 0 : index
    %167 = vector.load %arg6[%c1_77, %c0_78, %c0_79] : memref<2x1x96xf32, #tpu.memory_space<vmem>>, vector<1x1x96xf32>
    %168 = vector.shape_cast %167 : vector<1x1x96xf32> to vector<1x96xf32>
    %169 = vector.broadcast %168 : vector<1x96xf32> to vector<192x96xf32>
    %170 = arith.addf %166, %169 : vector<192x96xf32>
    %171 = vector.shape_cast %170 : vector<192x96xf32> to vector<8x24x96xf32>
    %172 = vector.extract_strided_slice %171 {offsets = [0, 0, 0], sizes = [8, 24, 16], strides = [1, 1, 1]} : vector<8x24x96xf32> to vector<8x24x16xf32>
    %173 = vector.extract_strided_slice %171 {offsets = [0, 0, 32], sizes = [8, 24, 16], strides = [1, 1, 1]} : vector<8x24x96xf32> to vector<8x24x16xf32>
    %174 = vector.extract_strided_slice %171 {offsets = [0, 0, 64], sizes = [8, 24, 16], strides = [1, 1, 1]} : vector<8x24x96xf32> to vector<8x24x16xf32>
    %175 = arith.truncf %172 : vector<8x24x16xf32> to vector<8x24x16xbf16>
    %176 = arith.truncf %173 : vector<8x24x16xf32> to vector<8x24x16xbf16>
    "tpu.trace_start"() <{level = 10 : i32, message = "bqd,bkd->bqk"}> : () -> ()
    %cst_80 = arith.constant dense<0.000000e+00> : vector<8x24x24xf32>
    %177 = tpu.matmul %175, %176, %cst_80 {dimension_numbers = #tpu.dot_dimension_numbers<[2], [2], [1], [1], [0, 0, 0, 1, 1, 1], [0], [0]>} : vector<8x24x16xbf16>, vector<8x24x16xbf16>, vector<8x24x24xf32> -> vector<8x24x24xf32>
    "tpu.trace_stop"() : () -> ()
    %cst_81 = arith.constant 2.500000e-01 : f32
    %178 = vector.broadcast %cst_81 : f32 to vector<8x24x24xf32>
    %179 = arith.mulf %177, %178 : vector<8x24x24xf32>
    %180 = vector.broadcast %5 : vector<1x1x24xf32> to vector<8x24x24xf32>
    %181 = arith.addf %179, %180 : vector<8x24x24xf32>
    %cst_82 = arith.constant dense<0xFF800000> : vector<8x24xf32>
    %182 = vector.multi_reduction <maximumf>, %181, %cst_82 [2] : vector<8x24x24xf32> to vector<8x24xf32>
    %183 = vector.shape_cast %182 : vector<8x24xf32> to vector<8x24x1xf32>
    %184 = vector.broadcast %183 : vector<8x24x1xf32> to vector<8x24x24xf32>
    %185 = arith.subf %181, %184 : vector<8x24x24xf32>
    %186 = math.exp %185 : vector<8x24x24xf32>
    %cst_83 = arith.constant dense<0.000000e+00> : vector<8x24xf32>
    %187 = vector.multi_reduction <add>, %186, %cst_83 [2] : vector<8x24x24xf32> to vector<8x24xf32>
    %188 = vector.shape_cast %187 : vector<8x24xf32> to vector<8x24x1xf32>
    %189 = tpu.reciprocal %188 {approx = true} : vector<8x24x1xf32> -> vector<8x24x1xf32>
    %190 = vector.broadcast %189 : vector<8x24x1xf32> to vector<8x24x24xf32>
    %191 = arith.mulf %186, %190 : vector<8x24x24xf32>
    %192 = arith.truncf %191 : vector<8x24x24xf32> to vector<8x24x24xbf16>
    %193 = arith.truncf %174 : vector<8x24x16xf32> to vector<8x24x16xbf16>
    "tpu.trace_start"() <{level = 10 : i32, message = "bqk,bkd->bqd"}> : () -> ()
    %cst_84 = arith.constant dense<0.000000e+00> : vector<8x24x16xf32>
    %194 = tpu.matmul %192, %193, %cst_84 {dimension_numbers = #tpu.dot_dimension_numbers<[2], [1], [1], [2], [0, 0, 0, 1, 1, 2], [0], [0]>} : vector<8x24x24xbf16>, vector<8x24x16xbf16>, vector<8x24x16xf32> -> vector<8x24x16xf32>
    "tpu.trace_stop"() : () -> ()
    %195 = vector.extract_strided_slice %171 {offsets = [0, 0, 16], sizes = [8, 24, 16], strides = [1, 1, 1]} : vector<8x24x96xf32> to vector<8x24x16xf32>
    %196 = vector.extract_strided_slice %171 {offsets = [0, 0, 48], sizes = [8, 24, 16], strides = [1, 1, 1]} : vector<8x24x96xf32> to vector<8x24x16xf32>
    %197 = vector.extract_strided_slice %171 {offsets = [0, 0, 80], sizes = [8, 24, 16], strides = [1, 1, 1]} : vector<8x24x96xf32> to vector<8x24x16xf32>
    %198 = arith.truncf %195 : vector<8x24x16xf32> to vector<8x24x16xbf16>
    %199 = arith.truncf %196 : vector<8x24x16xf32> to vector<8x24x16xbf16>
    "tpu.trace_start"() <{level = 10 : i32, message = "bqd,bkd->bqk"}> : () -> ()
    %cst_85 = arith.constant dense<0.000000e+00> : vector<8x24x24xf32>
    %200 = tpu.matmul %198, %199, %cst_85 {dimension_numbers = #tpu.dot_dimension_numbers<[2], [2], [1], [1], [0, 0, 0, 1, 1, 1], [0], [0]>} : vector<8x24x16xbf16>, vector<8x24x16xbf16>, vector<8x24x24xf32> -> vector<8x24x24xf32>
    "tpu.trace_stop"() : () -> ()
    %cst_86 = arith.constant 2.500000e-01 : f32
    %201 = vector.broadcast %cst_86 : f32 to vector<8x24x24xf32>
    %202 = arith.mulf %200, %201 : vector<8x24x24xf32>
    %203 = vector.broadcast %5 : vector<1x1x24xf32> to vector<8x24x24xf32>
    %204 = arith.addf %202, %203 : vector<8x24x24xf32>
    %cst_87 = arith.constant dense<0xFF800000> : vector<8x24xf32>
    %205 = vector.multi_reduction <maximumf>, %204, %cst_87 [2] : vector<8x24x24xf32> to vector<8x24xf32>
    %206 = vector.shape_cast %205 : vector<8x24xf32> to vector<8x24x1xf32>
    %207 = vector.broadcast %206 : vector<8x24x1xf32> to vector<8x24x24xf32>
    %208 = arith.subf %204, %207 : vector<8x24x24xf32>
    %209 = math.exp %208 : vector<8x24x24xf32>
    %cst_88 = arith.constant dense<0.000000e+00> : vector<8x24xf32>
    %210 = vector.multi_reduction <add>, %209, %cst_88 [2] : vector<8x24x24xf32> to vector<8x24xf32>
    %211 = vector.shape_cast %210 : vector<8x24xf32> to vector<8x24x1xf32>
    %212 = tpu.reciprocal %211 {approx = true} : vector<8x24x1xf32> -> vector<8x24x1xf32>
    %213 = vector.broadcast %212 : vector<8x24x1xf32> to vector<8x24x24xf32>
    %214 = arith.mulf %209, %213 : vector<8x24x24xf32>
    %215 = arith.truncf %214 : vector<8x24x24xf32> to vector<8x24x24xbf16>
    %216 = arith.truncf %197 : vector<8x24x16xf32> to vector<8x24x16xbf16>
    "tpu.trace_start"() <{level = 10 : i32, message = "bqk,bkd->bqd"}> : () -> ()
    %cst_89 = arith.constant dense<0.000000e+00> : vector<8x24x16xf32>
    %217 = tpu.matmul %215, %216, %cst_89 {dimension_numbers = #tpu.dot_dimension_numbers<[2], [1], [1], [2], [0, 0, 0, 1, 1, 2], [0], [0]>} : vector<8x24x24xbf16>, vector<8x24x16xbf16>, vector<8x24x16xf32> -> vector<8x24x16xf32>
    "tpu.trace_stop"() : () -> ()
    %218 = tpu.concatenate %194, %217 in 2 : vector<8x24x16xf32>, vector<8x24x16xf32> -> vector<8x24x32xf32>
    %219 = vector.shape_cast %218 : vector<8x24x32xf32> to vector<192x32xf32>
    %c1_90 = arith.constant 1 : index
    %c0_91 = arith.constant 0 : index
    %c0_92 = arith.constant 0 : index
    %220 = vector.load %arg7[%c1_90, %c0_91, %c0_92] : memref<2x32x32xbf16, #tpu.memory_space<vmem>>, vector<1x32x32xbf16>
    %221 = vector.shape_cast %220 : vector<1x32x32xbf16> to vector<32x32xbf16>
    %222 = arith.truncf %219 : vector<192x32xf32> to vector<192x32xbf16>
    %cst_93 = arith.constant dense<0.000000e+00> : vector<192x32xf32>
    %223 = tpu.matmul %222, %221, %cst_93 {dimension_numbers = #tpu.dot_dimension_numbers<[1], [0], [0], [1], [0, 0, 1, 1], [], []>} : vector<192x32xbf16>, vector<32x32xbf16>, vector<192x32xf32> -> vector<192x32xf32>
    %c1_94 = arith.constant 1 : index
    %c0_95 = arith.constant 0 : index
    %c0_96 = arith.constant 0 : index
    %224 = vector.load %arg8[%c1_94, %c0_95, %c0_96] : memref<2x1x32xf32, #tpu.memory_space<vmem>>, vector<1x1x32xf32>
    %225 = vector.shape_cast %224 : vector<1x1x32xf32> to vector<1x32xf32>
    %226 = vector.broadcast %225 : vector<1x32xf32> to vector<192x32xf32>
    %227 = arith.addf %223, %226 : vector<192x32xf32>
    %228 = arith.addf %162, %227 : vector<192x32xf32>
    %c1_97 = arith.constant 1 : index
    %c0_98 = arith.constant 0 : index
    %c0_99 = arith.constant 0 : index
    %229 = vector.load %arg9[%c1_97, %c0_98, %c0_99] : memref<2x1x32xf32, #tpu.memory_space<vmem>>, vector<1x1x32xf32>
    %230 = vector.shape_cast %229 : vector<1x1x32xf32> to vector<1x32xf32>
    %c1_100 = arith.constant 1 : index
    %c0_101 = arith.constant 0 : index
    %c0_102 = arith.constant 0 : index
    %231 = vector.load %arg10[%c1_100, %c0_101, %c0_102] : memref<2x1x32xf32, #tpu.memory_space<vmem>>, vector<1x1x32xf32>
    %232 = vector.shape_cast %231 : vector<1x1x32xf32> to vector<1x32xf32>
    %cst_103 = arith.constant dense<0.000000e+00> : vector<192xf32>
    %233 = vector.multi_reduction <add>, %228, %cst_103 [1] : vector<192x32xf32> to vector<192xf32>
    %234 = vector.shape_cast %233 : vector<192xf32> to vector<192x1xf32>
    %cst_104 = arith.constant 3.200000e+01 : f32
    %235 = vector.broadcast %cst_104 : f32 to vector<192x1xf32>
    %236 = arith.divf %234, %235 : vector<192x1xf32>
    %237 = vector.broadcast %236 : vector<192x1xf32> to vector<192x32xf32>
    %238 = arith.subf %228, %237 : vector<192x32xf32>
    %239 = arith.mulf %238, %238 : vector<192x32xf32>
    %cst_105 = arith.constant dense<0.000000e+00> : vector<192xf32>
    %240 = vector.multi_reduction <add>, %239, %cst_105 [1] : vector<192x32xf32> to vector<192xf32>
    %241 = vector.shape_cast %240 : vector<192xf32> to vector<192x1xf32>
    %cst_106 = arith.constant 3.200000e+01 : f32
    %242 = vector.broadcast %cst_106 : f32 to vector<192x1xf32>
    %243 = arith.divf %241, %242 : vector<192x1xf32>
    %244 = vector.broadcast %236 : vector<192x1xf32> to vector<192x32xf32>
    %245 = arith.subf %228, %244 : vector<192x32xf32>
    %cst_107 = arith.constant 9.99999974E-6 : f32
    %246 = vector.broadcast %cst_107 : f32 to vector<192x1xf32>
    %247 = arith.addf %243, %246 : vector<192x1xf32>
    %248 = math.rsqrt %247 : vector<192x1xf32>
    %249 = vector.broadcast %248 : vector<192x1xf32> to vector<192x32xf32>
    %250 = arith.mulf %245, %249 : vector<192x32xf32>
    %251 = vector.broadcast %230 : vector<1x32xf32> to vector<192x32xf32>
    %252 = arith.mulf %250, %251 : vector<192x32xf32>
    %253 = vector.broadcast %232 : vector<1x32xf32> to vector<192x32xf32>
    %254 = arith.addf %252, %253 : vector<192x32xf32>
    %c1_108 = arith.constant 1 : index
    %c0_109 = arith.constant 0 : index
    %c0_110 = arith.constant 0 : index
    %255 = vector.load %arg11[%c1_108, %c0_109, %c0_110] : memref<2x32x64xbf16, #tpu.memory_space<vmem>>, vector<1x32x64xbf16>
    %256 = vector.shape_cast %255 : vector<1x32x64xbf16> to vector<32x64xbf16>
    %257 = arith.truncf %254 : vector<192x32xf32> to vector<192x32xbf16>
    %cst_111 = arith.constant dense<0.000000e+00> : vector<192x64xf32>
    %258 = tpu.matmul %257, %256, %cst_111 {dimension_numbers = #tpu.dot_dimension_numbers<[1], [0], [0], [1], [0, 0, 1, 1], [], []>} : vector<192x32xbf16>, vector<32x64xbf16>, vector<192x64xf32> -> vector<192x64xf32>
    %c1_112 = arith.constant 1 : index
    %c0_113 = arith.constant 0 : index
    %c0_114 = arith.constant 0 : index
    %259 = vector.load %arg12[%c1_112, %c0_113, %c0_114] : memref<2x1x64xf32, #tpu.memory_space<vmem>>, vector<1x1x64xf32>
    %260 = vector.shape_cast %259 : vector<1x1x64xf32> to vector<1x64xf32>
    %261 = vector.broadcast %260 : vector<1x64xf32> to vector<192x64xf32>
    %262 = arith.addf %258, %261 : vector<192x64xf32>
    %cst_115 = arith.constant 0.000000e+00 : f32
    %263 = vector.broadcast %cst_115 : f32 to vector<192x64xf32>
    %264 = arith.maximumf %262, %263 : vector<192x64xf32>
    %c1_116 = arith.constant 1 : index
    %c0_117 = arith.constant 0 : index
    %c0_118 = arith.constant 0 : index
    %265 = vector.load %arg13[%c1_116, %c0_117, %c0_118] : memref<2x64x32xbf16, #tpu.memory_space<vmem>>, vector<1x64x32xbf16>
    %266 = vector.shape_cast %265 : vector<1x64x32xbf16> to vector<64x32xbf16>
    %267 = arith.truncf %264 : vector<192x64xf32> to vector<192x64xbf16>
    %cst_119 = arith.constant dense<0.000000e+00> : vector<192x32xf32>
    %268 = tpu.matmul %267, %266, %cst_119 {dimension_numbers = #tpu.dot_dimension_numbers<[1], [0], [0], [1], [0, 0, 1, 1], [], []>} : vector<192x64xbf16>, vector<64x32xbf16>, vector<192x32xf32> -> vector<192x32xf32>
    %c1_120 = arith.constant 1 : index
    %c0_121 = arith.constant 0 : index
    %c0_122 = arith.constant 0 : index
    %269 = vector.load %arg14[%c1_120, %c0_121, %c0_122] : memref<2x1x32xf32, #tpu.memory_space<vmem>>, vector<1x1x32xf32>
    %270 = vector.shape_cast %269 : vector<1x1x32xf32> to vector<1x32xf32>
    %271 = vector.broadcast %270 : vector<1x32xf32> to vector<192x32xf32>
    %272 = arith.addf %268, %271 : vector<192x32xf32>
    %273 = arith.addf %254, %272 : vector<192x32xf32>
    %c1_123 = arith.constant 1 : index
    %c0_124 = arith.constant 0 : index
    %c0_125 = arith.constant 0 : index
    %274 = vector.load %arg15[%c1_123, %c0_124, %c0_125] : memref<2x1x32xf32, #tpu.memory_space<vmem>>, vector<1x1x32xf32>
    %275 = vector.shape_cast %274 : vector<1x1x32xf32> to vector<1x32xf32>
    %c1_126 = arith.constant 1 : index
    %c0_127 = arith.constant 0 : index
    %c0_128 = arith.constant 0 : index
    %276 = vector.load %arg16[%c1_126, %c0_127, %c0_128] : memref<2x1x32xf32, #tpu.memory_space<vmem>>, vector<1x1x32xf32>
    %277 = vector.shape_cast %276 : vector<1x1x32xf32> to vector<1x32xf32>
    %cst_129 = arith.constant dense<0.000000e+00> : vector<192xf32>
    %278 = vector.multi_reduction <add>, %273, %cst_129 [1] : vector<192x32xf32> to vector<192xf32>
    %279 = vector.shape_cast %278 : vector<192xf32> to vector<192x1xf32>
    %cst_130 = arith.constant 3.200000e+01 : f32
    %280 = vector.broadcast %cst_130 : f32 to vector<192x1xf32>
    %281 = arith.divf %279, %280 : vector<192x1xf32>
    %282 = vector.broadcast %281 : vector<192x1xf32> to vector<192x32xf32>
    %283 = arith.subf %273, %282 : vector<192x32xf32>
    %284 = arith.mulf %283, %283 : vector<192x32xf32>
    %cst_131 = arith.constant dense<0.000000e+00> : vector<192xf32>
    %285 = vector.multi_reduction <add>, %284, %cst_131 [1] : vector<192x32xf32> to vector<192xf32>
    %286 = vector.shape_cast %285 : vector<192xf32> to vector<192x1xf32>
    %cst_132 = arith.constant 3.200000e+01 : f32
    %287 = vector.broadcast %cst_132 : f32 to vector<192x1xf32>
    %288 = arith.divf %286, %287 : vector<192x1xf32>
    %289 = vector.broadcast %281 : vector<192x1xf32> to vector<192x32xf32>
    %290 = arith.subf %273, %289 : vector<192x32xf32>
    %cst_133 = arith.constant 9.99999974E-6 : f32
    %291 = vector.broadcast %cst_133 : f32 to vector<192x1xf32>
    %292 = arith.addf %288, %291 : vector<192x1xf32>
    %293 = math.rsqrt %292 : vector<192x1xf32>
    %294 = vector.broadcast %293 : vector<192x1xf32> to vector<192x32xf32>
    %295 = arith.mulf %290, %294 : vector<192x32xf32>
    %296 = vector.broadcast %275 : vector<1x32xf32> to vector<192x32xf32>
    %297 = arith.mulf %295, %296 : vector<192x32xf32>
    %298 = vector.broadcast %277 : vector<1x32xf32> to vector<192x32xf32>
    %299 = arith.addf %297, %298 : vector<192x32xf32>
    %300 = vector.shape_cast %299 : vector<192x32xf32> to vector<8x24x32xf32>
    %301 = vector.broadcast %11 : vector<1x24x1xf32> to vector<8x24x32xf32>
    %302 = arith.mulf %300, %301 : vector<8x24x32xf32>
    %cst_134 = arith.constant dense<0.000000e+00> : vector<8x32xf32>
    %303 = vector.multi_reduction <add>, %302, %cst_134 [1] : vector<8x24x32xf32> to vector<8x32xf32>
    %cst_135 = arith.constant 5.000000e-02 : f32
    %304 = vector.broadcast %cst_135 : f32 to vector<8x32xf32>
    %305 = arith.mulf %303, %304 : vector<8x32xf32>
    %c0_136 = arith.constant 0 : index
    %c0_137 = arith.constant 0 : index
    %306 = vector.load %arg17[%c0_136, %c0_137] : memref<32x128xbf16, #tpu.memory_space<vmem>>, vector<32x128xbf16>
    %307 = arith.truncf %305 : vector<8x32xf32> to vector<8x32xbf16>
    %cst_138 = arith.constant dense<0.000000e+00> : vector<8x128xf32>
    %308 = tpu.matmul %307, %306, %cst_138 {dimension_numbers = #tpu.dot_dimension_numbers<[1], [0], [0], [1], [0, 0, 1, 1], [], []>} : vector<8x32xbf16>, vector<32x128xbf16>, vector<8x128xf32> -> vector<8x128xf32>
    %c0_139 = arith.constant 0 : index
    %c0_140 = arith.constant 0 : index
    %309 = vector.load %arg18[%c0_139, %c0_140] : memref<1x128xf32, #tpu.memory_space<vmem>>, vector<1x128xf32>
    %310 = vector.broadcast %309 : vector<1x128xf32> to vector<8x128xf32>
    %311 = arith.addf %308, %310 : vector<8x128xf32>
    %c0_141 = arith.constant 0 : index
    %c0_142 = arith.constant 0 : index
    %312 = vector.load %arg19[%c0_141, %c0_142] : memref<8x128xf32, #tpu.memory_space<vmem>>, vector<8x128xf32>
    tpu.vector_store %arg19[%c0_141, %c0_142], %311 {strides = array<i32>} : memref<8x128xf32, #tpu.memory_space<vmem>>, vector<8x128xf32>,
    return
  }
  func.func @transform_0(%arg0: i32) -> (i32, i32, i32) {
    %c0_i32 = arith.constant 0 : i32
    %c0_i32_0 = arith.constant 0 : i32
    %c0_i32_1 = arith.constant 0 : i32
    return %arg0, %c0_i32, %c0_i32_0 : i32, i32, i32
  }
  func.func @transform_1(%arg0: i32) -> (i32, i32) {
    %c0_i32 = arith.constant 0 : i32
    %c0_i32_0 = arith.constant 0 : i32
    %c0_i32_1 = arith.constant 0 : i32
    return %c0_i32, %c0_i32_0 : i32, i32
  }
  func.func @transform_2(%arg0: i32) -> (i32, i32) {
    %c0_i32 = arith.constant 0 : i32
    %c0_i32_0 = arith.constant 0 : i32
    %c0_i32_1 = arith.constant 0 : i32
    return %c0_i32, %c0_i32_0 : i32, i32
  }
  func.func @transform_3(%arg0: i32) -> (i32, i32) {
    %c0_i32 = arith.constant 0 : i32
    %c0_i32_0 = arith.constant 0 : i32
    %c0_i32_1 = arith.constant 0 : i32
    return %c0_i32, %c0_i32_0 : i32, i32
  }
  func.func @transform_4(%arg0: i32) -> (i32, i32, i32) {
    %c0_i32 = arith.constant 0 : i32
    %c0_i32_0 = arith.constant 0 : i32
    %c0_i32_1 = arith.constant 0 : i32
    %c0_i32_2 = arith.constant 0 : i32
    return %c0_i32, %c0_i32_0, %c0_i32_1 : i32, i32, i32
  }
  func.func @transform_5(%arg0: i32) -> (i32, i32, i32) {
    %c0_i32 = arith.constant 0 : i32
    %c0_i32_0 = arith.constant 0 : i32
    %c0_i32_1 = arith.constant 0 : i32
    %c0_i32_2 = arith.constant 0 : i32
    return %c0_i32, %c0_i32_0, %c0_i32_1 : i32, i32, i32
  }
  func.func @transform_6(%arg0: i32) -> (i32, i32, i32) {
    %c0_i32 = arith.constant 0 : i32
    %c0_i32_0 = arith.constant 0 : i32
    %c0_i32_1 = arith.constant 0 : i32
    %c0_i32_2 = arith.constant 0 : i32
    return %c0_i32, %c0_i32_0, %c0_i32_1 : i32, i32, i32
  }
  func.func @transform_7(%arg0: i32) -> (i32, i32, i32) {
    %c0_i32 = arith.constant 0 : i32
    %c0_i32_0 = arith.constant 0 : i32
    %c0_i32_1 = arith.constant 0 : i32
    %c0_i32_2 = arith.constant 0 : i32
    return %c0_i32, %c0_i32_0, %c0_i32_1 : i32, i32, i32
  }
  func.func @transform_8(%arg0: i32) -> (i32, i32, i32) {
    %c0_i32 = arith.constant 0 : i32
    %c0_i32_0 = arith.constant 0 : i32
    %c0_i32_1 = arith.constant 0 : i32
    %c0_i32_2 = arith.constant 0 : i32
    return %c0_i32, %c0_i32_0, %c0_i32_1 : i32, i32, i32
  }
  func.func @transform_9(%arg0: i32) -> (i32, i32, i32) {
    %c0_i32 = arith.constant 0 : i32
    %c0_i32_0 = arith.constant 0 : i32
    %c0_i32_1 = arith.constant 0 : i32
    %c0_i32_2 = arith.constant 0 : i32
    return %c0_i32, %c0_i32_0, %c0_i32_1 : i32, i32, i32
  }
  func.func @transform_10(%arg0: i32) -> (i32, i32, i32) {
    %c0_i32 = arith.constant 0 : i32
    %c0_i32_0 = arith.constant 0 : i32
    %c0_i32_1 = arith.constant 0 : i32
    %c0_i32_2 = arith.constant 0 : i32
    return %c0_i32, %c0_i32_0, %c0_i32_1 : i32, i32, i32
  }
  func.func @transform_11(%arg0: i32) -> (i32, i32, i32) {
    %c0_i32 = arith.constant 0 : i32
    %c0_i32_0 = arith.constant 0 : i32
    %c0_i32_1 = arith.constant 0 : i32
    %c0_i32_2 = arith.constant 0 : i32
    return %c0_i32, %c0_i32_0, %c0_i32_1 : i32, i32, i32
  }
  func.func @transform_12(%arg0: i32) -> (i32, i32, i32) {
    %c0_i32 = arith.constant 0 : i32
    %c0_i32_0 = arith.constant 0 : i32
    %c0_i32_1 = arith.constant 0 : i32
    %c0_i32_2 = arith.constant 0 : i32
    return %c0_i32, %c0_i32_0, %c0_i32_1 : i32, i32, i32
  }
  func.func @transform_13(%arg0: i32) -> (i32, i32, i32) {
    %c0_i32 = arith.constant 0 : i32
    %c0_i32_0 = arith.constant 0 : i32
    %c0_i32_1 = arith.constant 0 : i32
    %c0_i32_2 = arith.constant 0 : i32
    return %c0_i32, %c0_i32_0, %c0_i32_1 : i32, i32, i32
  }
  func.func @transform_14(%arg0: i32) -> (i32, i32, i32) {
    %c0_i32 = arith.constant 0 : i32
    %c0_i32_0 = arith.constant 0 : i32
    %c0_i32_1 = arith.constant 0 : i32
    %c0_i32_2 = arith.constant 0 : i32
    return %c0_i32, %c0_i32_0, %c0_i32_1 : i32, i32, i32
  }
  func.func @transform_15(%arg0: i32) -> (i32, i32, i32) {
    %c0_i32 = arith.constant 0 : i32
    %c0_i32_0 = arith.constant 0 : i32
    %c0_i32_1 = arith.constant 0 : i32
    %c0_i32_2 = arith.constant 0 : i32
    return %c0_i32, %c0_i32_0, %c0_i32_1 : i32, i32, i32
  }
  func.func @transform_16(%arg0: i32) -> (i32, i32) {
    %c0_i32 = arith.constant 0 : i32
    %c0_i32_0 = arith.constant 0 : i32
    %c0_i32_1 = arith.constant 0 : i32
    return %c0_i32, %c0_i32_0 : i32, i32
  }
  func.func @transform_17(%arg0: i32) -> (i32, i32) {
    %c0_i32 = arith.constant 0 : i32
    %c0_i32_0 = arith.constant 0 : i32
    %c0_i32_1 = arith.constant 0 : i32
    return %c0_i32, %c0_i32_0 : i32, i32
  }
  func.func @transform_18(%arg0: i32) -> (i32, i32) {
    %c0_i32 = arith.constant 0 : i32
    %c0_i32_0 = arith.constant 0 : i32
    return %arg0, %c0_i32 : i32, i32
  }
}

</mosaic_0001>

<bundles_post_ra>
// kernel: tst_logs_forward.1
= control target key start
LH: loop header
LB: loop body
LE: loop exit
PB: predicated region body
PF: predicated region fallthrough
CT: control target
= control target key end

     0   :  { %vm133_vm0 = vcmask 261120   ;;  %vm548_vm1 = vcmask 130048   ;;  %s11863_s23 = smov 64   ;;  %vm1411_vm2 = vcmask 1043456   ;;  %vm1119_vm4 = vcmask 195584   ;;  %s11865_s24 = smov 80   ;;  %s16407_s1 = inlined_call_operand.vmem [shape: bf16[32,32], index: 1, kind: input, shape index: {}]   ;;  %s16408_s0 = inlined_call_operand.vmem [shape: f32[8,24,32], index: 0, kind: input, shape index: {}]   ;;  %s16409_s4 = inlined_call_operand.vmem [shape: bf16[2,32,96], index: 4, kind: input, shape index: {}]   ;;  %s16410_s2 = inlined_call_operand.vmem [shape: f32[1,32], index: 2, kind: input, shape index: {}]   ;;  %s16411_s3 = inlined_call_operand.vmem [shape: f32[24,32], index: 3, kind: input, shape index: {}]   ;;  %s16412_s5 = inlined_call_operand.vmem [shape: f32[2,1,96], index: 5, kind: input, shape index: {}]   ;;  %s16413_s6 = inlined_call_operand.vmem [shape: bf16[2,32,32], index: 6, kind: input, shape index: {}]   ;;  %s16414_s7 = inlined_call_operand.vmem [shape: f32[2,1,32], index: 7, kind: input, shape index: {}]   ;;  %s16415_s10 = inlined_call_operand.vmem [shape: bf16[2,32,64], index: 10, kind: input, shape index: {}]   ;;  %s16416_s12 = inlined_call_operand.vmem [shape: bf16[2,64,32], index: 12, kind: input, shape index: {}]   ;;  %s16417_s8 = inlined_call_operand.vmem [shape: f32[2,1,32], index: 8, kind: input, shape index: {}]   ;;  %s16418_s9 = inlined_call_operand.vmem [shape: f32[2,1,32], index: 9, kind: input, shape index: {}]   ;;  %s16419_s11 = inlined_call_operand.vmem [shape: f32[2,1,64], index: 11, kind: input, shape index: {}]   ;;  %s16420_s13 = inlined_call_operand.vmem [shape: f32[2,1,32], index: 13, kind: input, shape index: {}]   ;;  %s16421_s14 = inlined_call_operand.vmem [shape: f32[2,1,32], index: 14, kind: input, shape index: {}]   ;;  %s16422_s15 = inlined_call_operand.vmem [shape: f32[2,1,32], index: 15, kind: input, shape index: {}]   ;;  %s16423_s16 = inlined_call_operand.vmem [shape: bf16[32,128], index: 16, kind: input, shape index: {}]   ;;  %s16424_s17 = inlined_call_operand.vmem [shape: f32[1,128], index: 17, kind: input, shape index: {}]   ;;  %s16425_s18 = inlined_call_operand.vmem [shape: f32[8,128], index: 18, kind: output, shape index: {}]  }
   0x1   :  { %16483 = sst [smem:[#allocation34_spill]] %s16407_s1  ;;  %v12065_v40 = vld [vmem:[%s16410_s2] ss:$0 sm:$0xff]  ;;  %v12080_v51 = vld [vmem:[%s16411_s3 + $0x8] sm:$0xff]  ;;  %v12087_v53 = vld [vmem:[%s16411_s3 + $0x10] sm:$0xff]  ;;  %s11866_s25 = smov 112  }
   0x2   :  { %16484 = sst [smem:[#allocation35_spill]] %s16408_s0  ;;  %s16486_s29 = sld [smem:[#allocation34_spill]]  ;;  %v12073_v45 = vld [vmem:[%s16411_s3] sm:$0xff]  ;;  %vm4259_vm5 = vcmask 523264   ;;  %vm11870_vm6 = vmmov 0   ;;  %vm9482_vm8 = vcmask 1041409  }
   0x3   :  { %16485 = sst [smem:[#allocation36_spill]] %s16409_s4  ;;  %s16487_s20 = sld [smem:[#allocation35_spill]]  ;;  %vm9484_vm9 = vcmask 1042434   ;;  %vm9486_vm10 = vcmask 1043459   ;;  %vm9488_vm11 = vcmask 1044484   ;;  %vm9490_vm12 = vcmask 1045509  }
   0x4   :  { %s16488_s26 = sld [smem:[#allocation36_spill]]  ;;  %s11862_s4 = smov 96   ;;  %vm9492_vm13 = vcmask 1046534   ;;  %vm9494_vm14 = vcmask 1047559  }
   0x5   :  { %s11867_s27 = smov 48   ;;  %s11868_s1 = smov 16  }
   0x8   :  { %v11262_v0 = vld [vmem:[%s16486_s29] sm:$0xff]   ;;  %v11263_v1 = vld [vmem:[%s16486_s29 + $0x8] sm:$0xff]  }
   0x9   :  { %10253 = vmatprep.subr.bf16.mxu0 %v11262_v0  ;;  %v74_v2 = vld [vmem:[%s16487_s20] sm:$0xff]  ;;  %v75_v3 = vld [vmem:[%s16487_s20 + $0x8] sm:$0xff]  ;;  %11033 = vmatprep.subr.bf16.mxu1 %v11262_v0  ;;  %v76_v5 = vld [vmem:[%s16487_s20 + $0x10] sm:$0xff] }
   0xa   :  { %10254 = vmatpush3.bf16.msra.mxu0 %v11262_v0  ;;  %v102_v4 = vpack.c.bf16 %v75_v3, %v74_v2  ;;  %v77_v6 = vld [vmem:[%s16487_s20 + $0x18] sm:$0xff]  ;;  %11035 = vmatpush3.bf16.msra.mxu1 %v11262_v0  ;;  %v78_v7 = vld [vmem:[%s16487_s20 + $0x20] sm:$0xff]  ;;  %v79_v8 = vld [vmem:[%s16487_s20 + $0x28] sm:$0xff] }
   0xb   :  { %10255 = vmatprep.subr.bf16.mxu0 %v11263_v1  ;;  %11034 = vmatprep.subr.bf16.mxu1 %v11263_v1  ;;  %v103_v9 = vpack.c.bf16 %v77_v6, %v76_v5  ;;  %v104_v10 = vpack.c.bf16 %v79_v8, %v78_v7  ;;  %v90_v11 = vld [vmem:[%s16487_s20 + $0x80] sm:$0xff]  ;;  %v91_v12 = vld [vmem:[%s16487_s20 + $0x88] sm:$0xff]  ;;  %v92_v14 = vld [vmem:[%s16487_s20 + $0x90] sm:$0xff] }
   0xc   :  { %10257 = vmatprep.mubr.msk.bf16.mxu0 %vm133_vm0, %v102_v4  ;;  %v110_v13 = vpack.c.bf16 %v91_v12, %v90_v11  ;;  %v93_v15 = vld [vmem:[%s16487_s20 + $0x98] sm:$0xff]  ;;  %v94_v16 = vld [vmem:[%s16487_s20 + $0xa0] sm:$0xff]  ;;  %v95_v18 = vld [vmem:[%s16487_s20 + $0xa8] sm:$0xff] }
   0xd   :  { %v111_v17 = vpack.c.bf16 %v93_v15, %v92_v14  ;;  %v112_v19 = vpack.c.bf16 %v95_v18, %v94_v16  ;;  %v80_v20 = vld [vmem:[%s16487_s20 + $0x30] sm:$0xff]  ;;  %v81_v21 = vld [vmem:[%s16487_s20 + $0x38] sm:$0xff]  ;;  %v82_v22 = vld [vmem:[%s16487_s20 + $0x40] sm:$0xff] }
   0xe   :  { %10256 = vmatpush3.bf16.msra.mxu0 %v11263_v1  ;;  %11036 = vmatpush3.bf16.msra.mxu1 %v11263_v1  ;;  %v83_v23 = vld [vmem:[%s16487_s20 + $0x48] sm:$0xff]  ;;  %v96_v24 = vld [vmem:[%s16487_s20 + $0xb0] sm:$0xff]  ;;  %v97_v25 = vld [vmem:[%s16487_s20 + $0xb8] sm:$0xff]  ;;  %v105_v26 = vpack.c.bf16 %v81_v21, %v80_v20 }
   0xf   :  { %10273 = vmatprep.mubr.msk.bf16.mxu1 %vm133_vm0, %v110_v13  ;;  %v106_v27 = vpack.c.bf16 %v83_v23, %v82_v22  ;;  %v113_v28 = vpack.c.bf16 %v97_v25, %v96_v24  ;;  %v84_v29 = vld [vmem:[%s16487_s20 + $0x50] sm:$0xff]  ;;  %v85_v30 = vld [vmem:[%s16487_s20 + $0x58] sm:$0xff]  ;;  %v86_v31 = vld [vmem:[%s16487_s20 + $0x60] sm:$0xff] }
  0x10   :  { %v87_v32 = vld [vmem:[%s16487_s20 + $0x68] sm:$0xff]  ;;  %v107_v33 = vpack.c.bf16 %v85_v30, %v84_v29  ;;  %v88_v35 = vld [vmem:[%s16487_s20 + $0x70] sm:$0xff]  ;;  %v89_v36 = vld [vmem:[%s16487_s20 + $0x78] sm:$0xff] }
  0x11   :  { %10258 = vmatmul.mubr.msk.bf16.vlgmr.msra.gmra.mrb[0].mxu0 %vm133_vm0, %v103_v9  ;;  %10274 = vmatmul.mubr.msk.bf16.vlgmr.msra.gmra.mrb[0].mxu1 %vm133_vm0, %v111_v17  ;;  %v108_v34 = vpack.c.bf16 %v87_v32, %v86_v31  ;;  %v109_v37 = vpack.c.bf16 %v89_v36, %v88_v35  ;;  %v11264_v38 = vld [vmem:[%s16488_s26] sm:$0xff]   ;;  %v11265_v39 = vld [vmem:[%s16488_s26 + $0x8] sm:$0xff]  }
  0x12   :  { %10261 = vmatprep.mubr.msk.bf16.mxu0 %vm133_vm0, %v104_v10  ;;  %10277 = vmatprep.mubr.msk.bf16.mxu1 %vm133_vm0, %v112_v19 }
  0x13   :  { %10281 = vmatprep.subr.bf16.mxu1 %v11264_v38 }
  0x14   :  { %10282 = vmatpush3.bf16.msra.mxu1 %v11264_v38 }
  0x15   :  { %10283 = vmatprep.subr.bf16.mxu1 %v11265_v39 }
  0x18   :  { %10284 = vmatpush3.bf16.msra.mxu1 %v11265_v39 }
  0x19   :  { %10262 = vmatmul.mubr.msk.bf16.gmra.mrb[4].mxu0 %vm133_vm0, %v105_v26  ;;  %10278 = vmatmul.mubr.msk.bf16.gmra.mrb[4].mxu1 %vm133_vm0, %v113_v28 }
  0x1a   :  { %10265 = vmatprep.mubr.msk.bf16.mxu0 %vm133_vm0, %v106_v27 }
  0x21   :  { %10266 = vmatmul.mubr.msk.bf16.gmra.mrb[8].mxu0 %vm133_vm0, %v107_v33 }
  0x22   :  { %10269 = vmatprep.mubr.msk.bf16.mxu0 %vm133_vm0, %v108_v34 }
  0x29   :  { %10270 = vmatmul.mubr.msk.bf16.gmra.mrb[12].mxu0 %vm133_vm0, %v109_v37 }
  0xe4   :  { %v10259_v41 = vpop.f32.mrb[0].mxu0  ;;  %v12067_v43 = vpop.f32.mrb[0].mxu1 }
  0xe5   :  { %v204_v42 = vpop.f32.mrb[1].mxu0  ;;  %v268_v47 = vpop.f32.mrb[1].mxu1  ;;  %v213_v48 = vadd.f32 %v10259_v41, %v12065_v40 }
  0xe6   :  { %v205_v44 = vadd.f32 %v12065_v40, %v204_v42  ;;  %v10260_v46 = vpop.f32.mrb[2].mxu0  ;;  %v12082_v52 = vpop.f32.mrb[2].mxu1  ;;  %v269_v31 = vadd.f32 %v12065_v40, %v268_v47 }
  0xe7   :  { %v216_v49 = vadd.f32 %v10260_v46, %v12065_v40  ;;  %v207_v50 = vpop.f32.mrb[3].mxu0  ;;  %v271_v55 = vpop.f32.mrb[3].mxu1  ;;  %v12100_v59 = vadd.f32 %v12087_v53, %v213_v48 }
  0xe8   :  { %v208_v54 = vadd.f32 %v12065_v40, %v207_v50  ;;  %v12094_v57 = vadd.f32 %v12073_v45, %v205_v44  ;;  %v272_v32 = vadd.f32 %v12065_v40, %v271_v55  ;;  %v12167_v44 = vadd.f32 %v12080_v51, %v269_v31 }
  0xe9   :  { %v12091_v56 = vadd.f32 %v12073_v45, %v216_v49  ;;  %16492 = vst [vmem:[#allocation5_spill] sm:$0xff] %v12100_v59  ;;  %v277_v50 = vadd.f32 %v12067_v43, %v12065_v40 }
  0xea   :  { %16490 = vst [vmem:[#allocation3_spill] sm:$0xff] %v12094_v57  ;;  %v12097_v58 = vadd.f32 %v12080_v51, %v208_v54  ;;  %16503 = vst [vmem:[#allocation16_spill] sm:$0xff] %v12167_v44  ;;  %v12170_v46 = vadd.f32 %v12087_v53, %v272_v32  ;;  %v280_v54 = vadd.f32 %v12082_v52, %v12065_v40 }
  0xeb   :  { %16489 = vst [vmem:[#allocation2_spill] sm:$0xff] %v12091_v56  ;;  %v331_v62 = vpack.c.bf16 %v12091_v56, %v12100_v59 }
  0xec   :  { %16491 = vst [vmem:[#allocation4_spill] sm:$0xff] %v12097_v58  ;;  %v330_v60 = vpack.c.bf16 %v12097_v58, %v12094_v57  ;;  %v10263_v61 = vpop.f32.mrb[4].mxu0  ;;  %v12107_v1 = vpop.f32.mrb[4].mxu1  ;;  %16504 = vst [vmem:[#allocation17_spill] sm:$0xff] %v12170_v46  ;;  %v12195_v43 = vadd.f32 %v12080_v51, %v280_v54 }
  0xed   :  { %v229_v63 = vadd.f32 %v10263_v61, %v12065_v40  ;;  %v220_v0 = vpop.f32.mrb[5].mxu0  ;;  %v284_v4 = vpop.f32.mrb[5].mxu1 }
  0xee   :  { %v221_v2 = vadd.f32 %v12065_v40, %v220_v0  ;;  %v10264_v3 = vpop.f32.mrb[6].mxu0  ;;  %10285 = vmatprep.mubr.msk.bf16.mxu1 %vm133_vm0, %v330_v60  ;;  %v10280_v8 = vpop.f32.mrb[6].mxu1  ;;  %v338_v60 = vpack.c.bf16 %v12170_v46, %v12167_v44  ;;  %v285_v61 = vadd.f32 %v12065_v40, %v284_v4  ;;  %16508 = vst [vmem:[#allocation21_spill] sm:$0xff] %v12195_v43 }
  0xef   :  { %v12112_v5 = vadd.f32 %v12073_v45, %v229_v63  ;;  %v232_v6 = vadd.f32 %v10264_v3, %v12065_v40  ;;  %v223_v7 = vpop.f32.mrb[7].mxu0  ;;  %10286 = vmatmul.mubr.msk.bf16.vlgmr.msra.gmra.mrb[8].mxu1 %vm133_vm0, %v331_v62  ;;  %v287_v11 = vpop.f32.mrb[7].mxu1  ;;  %v12192_v63 = vadd.f32 %v12073_v45, %v277_v50  ;;  %v293_v3 = vadd.f32 %v12107_v1, %v12065_v40 }
  0xf0   :  { %v12117_v9 = vadd.f32 %v12080_v51, %v221_v2  ;;  %v224_v10 = vadd.f32 %v12065_v40, %v223_v7  ;;  %v288_v62 = vadd.f32 %v12065_v40, %v287_v11  ;;  %v12199_v52 = vadd.f32 %v12087_v53, %v285_v61 }
  0xf1   :  { %16493 = vst [vmem:[#allocation6_spill] sm:$0xff] %v12112_v5  ;;  %v12121_v12 = vadd.f32 %v12080_v51, %v232_v6  ;;  %16507 = vst [vmem:[#allocation20_spill] sm:$0xff] %v12192_v63  ;;  %v339_v2 = vpack.c.bf16 %v12195_v43, %v12192_v63  ;;  %v296_v4 = vadd.f32 %v10280_v8, %v12065_v40 }
  0xf2   :  { %16494 = vst [vmem:[#allocation7_spill] sm:$0xff] %v12117_v9  ;;  %v12124_v13 = vadd.f32 %v12087_v53, %v224_v10  ;;  %16509 = vst [vmem:[#allocation22_spill] sm:$0xff] %v12199_v52  ;;  %v12203_v0 = vadd.f32 %v12073_v45, %v288_v62  ;;  %v12213_v7 = vadd.f32 %v12080_v51, %v293_v3 }
  0xf3   :  { %16495 = vst [vmem:[#allocation8_spill] sm:$0xff] %v12121_v12  ;;  %v333_v14 = vpack.c.bf16 %v12121_v12, %v12112_v5  ;;  %v12216_v10 = vadd.f32 %v12087_v53, %v296_v4 }
  0xf4   :  { %16496 = vst [vmem:[#allocation9_spill] sm:$0xff] %v12124_v13  ;;  %v332_v15 = vpack.c.bf16 %v12124_v13, %v12117_v9  ;;  %v10267_v16 = vpop.f32.mrb[8].mxu0  ;;  %16510 = vst [vmem:[#allocation23_spill] sm:$0xff] %v12203_v0  ;;  %v340_v6 = vpack.c.bf16 %v12203_v0, %v12199_v52 }
  0xf5   :  { %v245_v17 = vadd.f32 %v10267_v16, %v12065_v40  ;;  %v236_v18 = vpop.f32.mrb[9].mxu0  ;;  %16511 = vst [vmem:[#allocation24_spill] sm:$0xff] %v12213_v7  ;;  %16512 = vst [vmem:[#allocation25_spill] sm:$0xff] %v12216_v10 }
  0xf6   :  { %v237_v19 = vadd.f32 %v12065_v40, %v236_v18  ;;  %v10268_v20 = vpop.f32.mrb[10].mxu0  ;;  %10289 = vmatprep.mubr.msk.bf16.mxu1 %vm133_vm0, %v332_v15 }
  0xf7   :  { %v12134_v21 = vadd.f32 %v12080_v51, %v245_v17  ;;  %v248_v22 = vadd.f32 %v10268_v20, %v12065_v40  ;;  %v239_v23 = vpop.f32.mrb[11].mxu0  ;;  %10290 = vmatmul.mubr.msk.bf16.gmra.mrb[12].mxu1 %vm133_vm0, %v333_v14 }
  0xf8   :  { %v12139_v24 = vadd.f32 %v12087_v53, %v237_v19  ;;  %v240_v25 = vadd.f32 %v12065_v40, %v239_v23 }
  0xf9   :  { %16497 = vst [vmem:[#allocation10_spill] sm:$0xff] %v12134_v21  ;;  %v12143_v26 = vadd.f32 %v12087_v53, %v248_v22 }
  0xfa   :  { %16498 = vst [vmem:[#allocation11_spill] sm:$0xff] %v12139_v24  ;;  %v12146_v27 = vadd.f32 %v12073_v45, %v240_v25 }
  0xfb   :  { %16499 = vst [vmem:[#allocation12_spill] sm:$0xff] %v12143_v26  ;;  %v335_v28 = vpack.c.bf16 %v12143_v26, %v12134_v21 }
  0xfc   :  { %16500 = vst [vmem:[#allocation13_spill] sm:$0xff] %v12146_v27  ;;  %v334_v29 = vpack.c.bf16 %v12146_v27, %v12139_v24  ;;  %v10271_v30 = vpop.f32.mrb[12].mxu0 }
  0xfd   :  { %v261_v33 = vadd.f32 %v10271_v30, %v12065_v40  ;;  %v252_v34 = vpop.f32.mrb[13].mxu0 }
  0xfe   :  { %v253_v35 = vadd.f32 %v12065_v40, %v252_v34  ;;  %v10272_v36 = vpop.f32.mrb[14].mxu0  ;;  %10293 = vmatprep.mubr.msk.bf16.mxu1 %vm133_vm0, %v334_v29 }
  0xff   :  { %v12158_v37 = vadd.f32 %v12087_v53, %v261_v33  ;;  %v264_v38 = vadd.f32 %v10272_v36, %v12065_v40  ;;  %v255_v39 = vpop.f32.mrb[15].mxu0  ;;  %10294 = vmatmul.mubr.msk.bf16.gmra.mrb[16].mxu1 %vm133_vm0, %v335_v28 }
 0x100   :  { %v12163_v41 = vadd.f32 %v12073_v45, %v253_v35  ;;  %v256_v42 = vadd.f32 %v12065_v40, %v255_v39  ;;  %v12226_v40 = vld [vmem:[%s16412_s5] ss:$0 sm:$0xff] }
 0x101   :  { %16501 = vst [vmem:[#allocation14_spill] sm:$0xff] %v12158_v37  ;;  %v12173_v47 = vadd.f32 %v12073_v45, %v264_v38  ;;  %v341_v45 = vpack.c.bf16 %v12216_v10, %v12213_v7 }
 0x102   :  { %16502 = vst [vmem:[#allocation15_spill] sm:$0xff] %v12163_v41  ;;  %v12176_v48 = vadd.f32 %v12080_v51, %v256_v42 }
 0x103   :  { %16505 = vst [vmem:[#allocation18_spill] sm:$0xff] %v12173_v47  ;;  %v337_v49 = vpack.c.bf16 %v12173_v47, %v12158_v37 }
 0x104   :  { %16506 = vst [vmem:[#allocation19_spill] sm:$0xff] %v12176_v48  ;;  %v336_v55 = vpack.c.bf16 %v12176_v48, %v12163_v41 }
 0x106   :  { %10297 = vmatprep.mubr.msk.bf16.mxu1 %vm133_vm0, %v336_v55 }
 0x107   :  { %10298 = vmatmul.mubr.msk.bf16.gmra.mrb[20].mxu1 %vm133_vm0, %v337_v49 }
 0x108   :  { %10301 = vmatprep.mubr.msk.bf16.mxu1 %vm133_vm0, %v338_v60 }
 0x10f   :  { %10302 = vmatmul.mubr.msk.bf16.gmra.mrb[24].mxu1 %vm133_vm0, %v339_v2 }
 0x110   :  { %10305 = vmatprep.mubr.msk.bf16.mxu1 %vm133_vm0, %v340_v6 }
 0x117   :  { %10306 = vmatmul.mubr.msk.bf16.gmra.mrb[28].mxu1 %vm133_vm0, %v341_v45 }
 0x1c2   :  { %v10287_v1 = vpop.f32.mrb[8].mxu1 }
 0x1c3   :  { %v431_v51 = vpop.f32.mrb[9].mxu1  ;;  %v440_v15 = vadd.f32 %v10287_v1, %v12226_v40 }
 0x1c4   :  { %v10288_v8 = vpop.f32.mrb[10].mxu1  ;;  %v432_v53 = vadd.f32 %v12226_v40, %v431_v51 }
 0x1c5   :  { %v434_v11 = vpop.f32.mrb[11].mxu1  ;;  %v12237_v19 = vpack.c.bf16 %v440_v15, %v440_v15  ;;  %v443_v20 = vadd.f32 %v10288_v8, %v12226_v40 }
 0x1c6   :  { %v435_v14 = vadd.f32 %v12226_v40, %v434_v11 }
 0x1c8   :  { %v12231_v16 = vpack.c.bf16 %v435_v14, %v432_v53 }
 0x1ca   :  { %v10291_v17 = vpop.f32.mrb[12].mxu1  ;;  %544 = vrot.lane.b32.xlu0 %v12231_v16, %s11862_s4  ;;  %10313 = vmatprep.mubr.msk.bf16.mxu0 %vm548_vm1, %v12231_v16 }
 0x1cb   :  { %v447_v18 = vpop.f32.mrb[13].mxu1  ;;  %v456_v25 = vadd.f32 %v10291_v17, %v12226_v40 }
 0x1cc   :  { %v448_v22 = vadd.f32 %v12226_v40, %v447_v18  ;;  %v10292_v23 = vpop.f32.mrb[14].mxu1 }
 0x1cd   :  { %v459_v28 = vadd.f32 %v10292_v23, %v12226_v40  ;;  %v450_v29 = vpop.f32.mrb[15].mxu1 }
 0x1ce   :  { %v12243_v30 = vpack.c.bf16 %v448_v22, %v443_v20  ;;  %v451_v31 = vadd.f32 %v12226_v40, %v450_v29  ;;  %546 = vrot.lane.b32.xlu0 %v12237_v19, %s11862_s4 }
 0x1cf   :  { %v12248_v32 = vpack.c.bf16 %v459_v28, %v456_v25 }
 0x1d0   :  { %611 = vrot.lane.b32.xlu1 %v12243_v30, %s11862_s4  ;;  %10321 = vmatprep.mubr.msk.bf16.mxu1 %vm548_vm1, %v12243_v30  ;;  %v12254_v33 = vpack.c.bf16 %v451_v31, %v451_v31 }
 0x1d2   :  { %677 = vrot.lane.b32.xlu0 %v12248_v32, %s11862_s4  ;;  %v10295_v34 = vpop.f32.mrb[16].mxu1 }
 0x1d3   :  { %v463_v35 = vpop.f32.mrb[17].mxu1  ;;  %v472_v36 = vadd.f32 %v10295_v34, %v12226_v40 }
 0x1d4   :  { %613 = vrot.lane.b32.xlu1 %v12254_v33, %s11862_s4  ;;  %v464_v38 = vadd.f32 %v12226_v40, %v463_v35  ;;  %v10296_v39 = vpop.f32.mrb[18].mxu1 }
 0x1d5   :  { %v475_v42 = vadd.f32 %v10296_v39, %v12226_v40  ;;  %v466_v49 = vpop.f32.mrb[19].mxu1 }
 0x1d6   :  { %v12263_v50 = vpack.c.bf16 %v464_v38, %v464_v38  ;;  %v467_v54 = vadd.f32 %v12226_v40, %v466_v49 }
 0x1d7   :  { %v12266_v55 = vpack.c.bf16 %v475_v42, %v475_v42 }
 0x1d8   :  { %v12268_v60 = vpack.c.bf16 %v472_v36, %v467_v54  ;;  %679 = vrot.lane.b32.xlu1 %v12263_v50, %s11862_s4 }
 0x1da   :  { %v10299_v61 = vpop.f32.mrb[20].mxu1  ;;  %743 = vrot.lane.b32.xlu0 %v12268_v60, %s11862_s4 }
 0x1db   :  { %v488_v62 = vadd.f32 %v10299_v61, %v12226_v40  ;;  %v479_v2 = vpop.f32.mrb[21].mxu1 }
 0x1dc   :  { %v480_v3 = vadd.f32 %v12226_v40, %v479_v2  ;;  %v10300_v4 = vpop.f32.mrb[22].mxu1  ;;  %745 = vrot.lane.b32.xlu1 %v12266_v55, %s11862_s4 }
 0x1dd   :  { %v12278_v6 = vpack.c.bf16 %v488_v62, %v488_v62  ;;  %v482_v45 = vpop.f32.mrb[23].mxu1  ;;  %v491_v14 = vadd.f32 %v10300_v4, %v12226_v40 }
 0x1de   :  { %v483_v1 = vadd.f32 %v12226_v40, %v482_v45 }
 0x1e0   :  { %v12281_v51 = vpack.c.bf16 %v483_v1, %v480_v3  ;;  %811 = vrot.lane.b32.xlu1 %v12278_v6, %s11862_s4 }
 0x1e2   :  { %v10303_v8 = vpop.f32.mrb[24].mxu1  ;;  %809 = vrot.lane.b32.xlu0 %v12281_v51, %s11862_s4 }
 0x1e3   :  { %v504_v11 = vadd.f32 %v10303_v8, %v12226_v40  ;;  %v495_v53 = vpop.f32.mrb[25].mxu1 }
 0x1e4   :  { %v496_v15 = vadd.f32 %v12226_v40, %v495_v53  ;;  %v10304_v17 = vpop.f32.mrb[26].mxu1 }
 0x1e5   :  { %v507_v18 = vadd.f32 %v10304_v17, %v12226_v40  ;;  %v498_v20 = vpop.f32.mrb[27].mxu1 }
 0x1e6   :  { %v12291_v22 = vpack.c.bf16 %v496_v15, %v491_v14  ;;  %v499_v23 = vadd.f32 %v12226_v40, %v498_v20 }
 0x1e7   :  { %v12294_v25 = vpack.c.bf16 %v507_v18, %v504_v11 }
 0x1e8   :  { %v12296_v28 = vpack.c.bf16 %v499_v23, %v499_v23  ;;  %875 = vrot.lane.b32.xlu0 %v12291_v22, %s11862_s4 }
 0x1ea   :  { %v10307_v29 = vpop.f32.mrb[28].mxu1  ;;  %877 = vrot.lane.b32.xlu1 %v12296_v28, %s11862_s4 }
 0x1eb   :  { %v511_v31 = vpop.f32.mrb[29].mxu1  ;;  %v520_v34 = vadd.f32 %v10307_v29, %v12226_v40 }
 0x1ec   :  { %v512_v35 = vadd.f32 %v12226_v40, %v511_v31  ;;  %v10308_v36 = vpop.f32.mrb[30].mxu1  ;;  %941 = vrot.lane.b32.xlu0 %v12294_v25, %s11862_s4 }
 0x1ed   :  { %v523_v38 = vadd.f32 %v10308_v36, %v12226_v40  ;;  %v514_v39 = vpop.f32.mrb[31].mxu1 }
 0x1ee   :  { %v12307_v42 = vpack.c.bf16 %v512_v35, %v512_v35  ;;  %v515_v49 = vadd.f32 %v12226_v40, %v514_v39 }
 0x1ef   :  { %v12310_v54 = vpack.c.bf16 %v523_v38, %v523_v38 }
 0x1f0   :  { %v12312_v61 = vpack.c.bf16 %v520_v34, %v515_v49  ;;  %943 = vrot.lane.b32.xlu1 %v12307_v42, %s11862_s4 }
 0x1f2   :  { %1007 = vrot.lane.b32.xlu0 %v12312_v61, %s11862_s4 }
 0x1f4   :  { %1009 = vrot.lane.b32.xlu1 %v12310_v54, %s11862_s4 }
 0x1f6   :  { %1400 = vrot.lane.b32.xlu0 %v12231_v16, %s11863_s23 }
 0x1f8   :  { %1402 = vrot.lane.b32.xlu1 %v12237_v19, %s11863_s23 }
 0x1fa   :  { %1463 = vrot.lane.b32.xlu0 %v12243_v30, %s11863_s23 }
 0x1fc   :  { %1525 = vrot.lane.b32.xlu1 %v12248_v32, %s11863_s23 }
 0x200   :  { %1465 = vrot.lane.b32.xlu1 %v12254_v33, %s11863_s23 }
 0x204   :  { %1527 = vrot.lane.b32.xlu1 %v12263_v50, %s11863_s23 }
 0x23c   :  { %v545_v40 = vpop.permute.xlu0 %544 }
 0x23d   :  { %11037 = vmatprep.subr.msk.bf16.mxu0 %vm548_vm1, %v545_v40  ;;  %v556_v62 = vsel %vm548_vm1, %v545_v40, 0 }
 0x23e   :  { %10310 = vmatpush3.bf16.xpose.msra.mxu0 %v556_v62 }
 0x240   :  { %v547_v2 = vpop.permute.xlu0 %546 }
 0x241   :  { %11038 = vmatprep.subr.msk.bf16.mxu0 %vm548_vm1, %v547_v2  ;;  %v559_v45 = vsel %vm548_vm1, %v547_v2, 0 }
 0x242   :  { %v612_v3 = vpop.permute.xlu1 %611 }
 0x243   :  { %11039 = vmatprep.subr.msk.bf16.mxu1 %vm548_vm1, %v612_v3  ;;  %v622_v4 = vsel %vm548_vm1, %v612_v3, 0 }
 0x244   :  { %10318 = vmatpush3.bf16.xpose.msra.mxu1 %v622_v4  ;;  %v678_v1 = vpop.permute.xlu0 %677 }
 0x245   :  { %v688_v14 = vsel %vm548_vm1, %v678_v1, 0 }
 0x246   :  { %v614_v8 = vpop.permute.xlu1 %613  ;;  %10312 = vmatpush3.bf16.xpose.msra.mxu0 %v559_v45 }
 0x247   :  { %11040 = vmatprep.subr.msk.bf16.mxu1 %vm548_vm1, %v614_v8  ;;  %11041 = vmatprep.subr.msk.bf16.mxu0 %vm548_vm1, %v678_v1  ;;  %v625_v11 = vsel %vm548_vm1, %v614_v8, 0 }
 0x24a   :  { %v680_v15 = vpop.permute.xlu1 %679 }
 0x24b   :  { %v691_v23 = vsel %vm548_vm1, %v680_v15, 0 }
 0x24c   :  { %10320 = vmatpush3.bf16.xpose.msra.mxu1 %v625_v11  ;;  %v744_v53 = vpop.permute.xlu0 %743 }
 0x24d   :  { %10314 = vmatmul.mubr.msk.bf16.vlgmr.msra.gmra.mrb[16].mxu0 %vm548_vm1, %v12237_v19  ;;  %11043 = vmatprep.subr.msk.bf16.mxu1 %vm548_vm1, %v744_v53  ;;  %v754_v17 = vsel %vm548_vm1, %v744_v53, 0 }
 0x24e   :  { %10326 = vmatpush3.bf16.xpose.msra.mxu0 %v688_v14  ;;  %10329 = vmatprep.mubr.msk.bf16.mxu0 %vm548_vm1, %v12248_v32  ;;  %v746_v18 = vpop.permute.xlu1 %745 }
 0x24f   :  { %11042 = vmatprep.subr.msk.bf16.mxu0 %vm548_vm1, %v680_v15  ;;  %v757_v29 = vsel %vm548_vm1, %v746_v18, 0 }
 0x252   :  { %v812_v35 = vpop.permute.xlu1 %811 }
 0x253   :  { %10322 = vmatmul.mubr.msk.bf16.vlgmr.msra.gmra.mrb[32].mxu1 %vm548_vm1, %v12254_v33  ;;  %v823_v39 = vsel %vm548_vm1, %v812_v35, 0 }
 0x254   :  { %10334 = vmatpush3.bf16.xpose.msra.mxu1 %v754_v17  ;;  %10337 = vmatprep.mubr.msk.bf16.mxu1 %vm548_vm1, %v12268_v60  ;;  %v810_v20 = vpop.permute.xlu0 %809 }
 0x255   :  { %11044 = vmatprep.subr.msk.bf16.mxu1 %vm548_vm1, %v746_v18  ;;  %v820_v34 = vsel %vm548_vm1, %v810_v20, 0 }
 0x256   :  { %10328 = vmatpush3.bf16.xpose.msra.mxu0 %v691_v23  ;;  %v16429_v23 = vlaneseq }
 0x257   :  { %11045 = vmatprep.subr.msk.bf16.mxu0 %vm548_vm1, %v810_v20 }
 0x25a   :  { %v876_v31 = vpop.permute.xlu0 %875 }
 0x25b   :  { %v886_v36 = vsel %vm548_vm1, %v876_v31, 0 }
 0x25c   :  { %10336 = vmatpush3.bf16.xpose.msra.mxu1 %v757_v29  ;;  %v878_v38 = vpop.permute.xlu1 %877  ;;  %v61_v29 = vand.u32 127, %v16429_v23 }
 0x25d   :  { %10330 = vmatmul.mubr.msk.bf16.vlgmr.msra.gmra.mrb[20].mxu0 %vm548_vm1, %v12263_v50  ;;  %11047 = vmatprep.subr.msk.bf16.mxu1 %vm548_vm1, %v876_v31  ;;  %v889_v40 = vsel %vm548_vm1, %v878_v38, 0 }
 0x25e   :  { %10342 = vmatpush3.bf16.xpose.msra.mxu0 %v820_v34  ;;  %10345 = vmatprep.mubr.msk.bf16.mxu0 %vm548_vm1, %v12281_v51  ;;  %v942_v49 = vpop.permute.xlu0 %941  ;;  %vm62_vm3 = vcmp.lt.s32.totalorder %v61_v29, 20  ;;  %v11864_v34 = vmov -1e+30  }
 0x25f   :  { %11046 = vmatprep.subr.msk.bf16.mxu0 %vm548_vm1, %v812_v35  ;;  %v952_v3 = vsel %vm548_vm1, %v942_v49, 0  ;;  %v12400_v35 = vsel %vm62_vm3, 0.0, %v11864_v34 }
 0x260   :  { %16513 = vst [vmem:[#allocation26_spill] sm:$0xff] %v12400_v35 }
 0x262   :  { %v944_v62 = vpop.permute.xlu1 %943 }
 0x263   :  { %10338 = vmatmul.mubr.msk.bf16.vlgmr.msra.gmra.mrb[36].mxu1 %vm548_vm1, %v12266_v55  ;;  %v955_v1 = vsel %vm548_vm1, %v944_v62, 0 }
 0x264   :  { %10350 = vmatpush3.bf16.xpose.msra.mxu1 %v886_v36  ;;  %10353 = vmatprep.mubr.msk.bf16.mxu1 %vm548_vm1, %v12291_v22  ;;  %v1008_v2 = vpop.permute.xlu0 %1007 }
 0x265   :  { %11048 = vmatprep.subr.msk.bf16.mxu1 %vm548_vm1, %v878_v38  ;;  %v1018_v45 = vsel %vm548_vm1, %v1008_v2, 0 }
 0x266   :  { %10344 = vmatpush3.bf16.xpose.msra.mxu0 %v823_v39  ;;  %v1010_v4 = vpop.permute.xlu1 %1009 }
 0x267   :  { %11049 = vmatprep.subr.msk.bf16.mxu0 %vm548_vm1, %v942_v49  ;;  %v1021_v53 = vsel %vm548_vm1, %v1010_v4, 0 }
 0x268   :  { %v1401_v8 = vpop.permute.xlu0 %1400 }
 0x26a   :  { %v1403_v11 = vpop.permute.xlu1 %1402 }
 0x26b   :  { %v1413_v17 = vsel %vm1411_vm2, %v1403_v11, 0 }
 0x26c   :  { %10352 = vmatpush3.bf16.xpose.msra.mxu1 %v889_v40  ;;  %v1464_v14 = vpop.permute.xlu0 %1463 }
 0x26d   :  { %10346 = vmatmul.mubr.msk.bf16.vlgmr.msra.gmra.mrb[24].mxu0 %vm548_vm1, %v12278_v6  ;;  %11051 = vmatprep.subr.msk.bf16.mxu1 %vm548_vm1, %v1008_v2 }
 0x26e   :  { %10358 = vmatpush3.bf16.xpose.msra.mxu0 %v952_v3  ;;  %10361 = vmatprep.mubr.msk.bf16.mxu0 %vm548_vm1, %v12294_v25  ;;  %v12390_v15 = vpop.permute.xlu1 %1525 }
 0x26f   :  { %11050 = vmatprep.subr.msk.bf16.mxu0 %vm548_vm1, %v944_v62 }
 0x272   :  { %v1466_v18 = vpop.permute.xlu1 %1465 }
 0x273   :  { %10354 = vmatmul.mubr.msk.bf16.vlgmr.msra.gmra.mrb[40].mxu1 %vm548_vm1, %v12296_v28  ;;  %v1475_v20 = vsel %vm1411_vm2, %v1466_v18, 0 }
 0x274   :  { %10366 = vmatpush3.bf16.xpose.msra.mxu1 %v1018_v45  ;;  %10369 = vmatprep.mubr.msk.bf16.mxu1 %vm548_vm1, %v12312_v61 }
 0x275   :  { %11052 = vmatprep.subr.msk.bf16.mxu1 %vm548_vm1, %v1010_v4 }
 0x276   :  { %10360 = vmatpush3.bf16.xpose.msra.mxu0 %v955_v1 }
 0x277   :  { %10373 = vmatprep.subr.bf16.mxu0 %v1401_v8 }
 0x27c   :  { %10368 = vmatpush3.bf16.xpose.msra.mxu1 %v1021_v53 }
 0x27d   :  { %10362 = vmatmul.mubr.msk.bf16.vlgmr.msra.gmra.mrb[28].mxu0 %vm548_vm1, %v12307_v42  ;;  %10381 = vmatprep.subr.bf16.mxu1 %v1464_v14 }
 0x27e   :  { %10374 = vmatpush3.bf16.msra.mxu0 %v1401_v8 }
 0x27f   :  { %11053 = vmatprep.subr.msk.bf16.mxu0 %vm1411_vm2, %v1403_v11 }
 0x282   :  { %10376 = vmatpush3.bf16.msra.mxu0 %v1413_v17 }
 0x283   :  { %10370 = vmatmul.mubr.msk.bf16.vlgmr.msra.gmra.mrb[44].mxu1 %vm548_vm1, %v12310_v54  ;;  %10389 = vmatprep.subr.bf16.mxu0 %v12390_v15 }
 0x284   :  { %10382 = vmatpush3.bf16.msra.mxu1 %v1464_v14 }
 0x285   :  { %11054 = vmatprep.subr.msk.bf16.mxu1 %vm1411_vm2, %v1466_v18 }
 0x288   :  { %10384 = vmatpush3.bf16.msra.mxu1 %v1475_v20 }
 0x320   :  { %v10315_v31 = vpop.f32.mrb[16].mxu0 }
 0x321   :  { %v1073_v36 = vmul.f32 0.25, %v10315_v31  ;;  %v595_v38 = vpop.f32.mrb[17].mxu0 }
 0x322   :  { %v1071_v39 = vmul.f32 0.25, %v595_v38  ;;  %v10316_v49 = vpop.f32.mrb[18].mxu0 }
 0x323   :  { %v598_v40 = vpop.f32.mrb[19].mxu0  ;;  %v12403_v62 = vadd.f32 %v1073_v36, %v12400_v35 }
 0x324   :  { %v1072_v2 = vmul.f32 0.25, %v598_v40  ;;  %v12408_v4 = vadd.f32 %v1071_v39, %v12400_v35 }
 0x325   :  { %v1126_v3 = vsel %vm1119_vm4, %v12403_v62, -inf }
 0x326   :  { %v10323_v45 = vpop.f32.mrb[32].mxu1  ;;  %1127 = vmax.xlane.f32.xlu0 %v1126_v3  ;;  %v12411_v1 = vadd.f32 %v1072_v2, %v12400_v35  ;;  %v1120_v20 = vsel %vm1119_vm4, %v12408_v4, -inf }
 0x327   :  { %v1076_v8 = vmul.f32 0.25, %v10323_v45  ;;  %v661_v11 = vpop.f32.mrb[33].mxu1 }
 0x328   :  { %v10324_v53 = vpop.f32.mrb[34].mxu1  ;;  %v1123_v14 = vsel %vm1119_vm4, %v12411_v1, -inf  ;;  %v1074_v17 = vmul.f32 0.25, %v661_v11 }
 0x329   :  { %v664_v18 = vpop.f32.mrb[35].mxu1  ;;  %1124 = vmax.xlane.f32.xlu1 %v1123_v14  ;;  %v12418_v29 = vadd.f32 %v1076_v8, %v12400_v35 }
 0x32a   :  { %v1075_v31 = vmul.f32 0.25, %v664_v18  ;;  %1121 = vmax.xlane.f32.xlu0 %v1120_v20  ;;  %v12426_v38 = vadd.f32 %v1074_v17, %v12400_v35 }
 0x32b   :  { %v1135_v36 = vsel %vm1119_vm4, %v12418_v29, -inf }
 0x32c   :  { %v12421_v34 = vadd.f32 %v1075_v31, %v12400_v35  ;;  %v1129_v3 = vsel %vm1119_vm4, %v12426_v38, -inf }
 0x32e   :  { %1136 = vmax.xlane.f32.xlu0 %v1135_v36  ;;  %v1132_v39 = vsel %vm1119_vm4, %v12421_v34, -inf }
 0x32f   :  { %1133 = vmax.xlane.f32.xlu1 %v1132_v39 }
 0x330   :  { %v10331_v49 = vpop.f32.mrb[20].mxu0 }
 0x331   :  { %v1079_v40 = vmul.f32 0.25, %v10331_v49  ;;  %v727_v2 = vpop.f32.mrb[21].mxu0 }
 0x332   :  { %v1077_v45 = vmul.f32 0.25, %v727_v2  ;;  %1130 = vmax.xlane.f32.xlu0 %v1129_v3  ;;  %v10332_v8 = vpop.f32.mrb[22].mxu0 }
 0x333   :  { %v730_v11 = vpop.f32.mrb[23].mxu0  ;;  %v12433_v53 = vadd.f32 %v1079_v40, %v12400_v35 }
 0x334   :  { %v1078_v14 = vmul.f32 0.25, %v730_v11  ;;  %v12436_v17 = vadd.f32 %v1077_v45, %v12400_v35 }
 0x335   :  { %v1144_v18 = vsel %vm1119_vm4, %v12433_v53, -inf }
 0x336   :  { %v10339_v20 = vpop.f32.mrb[36].mxu1  ;;  %1145 = vmax.xlane.f32.xlu1 %v1144_v18  ;;  %v1138_v31 = vsel %vm1119_vm4, %v12436_v17, -inf  ;;  %v12443_v36 = vadd.f32 %v1078_v14, %v12400_v35 }
 0x337   :  { %v1082_v39 = vmul.f32 0.25, %v10339_v20  ;;  %v793_v49 = vpop.f32.mrb[37].mxu1  ;;  %1139 = vmax.xlane.f32.xlu0 %v1138_v31 }
 0x338   :  { %v1080_v40 = vmul.f32 0.25, %v793_v49  ;;  %v10340_v2 = vpop.f32.mrb[38].mxu1  ;;  %v1141_v3 = vsel %vm1119_vm4, %v12443_v36, -inf }
 0x339   :  { %v796_v45 = vpop.f32.mrb[39].mxu1  ;;  %v12448_v8 = vadd.f32 %v1082_v39, %v12400_v35 }
 0x33a   :  { %v1081_v11 = vmul.f32 0.25, %v796_v45  ;;  %1142 = vmax.xlane.f32.xlu1 %v1141_v3  ;;  %v12453_v14 = vadd.f32 %v1080_v40, %v12400_v35 }
 0x33b   :  { %v1153_v18 = vsel %vm1119_vm4, %v12448_v8, -inf }
 0x33c   :  { %1154 = vmax.xlane.f32.xlu0 %v1153_v18  ;;  %v12456_v20 = vadd.f32 %v1081_v11, %v12400_v35  ;;  %v1147_v39 = vsel %vm1119_vm4, %v12453_v14, -inf }
 0x33e   :  { %v1150_v31 = vsel %vm1119_vm4, %v12456_v20, -inf }
 0x33f   :  { %1151 = vmax.xlane.f32.xlu1 %v1150_v31 }
 0x340   :  { %1148 = vmax.xlane.f32.xlu0 %v1147_v39  ;;  %v10347_v49 = vpop.f32.mrb[24].mxu0 }
 0x341   :  { %v1085_v2 = vmul.f32 0.25, %v10347_v49  ;;  %v859_v3 = vpop.f32.mrb[25].mxu0 }
 0x342   :  { %v1083_v45 = vmul.f32 0.25, %v859_v3  ;;  %v10348_v23 = vpop.f32.mrb[26].mxu0 }
 0x343   :  { %v862_v10 = vpop.f32.mrb[27].mxu0  ;;  %v12463_v40 = vadd.f32 %v1085_v2, %v12400_v35 }
 0x344   :  { %v1084_v18 = vmul.f32 0.25, %v862_v10  ;;  %v12466_v11 = vadd.f32 %v1083_v45, %v12400_v35 }
 0x345   :  { %v1162_v31 = vsel %vm1119_vm4, %v12463_v40, -inf }
 0x346   :  { %v10355_v0 = vpop.f32.mrb[40].mxu1  ;;  %1163 = vmax.xlane.f32.xlu1 %v1162_v31  ;;  %v1156_v39 = vsel %vm1119_vm4, %v12466_v11, -inf  ;;  %v12473_v49 = vadd.f32 %v1084_v18, %v12400_v35 }
 0x347   :  { %v1088_v23 = vmul.f32 0.25, %v10355_v0  ;;  %v925_v3 = vpop.f32.mrb[41].mxu1  ;;  %1157 = vmax.xlane.f32.xlu0 %v1156_v39 }
 0x348   :  { %v1086_v2 = vmul.f32 0.25, %v925_v3  ;;  %v10356_v7 = vpop.f32.mrb[42].mxu1  ;;  %v1159_v10 = vsel %vm1119_vm4, %v12473_v49, -inf }
 0x349   :  { %v928_v45 = vpop.f32.mrb[43].mxu1  ;;  %v12478_v52 = vadd.f32 %v1088_v23, %v12400_v35 }
 0x34a   :  { %v1087_v43 = vmul.f32 0.25, %v928_v45  ;;  %1160 = vmax.xlane.f32.xlu1 %v1159_v10  ;;  %v12483_v18 = vadd.f32 %v1086_v2, %v12400_v35 }
 0x34b   :  { %v1171_v31 = vsel %vm1119_vm4, %v12478_v52, -inf }
 0x34c   :  { %1172 = vmax.xlane.f32.xlu0 %v1171_v31  ;;  %v12486_v0 = vadd.f32 %v1087_v43, %v12400_v35  ;;  %v1165_v39 = vsel %vm1119_vm4, %v12483_v18, -inf }
 0x34e   :  { %v1168_v7 = vsel %vm1119_vm4, %v12486_v0, -inf }
 0x34f   :  { %1169 = vmax.xlane.f32.xlu1 %v1168_v7 }
 0x350   :  { %1166 = vmax.xlane.f32.xlu0 %v1165_v39  ;;  %v10363_v23 = vpop.f32.mrb[28].mxu0 }
 0x351   :  { %v1091_v3 = vmul.f32 0.25, %v10363_v23  ;;  %v991_v10 = vpop.f32.mrb[29].mxu0 }
 0x352   :  { %v1089_v45 = vmul.f32 0.25, %v991_v10  ;;  %v10364_v46 = vpop.f32.mrb[30].mxu0 }
 0x353   :  { %v994_v63 = vpop.f32.mrb[31].mxu0  ;;  %v12493_v2 = vadd.f32 %v1091_v3, %v12400_v35 }
 0x354   :  { %v1090_v31 = vmul.f32 0.25, %v994_v63  ;;  %v12498_v44 = vadd.f32 %v1089_v45, %v12400_v35 }
 0x355   :  { %v1180_v43 = vsel %vm1119_vm4, %v12493_v2, -inf }
 0x356   :  { %v10371_v7 = vpop.f32.mrb[44].mxu1  ;;  %1181 = vmax.xlane.f32.xlu1 %v1180_v43  ;;  %v12501_v39 = vadd.f32 %v1090_v31, %v12400_v35  ;;  %v1174_v63 = vsel %vm1119_vm4, %v12498_v44, -inf }
 0x357   :  { %v1094_v23 = vmul.f32 0.25, %v10371_v7  ;;  %v1057_v47 = vpop.f32.mrb[45].mxu1 }
 0x358   :  { %v1092_v10 = vmul.f32 0.25, %v1057_v47  ;;  %v10372_v46 = vpop.f32.mrb[46].mxu1  ;;  %v1177_v3 = vsel %vm1119_vm4, %v12501_v39, -inf }
 0x359   :  { %v1060_v48 = vpop.f32.mrb[47].mxu1  ;;  %1178 = vmax.xlane.f32.xlu0 %v1177_v3  ;;  %v12508_v45 = vadd.f32 %v1094_v23, %v12400_v35  ;;  %v12536_v46 = vpop.permute.xlu1 %1527 }
 0x35a   :  { %1175 = vmax.xlane.f32.xlu1 %v1174_v63  ;;  %v12513_v43 = vadd.f32 %v1092_v10, %v12400_v35  ;;  %v1093_v7 = vmul.f32 0.25, %v1060_v48 }
 0x35b   :  { %v1189_v31 = vsel %vm1119_vm4, %v12508_v45, -inf }
 0x35c   :  { %v1183_v47 = vsel %vm1119_vm4, %v12513_v43, -inf  ;;  %v12530_v23 = vadd.f32 %v1093_v7, %v12400_v35 }
 0x35d   :  { %1190 = vmax.xlane.f32.xlu0 %v1189_v31 }
 0x35e   :  { %v1186_v10 = vsel %vm1119_vm4, %v12530_v23, -inf }
 0x361   :  { %1184 = vmax.xlane.f32.xlu0 %v1183_v47 }
 0x36b   :  { %1649 = vrot.lane.b32.xlu1 %v12281_v51, %s11863_s23 }
 0x36f   :  { %1589 = vrot.lane.b32.xlu1 %v12266_v55, %s11863_s23 }
 0x373   :  { %1651 = vrot.lane.b32.xlu1 %v12278_v6, %s11863_s23 }
 0x377   :  { %1711 = vrot.lane.b32.xlu1 %v12291_v22, %s11863_s23  ;;  %1587 = vrot.lane.b32.xlu0 %v12268_v60, %s11863_s23 }
 0x37b   :  { %1773 = vrot.lane.b32.xlu1 %v12294_v25, %s11863_s23 }
 0x39f   :  { %1187 = vmax.xlane.f32.xlu1 %v1186_v10 }
 0x3b0   :  { %1713 = vrot.lane.b32.xlu1 %v12296_v28, %s11863_s23 }
 0x3b3   :  { %v1128_v3 = vpop.xlane.xlu0 %1127 }
 0x3b4   :  { %v1194_v41 = vsub.f32 %v12403_v62, %v1128_v3 }
 0x3b6   :  { %v1125_v63 = vpop.xlane.xlu1 %1124  ;;  %v1220_v24 = vmul.f32 1.442695, %v1194_v41 }
 0x3b7   :  { %v1193_v31 = vsub.f32 %v12411_v1, %v1125_v63  ;;  %v1122_v47 = vpop.xlane.xlu0 %1121 }
 0x3b8   :  { %v1192_v12 = vsub.f32 %v12408_v4, %v1122_v47 }
 0x3b9   :  { %v1218_v37 = vmul.f32 1.442695, %v1193_v31 }
 0x3ba   :  { %v1216_v62 = vmul.f32 1.442695, %v1192_v12 }
 0x3bb   :  { %11286 = vpow2.f32 %v1218_v37  ;;  %v1137_v48 = vpop.xlane.xlu0 %1136 }
 0x3bc   :  { %v1197_v7 = vsub.f32 %v12418_v29, %v1137_v48  ;;  %v1134_v27 = vpop.xlane.xlu1 %1133 }
 0x3bd   :  { %v1196_v37 = vsub.f32 %v12421_v34, %v1134_v27 }
 0x3be   :  { %v1226_v26 = vmul.f32 1.442695, %v1197_v7 }
 0x3bf   :  { %v1131_v10 = vpop.xlane.xlu0 %1130  ;;  %v1224_v41 = vmul.f32 1.442695, %v1196_v37 }
 0x3c0   :  { %11288 = vpow2.f32 %v1226_v26  ;;  %v1195_v21 = vsub.f32 %v12426_v38, %v1131_v10 }
 0x3c2   :  { %v1222_v5 = vmul.f32 1.442695, %v1195_v21 }
 0x3c3   :  { %v1146_v13 = vpop.xlane.xlu1 %1145 }
 0x3c4   :  { %11290 = vpow2.f32 %v1222_v5  ;;  %v1140_v1 = vpop.xlane.xlu0 %1139  ;;  %v1200_v4 = vsub.f32 %v12433_v53, %v1146_v13 }
 0x3c5   :  { %v12543_v63 = vpop.eup %11286  ;;  %v1198_v29 = vsub.f32 %v12436_v17, %v1140_v1  ;;  %11292 = vpow2.f32 %v1220_v24 }
 0x3c6   :  { %v1267_v26 = vsel %vm1119_vm4, %v12543_v63, 0.0  ;;  %v1232_v34 = vmul.f32 1.442695, %v1200_v4 }
 0x3c7   :  { %v1228_v3 = vmul.f32 1.442695, %v1198_v29  ;;  %1268 = vadd.xlane.f32.xlu0 %v1267_v26  ;;  %v1143_v21 = vpop.xlane.xlu1 %1142 }
 0x3c8   :  { %v1199_v13 = vsub.f32 %v12443_v36, %v1143_v21 }
 0x3c9   :  { %11294 = vpow2.f32 %v1228_v3  ;;  %v1155_v5 = vpop.xlane.xlu0 %1154 }
 0x3ca   :  { %v12550_v38 = vpop.eup %11288  ;;  %11296 = vpow2.f32 %v1216_v62  ;;  %v1203_v27 = vsub.f32 %v12448_v8, %v1155_v5  ;;  %v1230_v10 = vmul.f32 1.442695, %v1199_v13 }
 0x3cb   :  { %v1279_v24 = vsel %vm1119_vm4, %v12550_v38, 0.0  ;;  %11298 = vpow2.f32 %v1224_v41 }
 0x3cc   :  { %v1238_v12 = vmul.f32 1.442695, %v1203_v27  ;;  %1280 = vadd.xlane.f32.xlu0 %v1279_v24  ;;  %v1152_v47 = vpop.xlane.xlu1 %1151 }
 0x3cd   :  { %v1149_v17 = vpop.xlane.xlu0 %1148  ;;  %v1202_v1 = vsub.f32 %v12456_v20, %v1152_v47 }
 0x3ce   :  { %v12555_v31 = vpop.eup %11290  ;;  %11300 = vpow2.f32 %v1238_v12  ;;  %v1201_v53 = vsub.f32 %v12453_v14, %v1149_v17 }
 0x3cf   :  { %v1273_v48 = vsel %vm1119_vm4, %v12555_v31, 0.0  ;;  %v12561_v8 = vpop.eup %11292  ;;  %11302 = vpow2.f32 %v1232_v34  ;;  %v1236_v41 = vmul.f32 1.442695, %v1202_v1 }
 0x3d0   :  { %v1234_v7 = vmul.f32 1.442695, %v1201_v53  ;;  %1274 = vadd.xlane.f32.xlu0 %v1273_v48  ;;  %v1270_v36 = vsel %vm1119_vm4, %v12561_v8, 0.0 }
 0x3d2   :  { %11304 = vpow2.f32 %v1234_v7 }
 0x3d3   :  { %v12564_v37 = vpop.eup %11294  ;;  %v1164_v29 = vpop.xlane.xlu1 %1163  ;;  %11306 = vpow2.f32 %v1230_v10 }
 0x3d4   :  { %v12568_v14 = vpop.eup %11296  ;;  %v1158_v62 = vpop.xlane.xlu0 %1157  ;;  %1271 = vadd.xlane.f32.xlu1 %v1270_v36  ;;  %v1282_v26 = vsel %vm1119_vm4, %v12564_v37, 0.0  ;;  %v1206_v20 = vsub.f32 %v12463_v40, %v1164_v29 }
 0x3d5   :  { %v1204_v3 = vsub.f32 %v12466_v11, %v1158_v62  ;;  %1283 = vadd.xlane.f32.xlu0 %v1282_v26  ;;  %v12574_v4 = vpop.eup %11298  ;;  %v1264_v27 = vsel %vm1119_vm4, %v12568_v14, 0.0 }
 0x3d6   :  { %v1244_v34 = vmul.f32 1.442695, %v1206_v20  ;;  %v1276_v13 = vsel %vm1119_vm4, %v12574_v4, 0.0 }
 0x3d7   :  { %v1240_v21 = vmul.f32 1.442695, %v1204_v3  ;;  %v1161_v5 = vpop.xlane.xlu1 %1160 }
 0x3d8   :  { %v12578_v24 = vpop.eup %11300  ;;  %1265 = vadd.xlane.f32.xlu1 %v1264_v27  ;;  %v1205_v17 = vsub.f32 %v12473_v49, %v1161_v5 }
 0x3d9   :  { %11308 = vpow2.f32 %v1240_v21  ;;  %v1173_v12 = vpop.xlane.xlu0 %1172  ;;  %v1297_v11 = vsel %vm1119_vm4, %v12578_v24, 0.0  ;;  %v12583_v40 = vpop.eup %11302 }
 0x3da   :  { %11310 = vpow2.f32 %v1236_v41  ;;  %1298 = vadd.xlane.f32.xlu0 %v1297_v11  ;;  %v1242_v48 = vmul.f32 1.442695, %v1205_v17  ;;  %v1209_v7 = vsub.f32 %v12478_v52, %v1173_v12  ;;  %v1288_v49 = vsel %vm1119_vm4, %v12583_v40, 0.0 }
 0x3db   :  { %11312 = vpow2.f32 %v1244_v34 }
 0x3dc   :  { %v12587_v53 = vpop.eup %11304  ;;  %1277 = vadd.xlane.f32.xlu1 %v1276_v13  ;;  %v1170_v10 = vpop.xlane.xlu1 %1169  ;;  %11314 = vpow2.f32 %v1242_v48  ;;  %v1250_v36 = vmul.f32 1.442695, %v1209_v7 }
 0x3dd   :  { %v1291_v47 = vsel %vm1119_vm4, %v12587_v53, 0.0  ;;  %v1167_v1 = vpop.xlane.xlu0 %1166  ;;  %v12594_v29 = vpop.eup %11306  ;;  %v1208_v5 = vsub.f32 %v12486_v0, %v1170_v10 }
 0x3de   :  { %1292 = vadd.xlane.f32.xlu0 %v1291_v47  ;;  %v1207_v62 = vsub.f32 %v12483_v18, %v1167_v1  ;;  %v1285_v41 = vsel %vm1119_vm4, %v12594_v29, 0.0  ;;  %11316 = vpow2.f32 %v1250_v36 }
 0x3df   :  { %v1248_v13 = vmul.f32 1.442695, %v1208_v5 }
 0x3e0   :  { %1289 = vadd.xlane.f32.xlu1 %v1288_v49  ;;  %v1246_v27 = vmul.f32 1.442695, %v1207_v62 }
 0x3e3   :  { %v12597_v26 = vpop.eup %11308  ;;  %v1182_v3 = vpop.xlane.xlu1 %1181 }
 0x3e4   :  { %v12601_v52 = vpop.eup %11310  ;;  %v1212_v20 = vsub.f32 %v12493_v2, %v1182_v3  ;;  %1286 = vadd.xlane.f32.xlu1 %v1285_v41  ;;  %v1300_v21 = vsel %vm1119_vm4, %v12597_v26, 0.0 }
 0x3e5   :  { %1301 = vadd.xlane.f32.xlu0 %v1300_v21  ;;  %v1294_v34 = vsel %vm1119_vm4, %v12601_v52, 0.0  ;;  %v12609_v17 = vpop.eup %11312 }
 0x3e6   :  { %v1256_v18 = vmul.f32 1.442695, %v1212_v20  ;;  %v1179_v12 = vpop.xlane.xlu0 %1178  ;;  %v1306_v10 = vsel %vm1119_vm4, %v12609_v17, 0.0  ;;  %v12616_v1 = vpop.eup %11314 }
 0x3e7   :  { %v1176_v11 = vpop.xlane.xlu1 %1175  ;;  %v1211_v47 = vsub.f32 %v12501_v39, %v1179_v12  ;;  %v1303_v39 = vsel %vm1119_vm4, %v12616_v1, 0.0 }
 0x3e8   :  { %11318 = vpow2.f32 %v1256_v18  ;;  %v1210_v2 = vsub.f32 %v12498_v44, %v1176_v11  ;;  %1295 = vadd.xlane.f32.xlu1 %v1294_v34  ;;  %v12621_v3 = vpop.eup %11316 }
 0x3e9   :  { %11320 = vpow2.f32 %v1246_v27  ;;  %v1254_v36 = vmul.f32 1.442695, %v1211_v47  ;;  %v1315_v21 = vsel %vm1119_vm4, %v12621_v3, 0.0 }
 0x3ea   :  { %v1252_v48 = vmul.f32 1.442695, %v1210_v2  ;;  %v1191_v7 = vpop.xlane.xlu0 %1190 }
 0x3eb   :  { %v1215_v0 = vsub.f32 %v12508_v45, %v1191_v7 }
 0x3ec   :  { %11322 = vpow2.f32 %v1252_v48  ;;  %1307 = vadd.xlane.f32.xlu1 %v1306_v10  ;;  %v12656_v10 = vpop.permute.xlu1 %1649 }
 0x3ed   :  { %v1262_v49 = vmul.f32 1.442695, %v1215_v0  ;;  %11324 = vpow2.f32 %v1248_v13 }
 0x3ee   :  { %v1185_v44 = vpop.xlane.xlu0 %1184 }
 0x3ef   :  { %11326 = vpow2.f32 %v1262_v49  ;;  %v1213_v62 = vsub.f32 %v12513_v43, %v1185_v44 }
 0x3f0   :  { %1304 = vadd.xlane.f32.xlu1 %v1303_v39  ;;  %11328 = vpow2.f32 %v1254_v36  ;;  %v12660_v49 = vpop.permute.xlu1 %1589 }
 0x3f1   :  { %v1258_v41 = vmul.f32 1.442695, %v1213_v62 }
 0x3f2   :  { %v12623_v45 = vpop.eup %11318  ;;  %v12625_v20 = vpop.permute.xlu0 %1587 }
 0x3f3   :  { %10397 = vmatprep.subr.bf16.mxu1 %v12625_v20  ;;  %v1324_v43 = vsel %vm1119_vm4, %v12623_v45, 0.0  ;;  %v12632_v5 = vpop.eup %11320  ;;  %11330 = vpow2.f32 %v1258_v41 }
 0x3f4   :  { %1316 = vadd.xlane.f32.xlu1 %v1315_v21  ;;  %1325 = vadd.xlane.f32.xlu0 %v1324_v43  ;;  %v1309_v18 = vsel %vm1119_vm4, %v12632_v5, 0.0  ;;  %v12664_v36 = vpop.permute.xlu1 %1651 }
 0x3f6   :  { %v12634_v27 = vpop.eup %11322 }
 0x3f7   :  { %v1318_v12 = vsel %vm1119_vm4, %v12634_v27, 0.0  ;;  %v12640_v11 = vpop.eup %11324 }
 0x3f8   :  { %1310 = vadd.xlane.f32.xlu1 %v1309_v18  ;;  %1319 = vadd.xlane.f32.xlu0 %v1318_v12  ;;  %v1312_v13 = vsel %vm1119_vm4, %v12640_v11, 0.0  ;;  %v12670_v44 = vpop.permute.xlu1 %1711 }
 0x3f9   :  { %v12642_v34 = vpop.eup %11326 }
 0x3fa   :  { %v1333_v2 = vsel %vm1119_vm4, %v12642_v34, 0.0  ;;  %v12648_v47 = vpop.eup %11328 }
 0x3fb   :  { %v1321_v48 = vsel %vm1119_vm4, %v12648_v47, 0.0 }
 0x3fc   :  { %1313 = vadd.xlane.f32.xlu1 %v1312_v13  ;;  %1334 = vadd.xlane.f32.xlu0 %v1333_v2  ;;  %v12674_v62 = vpop.permute.xlu1 %1773 }
 0x3fd   :  { %v12652_v7 = vpop.eup %11330 }
 0x3fe   :  { %v1327_v0 = vsel %vm1119_vm4, %v12652_v7, 0.0 }
 0x400   :  { %1322 = vadd.xlane.f32.xlu1 %v1321_v48 }
 0x404   :  { %1328 = vadd.xlane.f32.xlu1 %v1327_v0 }
 0x415   :  { %1835 = vrot.lane.b32.xlu1 %v12312_v61, %s11863_s23 }
 0x419   :  { %1837 = vrot.lane.b32.xlu1 %v12310_v54, %s11863_s23 }
 0x41d   :  { %1901 = vrot.lane.b32.xlu1 %v12231_v16, %s11865_s24 }
 0x421   :  { %1903 = vrot.lane.b32.xlu1 %v12237_v19, %s11865_s24 }
 0x425   :  { %1969 = vrot.lane.b32.xlu1 %v12243_v30, %s11865_s24 }
 0x429   :  { %1897 = vrot.lane.b32.xlu1 %v12231_v16, %s11866_s25 }
 0x42c   :  { %v1188_v39 = vpop.xlane.xlu1 %1187 }
 0x42d   :  { %v1214_v41 = vsub.f32 %v12530_v23, %v1188_v39  ;;  %2037 = vrot.lane.b32.xlu1 %v12248_v32, %s11865_s24 }
 0x42f   :  { %v1260_v21 = vmul.f32 1.442695, %v1214_v41 }
 0x430   :  { %v12713_v2 = vpop.permute.xlu1 %1713 }
 0x431   :  { %11332 = vpow2.f32 %v1260_v21  ;;  %1965 = vrot.lane.b32.xlu1 %v12243_v30, %s11866_s25 }
 0x435   :  { %2039 = vrot.lane.b32.xlu1 %v12263_v50, %s11865_s24 }
 0x439   :  { %2033 = vrot.lane.b32.xlu1 %v12248_v32, %s11866_s25 }
 0x43b   :  { %v12687_v43 = vpop.eup %11332 }
 0x43c   :  { %v1330_v18 = vsel %vm1119_vm4, %v12687_v43, 0.0 }
 0x43d   :  { %1331 = vadd.xlane.f32.xlu0 %v1330_v18  ;;  %2107 = vrot.lane.b32.xlu1 %v12266_v55, %s11865_s24 }
 0x441   :  { %2101 = vrot.lane.b32.xlu1 %v12268_v60, %s11866_s25 }
 0x445   :  { %2241 = vrot.lane.b32.xlu1 %v12291_v22, %s11865_s24 }
 0x449   :  { %2169 = vrot.lane.b32.xlu1 %v12281_v51, %s11866_s25 }
 0x44d   :  { %2309 = vrot.lane.b32.xlu1 %v12294_v25, %s11865_s24 }
 0x451   :  { %2237 = vrot.lane.b32.xlu1 %v12291_v22, %s11866_s25 }
 0x453   :  { %1775 = vrot.lane.b32.xlu0 %v12307_v42, %s11863_s23 }
 0x454   :  { %v1269_v23 = vpop.xlane.xlu0 %1268 }
 0x455   :  { %2311 = vrot.lane.b32.xlu1 %v12307_v42, %s11865_s24 }
 0x457   :  { %1971 = vrot.lane.b32.xlu0 %v12254_v33, %s11865_s24 }
 0x459   :  { %2305 = vrot.lane.b32.xlu1 %v12294_v25, %s11866_s25  ;;  %v1281_v12 = vpop.xlane.xlu0 %1280 }
 0x45b   :  { %1899 = vrot.lane.b32.xlu0 %v12237_v19, %s11866_s25 }
 0x45d   :  { %2379 = vrot.lane.b32.xlu1 %v12310_v54, %s11865_s24  ;;  %v1275_v13 = vpop.xlane.xlu0 %1274 }
 0x45f   :  { %1967 = vrot.lane.b32.xlu0 %v12254_v33, %s11866_s25 }
 0x461   :  { %v1272_v48 = vpop.xlane.xlu1 %1271  ;;  %2375 = vrot.lane.b32.xlu1 %v12310_v54, %s11866_s25 }
 0x462   :  { %11334 = vrcp.f32 %v1272_v48  ;;  %v1284_v0 = vpop.xlane.xlu0 %1283 }
 0x463   :  { %2105 = vrot.lane.b32.xlu0 %v12268_v60, %s11865_s24  ;;  %11336 = vrcp.f32 %v1269_v23 }
 0x465   :  { %v1266_v39 = vpop.xlane.xlu1 %1265  ;;  %2769 = vrot.lane.b32.xlu1 %v12231_v16, %s11867_s27 }
 0x466   :  { %11338 = vrcp.f32 %v1266_v39 }
 0x467   :  { %11340 = vrcp.f32 %v1281_v12  ;;  %2035 = vrot.lane.b32.xlu0 %v12263_v50, %s11866_s25  ;;  %v1299_v21 = vpop.xlane.xlu0 %1298 }
 0x468   :  { %11342 = vrcp.f32 %v1275_v13 }
 0x469   :  { %v1278_v41 = vpop.xlane.xlu1 %1277  ;;  %2893 = vrot.lane.b32.xlu1 %v12248_v32, %s11867_s27 }
 0x46a   :  { %11344 = vrcp.f32 %v1278_v41 }
 0x46b   :  { %2173 = vrot.lane.b32.xlu0 %v12281_v51, %s11865_s24  ;;  %v1293_v48 = vpop.xlane.xlu0 %1292 }
 0x46c   :  { %v11335_v18 = vpop.eup %11334 }
 0x46d   :  { %v1290_v23 = vpop.xlane.xlu1 %1289  ;;  %2955 = vrot.lane.b32.xlu1 %v12268_v60, %s11867_s27  ;;  %v11337_v16 = vpop.eup %11336  ;;  %v1362_v13 = vmul.f32 %v11335_v18, %v12561_v8 }
 0x46e   :  { %11346 = vrcp.f32 %v1290_v23  ;;  %v1361_v9 = vmul.f32 %v11337_v16, %v12543_v63 }
 0x46f   :  { %2175 = vrot.lane.b32.xlu0 %v12278_v6, %s11865_s24  ;;  %11348 = vrcp.f32 %v1284_v0  ;;  %v1385_v58 = vpack.c.bf16 %v1362_v13, %v1362_v13 }
 0x470   :  { %v11339_v12 = vpop.eup %11338 }
 0x471   :  { %v11341_v32 = vpop.eup %11340  ;;  %v1287_v39 = vpop.xlane.xlu1 %1286  ;;  %v1360_v41 = vmul.f32 %v11339_v12, %v12568_v14 }
 0x472   :  { %v11343_v56 = vpop.eup %11342  ;;  %11350 = vrcp.f32 %v1287_v39  ;;  %v1365_v0 = vmul.f32 %v11341_v32, %v12550_v38 }
 0x473   :  { %11352 = vrcp.f32 %v1299_v21  ;;  %2103 = vrot.lane.b32.xlu0 %v12266_v55, %s11866_s25  ;;  %v1384_v60 = vpack.c.bf16 %v1361_v9, %v1360_v41  ;;  %v1363_v18 = vmul.f32 %v11343_v56, %v12555_v31  ;;  %v1302_v21 = vpop.xlane.xlu0 %1301 }
 0x474   :  { %v11345_v23 = vpop.eup %11344  ;;  %11354 = vrcp.f32 %v1293_v48  ;;  %v1387_v63 = vpack.c.bf16 %v1365_v0, %v1365_v0 }
 0x475   :  { %v1296_v8 = vpop.xlane.xlu1 %1295  ;;  %10377 = vmatprep.mubr.msk.bf16.mxu0 %vm1119_vm4, %v1384_v60  ;;  %v1364_v14 = vmul.f32 %v11345_v23, %v12574_v4 }
 0x476   :  { %11356 = vrcp.f32 %v1296_v8  ;;  %10378 = vmatmul.mubr.msk.bf16.vlgmr.msra.gmra.mrb[32].mxu0 %vm1119_vm4, %v1385_v58  ;;  %v1537_v58 = vsel %vm1411_vm2, %v12536_v46, 0 }
 0x477   :  { %10390 = vmatpush3.bf16.msra.mxu0 %v12390_v15  ;;  %2243 = vrot.lane.b32.xlu0 %v12296_v28, %s11865_s24  ;;  %v1386_v9 = vpack.c.bf16 %v1364_v14, %v1363_v18 }
 0x478   :  { %11055 = vmatprep.subr.msk.bf16.mxu0 %vm1411_vm2, %v12536_v46  ;;  %v11347_v38 = vpop.eup %11346 }
 0x479   :  { %v1308_v16 = vpop.xlane.xlu1 %1307  ;;  %10385 = vmatprep.mubr.msk.bf16.mxu1 %vm1119_vm4, %v1386_v9  ;;  %v11349_v56 = vpop.eup %11348  ;;  %v1368_v31 = vmul.f32 %v11347_v38, %v12583_v40 }
 0x47a   :  { %10386 = vmatmul.mubr.msk.bf16.vlgmr.msra.gmra.mrb[48].mxu1 %vm1119_vm4, %v1387_v63  ;;  %11358 = vrcp.f32 %v1308_v16  ;;  %v1366_v46 = vmul.f32 %v11349_v56, %v12564_v37 }
 0x47b   :  { %10392 = vmatpush3.bf16.msra.mxu0 %v1537_v58  ;;  %10398 = vmatpush3.bf16.msra.mxu1 %v12625_v20  ;;  %11360 = vrcp.f32 %v1302_v21  ;;  %v1599_v20 = vsel %vm1411_vm2, %v12660_v49, 0  ;;  %v1389_v40 = vpack.c.bf16 %v1368_v31, %v1368_v31 }
 0x47c   :  { %v11351_v15 = vpop.eup %11350  ;;  %2171 = vrot.lane.b32.xlu0 %v12278_v6, %s11866_s25  ;;  %11056 = vmatprep.subr.msk.bf16.mxu1 %vm1411_vm2, %v12660_v49 }
 0x47d   :  { %v11353_v4 = vpop.eup %11352  ;;  %10405 = vmatprep.subr.bf16.mxu0 %v12656_v10  ;;  %v1305_v12 = vpop.xlane.xlu1 %1304  ;;  %v1367_v13 = vmul.f32 %v11351_v15, %v12594_v29 }
 0x47e   :  { %v11355_v32 = vpop.eup %11354  ;;  %11362 = vrcp.f32 %v1305_v12  ;;  %v1371_v41 = vmul.f32 %v11353_v4, %v12578_v24 }
 0x47f   :  { %10400 = vmatpush3.bf16.msra.mxu1 %v1599_v20  ;;  %v1388_v48 = vpack.c.bf16 %v1367_v13, %v1366_v46  ;;  %v1369_v37 = vmul.f32 %v11355_v32, %v12587_v53 }
 0x480   :  { %v11357_v39 = vpop.eup %11356  ;;  %2239 = vrot.lane.b32.xlu0 %v12296_v28, %s11866_s25  ;;  %10413 = vmatprep.subr.bf16.mxu1 %v12670_v44  ;;  %v1391_v24 = vpack.c.bf16 %v1371_v41, %v1371_v41 }
 0x481   :  { %v1317_v60 = vpop.xlane.xlu1 %1316  ;;  %10393 = vmatprep.mubr.msk.bf16.mxu0 %vm1119_vm4, %v1388_v48  ;;  %v1370_v29 = vmul.f32 %v11357_v39, %v12601_v52  ;;  %v12773_v49 = vpop.xlane.xlu0 %1325  ;;  %v1661_v52 = vsel %vm1411_vm2, %v12664_v36, 0 }
 0x482   :  { %10394 = vmatmul.mubr.msk.bf16.vlgmr.msra.gmra.mrb[36].mxu0 %vm1119_vm4, %v1389_v40  ;;  %11364 = vrcp.f32 %v1317_v60 }
 0x483   :  { %10406 = vmatpush3.bf16.msra.mxu0 %v12656_v10  ;;  %v1390_v23 = vpack.c.bf16 %v1370_v29, %v1369_v37 }
 0x484   :  { %2377 = vrot.lane.b32.xlu0 %v12312_v61, %s11865_s24  ;;  %11057 = vmatprep.subr.msk.bf16.mxu0 %vm1411_vm2, %v12664_v36  ;;  %v11359_v0 = vpop.eup %11358 }
 0x485   :  { %v1311_v8 = vpop.xlane.xlu1 %1310  ;;  %10401 = vmatprep.mubr.msk.bf16.mxu1 %vm1119_vm4, %v1390_v23  ;;  %v11361_v53 = vpop.eup %11360  ;;  %v1374_v18 = vmul.f32 %v11359_v0, %v12609_v17 }
 0x486   :  { %10402 = vmatmul.mubr.msk.bf16.vlgmr.msra.gmra.mrb[52].mxu1 %vm1119_vm4, %v1391_v24  ;;  %11366 = vrcp.f32 %v1311_v8  ;;  %v1320_v14 = vpop.xlane.xlu0 %1319  ;;  %v1372_v36 = vmul.f32 %v11361_v53, %v12597_v26 }
 0x487   :  { %10408 = vmatpush3.bf16.msra.mxu0 %v1661_v52  ;;  %10414 = vmatpush3.bf16.msra.mxu1 %v12670_v44  ;;  %v1723_v44 = vsel %vm1411_vm2, %v12713_v2, 0  ;;  %v1393_v21 = vpack.c.bf16 %v1374_v18, %v1374_v18 }
 0x488   :  { %v11363_v10 = vpop.eup %11362  ;;  %2307 = vrot.lane.b32.xlu0 %v12307_v42, %s11866_s25  ;;  %11058 = vmatprep.subr.msk.bf16.mxu1 %vm1411_vm2, %v12713_v2 }
 0x489   :  { %10421 = vmatprep.subr.bf16.mxu0 %v12674_v62  ;;  %v1314_v9 = vpop.xlane.xlu1 %1313  ;;  %v1373_v63 = vmul.f32 %v11363_v10, %v12616_v1 }
 0x48a   :  { %11368 = vrcp.f32 %v1314_v9  ;;  %v1335_v48 = vpop.xlane.xlu0 %1334 }
 0x48b   :  { %10416 = vmatpush3.bf16.msra.mxu1 %v1723_v44  ;;  %v1392_v38 = vpack.c.bf16 %v1373_v63, %v1372_v36  ;;  %11370 = vrcp.f32 %v1320_v14 }
 0x48c   :  { %2373 = vrot.lane.b32.xlu0 %v12312_v61, %s11866_s25  ;;  %v11365_v26 = vpop.eup %11364 }
 0x48d   :  { %v1323_v17 = vpop.xlane.xlu1 %1322  ;;  %10409 = vmatprep.mubr.msk.bf16.mxu0 %vm1119_vm4, %v1392_v38  ;;  %v1377_v56 = vmul.f32 %v11365_v26, %v12621_v3 }
 0x48e   :  { %11372 = vrcp.f32 %v1323_v17  ;;  %10410 = vmatmul.mubr.msk.bf16.vlgmr.msra.gmra.mrb[40].mxu0 %vm1119_vm4, %v1393_v21 }
 0x48f   :  { %10422 = vmatpush3.bf16.msra.mxu0 %v12674_v62  ;;  %11374 = vrcp.f32 %v12773_v49 }
 0x490   :  { %2831 = vrot.lane.b32.xlu0 %v12243_v30, %s11867_s27  ;;  %v11367_v2 = vpop.eup %11366  ;;  %v1395_v30 = vpack.c.bf16 %v1377_v56, %v1377_v56  ;;  %11376 = vrcp.f32 %v1335_v48 }
 0x491   :  { %v1329_v1 = vpop.xlane.xlu1 %1328  ;;  %v1375_v15 = vmul.f32 %v11367_v2, %v12632_v5 }
 0x492   :  { %11378 = vrcp.f32 %v1329_v1 }
 0x494   :  { %v11369_v16 = vpop.eup %11368  ;;  %2771 = vrot.lane.b32.xlu0 %v12237_v19, %s11867_s27 }
 0x495   :  { %v1836_v58 = vpop.permute.xlu1 %1835  ;;  %v1376_v31 = vmul.f32 %v11369_v16, %v12640_v11  ;;  %v11371_v4 = vpop.eup %11370 }
 0x496   :  { %10429 = vmatprep.subr.bf16.mxu1 %v1836_v58  ;;  %v1378_v19 = vmul.f32 %v11371_v4, %v12634_v27 }
 0x497   :  { %v1394_v62 = vpack.c.bf16 %v1376_v31, %v1375_v15 }
 0x498   :  { %v11373_v12 = vpop.eup %11372  ;;  %2833 = vrot.lane.b32.xlu0 %v12254_v33, %s11867_s27 }
 0x499   :  { %v1838_v46 = vpop.permute.xlu1 %1837  ;;  %10417 = vmatprep.mubr.msk.bf16.mxu1 %vm1119_vm4, %v1394_v62  ;;  %v1379_v3 = vmul.f32 %v11373_v12, %v12648_v47  ;;  %v11375_v39 = vpop.eup %11374 }
 0x49a   :  { %10418 = vmatmul.mubr.msk.bf16.vlgmr.msra.gmra.mrb[56].mxu1 %vm1119_vm4, %v1395_v30  ;;  %v1847_v33 = vsel %vm1411_vm2, %v1838_v46, 0  ;;  %v1380_v41 = vmul.f32 %v11375_v39, %v12623_v45  ;;  %v11377_v23 = vpop.eup %11376 }
 0x49b   :  { %10430 = vmatpush3.bf16.msra.mxu1 %v1836_v58  ;;  %v1396_v5 = vpack.c.bf16 %v1379_v3, %v1378_v19  ;;  %v1383_v45 = vmul.f32 %v11377_v23, %v12642_v34 }
 0x49c   :  { %2895 = vrot.lane.b32.xlu0 %v12263_v50, %s11867_s27  ;;  %11060 = vmatprep.subr.msk.bf16.mxu1 %vm1411_vm2, %v1838_v46  ;;  %v1397_v49 = vpack.c.bf16 %v1380_v41, %v1380_v41  ;;  %v11379_v0 = vpop.eup %11378 }
 0x49d   :  { %v1902_v11 = vpop.permute.xlu1 %1901  ;;  %10425 = vmatprep.mubr.msk.bf16.mxu0 %vm1119_vm4, %v1396_v5  ;;  %v1381_v10 = vmul.f32 %v11379_v0, %v12652_v7  ;;  %v1399_v36 = vpack.c.bf16 %v1383_v45, %v1383_v45 }
 0x49e   :  { %v1912_v14 = vsel %vm548_vm1, %v1902_v11, 0 }
 0x49f   :  { %10432 = vmatpush3.bf16.msra.mxu1 %v1847_v33 }
 0x4a1   :  { %v1904_v13 = vpop.permute.xlu1 %1903 }
 0x4a5   :  { %v1970_v32 = vpop.permute.xlu1 %1969 }
 0x4a6   :  { %11063 = vmatprep.subr.msk.bf16.mxu1 %vm548_vm1, %v1970_v32  ;;  %v1980_v34 = vsel %vm548_vm1, %v1970_v32, 0 }
 0x4a9   :  { %v1898_v27 = vpop.permute.xlu1 %1897 }
 0x4ad   :  { %v2038_v47 = vpop.permute.xlu1 %2037 }
 0x4ae   :  { %v2048_v2 = vsel %vm548_vm1, %v2038_v47, 0 }
 0x4b1   :  { %v1966_v20 = vpop.permute.xlu1 %1965 }
 0x4b5   :  { %v2040_v50 = vpop.permute.xlu1 %2039 }
 0x4b6   :  { %v2051_v31 = vsel %vm548_vm1, %v2040_v50, 0 }
 0x4b9   :  { %v2034_v37 = vpop.permute.xlu1 %2033 }
 0x4bd   :  { %v2108_v53 = vpop.permute.xlu1 %2107 }
 0x4be   :  { %v2119_v12 = vsel %vm548_vm1, %v2108_v53, 0 }
 0x4c1   :  { %v2102_v44 = vpop.permute.xlu1 %2101 }
 0x4c5   :  { %v2242_v38 = vpop.permute.xlu1 %2241 }
 0x4c6   :  { %v2252_v5 = vsel %vm548_vm1, %v2242_v38, 0 }
 0x4c9   :  { %v2170_v1 = vpop.permute.xlu1 %2169 }
 0x4ca   :  { %v1332_v40 = vpop.xlane.xlu0 %1331 }
 0x4cb   :  { %11380 = vrcp.f32 %v1332_v40 }
 0x4cd   :  { %v2310_v58 = vpop.permute.xlu1 %2309 }
 0x4ce   :  { %v1776_v60 = vpop.permute.xlu0 %1775 }
 0x4cf   :  { %11059 = vmatprep.subr.msk.bf16.mxu0 %vm1411_vm2, %v1776_v60  ;;  %v1785_v29 = vsel %vm1411_vm2, %v1776_v60, 0 }
 0x4d0   :  { %10424 = vmatpush3.bf16.msra.mxu0 %v1785_v29 }
 0x4d1   :  { %11061 = vmatprep.subr.msk.bf16.mxu0 %vm548_vm1, %v1902_v11  ;;  %v2238_v62 = vpop.permute.xlu1 %2237 }
 0x4d2   :  { %v1972_v24 = vpop.permute.xlu0 %1971 }
 0x4d3   :  { %10426 = vmatmul.mubr.msk.bf16.vlgmr.msra.gmra.mrb[44].mxu0 %vm1119_vm4, %v1397_v49  ;;  %v1983_v17 = vsel %vm548_vm1, %v1972_v24, 0 }
 0x4d4   :  { %10441 = vmatprep.mubr.msk.bf16.mxu0 %vm548_vm1, %v1898_v27 }
 0x4d5   :  { %v11381_v8 = vpop.eup %11380  ;;  %v2312_v19 = vpop.permute.xlu1 %2311 }
 0x4d6   :  { %v1900_v52 = vpop.permute.xlu0 %1899  ;;  %v1382_v18 = vmul.f32 %v11381_v8, %v12687_v43  ;;  %v1915_v43 = vsel %vm548_vm1, %v1904_v13, 0  ;;  %v2323_v41 = vsel %vm548_vm1, %v2312_v19, 0 }
 0x4d8   :  { %v1398_v9 = vpack.c.bf16 %v1382_v18, %v1381_v10 }
 0x4d9   :  { %10438 = vmatpush3.bf16.xpose.msra.mxu0 %v1912_v14  ;;  %v2306_v33 = vpop.permute.xlu1 %2305 }
 0x4da   :  { %10433 = vmatprep.mubr.msk.bf16.mxu1 %vm1119_vm4, %v1398_v9  ;;  %11062 = vmatprep.subr.msk.bf16.mxu0 %vm548_vm1, %v1904_v13  ;;  %v1968_v63 = vpop.permute.xlu0 %1967 }
 0x4db   :  { %10434 = vmatmul.mubr.msk.bf16.vlgmr.msra.gmra.mrb[60].mxu1 %vm1119_vm4, %v1399_v36 }
 0x4dc   :  { %10446 = vmatpush3.bf16.xpose.msra.mxu1 %v1980_v34  ;;  %10449 = vmatprep.mubr.msk.bf16.mxu1 %vm548_vm1, %v1966_v20  ;;  %v2320_v20 = vsel %vm548_vm1, %v2310_v58, 0 }
 0x4dd   :  { %11064 = vmatprep.subr.msk.bf16.mxu1 %vm548_vm1, %v1972_v24 }
 0x4de   :  { %v2106_v7 = vpop.permute.xlu0 %2105 }
 0x4df   :  { %v2116_v56 = vsel %vm548_vm1, %v2106_v7, 0 }
 0x4e1   :  { %10440 = vmatpush3.bf16.xpose.msra.mxu0 %v1915_v43 }
 0x4e2   :  { %11065 = vmatprep.subr.msk.bf16.mxu0 %vm548_vm1, %v2038_v47  ;;  %v2036_v21 = vpop.permute.xlu0 %2035  ;;  %v2380_v47 = vpop.permute.xlu1 %2379 }
 0x4e4   :  { %10448 = vmatpush3.bf16.xpose.msra.mxu1 %v1983_v17 }
 0x4e5   :  { %11067 = vmatprep.subr.msk.bf16.mxu1 %vm548_vm1, %v2106_v7 }
 0x4e6   :  { %v2174_v26 = vpop.permute.xlu0 %2173 }
 0x4e7   :  { %v2184_v46 = vsel %vm548_vm1, %v2174_v26, 0 }
 0x4e8   :  { %10442 = vmatmul.mubr.msk.bf16.vlgmr.msra.gmra.mrb[48].mxu0 %vm548_vm1, %v1900_v52 }
 0x4e9   :  { %10454 = vmatpush3.bf16.xpose.msra.mxu0 %v2048_v2  ;;  %10457 = vmatprep.mubr.msk.bf16.mxu0 %vm548_vm1, %v2034_v37  ;;  %v2391_v37 = vsel %vm548_vm1, %v2380_v47, 0 }
 0x4ea   :  { %11066 = vmatprep.subr.msk.bf16.mxu0 %vm548_vm1, %v2040_v50  ;;  %v2176_v16 = vpop.permute.xlu0 %2175  ;;  %v2376_v50 = vpop.permute.xlu1 %2375 }
 0x4eb   :  { %10450 = vmatmul.mubr.msk.bf16.vlgmr.msra.gmra.mrb[64].mxu1 %vm548_vm1, %v1968_v63  ;;  %v2187_v13 = vsel %vm548_vm1, %v2176_v16, 0 }
 0x4ec   :  { %10462 = vmatpush3.bf16.xpose.msra.mxu1 %v2116_v56  ;;  %10465 = vmatprep.mubr.msk.bf16.mxu1 %vm548_vm1, %v2102_v44 }
 0x4ed   :  { %11068 = vmatprep.subr.msk.bf16.mxu1 %vm548_vm1, %v2108_v53 }
 0x4ee   :  { %v2104_v15 = vpop.permute.xlu0 %2103  ;;  %v2770_v60 = vpop.permute.xlu1 %2769 }
 0x4f1   :  { %10456 = vmatpush3.bf16.xpose.msra.mxu0 %v2051_v31 }
 0x4f2   :  { %11069 = vmatprep.subr.msk.bf16.mxu0 %vm548_vm1, %v2174_v26  ;;  %v2244_v4 = vpop.permute.xlu0 %2243  ;;  %v12875_v49 = vpop.permute.xlu1 %2893 }
 0x4f3   :  { %v2255_v32 = vsel %vm548_vm1, %v2244_v4, 0 }
 0x4f4   :  { %10464 = vmatpush3.bf16.xpose.msra.mxu1 %v2119_v12 }
 0x4f5   :  { %11071 = vmatprep.subr.msk.bf16.mxu1 %vm548_vm1, %v2242_v38 }
 0x4f6   :  { %v2172_v30 = vpop.permute.xlu0 %2171  ;;  %v12883_v8 = vpop.permute.xlu1 %2955 }
 0x4f8   :  { %10458 = vmatmul.mubr.msk.bf16.vlgmr.msra.gmra.mrb[52].mxu0 %vm548_vm1, %v2036_v21 }
 0x4f9   :  { %10470 = vmatpush3.bf16.xpose.msra.mxu0 %v2184_v46  ;;  %10473 = vmatprep.mubr.msk.bf16.mxu0 %vm548_vm1, %v2170_v1 }
 0x4fa   :  { %11070 = vmatprep.subr.msk.bf16.mxu0 %vm548_vm1, %v2176_v16  ;;  %v2240_v3 = vpop.permute.xlu0 %2239 }
 0x4fb   :  { %10466 = vmatmul.mubr.msk.bf16.vlgmr.msra.gmra.mrb[68].mxu1 %vm548_vm1, %v2104_v15 }
 0x4fc   :  { %10478 = vmatpush3.bf16.xpose.msra.mxu1 %v2252_v5  ;;  %10481 = vmatprep.mubr.msk.bf16.mxu1 %vm548_vm1, %v2238_v62 }
 0x4fd   :  { %11072 = vmatprep.subr.msk.bf16.mxu1 %vm548_vm1, %v2244_v4 }
 0x4fe   :  { %v2378_v11 = vpop.permute.xlu0 %2377 }
 0x4ff   :  { %v2388_v39 = vsel %vm548_vm1, %v2378_v11, 0 }
 0x501   :  { %10472 = vmatpush3.bf16.xpose.msra.mxu0 %v2187_v13 }
 0x502   :  { %11073 = vmatprep.subr.msk.bf16.mxu0 %vm548_vm1, %v2310_v58  ;;  %v2308_v27 = vpop.permute.xlu0 %2307 }
 0x504   :  { %10480 = vmatpush3.bf16.xpose.msra.mxu1 %v2255_v32 }
 0x505   :  { %11075 = vmatprep.subr.msk.bf16.mxu1 %vm548_vm1, %v2378_v11 }
 0x506   :  { %v2374_v48 = vpop.permute.xlu0 %2373 }
 0x508   :  { %10474 = vmatmul.mubr.msk.bf16.vlgmr.msra.gmra.mrb[56].mxu0 %vm548_vm1, %v2172_v30 }
 0x509   :  { %10486 = vmatpush3.bf16.xpose.msra.mxu0 %v2320_v20  ;;  %10489 = vmatprep.mubr.msk.bf16.mxu0 %vm548_vm1, %v2306_v33 }
 0x50a   :  { %11074 = vmatprep.subr.msk.bf16.mxu0 %vm548_vm1, %v2312_v19  ;;  %v2832_v40 = vpop.permute.xlu0 %2831 }
 0x50b   :  { %10482 = vmatmul.mubr.msk.bf16.vlgmr.msra.gmra.mrb[72].mxu1 %vm548_vm1, %v2240_v3 }
 0x50c   :  { %10494 = vmatpush3.bf16.xpose.msra.mxu1 %v2388_v39  ;;  %10497 = vmatprep.mubr.msk.bf16.mxu1 %vm548_vm1, %v2374_v48 }
 0x50d   :  { %11076 = vmatprep.subr.msk.bf16.mxu1 %vm548_vm1, %v2380_v47 }
 0x50e   :  { %v2772_v29 = vpop.permute.xlu0 %2771 }
 0x50f   :  { %v2781_v24 = vsel %vm1411_vm2, %v2772_v29, 0 }
 0x511   :  { %10488 = vmatpush3.bf16.xpose.msra.mxu0 %v2323_v41 }
 0x512   :  { %10501 = vmatprep.subr.bf16.mxu0 %v2770_v60  ;;  %v2834_v23 = vpop.permute.xlu0 %2833 }
 0x513   :  { %v2843_v0 = vsel %vm1411_vm2, %v2834_v23, 0 }
 0x514   :  { %10496 = vmatpush3.bf16.xpose.msra.mxu1 %v2391_v37 }
 0x515   :  { %10509 = vmatprep.subr.bf16.mxu1 %v2832_v40 }
 0x518   :  { %10490 = vmatmul.mubr.msk.bf16.vlgmr.msra.gmra.mrb[60].mxu0 %vm548_vm1, %v2308_v27 }
 0x519   :  { %10502 = vmatpush3.bf16.msra.mxu0 %v2770_v60 }
 0x51a   :  { %11077 = vmatprep.subr.msk.bf16.mxu0 %vm1411_vm2, %v2772_v29 }
 0x51b   :  { %10498 = vmatmul.mubr.msk.bf16.vlgmr.msra.gmra.mrb[76].mxu1 %vm548_vm1, %v2376_v50 }
 0x51c   :  { %10510 = vmatpush3.bf16.msra.mxu1 %v2832_v40 }
 0x51d   :  { %11078 = vmatprep.subr.msk.bf16.mxu1 %vm1411_vm2, %v2834_v23  ;;  %10504 = vmatpush3.bf16.msra.mxu0 %v2781_v24 }
 0x51e   :  { %10517 = vmatprep.subr.bf16.mxu0 %v12875_v49 }
 0x520   :  { %10512 = vmatpush3.bf16.msra.mxu1 %v2843_v0 }
 0x521   :  { %10525 = vmatprep.subr.bf16.mxu1 %v12883_v8 }
 0x549   :  { %v12886_v53 = vpop.f32.mrb[32].mxu0 }
 0x54a   :  { %v12888_v45 = vpop.f32.mrb[33].mxu0 }
 0x54b   :  { %v10380_v52 = vpop.f32.mrb[34].mxu0 }
 0x54c   :  { %v12890_v10 = vpop.f32.mrb[35].mxu0 }
 0x54d   :  { %v12892_v18 = vpop.f32.mrb[48].mxu1 }
 0x54e   :  { %v12894_v14 = vpop.f32.mrb[49].mxu1 }
 0x54f   :  { %v10388_v9 = vpop.f32.mrb[50].mxu1 }
 0x550   :  { %v12896_v36 = vpop.f32.mrb[51].mxu1 }
 0x555   :  { %v12898_v63 = vpop.f32.mrb[36].mxu0 }
 0x556   :  { %v12900_v44 = vpop.f32.mrb[37].mxu0 }
 0x557   :  { %v10396_v34 = vpop.f32.mrb[38].mxu0 }
 0x558   :  { %v12902_v7 = vpop.f32.mrb[39].mxu0 }
 0x559   :  { %v12904_v43 = vpop.f32.mrb[52].mxu1 }
 0x55a   :  { %v12906_v38 = vpop.f32.mrb[53].mxu1 }
 0x55b   :  { %v10404_v21 = vpop.f32.mrb[54].mxu1 }
 0x55c   :  { %v12908_v17 = vpop.f32.mrb[55].mxu1 }
 0x561   :  { %v12910_v26 = vpop.f32.mrb[40].mxu0 }
 0x562   :  { %v12912_v1 = vpop.f32.mrb[41].mxu0 }
 0x563   :  { %v10412_v2 = vpop.f32.mrb[42].mxu0 }
 0x564   :  { %v12914_v16 = vpop.f32.mrb[43].mxu0 }
 0x56d   :  { %v12916_v56 = vpop.f32.mrb[56].mxu1 }
 0x56e   :  { %v12918_v58 = vpop.f32.mrb[57].mxu1 }
 0x56f   :  { %v10420_v15 = vpop.f32.mrb[58].mxu1 }
 0x570   :  { %v12920_v31 = vpop.f32.mrb[59].mxu1 }
 0x571   :  { %16514 = vst [vmem:[#allocation27_spill] sm:$0xff] %v12920_v31 }
 0x5a6   :  { %v12922_v4 = vpop.f32.mrb[44].mxu0 }
 0x5a7   :  { %16515 = vst [vmem:[#allocation28_spill] sm:$0xff] %v12922_v4  ;;  %v12924_v62 = vpop.f32.mrb[45].mxu0 }
 0x5a8   :  { %16516 = vst [vmem:[#allocation29_spill] sm:$0xff] %v12924_v62  ;;  %v10428_v12 = vpop.f32.mrb[46].mxu0 }
 0x5a9   :  { %v12926_v30 = vpop.f32.mrb[47].mxu0 }
 0x5aa   :  { %16517 = vst [vmem:[#allocation30_spill] sm:$0xff] %v12926_v30 }
 0x5ae   :  { %v12928_v46 = vpop.f32.mrb[60].mxu1 }
 0x5af   :  { %16518 = vst [vmem:[#allocation31_spill] sm:$0xff] %v12928_v46  ;;  %v12930_v19 = vpop.f32.mrb[61].mxu1 }
 0x5b0   :  { %16519 = vst [vmem:[#allocation32_spill] sm:$0xff] %v12930_v19  ;;  %v10436_v3 = vpop.f32.mrb[62].mxu1 }
 0x5b1   :  { %v12932_v5 = vpop.f32.mrb[63].mxu1 }
 0x5b2   :  { %16520 = vst [vmem:[#allocation33_spill] sm:$0xff] %v12932_v5 }
 0x5bb   :  { %v10443_v11 = vpop.f32.mrb[48].mxu0 }
 0x5bc   :  { %v2443_v33 = vmul.f32 0.25, %v10443_v11  ;;  %v1951_v13 = vpop.f32.mrb[49].mxu0 }
 0x5bd   :  { %v2441_v32 = vmul.f32 0.25, %v1951_v13  ;;  %v10444_v27 = vpop.f32.mrb[50].mxu0 }
 0x5be   :  { %v12935_v47 = vadd.f32 %v2443_v33, %v12400_v35  ;;  %v10451_v20 = vpop.f32.mrb[64].mxu1  ;;  %v1954_v48 = vpop.f32.mrb[51].mxu0 }
 0x5bf   :  { %v2446_v50 = vmul.f32 0.25, %v10451_v20  ;;  %v2442_v39 = vmul.f32 0.25, %v1954_v48  ;;  %v2019_v40 = vpop.f32.mrb[65].mxu1  ;;  %v12938_v41 = vadd.f32 %v2441_v32, %v12400_v35 }
 0x5c0   :  { %v2444_v60 = vmul.f32 0.25, %v2019_v40  ;;  %v10452_v37 = vpop.f32.mrb[66].mxu1  ;;  %v2495_v29 = vsel %vm1119_vm4, %v12935_v47, -inf }
 0x5c1   :  { %v12943_v23 = vadd.f32 %v2442_v39, %v12400_v35  ;;  %v2022_v24 = vpop.f32.mrb[67].mxu1  ;;  %2496 = vmax.xlane.f32.xlu0 %v2495_v29  ;;  %v12946_v0 = vadd.f32 %v2446_v50, %v12400_v35  ;;  %v2489_v21 = vsel %vm1119_vm4, %v12938_v41, -inf }
 0x5c2   :  { %v12951_v9 = vadd.f32 %v2444_v60, %v12400_v35  ;;  %v2445_v34 = vmul.f32 0.25, %v2022_v24 }
 0x5c3   :  { %v2492_v52 = vsel %vm1119_vm4, %v12943_v23, -inf  ;;  %v2504_v2 = vsel %vm1119_vm4, %v12946_v0, -inf }
 0x5c4   :  { %2493 = vmax.xlane.f32.xlu1 %v2492_v52  ;;  %v12958_v15 = vadd.f32 %v2445_v34, %v12400_v35  ;;  %v2498_v12 = vsel %vm1119_vm4, %v12951_v9, -inf }
 0x5c5   :  { %2490 = vmax.xlane.f32.xlu0 %v2489_v21 }
 0x5c6   :  { %v2501_v13 = vsel %vm1119_vm4, %v12958_v15, -inf }
 0x5c8   :  { %2505 = vmax.xlane.f32.xlu1 %v2504_v2 }
 0x5c9   :  { %2499 = vmax.xlane.f32.xlu0 %v2498_v12 }
 0x5cb   :  { %v10459_v3 = vpop.f32.mrb[52].mxu0 }
 0x5cc   :  { %v2449_v11 = vmul.f32 0.25, %v10459_v3  ;;  %v2087_v33 = vpop.f32.mrb[53].mxu0 }
 0x5cd   :  { %v2447_v32 = vmul.f32 0.25, %v2087_v33  ;;  %2502 = vmax.xlane.f32.xlu0 %v2501_v13  ;;  %v10460_v27 = vpop.f32.mrb[54].mxu0 }
 0x5ce   :  { %v12965_v20 = vadd.f32 %v2449_v11, %v12400_v35  ;;  %v10467_v48 = vpop.f32.mrb[68].mxu1  ;;  %v2090_v50 = vpop.f32.mrb[55].mxu0 }
 0x5cf   :  { %v2452_v39 = vmul.f32 0.25, %v10467_v48  ;;  %v2448_v40 = vmul.f32 0.25, %v2090_v50  ;;  %v2155_v60 = vpop.f32.mrb[69].mxu1  ;;  %v12968_v37 = vadd.f32 %v2447_v32, %v12400_v35 }
 0x5d0   :  { %v10468_v29 = vpop.f32.mrb[70].mxu1  ;;  %v2513_v24 = vsel %vm1119_vm4, %v12965_v20, -inf  ;;  %v2450_v12 = vmul.f32 0.25, %v2155_v60 }
 0x5d1   :  { %v12973_v52 = vadd.f32 %v2448_v40, %v12400_v35  ;;  %v2158_v34 = vpop.f32.mrb[71].mxu1  ;;  %2514 = vmax.xlane.f32.xlu0 %v2513_v24  ;;  %v12976_v2 = vadd.f32 %v2452_v39, %v12400_v35  ;;  %v2507_v33 = vsel %vm1119_vm4, %v12968_v37, -inf }
 0x5d2   :  { %v2451_v21 = vmul.f32 0.25, %v2158_v34  ;;  %v12986_v13 = vadd.f32 %v2450_v12, %v12400_v35 }
 0x5d3   :  { %v2510_v3 = vsel %vm1119_vm4, %v12973_v52, -inf  ;;  %v2522_v32 = vsel %vm1119_vm4, %v12976_v2, -inf }
 0x5d4   :  { %v12981_v11 = vadd.f32 %v2451_v21, %v12400_v35  ;;  %2511 = vmax.xlane.f32.xlu1 %v2510_v3  ;;  %v2516_v50 = vsel %vm1119_vm4, %v12986_v13, -inf }
 0x5d5   :  { %2508 = vmax.xlane.f32.xlu0 %v2507_v33 }
 0x5d6   :  { %v2519_v27 = vsel %vm1119_vm4, %v12981_v11, -inf }
 0x5d8   :  { %2523 = vmax.xlane.f32.xlu1 %v2522_v32 }
 0x5d9   :  { %2520 = vmax.xlane.f32.xlu0 %v2519_v27 }
 0x5db   :  { %v10475_v48 = vpop.f32.mrb[56].mxu0 }
 0x5dc   :  { %v2455_v39 = vmul.f32 0.25, %v10475_v48  ;;  %2517 = vmax.xlane.f32.xlu1 %v2516_v50  ;;  %v2223_v40 = vpop.f32.mrb[57].mxu0 }
 0x5dd   :  { %v2453_v60 = vmul.f32 0.25, %v2223_v40  ;;  %v10476_v29 = vpop.f32.mrb[58].mxu0 }
 0x5de   :  { %v12995_v24 = vadd.f32 %v2455_v39, %v12400_v35  ;;  %v10483_v34 = vpop.f32.mrb[72].mxu1  ;;  %v2226_v21 = vpop.f32.mrb[59].mxu0 }
 0x5df   :  { %v2458_v12 = vmul.f32 0.25, %v10483_v34  ;;  %v2454_v3 = vmul.f32 0.25, %v2226_v21  ;;  %v2291_v33 = vpop.f32.mrb[73].mxu1  ;;  %v12998_v32 = vadd.f32 %v2453_v60, %v12400_v35 }
 0x5e0   :  { %v10484_v27 = vpop.f32.mrb[74].mxu1  ;;  %v2531_v59 = vsel %vm1119_vm4, %v12995_v24, -inf  ;;  %v2456_v29 = vmul.f32 0.25, %v2291_v33 }
 0x5e1   :  { %v13003_v48 = vadd.f32 %v2454_v3, %v12400_v35  ;;  %v2294_v50 = vpop.f32.mrb[75].mxu1  ;;  %2532 = vmax.xlane.f32.xlu0 %v2531_v59  ;;  %v13006_v39 = vadd.f32 %v2458_v12, %v12400_v35  ;;  %v2525_v21 = vsel %vm1119_vm4, %v12998_v32, -inf }
 0x5e2   :  { %v2457_v40 = vmul.f32 0.25, %v2294_v50  ;;  %v13016_v3 = vadd.f32 %v2456_v29, %v12400_v35 }
 0x5e3   :  { %v2528_v34 = vsel %vm1119_vm4, %v13003_v48, -inf  ;;  %v2540_v59 = vsel %vm1119_vm4, %v13006_v39, -inf }
 0x5e4   :  { %v13011_v60 = vadd.f32 %v2457_v40, %v12400_v35  ;;  %2529 = vmax.xlane.f32.xlu1 %v2528_v34  ;;  %v2534_v27 = vsel %vm1119_vm4, %v13016_v3, -inf }
 0x5e5   :  { %2526 = vmax.xlane.f32.xlu0 %v2525_v21 }
 0x5e6   :  { %v2537_v12 = vsel %vm1119_vm4, %v13011_v60, -inf }
 0x5e8   :  { %2541 = vmax.xlane.f32.xlu1 %v2540_v59 }
 0x5e9   :  { %2538 = vmax.xlane.f32.xlu0 %v2537_v12 }
 0x5eb   :  { %v10491_v33 = vpop.f32.mrb[60].mxu0 }
 0x5ec   :  { %v2461_v50 = vmul.f32 0.25, %v10491_v33  ;;  %2535 = vmax.xlane.f32.xlu1 %v2534_v27  ;;  %v2359_v40 = vpop.f32.mrb[61].mxu0 }
 0x5ed   :  { %v2459_v34 = vmul.f32 0.25, %v2359_v40  ;;  %v10492_v21 = vpop.f32.mrb[62].mxu0 }
 0x5ee   :  { %v13025_v29 = vadd.f32 %v2461_v50, %v12400_v35  ;;  %v10499_v57 = vpop.f32.mrb[76].mxu1  ;;  %v2362_v5 = vpop.f32.mrb[63].mxu0 }
 0x5ef   :  { %v2464_v46 = vmul.f32 0.25, %v10499_v57  ;;  %v2460_v59 = vmul.f32 0.25, %v2362_v5  ;;  %v2427_v4 = vpop.f32.mrb[77].mxu1  ;;  %v13028_v19 = vadd.f32 %v2459_v34, %v12400_v35 }
 0x5f0   :  { %v10500_v12 = vpop.f32.mrb[78].mxu1  ;;  %v2549_v62 = vsel %vm1119_vm4, %v13025_v29, -inf  ;;  %v2462_v21 = vmul.f32 0.25, %v2427_v4 }
 0x5f1   :  { %v13033_v33 = vadd.f32 %v2460_v59, %v12400_v35  ;;  %v2430_v27 = vpop.f32.mrb[79].mxu1  ;;  %2550 = vmax.xlane.f32.xlu0 %v2549_v62  ;;  %v13036_v50 = vadd.f32 %v2464_v46, %v12400_v35  ;;  %v2543_v34 = vsel %vm1119_vm4, %v13028_v19, -inf  ;;  %v13060_v12 = vpop.permute.xlu0 %2895 }
 0x5f2   :  { %v2463_v40 = vmul.f32 0.25, %v2430_v27  ;;  %v13046_v59 = vadd.f32 %v2462_v21, %v12400_v35 }
 0x5f3   :  { %v2546_v57 = vsel %vm1119_vm4, %v13033_v33, -inf  ;;  %v2558_v62 = vsel %vm1119_vm4, %v13036_v50, -inf }
 0x5f4   :  { %v13041_v5 = vadd.f32 %v2463_v40, %v12400_v35  ;;  %2547 = vmax.xlane.f32.xlu1 %v2546_v57  ;;  %v2552_v46 = vsel %vm1119_vm4, %v13046_v59, -inf }
 0x5f5   :  { %2544 = vmax.xlane.f32.xlu0 %v2543_v34 }
 0x5f6   :  { %v2555_v4 = vsel %vm1119_vm4, %v13041_v5, -inf }
 0x5f8   :  { %2559 = vmax.xlane.f32.xlu1 %v2558_v62 }
 0x5f9   :  { %2556 = vmax.xlane.f32.xlu0 %v2555_v4 }
 0x5fc   :  { %2553 = vmax.xlane.f32.xlu1 %v2552_v46 }
 0x60d   :  { %3017 = vrot.lane.b32.xlu1 %v12281_v51, %s11867_s27 }
 0x60f   :  { %2957 = vrot.lane.b32.xlu0 %v12266_v55, %s11867_s27 }
 0x611   :  { %3079 = vrot.lane.b32.xlu1 %v12291_v22, %s11867_s27 }
 0x64e   :  { %v2497_v27 = vpop.xlane.xlu0 %2496 }
 0x64f   :  { %v2563_v40 = vsub.f32 %v12935_v47, %v2497_v27 }
 0x651   :  { %v2589_v21 = vmul.f32 1.442695, %v2563_v40  ;;  %v2494_v57 = vpop.xlane.xlu1 %2493 }
 0x652   :  { %v2562_v34 = vsub.f32 %v12943_v23, %v2494_v57  ;;  %v2491_v62 = vpop.xlane.xlu0 %2490 }
 0x653   :  { %11382 = vpow2.f32 %v2589_v21  ;;  %v2561_v4 = vsub.f32 %v12938_v41, %v2491_v62 }
 0x654   :  { %v2587_v51 = vmul.f32 1.442695, %v2562_v34 }
 0x655   :  { %v2585_v46 = vmul.f32 1.442695, %v2561_v4  ;;  %v2506_v35 = vpop.xlane.xlu1 %2505 }
 0x656   :  { %11384 = vpow2.f32 %v2587_v51  ;;  %v2566_v55 = vsub.f32 %v12946_v0, %v2506_v35  ;;  %v2500_v22 = vpop.xlane.xlu0 %2499 }
 0x657   :  { %11386 = vpow2.f32 %v2585_v46  ;;  %v2564_v30 = vsub.f32 %v12951_v9, %v2500_v22 }
 0x658   :  { %v2595_v31 = vmul.f32 1.442695, %v2566_v55 }
 0x659   :  { %v2591_v47 = vmul.f32 1.442695, %v2564_v30 }
 0x65a   :  { %11388 = vpow2.f32 %v2595_v31  ;;  %v2503_v27 = vpop.xlane.xlu0 %2502 }
 0x65b   :  { %v2565_v23 = vsub.f32 %v12958_v15, %v2503_v27  ;;  %11390 = vpow2.f32 %v2591_v47 }
 0x65d   :  { %v13068_v40 = vpop.eup %11382  ;;  %v2593_v41 = vmul.f32 1.442695, %v2565_v23 }
 0x65e   :  { %v2515_v21 = vpop.xlane.xlu0 %2514  ;;  %v2639_v57 = vsel %vm1119_vm4, %v13068_v40, 0.0 }
 0x65f   :  { %11392 = vpow2.f32 %v2593_v41  ;;  %v2569_v35 = vsub.f32 %v12965_v20, %v2515_v21  ;;  %2640 = vadd.xlane.f32.xlu0 %v2639_v57 }
 0x660   :  { %v13073_v0 = vpop.eup %11384 }
 0x661   :  { %v13075_v9 = vpop.eup %11386  ;;  %v2601_v31 = vmul.f32 1.442695, %v2569_v35  ;;  %v2512_v30 = vpop.xlane.xlu1 %2511  ;;  %v2636_v15 = vsel %vm1119_vm4, %v13073_v0, 0.0 }
 0x662   :  { %v2568_v34 = vsub.f32 %v12973_v52, %v2512_v30  ;;  %2637 = vadd.xlane.f32.xlu1 %v2636_v15  ;;  %v2509_v62 = vpop.xlane.xlu0 %2508  ;;  %v2633_v4 = vsel %vm1119_vm4, %v13075_v9, 0.0 }
 0x663   :  { %11394 = vpow2.f32 %v2601_v31  ;;  %v2567_v20 = vsub.f32 %v12968_v37, %v2509_v62  ;;  %2634 = vadd.xlane.f32.xlu0 %v2633_v4 }
 0x664   :  { %v13083_v51 = vpop.eup %11388  ;;  %v2599_v46 = vmul.f32 1.442695, %v2568_v34 }
 0x665   :  { %v2597_v55 = vmul.f32 1.442695, %v2567_v20  ;;  %v2524_v22 = vpop.xlane.xlu1 %2523  ;;  %v2648_v47 = vsel %vm1119_vm4, %v13083_v51, 0.0  ;;  %v13087_v27 = vpop.eup %11390 }
 0x666   :  { %11396 = vpow2.f32 %v2599_v46  ;;  %v2572_v52 = vsub.f32 %v12976_v2, %v2524_v22  ;;  %2649 = vadd.xlane.f32.xlu1 %v2648_v47  ;;  %v2521_v23 = vpop.xlane.xlu0 %2520  ;;  %v2642_v35 = vsel %vm1119_vm4, %v13087_v27, 0.0 }
 0x667   :  { %11398 = vpow2.f32 %v2597_v55  ;;  %v2571_v37 = vsub.f32 %v12981_v11, %v2521_v23 }
 0x668   :  { %v2607_v41 = vmul.f32 1.442695, %v2572_v52 }
 0x669   :  { %v13091_v21 = vpop.eup %11392  ;;  %v2518_v57 = vpop.xlane.xlu1 %2517  ;;  %v2605_v2 = vmul.f32 1.442695, %v2571_v37 }
 0x66a   :  { %11400 = vpow2.f32 %v2607_v41  ;;  %v2570_v31 = vsub.f32 %v12986_v13, %v2518_v57  ;;  %2643 = vadd.xlane.f32.xlu1 %v2642_v35  ;;  %v2645_v30 = vsel %vm1119_vm4, %v13091_v21, 0.0 }
 0x66b   :  { %2646 = vadd.xlane.f32.xlu0 %v2645_v30 }
 0x66c   :  { %v2603_v15 = vmul.f32 1.442695, %v2570_v31 }
 0x66d   :  { %v13098_v34 = vpop.eup %11394 }
 0x66e   :  { %11402 = vpow2.f32 %v2603_v15  ;;  %v2533_v11 = vpop.xlane.xlu0 %2532  ;;  %v2657_v62 = vsel %vm1119_vm4, %v13098_v34, 0.0 }
 0x66f   :  { %v2575_v4 = vsub.f32 %v12995_v24, %v2533_v11  ;;  %2658 = vadd.xlane.f32.xlu0 %v2657_v62  ;;  %11404 = vpow2.f32 %v2605_v2 }
 0x670   :  { %v13103_v20 = vpop.eup %11396 }
 0x671   :  { %v13105_v13 = vpop.eup %11398  ;;  %v2613_v46 = vmul.f32 1.442695, %v2575_v4  ;;  %v2530_v55 = vpop.xlane.xlu1 %2529  ;;  %v2654_v22 = vsel %vm1119_vm4, %v13103_v20, 0.0 }
 0x672   :  { %v2574_v47 = vsub.f32 %v13003_v48, %v2530_v55  ;;  %2655 = vadd.xlane.f32.xlu1 %v2654_v22  ;;  %v2527_v52 = vpop.xlane.xlu0 %2526  ;;  %v2651_v23 = vsel %vm1119_vm4, %v13105_v13, 0.0 }
 0x673   :  { %11406 = vpow2.f32 %v2613_v46  ;;  %v2573_v24 = vsub.f32 %v12998_v32, %v2527_v52  ;;  %2652 = vadd.xlane.f32.xlu0 %v2651_v23 }
 0x674   :  { %v13113_v41 = vpop.eup %11400  ;;  %v2611_v37 = vmul.f32 1.442695, %v2574_v47 }
 0x675   :  { %v2609_v57 = vmul.f32 1.442695, %v2573_v24  ;;  %v2542_v35 = vpop.xlane.xlu1 %2541  ;;  %v2666_v31 = vsel %vm1119_vm4, %v13113_v41, 0.0 }
 0x676   :  { %11408 = vpow2.f32 %v2611_v37  ;;  %v2578_v48 = vsub.f32 %v13006_v39, %v2542_v35  ;;  %2667 = vadd.xlane.f32.xlu1 %v2666_v31  ;;  %v2539_v30 = vpop.xlane.xlu0 %2538 }
 0x677   :  { %11410 = vpow2.f32 %v2609_v57  ;;  %v2577_v32 = vsub.f32 %v13011_v60, %v2539_v30 }
 0x678   :  { %v13118_v2 = vpop.eup %11402  ;;  %v2619_v15 = vmul.f32 1.442695, %v2578_v48 }
 0x679   :  { %v2536_v11 = vpop.xlane.xlu1 %2535  ;;  %v2660_v62 = vsel %vm1119_vm4, %v13118_v2, 0.0  ;;  %v13123_v4 = vpop.eup %11404  ;;  %v2617_v55 = vmul.f32 1.442695, %v2577_v32 }
 0x67a   :  { %11412 = vpow2.f32 %v2619_v15  ;;  %v2576_v46 = vsub.f32 %v13016_v3, %v2536_v11  ;;  %2661 = vadd.xlane.f32.xlu0 %v2660_v62  ;;  %v2663_v47 = vsel %vm1119_vm4, %v13123_v4, 0.0 }
 0x67c   :  { %v2615_v39 = vmul.f32 1.442695, %v2576_v46 }
 0x67d   :  { %v13126_v22 = vpop.eup %11406 }
 0x67e   :  { %11414 = vpow2.f32 %v2615_v39  ;;  %2664 = vadd.xlane.f32.xlu0 %v2663_v47  ;;  %v2551_v60 = vpop.xlane.xlu0 %2550  ;;  %v2675_v52 = vsel %vm1119_vm4, %v13126_v22, 0.0 }
 0x67f   :  { %v2581_v23 = vsub.f32 %v13025_v29, %v2551_v60  ;;  %2676 = vadd.xlane.f32.xlu1 %v2675_v52  ;;  %11416 = vpow2.f32 %v2617_v55 }
 0x680   :  { %v13133_v24 = vpop.eup %11408 }
 0x681   :  { %v13135_v3 = vpop.eup %11410  ;;  %v2625_v37 = vmul.f32 1.442695, %v2581_v23  ;;  %v2548_v57 = vpop.xlane.xlu1 %2547  ;;  %v2672_v35 = vsel %vm1119_vm4, %v13133_v24, 0.0 }
 0x682   :  { %v2580_v31 = vsub.f32 %v13033_v33, %v2548_v57  ;;  %v2545_v48 = vpop.xlane.xlu0 %2544  ;;  %v2669_v30 = vsel %vm1119_vm4, %v13135_v3, 0.0 }
 0x683   :  { %11418 = vpow2.f32 %v2625_v37  ;;  %v2579_v29 = vsub.f32 %v13028_v19, %v2545_v48  ;;  %2673 = vadd.xlane.f32.xlu1 %v2672_v35  ;;  %2670 = vadd.xlane.f32.xlu0 %v2669_v30 }
 0x684   :  { %v13143_v15 = vpop.eup %11412  ;;  %v2623_v32 = vmul.f32 1.442695, %v2580_v31 }
 0x685   :  { %v2621_v11 = vmul.f32 1.442695, %v2579_v29  ;;  %v2560_v62 = vpop.xlane.xlu1 %2559  ;;  %v2684_v46 = vsel %vm1119_vm4, %v13143_v15, 0.0 }
 0x686   :  { %11420 = vpow2.f32 %v2623_v32  ;;  %v2584_v33 = vsub.f32 %v13036_v50, %v2560_v62  ;;  %v2557_v55 = vpop.xlane.xlu0 %2556 }
 0x687   :  { %11422 = vpow2.f32 %v2621_v11  ;;  %v2583_v39 = vsub.f32 %v13041_v5, %v2557_v55  ;;  %2685 = vadd.xlane.f32.xlu1 %v2684_v46 }
 0x688   :  { %v13149_v47 = vpop.eup %11414  ;;  %v2631_v19 = vmul.f32 1.442695, %v2584_v33 }
 0x689   :  { %v2629_v60 = vmul.f32 1.442695, %v2583_v39  ;;  %v2554_v52 = vpop.xlane.xlu1 %2553  ;;  %v2678_v23 = vsel %vm1119_vm4, %v13149_v47, 0.0  ;;  %v13153_v37 = vpop.eup %11416 }
 0x68a   :  { %11424 = vpow2.f32 %v2631_v19  ;;  %v2582_v57 = vsub.f32 %v13046_v59, %v2554_v52  ;;  %2679 = vadd.xlane.f32.xlu0 %v2678_v23  ;;  %v2681_v5 = vsel %vm1119_vm4, %v13153_v37, 0.0  ;;  %v2958_v19 = vpop.permute.xlu0 %2957 }
 0x68b   :  { %11426 = vpow2.f32 %v2629_v60 }
 0x68c   :  { %v2627_v50 = vmul.f32 1.442695, %v2582_v57 }
 0x68d   :  { %v13156_v35 = vpop.eup %11418  ;;  %v13194_v39 = vpop.permute.xlu1 %3017 }
 0x68e   :  { %11428 = vpow2.f32 %v2627_v50  ;;  %2682 = vadd.xlane.f32.xlu0 %v2681_v5  ;;  %v2693_v31 = vsel %vm1119_vm4, %v13156_v35, 0.0 }
 0x68f   :  { %2694 = vadd.xlane.f32.xlu1 %v2693_v31 }
 0x690   :  { %v13162_v48 = vpop.eup %11420 }
 0x691   :  { %v13164_v30 = vpop.eup %11422  ;;  %v2690_v59 = vsel %vm1119_vm4, %v13162_v48, 0.0  ;;  %v13196_v60 = vpop.permute.xlu1 %3079 }
 0x692   :  { %v2687_v29 = vsel %vm1119_vm4, %v13164_v30, 0.0 }
 0x693   :  { %2691 = vadd.xlane.f32.xlu1 %v2690_v59  ;;  %2688 = vadd.xlane.f32.xlu0 %v2687_v29 }
 0x694   :  { %v13170_v32 = vpop.eup %11424 }
 0x695   :  { %v2702_v11 = vsel %vm1119_vm4, %v13170_v32, 0.0  ;;  %v13174_v62 = vpop.eup %11426 }
 0x696   :  { %v2699_v55 = vsel %vm1119_vm4, %v13174_v62, 0.0 }
 0x697   :  { %2703 = vadd.xlane.f32.xlu0 %v2702_v11 }
 0x698   :  { %v13176_v46 = vpop.eup %11428 }
 0x699   :  { %v2696_v33 = vsel %vm1119_vm4, %v13176_v46, 0.0 }
 0x69a   :  { %2697 = vadd.xlane.f32.xlu1 %v2696_v33 }
 0x69b   :  { %2700 = vadd.xlane.f32.xlu0 %v2699_v55 }
 0x6ab   :  { %3081 = vrot.lane.b32.xlu1 %v12296_v28, %s11867_s27 }
 0x6af   :  { %3141 = vrot.lane.b32.xlu1 %v12294_v25, %s11867_s27 }
 0x6b1   :  { %3019 = vrot.lane.b32.xlu0 %v12278_v6, %s11867_s27 }
 0x6b3   :  { %3143 = vrot.lane.b32.xlu1 %v12307_v42, %s11867_s27 }
 0x6b7   :  { %3203 = vrot.lane.b32.xlu1 %v12312_v61, %s11867_s27 }
 0x6bb   :  { %3205 = vrot.lane.b32.xlu1 %v12310_v54, %s11867_s27 }
 0x6ec   :  { %v2641_v28 = vpop.xlane.xlu0 %2640 }
 0x6ed   :  { %11430 = vrcp.f32 %v2641_v28 }
 0x6ef   :  { %v2638_v25 = vpop.xlane.xlu1 %2637 }
 0x6f0   :  { %11432 = vrcp.f32 %v2638_v25  ;;  %v2635_v52 = vpop.xlane.xlu0 %2634 }
 0x6f1   :  { %11434 = vrcp.f32 %v2635_v52 }
 0x6f3   :  { %v2650_v6 = vpop.xlane.xlu1 %2649 }
 0x6f4   :  { %11436 = vrcp.f32 %v2650_v6  ;;  %v2905_v6 = vsel %vm1411_vm2, %v13060_v12, 0 }
 0x6f7   :  { %v2644_v42 = vpop.xlane.xlu1 %2643  ;;  %v11431_v23 = vpop.eup %11430 }
 0x6f8   :  { %11438 = vrcp.f32 %v2644_v42  ;;  %v2647_v61 = vpop.xlane.xlu0 %2646  ;;  %v2731_v5 = vmul.f32 %v11431_v23, %v13068_v40 }
 0x6f9   :  { %11440 = vrcp.f32 %v2647_v61 }
 0x6fa   :  { %v11433_v57 = vpop.eup %11432  ;;  %v2754_v33 = vpack.c.bf16 %v2731_v5, %v2731_v5 }
 0x6fb   :  { %v11435_v54 = vpop.eup %11434  ;;  %v2730_v50 = vmul.f32 %v11433_v57, %v13073_v0 }
 0x6fc   :  { %v2659_v31 = vpop.xlane.xlu0 %2658  ;;  %v2729_v59 = vmul.f32 %v11435_v54, %v13075_v9 }
 0x6fd   :  { %11442 = vrcp.f32 %v2659_v31  ;;  %v2967_v31 = vsel %vm1411_vm2, %v2958_v19, 0 }
 0x6fe   :  { %v2753_v29 = vpack.c.bf16 %v2730_v50, %v2729_v59  ;;  %v11437_v55 = vpop.eup %11436 }
 0x6ff   :  { %v2656_v11 = vpop.xlane.xlu1 %2655  ;;  %v2734_v9 = vmul.f32 %v11437_v55, %v13083_v51 }
 0x700   :  { %11444 = vrcp.f32 %v2656_v11  ;;  %10505 = vmatprep.mubr.msk.bf16.mxu0 %vm1119_vm4, %v2753_v29  ;;  %v2653_v28 = vpop.xlane.xlu0 %2652 }
 0x701   :  { %11446 = vrcp.f32 %v2653_v28  ;;  %10506 = vmatmul.mubr.msk.bf16.vlgmr.msra.gmra.mrb[64].mxu0 %vm1119_vm4, %v2754_v33 }
 0x702   :  { %v11439_v25 = vpop.eup %11438  ;;  %10518 = vmatpush3.bf16.msra.mxu0 %v12875_v49  ;;  %v2756_v49 = vpack.c.bf16 %v2734_v9, %v2734_v9 }
 0x703   :  { %v11441_v0 = vpop.eup %11440  ;;  %11079 = vmatprep.subr.msk.bf16.mxu0 %vm1411_vm2, %v13060_v12  ;;  %v2732_v40 = vmul.f32 %v11439_v25, %v13087_v27  ;;  %v2668_v42 = vpop.xlane.xlu1 %2667 }
 0x704   :  { %v2733_v52 = vmul.f32 %v11441_v0, %v13091_v21  ;;  %11448 = vrcp.f32 %v2668_v42 }
 0x706   :  { %10520 = vmatpush3.bf16.msra.mxu0 %v2905_v6  ;;  %v2755_v23 = vpack.c.bf16 %v2733_v52, %v2732_v40 }
 0x707   :  { %10533 = vmatprep.subr.bf16.mxu0 %v13194_v39  ;;  %v2662_v61 = vpop.xlane.xlu0 %2661  ;;  %v11443_v57 = vpop.eup %11442 }
 0x708   :  { %10513 = vmatprep.mubr.msk.bf16.mxu1 %vm1119_vm4, %v2755_v23  ;;  %11450 = vrcp.f32 %v2662_v61  ;;  %v2737_v54 = vmul.f32 %v11443_v57, %v13098_v34 }
 0x709   :  { %10514 = vmatmul.mubr.msk.bf16.vlgmr.msra.gmra.mrb[80].mxu1 %vm1119_vm4, %v2756_v49 }
 0x70a   :  { %v11445_v27 = vpop.eup %11444  ;;  %10526 = vmatpush3.bf16.msra.mxu1 %v12883_v8  ;;  %v2758_v29 = vpack.c.bf16 %v2737_v54, %v2737_v54 }
 0x70b   :  { %v11447_v51 = vpop.eup %11446  ;;  %11080 = vmatprep.subr.msk.bf16.mxu1 %vm1411_vm2, %v2958_v19  ;;  %v2665_v12 = vpop.xlane.xlu0 %2664  ;;  %v2736_v21 = vmul.f32 %v11445_v27, %v13103_v20 }
 0x70c   :  { %11452 = vrcp.f32 %v2665_v12  ;;  %v2677_v50 = vpop.xlane.xlu1 %2676  ;;  %v2735_v5 = vmul.f32 %v11447_v51, %v13105_v13 }
 0x70e   :  { %10528 = vmatpush3.bf16.msra.mxu1 %v2967_v31  ;;  %v2757_v59 = vpack.c.bf16 %v2736_v21, %v2735_v5  ;;  %v11449_v34 = vpop.eup %11448 }
 0x70f   :  { %10541 = vmatprep.subr.bf16.mxu1 %v13196_v60  ;;  %v2740_v19 = vmul.f32 %v11449_v34, %v13113_v41 }
 0x710   :  { %v2674_v8 = vpop.xlane.xlu1 %2673  ;;  %10521 = vmatprep.mubr.msk.bf16.mxu0 %vm1119_vm4, %v2757_v59  ;;  %v2671_v11 = vpop.xlane.xlu0 %2670 }
 0x711   :  { %11454 = vrcp.f32 %v2674_v8  ;;  %10522 = vmatmul.mubr.msk.bf16.vlgmr.msra.gmra.mrb[68].mxu0 %vm1119_vm4, %v2758_v29  ;;  %v2760_v40 = vpack.c.bf16 %v2740_v19, %v2740_v19 }
 0x712   :  { %11456 = vrcp.f32 %v2671_v11  ;;  %10534 = vmatpush3.bf16.msra.mxu0 %v13194_v39  ;;  %v11451_v20 = vpop.eup %11450 }
 0x713   :  { %v2738_v55 = vmul.f32 %v11451_v20, %v13118_v2 }
 0x714   :  { %v2686_v25 = vpop.xlane.xlu1 %2685 }
 0x716   :  { %v11453_v13 = vpop.eup %11452 }
 0x717   :  { %v2680_v33 = vpop.xlane.xlu0 %2679  ;;  %v2739_v28 = vmul.f32 %v11453_v13, %v13123_v4 }
 0x718   :  { %11458 = vrcp.f32 %v2680_v33 }
 0x719   :  { %v2759_v0 = vpack.c.bf16 %v2739_v28, %v2738_v55 }
 0x71b   :  { %v11455_v9 = vpop.eup %11454  ;;  %10529 = vmatprep.mubr.msk.bf16.mxu1 %vm1119_vm4, %v2759_v0  ;;  %v2683_v52 = vpop.xlane.xlu0 %2682 }
 0x71c   :  { %v11457_v6 = vpop.eup %11456  ;;  %11460 = vrcp.f32 %v2683_v52  ;;  %v2695_v39 = vpop.xlane.xlu1 %2694  ;;  %10530 = vmatmul.mubr.msk.bf16.vlgmr.msra.gmra.mrb[84].mxu1 %vm1119_vm4, %v2760_v40  ;;  %v2742_v41 = vmul.f32 %v11455_v9, %v13133_v24 }
 0x71d   :  { %11462 = vrcp.f32 %v2686_v25  ;;  %10542 = vmatpush3.bf16.msra.mxu1 %v13196_v60  ;;  %v2741_v2 = vmul.f32 %v11457_v6, %v13135_v3 }
 0x71e   :  { %11464 = vrcp.f32 %v2677_v50 }
 0x71f   :  { %v2761_v4 = vpack.c.bf16 %v2742_v41, %v2741_v2 }
 0x720   :  { %v2692_v42 = vpop.xlane.xlu1 %2691  ;;  %v2689_v23 = vpop.xlane.xlu0 %2688 }
 0x721   :  { %11466 = vrcp.f32 %v2692_v42  ;;  %10537 = vmatprep.mubr.msk.bf16.mxu0 %vm1119_vm4, %v2761_v4 }
 0x722   :  { %11468 = vrcp.f32 %v2689_v23  ;;  %v11459_v61 = vpop.eup %11458 }
 0x723   :  { %11470 = vrcp.f32 %v2695_v39  ;;  %v2744_v24 = vmul.f32 %v11459_v61, %v13149_v47  ;;  %v11266_v39 = vld [vmem:[%s16413_s6] sm:$0xff]  }
 0x724   :  { %v2704_v49 = vpop.xlane.xlu0 %2703 }
 0x726   :  { %v11461_v57 = vpop.eup %11460 }
 0x727   :  { %v11463_v27 = vpop.eup %11462  ;;  %v2698_v51 = vpop.xlane.xlu1 %2697  ;;  %v2745_v60 = vmul.f32 %v11461_v57, %v13153_v37 }
 0x728   :  { %v11465_v12 = vpop.eup %11464  ;;  %11472 = vrcp.f32 %v2698_v51  ;;  %v2701_v3 = vpop.xlane.xlu0 %2700  ;;  %v2746_v54 = vmul.f32 %v11463_v27, %v13143_v15 }
 0x729   :  { %11474 = vrcp.f32 %v2701_v3  ;;  %v2763_v21 = vpack.c.bf16 %v2745_v60, %v2744_v24  ;;  %v2743_v31 = vmul.f32 %v11465_v12, %v13126_v22 }
 0x72a   :  { %11476 = vrcp.f32 %v2704_v49  ;;  %v2764_v11 = vpack.c.bf16 %v2746_v54, %v2746_v54 }
 0x72b   :  { %v11467_v50 = vpop.eup %11466  ;;  %v3082_v5 = vpop.permute.xlu1 %3081  ;;  %10545 = vmatprep.mubr.msk.bf16.mxu1 %vm1119_vm4, %v2763_v21  ;;  %v2762_v22 = vpack.c.bf16 %v2743_v31, %v2743_v31 }
 0x72c   :  { %v11469_v59 = vpop.eup %11468  ;;  %11082 = vmatprep.subr.msk.bf16.mxu1 %vm1411_vm2, %v3082_v5  ;;  %v3020_v29 = vpop.permute.xlu0 %3019  ;;  %v3091_v47 = vsel %vm1411_vm2, %v3082_v5, 0  ;;  %v2748_v37 = vmul.f32 %v11467_v50, %v13162_v48 }
 0x72d   :  { %11081 = vmatprep.subr.msk.bf16.mxu0 %vm1411_vm2, %v3020_v29  ;;  %10544 = vmatpush3.bf16.msra.mxu1 %v3091_v47  ;;  %v3029_v15 = vsel %vm1411_vm2, %v3020_v29, 0  ;;  %v2747_v8 = vmul.f32 %v11469_v59, %v13164_v30  ;;  %v11471_v20 = vpop.eup %11470 }
 0x72e   :  { %10536 = vmatpush3.bf16.msra.mxu0 %v3029_v15  ;;  %v2749_v30 = vmul.f32 %v11471_v20, %v13156_v35 }
 0x72f   :  { %v3142_v34 = vpop.permute.xlu1 %3141  ;;  %v2765_v13 = vpack.c.bf16 %v2748_v37, %v2747_v8 }
 0x730   :  { %10546 = vmatmul.mubr.msk.bf16.vlgmr.msra.gmra.mrb[88].mxu1 %vm1119_vm4, %v2764_v11  ;;  %10549 = vmatprep.subr.bf16.mxu0 %v3142_v34  ;;  %v2766_v52 = vpack.c.bf16 %v2749_v30, %v2749_v30 }
 0x731   :  { %10538 = vmatmul.mubr.msk.bf16.vlgmr.msra.gmra.mrb[72].mxu0 %vm1119_vm4, %v2762_v22 }
 0x732   :  { %v11473_v48 = vpop.eup %11472  ;;  %10550 = vmatpush3.bf16.msra.mxu0 %v3142_v34  ;;  %10553 = vmatprep.mubr.msk.bf16.mxu0 %vm1119_vm4, %v2765_v13 }
 0x733   :  { %v11475_v19 = vpop.eup %11474  ;;  %v3144_v33 = vpop.permute.xlu1 %3143  ;;  %v2750_v55 = vmul.f32 %v11473_v48, %v13176_v46 }
 0x734   :  { %11083 = vmatprep.subr.msk.bf16.mxu0 %vm1411_vm2, %v3144_v33  ;;  %v3153_v28 = vsel %vm1411_vm2, %v3144_v33, 0  ;;  %v2751_v25 = vmul.f32 %v11475_v19, %v13174_v62  ;;  %v11477_v40 = vpop.eup %11476 }
 0x735   :  { %v2752_v46 = vmul.f32 %v11477_v40, %v13170_v32  ;;  %v11267_v32 = vld [vmem:[%s16413_s6 + $0x8] sm:$0xff]  }
 0x736   :  { %10552 = vmatpush3.bf16.msra.mxu0 %v3153_v28  ;;  %v2767_v0 = vpack.c.bf16 %v2751_v25, %v2750_v55 }
 0x737   :  { %v3204_v9 = vpop.permute.xlu1 %3203  ;;  %v2768_v62 = vpack.c.bf16 %v2752_v46, %v2752_v46  ;;  %10565 = vmatprep.subr.bf16.mxu0 %v11266_v39 }
 0x738   :  { %10557 = vmatprep.subr.bf16.mxu1 %v3204_v9  ;;  %10561 = vmatprep.mubr.msk.bf16.mxu1 %vm1119_vm4, %v2767_v0 }
 0x739   :  { %10554 = vmatmul.mubr.msk.bf16.vlgmr.msra.gmra.mrb[76].mxu0 %vm1119_vm4, %v2766_v52  ;;  %10558 = vmatpush3.bf16.msra.mxu1 %v3204_v9 }
 0x73a   :  { %10566 = vmatpush3.bf16.msra.mxu0 %v11266_v39 }
 0x73b   :  { %v3206_v35 = vpop.permute.xlu1 %3205  ;;  %10567 = vmatprep.subr.bf16.mxu0 %v11267_v32 }
 0x73c   :  { %11084 = vmatprep.subr.msk.bf16.mxu1 %vm1411_vm2, %v3206_v35  ;;  %v3215_v6 = vsel %vm1411_vm2, %v3206_v35, 0 }
 0x73d   :  { %10560 = vmatpush3.bf16.msra.mxu1 %v3215_v6 }
 0x73e   :  { %10568 = vmatpush3.bf16.msra.mxu0 %v11267_v32 }
 0x740   :  { %10562 = vmatmul.mubr.msk.bf16.vlgmr.msra.gmra.mrb[92].mxu1 %vm1119_vm4, %v2768_v62 }
 0x7d4   :  { %v10507_v41 = vpop.f32.mrb[64].mxu0 }
 0x7d5   :  { %v2817_v2 = vpop.f32.mrb[65].mxu0 }
 0x7d6   :  { %v10508_v4 = vpop.f32.mrb[66].mxu0 }
 0x7d7   :  { %v2820_v42 = vpop.f32.mrb[67].mxu0 }
 0x7d8   :  { %v11142_v23 = vpack.i.bf16 %v2820_v42, %v2817_v2 }
 0x7da   :  { %11143 = vrot.lane.b32.xlu0 %v11142_v23, %s11868_s1 }
 0x7dc   :  { %v10515_v61 = vpop.f32.mrb[80].mxu1 }
 0x7dd   :  { %v2879_v49 = vpop.f32.mrb[81].mxu1 }
 0x7de   :  { %v11147_v57 = vpack.i.bf16 %v2879_v49, %v10507_v41  ;;  %v10516_v27 = vpop.f32.mrb[82].mxu1 }
 0x7df   :  { %v2882_v51 = vpop.f32.mrb[83].mxu1 }
 0x7e0   :  { %v11152_v24 = vpack.i.bf16 %v10515_v61, %v2882_v51  ;;  %11148 = vrot.lane.b32.xlu1 %v11147_v57, %s11868_s1 }
 0x7e2   :  { %11153 = vrot.lane.b32.xlu0 %v11152_v24, %s11868_s1 }
 0x7e4   :  { %v10523_v60 = vpop.f32.mrb[68].mxu0 }
 0x7e5   :  { %v2941_v12 = vpop.f32.mrb[69].mxu0 }
 0x7e6   :  { %v10524_v3 = vpop.f32.mrb[70].mxu0 }
 0x7e7   :  { %v2944_v21 = vpop.f32.mrb[71].mxu0 }
 0x7e8   :  { %v11157_v54 = vpack.i.bf16 %v2944_v21, %v2941_v12 }
 0x7ea   :  { %11158 = vrot.lane.b32.xlu1 %v11157_v54, %s11868_s1 }
 0x7ef   :  { %v10531_v50 = vpop.f32.mrb[84].mxu1 }
 0x7f0   :  { %v3003_v5 = vpop.f32.mrb[85].mxu1 }
 0x7f1   :  { %v11162_v31 = vpack.i.bf16 %v3003_v5, %v10523_v60  ;;  %v10532_v59 = vpop.f32.mrb[86].mxu1 }
 0x7f2   :  { %v3006_v29 = vpop.f32.mrb[87].mxu1 }
 0x7f3   :  { %v11167_v47 = vpack.i.bf16 %v10531_v50, %v3006_v29  ;;  %11163 = vrot.lane.b32.xlu0 %v11162_v31, %s11868_s1 }
 0x7f5   :  { %11168 = vrot.lane.b32.xlu1 %v11167_v47, %s11868_s1 }
 0x803   :  { %v10547_v37 = vpop.f32.mrb[88].mxu1 }
 0x804   :  { %v10539_v15 = vpop.f32.mrb[72].mxu0  ;;  %v3127_v8 = vpop.f32.mrb[89].mxu1 }
 0x805   :  { %v11177_v11 = vpack.i.bf16 %v3127_v8, %v10539_v15  ;;  %v3065_v34 = vpop.f32.mrb[73].mxu0  ;;  %v10548_v22 = vpop.f32.mrb[90].mxu1 }
 0x806   :  { %v10540_v20 = vpop.f32.mrb[74].mxu0  ;;  %v3130_v13 = vpop.f32.mrb[91].mxu1 }
 0x807   :  { %v11182_v48 = vpack.i.bf16 %v10547_v37, %v3130_v13  ;;  %11178 = vrot.lane.b32.xlu1 %v11177_v11, %s11868_s1  ;;  %v3068_v19 = vpop.f32.mrb[75].mxu0 }
 0x808   :  { %v11172_v33 = vpack.i.bf16 %v3068_v19, %v3065_v34 }
 0x80a   :  { %11173 = vrot.lane.b32.xlu0 %v11172_v33, %s11868_s1 }
 0x80c   :  { %v10555_v55 = vpop.f32.mrb[76].mxu0 }
 0x80d   :  { %v3189_v30 = vpop.f32.mrb[77].mxu0 }
 0x80e   :  { %11183 = vrot.lane.b32.xlu0 %v11182_v48, %s11868_s1  ;;  %v10556_v28 = vpop.f32.mrb[78].mxu0 }
 0x80f   :  { %v3192_v25 = vpop.f32.mrb[79].mxu0 }
 0x810   :  { %v11187_v0 = vpack.i.bf16 %v3192_v25, %v3189_v30 }
 0x812   :  { %11188 = vrot.lane.b32.xlu1 %v11187_v0, %s11868_s1 }
 0x813   :  { %v10563_v40 = vpop.f32.mrb[92].mxu1 }
 0x814   :  { %v3251_v9 = vpop.f32.mrb[93].mxu1 }
 0x815   :  { %v11192_v52 = vpack.i.bf16 %v3251_v9, %v10555_v55  ;;  %v10564_v46 = vpop.f32.mrb[94].mxu1 }
 0x816   :  { %v3254_v35 = vpop.f32.mrb[95].mxu1  ;;  %v16523_v46 = vld [vmem:[#allocation29_spill] sm:$0xff] }
 0x817   :  { %v11197_v6 = vpack.i.bf16 %v10563_v40, %v3254_v35  ;;  %11193 = vrot.lane.b32.xlu0 %v11192_v52, %s11868_s1 }
 0x819   :  { %11198 = vrot.lane.b32.xlu1 %v11197_v6, %s11868_s1 }
 0x84c   :  { %v11144_v62 = vpop.permute.xlu0 %11143 }
 0x84d   :  { %v11146_v39 = vunpack.i.h.bf16 %v11144_v62  ;;  %v11145_v41 = vunpack.i.l.bf16 %v11144_v62 }
 0x84f   :  { %v3362_v32 = vsel %vm548_vm1, %v12890_v10, %v11146_v39  ;;  %v3361_v2 = vsel %vm548_vm1, %v12888_v45, %v11145_v41 }
 0x850   :  { %v3389_v4 = vpack.c.bf16 %v3362_v32, %v3361_v2  ;;  %v16524_v32 = vld [vmem:[#allocation32_spill] sm:$0xff] }
 0x852   :  { %v11149_v42 = vpop.permute.xlu1 %11148  ;;  %10569 = vmatprep.mubr.msk.bf16.mxu0 %vm133_vm0, %v3389_v4  ;;  %v16525_v4 = vld [vmem:[#allocation28_spill] sm:$0xff] }
 0x853   :  { %v11151_v23 = vunpack.i.h.bf16 %v11149_v42  ;;  %v11150_v61 = vunpack.i.l.bf16 %v11149_v42 }
 0x854   :  { %v11154_v49 = vpop.permute.xlu0 %11153 }
 0x855   :  { %v3364_v57 = vsel %vm548_vm1, %v12894_v14, %v11151_v23  ;;  %v3363_v27 = vsel %vm548_vm1, %v12886_v53, %v11150_v61  ;;  %v11156_v51 = vunpack.i.h.bf16 %v11154_v49  ;;  %v11155_v24 = vunpack.i.l.bf16 %v11154_v49 }
 0x856   :  { %v3390_v60 = vpack.c.bf16 %v3364_v57, %v3363_v27  ;;  %v16526_v57 = vld [vmem:[#allocation31_spill] sm:$0xff] }
 0x857   :  { %v3366_v10 = vsel %vm548_vm1, %v12892_v18, %v11156_v51  ;;  %v3365_v45 = vsel %vm548_vm1, %v12896_v36, %v11155_v24  ;;  %v16527_v51 = vld [vmem:[#allocation33_spill] sm:$0xff] }
 0x858   :  { %10570 = vmatmul.mubr.msk.bf16.vlgmr.msra.gmra.mrb[80].mxu0 %vm133_vm0, %v3390_v60  ;;  %v3391_v12 = vpack.c.bf16 %v3366_v10, %v3365_v45  ;;  %v13339_v10 = vld [vmem:[%s16414_s7] ss:$0 sm:$0xff] }
 0x85a   :  { %10573 = vmatprep.mubr.msk.bf16.mxu0 %vm133_vm0, %v3391_v12 }
 0x85c   :  { %v11159_v3 = vpop.permute.xlu1 %11158 }
 0x85d   :  { %v11161_v21 = vunpack.i.h.bf16 %v11159_v3  ;;  %v11160_v14 = vunpack.i.l.bf16 %v11159_v3 }
 0x85f   :  { %v3368_v53 = vsel %vm548_vm1, %v12902_v7, %v11161_v21  ;;  %v3367_v54 = vsel %vm548_vm1, %v12900_v44, %v11160_v14 }
 0x860   :  { %v3392_v50 = vpack.c.bf16 %v3368_v53, %v3367_v54  ;;  %v16528_v54 = vld [vmem:[#allocation3_spill] sm:$0xff] }
 0x862   :  { %10574 = vmatmul.mubr.msk.bf16.gmra.mrb[84].mxu0 %vm133_vm0, %v3392_v50 }
 0x865   :  { %v11164_v18 = vpop.permute.xlu0 %11163 }
 0x866   :  { %v11166_v5 = vunpack.i.h.bf16 %v11164_v18  ;;  %v11165_v36 = vunpack.i.l.bf16 %v11164_v18 }
 0x867   :  { %v11169_v31 = vpop.permute.xlu1 %11168 }
 0x868   :  { %v3370_v59 = vsel %vm548_vm1, %v12906_v38, %v11166_v5  ;;  %v3369_v29 = vsel %vm548_vm1, %v12898_v63, %v11165_v36  ;;  %v11171_v47 = vunpack.i.h.bf16 %v11169_v31  ;;  %v11170_v37 = vunpack.i.l.bf16 %v11169_v31  ;;  %v16529_v36 = vld [vmem:[#allocation5_spill] sm:$0xff] }
 0x869   :  { %v3393_v15 = vpack.c.bf16 %v3370_v59, %v3369_v29  ;;  %v16530_v59 = vld [vmem:[#allocation4_spill] sm:$0xff] }
 0x86a   :  { %v3372_v7 = vsel %vm548_vm1, %v12904_v43, %v11171_v47  ;;  %v3371_v44 = vsel %vm548_vm1, %v12908_v17, %v11170_v37 }
 0x86b   :  { %10577 = vmatprep.mubr.msk.bf16.mxu0 %vm133_vm0, %v3393_v15  ;;  %v3394_v8 = vpack.c.bf16 %v3372_v7, %v3371_v44  ;;  %v16531_v15 = vld [vmem:[#allocation2_spill] sm:$0xff] }
 0x86d   :  { %10578 = vmatmul.mubr.msk.bf16.gmra.mrb[88].mxu0 %vm133_vm0, %v3394_v8 }
 0x879   :  { %v11179_v11 = vpop.permute.xlu1 %11178 }
 0x87a   :  { %v11181_v34 = vunpack.i.h.bf16 %v11179_v11  ;;  %v11180_v38 = vunpack.i.l.bf16 %v11179_v11 }
 0x87c   :  { %v3376_v63 = vsel %vm548_vm1, %v12918_v58, %v11181_v34  ;;  %v3375_v22 = vsel %vm548_vm1, %v12910_v26, %v11180_v38  ;;  %v11174_v20 = vpop.permute.xlu0 %11173  ;;  %v16521_v26 = vld [vmem:[#allocation27_spill] sm:$0xff] }
 0x87d   :  { %v11176_v13 = vunpack.i.h.bf16 %v11174_v20  ;;  %v11175_v43 = vunpack.i.l.bf16 %v11174_v20  ;;  %v3396_v48 = vpack.c.bf16 %v3376_v63, %v3375_v22 }
 0x87f   :  { %v3374_v17 = vsel %vm548_vm1, %v12914_v16, %v11176_v13  ;;  %v3373_v19 = vsel %vm548_vm1, %v12912_v1, %v11175_v43  ;;  %v16522_v1 = vld [vmem:[#allocation30_spill] sm:$0xff]  ;;  %v16532_v13 = vld [vmem:[#allocation7_spill] sm:$0xff] }
 0x880   :  { %v11184_v33 = vpop.permute.xlu0 %11183  ;;  %v3395_v55 = vpack.c.bf16 %v3374_v17, %v3373_v19  ;;  %v16533_v19 = vld [vmem:[#allocation9_spill] sm:$0xff] }
 0x881   :  { %v11186_v30 = vunpack.i.h.bf16 %v11184_v33  ;;  %v11185_v28 = vunpack.i.l.bf16 %v11184_v33 }
 0x882   :  { %10581 = vmatprep.mubr.msk.bf16.mxu0 %vm133_vm0, %v3395_v55  ;;  %v16534_v55 = vld [vmem:[#allocation6_spill] sm:$0xff] }
 0x883   :  { %v3378_v58 = vsel %vm548_vm1, %v12916_v56, %v11186_v30  ;;  %v3377_v25 = vsel %vm548_vm1, %v16521_v26, %v11185_v28  ;;  %10582 = vmatmul.mubr.msk.bf16.gmra.mrb[92].mxu0 %vm133_vm0, %v3396_v48  ;;  %v16535_v28 = vld [vmem:[#allocation8_spill] sm:$0xff] }
 0x884   :  { %v11189_v0 = vpop.permute.xlu1 %11188  ;;  %v3397_v40 = vpack.c.bf16 %v3378_v58, %v3377_v25 }
 0x885   :  { %v11191_v16 = vunpack.i.h.bf16 %v11189_v0  ;;  %v11190_v9 = vunpack.i.l.bf16 %v11189_v0 }
 0x886   :  { %10585 = vmatprep.mubr.msk.bf16.mxu0 %vm133_vm0, %v3397_v40 }
 0x887   :  { %v3380_v52 = vsel %vm548_vm1, %v16522_v1, %v11191_v16  ;;  %v3379_v35 = vsel %vm548_vm1, %v16523_v46, %v11190_v9 }
 0x888   :  { %v3398_v6 = vpack.c.bf16 %v3380_v52, %v3379_v35 }
 0x889   :  { %v11194_v62 = vpop.permute.xlu0 %11193 }
 0x88a   :  { %v11196_v56 = vunpack.i.h.bf16 %v11194_v62  ;;  %v11195_v39 = vunpack.i.l.bf16 %v11194_v62 }
 0x88b   :  { %v11199_v41 = vpop.permute.xlu1 %11198  ;;  %10586 = vmatmul.mubr.msk.bf16.gmra.mrb[96].mxu0 %vm133_vm0, %v3398_v6  ;;  %v16536_v6 = vld [vmem:[#allocation11_spill] sm:$0xff] }
 0x88c   :  { %v3382_v2 = vsel %vm548_vm1, %v16524_v32, %v11196_v56  ;;  %v3381_v42 = vsel %vm548_vm1, %v16525_v4, %v11195_v39  ;;  %v11201_v23 = vunpack.i.h.bf16 %v11199_v41  ;;  %v11200_v61 = vunpack.i.l.bf16 %v11199_v41  ;;  %v16537_v41 = vld [vmem:[#allocation10_spill] sm:$0xff] }
 0x88d   :  { %v3399_v49 = vpack.c.bf16 %v3382_v2, %v3381_v42  ;;  %v16538_v2 = vld [vmem:[#allocation13_spill] sm:$0xff] }
 0x88e   :  { %v3384_v27 = vsel %vm548_vm1, %v16526_v57, %v11201_v23  ;;  %v3383_v24 = vsel %vm548_vm1, %v16527_v51, %v11200_v61  ;;  %v16539_v23 = vld [vmem:[#allocation12_spill] sm:$0xff] }
 0x88f   :  { %10589 = vmatprep.mubr.msk.bf16.mxu0 %vm133_vm0, %v3399_v49  ;;  %v3400_v60 = vpack.c.bf16 %v3384_v27, %v3383_v24 }
 0x893   :  { %10590 = vmatmul.mubr.msk.bf16.gmra.mrb[100].mxu0 %vm133_vm0, %v3400_v60 }
 0x92b   :  { %v10571_v45 = vpop.f32.mrb[80].mxu0 }
 0x92c   :  { %v3490_v12 = vpop.f32.mrb[81].mxu0  ;;  %v3499_v3 = vadd.f32 %v10571_v45, %v13339_v10 }
 0x92d   :  { %v3491_v21 = vadd.f32 %v13339_v10, %v3490_v12  ;;  %v10572_v14 = vpop.f32.mrb[82].mxu0 }
 0x92e   :  { %v3493_v53 = vpop.f32.mrb[83].mxu0  ;;  %v3502_v5 = vadd.f32 %v10572_v14, %v13339_v10  ;;  %v13349_v31 = vadd.f32 %v3499_v3, %v16529_v36  ;;  %v16542_v36 = vld [vmem:[#allocation19_spill] sm:$0xff] }
 0x92f   :  { %v13344_v50 = vadd.f32 %v3491_v21, %v16528_v54  ;;  %v3494_v18 = vadd.f32 %v13339_v10, %v3493_v53  ;;  %v16540_v21 = vld [vmem:[#allocation15_spill] sm:$0xff] }
 0x930   :  { %v13359_v7 = vadd.f32 %v3502_v5, %v16531_v15  ;;  %v3617_v8 = vsel %vm133_vm0, %v13349_v31, 0.0 }
 0x931   :  { %v13352_v29 = vadd.f32 %v3494_v18, %v16530_v59  ;;  %v3611_v47 = vsel %vm133_vm0, %v13344_v50, 0.0  ;;  %v16541_v18 = vld [vmem:[#allocation14_spill] sm:$0xff] }
 0x932   :  { %3612 = vadd.xlane.f32.xlu0 %v3611_v47  ;;  %v3620_v22 = vsel %vm133_vm0, %v13359_v7, 0.0 }
 0x933   :  { %v3614_v37 = vsel %vm133_vm0, %v13352_v29, 0.0 }
 0x934   :  { %3615 = vadd.xlane.f32.xlu1 %v3614_v37  ;;  %v16543_v37 = vld [vmem:[#allocation18_spill] sm:$0xff] }
 0x935   :  { %v10575_v44 = vpop.f32.mrb[84].mxu0 }
 0x936   :  { %v3506_v11 = vpop.f32.mrb[85].mxu0  ;;  %3618 = vadd.xlane.f32.xlu0 %v3617_v8  ;;  %v3515_v20 = vadd.f32 %v10575_v44, %v13339_v10 }
 0x937   :  { %v3507_v34 = vadd.f32 %v13339_v10, %v3506_v11  ;;  %v10576_v38 = vpop.f32.mrb[86].mxu0 }
 0x938   :  { %v3509_v63 = vpop.f32.mrb[87].mxu0  ;;  %v3518_v48 = vadd.f32 %v10576_v38, %v13339_v10  ;;  %v13376_v30 = vadd.f32 %v3515_v20, %v16534_v55 }
 0x939   :  { %v13368_v43 = vadd.f32 %v3507_v34, %v16532_v13  ;;  %v3510_v17 = vadd.f32 %v13339_v10, %v3509_v63  ;;  %v16544_v13 = vld [vmem:[#allocation16_spill] sm:$0xff] }
 0x93a   :  { %3621 = vadd.xlane.f32.xlu0 %v3620_v22  ;;  %v13379_v58 = vadd.f32 %v3518_v48, %v16535_v28  ;;  %v3629_v9 = vsel %vm133_vm0, %v13376_v30, 0.0  ;;  %v16545_v28 = vld [vmem:[#allocation20_spill] sm:$0xff] }
 0x93b   :  { %v13373_v33 = vadd.f32 %v3510_v17, %v16533_v19  ;;  %v3623_v25 = vsel %vm133_vm0, %v13368_v43, 0.0 }
 0x93c   :  { %v3632_v16 = vsel %vm133_vm0, %v13379_v58, 0.0 }
 0x93d   :  { %v3626_v26 = vsel %vm133_vm0, %v13373_v33, 0.0 }
 0x93e   :  { %3627 = vadd.xlane.f32.xlu1 %v3626_v26  ;;  %3624 = vadd.xlane.f32.xlu0 %v3623_v25  ;;  %v16546_v25 = vld [vmem:[#allocation17_spill] sm:$0xff] }
 0x940   :  { %v10579_v0 = vpop.f32.mrb[88].mxu0 }
 0x941   :  { %v3522_v40 = vpop.f32.mrb[89].mxu0  ;;  %v3531_v1 = vadd.f32 %v10579_v0, %v13339_v10 }
 0x942   :  { %v3523_v52 = vadd.f32 %v13339_v10, %v3522_v40  ;;  %v10580_v46 = vpop.f32.mrb[90].mxu0  ;;  %3633 = vadd.xlane.f32.xlu1 %v3632_v16  ;;  %3630 = vadd.xlane.f32.xlu0 %v3629_v9  ;;  %v16547_v16 = vld [vmem:[#allocation21_spill] sm:$0xff] }
 0x943   :  { %v3525_v35 = vpop.f32.mrb[91].mxu0  ;;  %v3534_v56 = vadd.f32 %v10580_v46, %v13339_v10  ;;  %v13397_v32 = vadd.f32 %v3531_v1, %v16537_v41 }
 0x944   :  { %v13392_v62 = vadd.f32 %v3523_v52, %v16536_v6  ;;  %v3526_v39 = vadd.f32 %v13339_v10, %v3525_v35 }
 0x945   :  { %v13405_v61 = vadd.f32 %v3534_v56, %v16539_v23  ;;  %v3641_v57 = vsel %vm133_vm0, %v13397_v32, 0.0 }
 0x946   :  { %v13400_v4 = vadd.f32 %v3526_v39, %v16538_v2  ;;  %v3635_v42 = vsel %vm133_vm0, %v13392_v62, 0.0 }
 0x947   :  { %3636 = vadd.xlane.f32.xlu0 %v3635_v42  ;;  %v3644_v27 = vsel %vm133_vm0, %v13405_v61, 0.0  ;;  %v16548_v42 = vld [vmem:[#allocation22_spill] sm:$0xff] }
 0x948   :  { %v3638_v49 = vsel %vm133_vm0, %v13400_v4, 0.0 }
 0x949   :  { %3639 = vadd.xlane.f32.xlu1 %v3638_v49 }
 0x94b   :  { %3642 = vadd.xlane.f32.xlu0 %v3641_v57 }
 0x94d   :  { %3645 = vadd.xlane.f32.xlu1 %v3644_v27  ;;  %v16549_v27 = vld [vmem:[#allocation24_spill] sm:$0xff] }
 0x956   :  { %v10583_v51 = vpop.f32.mrb[92].mxu0 }
 0x957   :  { %v3538_v24 = vpop.f32.mrb[93].mxu0  ;;  %v3547_v60 = vadd.f32 %v10583_v51, %v13339_v10 }
 0x958   :  { %v3539_v45 = vadd.f32 %v13339_v10, %v3538_v24  ;;  %v10584_v12 = vpop.f32.mrb[94].mxu0  ;;  %v16550_v24 = vld [vmem:[#allocation23_spill] sm:$0xff] }
 0x959   :  { %v3541_v3 = vpop.f32.mrb[95].mxu0  ;;  %v3550_v53 = vadd.f32 %v10584_v12, %v13339_v10  ;;  %v13421_v5 = vadd.f32 %v3547_v60, %v16541_v18  ;;  %v16551_v12 = vld [vmem:[#allocation25_spill] sm:$0xff] }
 0x95a   :  { %v13416_v14 = vadd.f32 %v3539_v45, %v16540_v21  ;;  %v3542_v54 = vadd.f32 %v13339_v10, %v3541_v3 }
 0x95b   :  { %v13429_v15 = vadd.f32 %v3550_v53, %v16543_v37  ;;  %v3653_v22 = vsel %vm133_vm0, %v13421_v5, 0.0 }
 0x95c   :  { %v13424_v59 = vadd.f32 %v3542_v54, %v16542_v36  ;;  %v3647_v47 = vsel %vm133_vm0, %v13416_v14, 0.0 }
 0x95d   :  { %3648 = vadd.xlane.f32.xlu0 %v3647_v47  ;;  %v3656_v55 = vsel %vm133_vm0, %v13429_v15, 0.0 }
 0x95e   :  { %v10587_v44 = vpop.f32.mrb[96].mxu0  ;;  %v3650_v8 = vsel %vm133_vm0, %v13424_v59, 0.0 }
 0x95f   :  { %v3554_v11 = vpop.f32.mrb[97].mxu0  ;;  %3651 = vadd.xlane.f32.xlu1 %v3650_v8  ;;  %v3563_v34 = vadd.f32 %v10587_v44, %v13339_v10 }
 0x960   :  { %v3555_v38 = vadd.f32 %v13339_v10, %v3554_v11  ;;  %v10588_v63 = vpop.f32.mrb[98].mxu0 }
 0x961   :  { %v3557_v20 = vpop.f32.mrb[99].mxu0  ;;  %3654 = vadd.xlane.f32.xlu0 %v3653_v22  ;;  %v3566_v17 = vadd.f32 %v10588_v63, %v13339_v10  ;;  %v13445_v26 = vadd.f32 %v3563_v34, %v16545_v28 }
 0x962   :  { %v13438_v48 = vadd.f32 %v3555_v38, %v16544_v13  ;;  %v3558_v19 = vadd.f32 %v13339_v10, %v3557_v20 }
 0x963   :  { %3657 = vadd.xlane.f32.xlu1 %v3656_v55  ;;  %v13453_v9 = vadd.f32 %v3566_v17, %v16547_v16  ;;  %v3665_v39 = vsel %vm133_vm0, %v13445_v26, 0.0 }
 0x964   :  { %v13448_v0 = vadd.f32 %v3558_v19, %v16546_v25  ;;  %v3659_v40 = vsel %vm133_vm0, %v13438_v48, 0.0 }
 0x965   :  { %3660 = vadd.xlane.f32.xlu0 %v3659_v40  ;;  %v3668_v57 = vsel %vm133_vm0, %v13453_v9, 0.0 }
 0x966   :  { %v10591_v1 = vpop.f32.mrb[100].mxu0  ;;  %v3662_v52 = vsel %vm133_vm0, %v13448_v0, 0.0 }
 0x967   :  { %v3570_v46 = vpop.f32.mrb[101].mxu0  ;;  %3663 = vadd.xlane.f32.xlu1 %v3662_v52  ;;  %v3579_v35 = vadd.f32 %v10591_v1, %v13339_v10 }
 0x968   :  { %v3571_v6 = vadd.f32 %v13339_v10, %v3570_v46  ;;  %v10592_v56 = vpop.f32.mrb[102].mxu0 }
 0x969   :  { %v3582_v41 = vadd.f32 %v10592_v56, %v13339_v10  ;;  %v3573_v2 = vpop.f32.mrb[103].mxu0  ;;  %3666 = vadd.xlane.f32.xlu0 %v3665_v39  ;;  %v13469_v51 = vadd.f32 %v3579_v35, %v16549_v27 }
 0x96a   :  { %v13463_v23 = vadd.f32 %v3571_v6, %v16548_v42  ;;  %v3574_v49 = vadd.f32 %v13339_v10, %v3573_v2 }
 0x96b   :  { %3669 = vadd.xlane.f32.xlu1 %v3668_v57  ;;  %v13477_v3 = vadd.f32 %v3582_v41, %v16551_v12  ;;  %v3677_v21 = vsel %vm133_vm0, %v13469_v51, 0.0 }
 0x96c   :  { %v13472_v60 = vadd.f32 %v3574_v49, %v16550_v24  ;;  %v3671_v45 = vsel %vm133_vm0, %v13463_v23, 0.0 }
 0x96d   :  { %3672 = vadd.xlane.f32.xlu0 %v3671_v45  ;;  %v3680_v53 = vsel %vm133_vm0, %v13477_v3, 0.0 }
 0x96e   :  { %v3674_v10 = vsel %vm133_vm0, %v13472_v60, 0.0 }
 0x96f   :  { %3675 = vadd.xlane.f32.xlu1 %v3674_v10 }
 0x971   :  { %3678 = vadd.xlane.f32.xlu0 %v3677_v21 }
 0x973   :  { %3681 = vadd.xlane.f32.xlu1 %v3680_v53 }
 0x9bf   :  { %v3613_v54 = vpop.xlane.xlu0 %3612 }
 0x9c0   :  { %v3684_v18 = vmul.f32 0.03125, %v3613_v54 }
 0x9c1   :  { %v3616_v36 = vpop.xlane.xlu1 %3615 }
 0x9c2   :  { %v13486_v47 = vsub.f32 %v13344_v50, %v3684_v18  ;;  %v3685_v37 = vmul.f32 0.03125, %v3616_v36 }
 0x9c3   :  { %v3619_v44 = vpop.xlane.xlu0 %3618 }
 0x9c4   :  { %v13489_v8 = vsub.f32 %v13352_v29, %v3685_v37  ;;  %v3686_v11 = vmul.f32 0.03125, %v3619_v44  ;;  %v3732_v34 = vmul.f32 %v13486_v47, %v13486_v47 }
 0x9c6   :  { %v13494_v38 = vsub.f32 %v13349_v31, %v3686_v11  ;;  %v3756_v63 = vsel %vm133_vm0, %v3732_v34, 0.0  ;;  %v3733_v22 = vmul.f32 %v13489_v8, %v13489_v8 }
 0x9c7   :  { %3757 = vadd.xlane.f32.xlu0 %v3756_v63  ;;  %v3622_v50 = vpop.xlane.xlu0 %3621 }
 0x9c8   :  { %v3687_v20 = vmul.f32 0.03125, %v3622_v50  ;;  %v3759_v13 = vsel %vm133_vm0, %v3733_v22, 0.0  ;;  %v3734_v29 = vmul.f32 %v13494_v38, %v13494_v38 }
 0x9c9   :  { %3760 = vadd.xlane.f32.xlu1 %v3759_v13 }
 0x9ca   :  { %v13503_v17 = vsub.f32 %v13359_v7, %v3687_v20  ;;  %v3762_v31 = vsel %vm133_vm0, %v3734_v29, 0.0 }
 0x9cb   :  { %v3628_v19 = vpop.xlane.xlu1 %3627  ;;  %3763 = vadd.xlane.f32.xlu0 %v3762_v31  ;;  %v3625_v55 = vpop.xlane.xlu0 %3624 }
 0x9cc   :  { %v3689_v28 = vmul.f32 0.03125, %v3628_v19  ;;  %v3688_v25 = vmul.f32 0.03125, %v3625_v55  ;;  %v3735_v40 = vmul.f32 %v13503_v17, %v13503_v17 }
 0x9ce   :  { %v13509_v16 = vsub.f32 %v13373_v33, %v3689_v28  ;;  %v13512_v1 = vsub.f32 %v13368_v43, %v3688_v25  ;;  %v3765_v52 = vsel %vm133_vm0, %v3735_v40, 0.0 }
 0x9cf   :  { %v3634_v7 = vpop.xlane.xlu1 %3633  ;;  %3766 = vadd.xlane.f32.xlu1 %v3765_v52  ;;  %v3631_v46 = vpop.xlane.xlu0 %3630  ;;  %v11269_v52 = vld [vmem:[%s16415_s10 + $0x8] sm:$0xff]  }
 0x9d0   :  { %v3691_v35 = vmul.f32 0.03125, %v3634_v7  ;;  %v3690_v6 = vmul.f32 0.03125, %v3631_v46  ;;  %v3737_v56 = vmul.f32 %v13509_v16, %v13509_v16  ;;  %v3736_v39 = vmul.f32 %v13512_v1, %v13512_v1 }
 0x9d2   :  { %v13520_v41 = vsub.f32 %v13379_v58, %v3691_v35  ;;  %v13523_v33 = vsub.f32 %v13376_v30, %v3690_v6  ;;  %v3771_v43 = vsel %vm133_vm0, %v3737_v56, 0.0  ;;  %v3768_v2 = vsel %vm133_vm0, %v3736_v39, 0.0 }
 0x9d3   :  { %3772 = vadd.xlane.f32.xlu1 %v3771_v43  ;;  %3769 = vadd.xlane.f32.xlu0 %v3768_v2 }
 0x9d4   :  { %v3637_v42 = vpop.xlane.xlu0 %3636  ;;  %v3739_v49 = vmul.f32 %v13520_v41, %v13520_v41  ;;  %v3738_v57 = vmul.f32 %v13523_v33, %v13523_v33 }
 0x9d5   :  { %v3692_v27 = vmul.f32 0.03125, %v3637_v42 }
 0x9d6   :  { %v3640_v24 = vpop.xlane.xlu1 %3639  ;;  %v3777_v58 = vsel %vm133_vm0, %v3739_v49, 0.0  ;;  %v3774_v30 = vsel %vm133_vm0, %v3738_v57, 0.0 }
 0x9d7   :  { %v13534_v45 = vsub.f32 %v13392_v62, %v3692_v27  ;;  %v3693_v12 = vmul.f32 0.03125, %v3640_v24  ;;  %3778 = vadd.xlane.f32.xlu1 %v3777_v58  ;;  %3775 = vadd.xlane.f32.xlu0 %v3774_v30 }
 0x9d8   :  { %v3643_v10 = vpop.xlane.xlu0 %3642 }
 0x9d9   :  { %v13537_v21 = vsub.f32 %v13400_v4, %v3693_v12  ;;  %v3694_v53 = vmul.f32 0.03125, %v3643_v10  ;;  %v3740_v54 = vmul.f32 %v13534_v45, %v13534_v45 }
 0x9da   :  { %v3646_v18 = vpop.xlane.xlu1 %3645 }
 0x9db   :  { %v13542_v36 = vsub.f32 %v13397_v32, %v3694_v53  ;;  %v3695_v37 = vmul.f32 0.03125, %v3646_v18  ;;  %v3780_v44 = vsel %vm133_vm0, %v3740_v54, 0.0  ;;  %v3741_v62 = vmul.f32 %v13537_v21, %v13537_v21 }
 0x9dc   :  { %3781 = vadd.xlane.f32.xlu0 %v3780_v44 }
 0x9dd   :  { %v13548_v11 = vsub.f32 %v13405_v61, %v3695_v37  ;;  %v3783_v4 = vsel %vm133_vm0, %v3741_v62, 0.0  ;;  %v3742_v34 = vmul.f32 %v13542_v36, %v13542_v36  ;;  %v11268_v61 = vld [vmem:[%s16415_s10] sm:$0xff]  }
 0x9de   :  { %3784 = vadd.xlane.f32.xlu1 %v3783_v4  ;;  %10593 = vmatprep.subr.bf16.mxu1 %v11268_v61 }
 0x9df   :  { %v3786_v63 = vsel %vm133_vm0, %v3742_v34, 0.0  ;;  %v3743_v32 = vmul.f32 %v13548_v11, %v13548_v11  ;;  %10594 = vmatpush3.bf16.msra.mxu1 %v11268_v61 }
 0x9e0   :  { %3787 = vadd.xlane.f32.xlu0 %v3786_v63  ;;  %10595 = vmatprep.subr.bf16.mxu1 %v11269_v52 }
 0x9e1   :  { %v3789_v22 = vsel %vm133_vm0, %v3743_v32, 0.0 }
 0x9e2   :  { %3790 = vadd.xlane.f32.xlu1 %v3789_v22 }
 0x9e3   :  { %10596 = vmatpush3.bf16.msra.mxu1 %v11269_v52 }
 0x9ea   :  { %v3649_v50 = vpop.xlane.xlu0 %3648 }
 0x9eb   :  { %v3696_v20 = vmul.f32 0.03125, %v3649_v50 }
 0x9ec   :  { %v3652_v13 = vpop.xlane.xlu1 %3651 }
 0x9ed   :  { %v13561_v29 = vsub.f32 %v13416_v14, %v3696_v20  ;;  %v3697_v31 = vmul.f32 0.03125, %v3652_v13 }
 0x9ee   :  { %v3655_v19 = vpop.xlane.xlu0 %3654 }
 0x9ef   :  { %v13564_v55 = vsub.f32 %v13424_v59, %v3697_v31  ;;  %v3698_v28 = vmul.f32 0.03125, %v3655_v19  ;;  %v3744_v25 = vmul.f32 %v13561_v29, %v13561_v29 }
 0x9f0   :  { %v3658_v40 = vpop.xlane.xlu1 %3657 }
 0x9f1   :  { %v13572_v7 = vsub.f32 %v13421_v5, %v3698_v28  ;;  %v3699_v14 = vmul.f32 0.03125, %v3658_v40  ;;  %v3792_v46 = vsel %vm133_vm0, %v3744_v25, 0.0  ;;  %v3745_v59 = vmul.f32 %v13564_v55, %v13564_v55 }
 0x9f2   :  { %3793 = vadd.xlane.f32.xlu0 %v3792_v46  ;;  %v3661_v35 = vpop.xlane.xlu0 %3660  ;;  %v11271_v46 = vld [vmem:[%s16416_s12 + $0x8] sm:$0xff]  }
 0x9f3   :  { %v13578_v6 = vsub.f32 %v13429_v15, %v3699_v14  ;;  %v3700_v56 = vmul.f32 0.03125, %v3661_v35  ;;  %v3795_v39 = vsel %vm133_vm0, %v3745_v59, 0.0  ;;  %v3746_v43 = vmul.f32 %v13572_v7, %v13572_v7 }
 0x9f4   :  { %v3664_v5 = vpop.xlane.xlu1 %3663  ;;  %3796 = vadd.xlane.f32.xlu1 %v3795_v39 }
 0x9f5   :  { %v13584_v2 = vsub.f32 %v13438_v48, %v3700_v56  ;;  %v3701_v42 = vmul.f32 0.03125, %v3664_v5  ;;  %v3798_v49 = vsel %vm133_vm0, %v3746_v43, 0.0  ;;  %v3747_v57 = vmul.f32 %v13578_v6, %v13578_v6 }
 0x9f6   :  { %3799 = vadd.xlane.f32.xlu0 %v3798_v49  ;;  %v3667_v15 = vpop.xlane.xlu0 %3666 }
 0x9f7   :  { %v13590_v27 = vsub.f32 %v13448_v0, %v3701_v42  ;;  %v3702_v24 = vmul.f32 0.03125, %v3667_v15  ;;  %v3801_v58 = vsel %vm133_vm0, %v3747_v57, 0.0  ;;  %v3748_v30 = vmul.f32 %v13584_v2, %v13584_v2 }
 0x9f8   :  { %v3670_v12 = vpop.xlane.xlu1 %3669  ;;  %3802 = vadd.xlane.f32.xlu1 %v3801_v58 }
 0x9f9   :  { %v13596_v48 = vsub.f32 %v13445_v26, %v3702_v24  ;;  %v3703_v10 = vmul.f32 0.03125, %v3670_v12  ;;  %v3804_v53 = vsel %vm133_vm0, %v3748_v30, 0.0  ;;  %v3749_v54 = vmul.f32 %v13590_v27, %v13590_v27 }
 0x9fa   :  { %3805 = vadd.xlane.f32.xlu0 %v3804_v53  ;;  %v3673_v0 = vpop.xlane.xlu0 %3672 }
 0x9fb   :  { %v13602_v18 = vsub.f32 %v13453_v9, %v3703_v10  ;;  %v3704_v37 = vmul.f32 0.03125, %v3673_v0  ;;  %v3807_v44 = vsel %vm133_vm0, %v3749_v54, 0.0  ;;  %v3750_v62 = vmul.f32 %v13596_v48, %v13596_v48  ;;  %v13644_v0 = vld [vmem:[%s16417_s8] ss:$0 sm:$0xff] }
 0x9fc   :  { %v3676_v4 = vpop.xlane.xlu1 %3675  ;;  %3808 = vadd.xlane.f32.xlu1 %v3807_v44 }
 0x9fd   :  { %v13608_v26 = vsub.f32 %v13463_v23, %v3704_v37  ;;  %v3705_v34 = vmul.f32 0.03125, %v3676_v4  ;;  %v3810_v63 = vsel %vm133_vm0, %v3750_v62, 0.0  ;;  %v3751_v32 = vmul.f32 %v13602_v18, %v13602_v18 }
 0x9fe   :  { %3811 = vadd.xlane.f32.xlu0 %v3810_v63  ;;  %v3679_v9 = vpop.xlane.xlu0 %3678 }
 0x9ff   :  { %v13614_v22 = vsub.f32 %v13472_v60, %v3705_v34  ;;  %v3706_v50 = vmul.f32 0.03125, %v3679_v9  ;;  %v3813_v20 = vsel %vm133_vm0, %v3751_v32, 0.0  ;;  %v3752_v13 = vmul.f32 %v13608_v26, %v13608_v26 }
 0xa00   :  { %v3682_v61 = vpop.xlane.xlu1 %3681  ;;  %3814 = vadd.xlane.f32.xlu1 %v3813_v20 }
 0xa01   :  { %v13620_v23 = vsub.f32 %v13469_v51, %v3706_v50  ;;  %v3707_v31 = vmul.f32 0.03125, %v3682_v61  ;;  %v3816_v19 = vsel %vm133_vm0, %v3752_v13, 0.0  ;;  %v3753_v28 = vmul.f32 %v13614_v22, %v13614_v22 }
 0xa02   :  { %3817 = vadd.xlane.f32.xlu0 %v3816_v19  ;;  %v13652_v19 = vld [vmem:[%s16418_s9] ss:$0 sm:$0xff] }
 0xa03   :  { %v13626_v60 = vsub.f32 %v13477_v3, %v3707_v31  ;;  %v3819_v25 = vsel %vm133_vm0, %v3753_v28, 0.0  ;;  %v3754_v40 = vmul.f32 %v13620_v23, %v13620_v23  ;;  %v11270_v3 = vld [vmem:[%s16416_s12] sm:$0xff]  }
 0xa04   :  { %3820 = vadd.xlane.f32.xlu1 %v3819_v25  ;;  %10621 = vmatprep.subr.bf16.mxu0 %v11270_v3 }
 0xa05   :  { %v3822_v52 = vsel %vm133_vm0, %v3754_v40, 0.0  ;;  %v3755_v51 = vmul.f32 %v13626_v60, %v13626_v60  ;;  %10622 = vmatpush3.bf16.msra.mxu0 %v11270_v3 }
 0xa06   :  { %3823 = vadd.xlane.f32.xlu0 %v3822_v52  ;;  %10623 = vmatprep.subr.bf16.mxu0 %v11271_v46 }
 0xa07   :  { %v3825_v14 = vsel %vm133_vm0, %v3755_v51, 0.0 }
 0xa08   :  { %3826 = vadd.xlane.f32.xlu1 %v3825_v14 }
 0xa09   :  { %10624 = vmatpush3.bf16.msra.mxu0 %v11271_v46 }
 0xa54   :  { %v3758_v59 = vpop.xlane.xlu0 %3757 }
 0xa55   :  { %v3828_v35 = vmul.f32 0.03125, %v3758_v59 }
 0xa56   :  { %v3761_v56 = vpop.xlane.xlu1 %3760 }
 0xa57   :  { %v3852_v39 = vadd.f32 1e-05, %v3828_v35  ;;  %v3829_v43 = vmul.f32 0.03125, %v3761_v56 }
 0xa58   :  { %v3764_v5 = vpop.xlane.xlu0 %3763 }
 0xa59   :  { %11478 = vrsqrt.f32 %v3852_v39  ;;  %v3853_v42 = vadd.f32 1e-05, %v3829_v43  ;;  %v3830_v49 = vmul.f32 0.03125, %v3764_v5 }
 0xa5b   :  { %11480 = vrsqrt.f32 %v3853_v42  ;;  %v3854_v57 = vadd.f32 1e-05, %v3830_v49 }
 0xa5c   :  { %v3767_v15 = vpop.xlane.xlu1 %3766 }
 0xa5d   :  { %11482 = vrsqrt.f32 %v3854_v57  ;;  %v3831_v24 = vmul.f32 0.03125, %v3767_v15 }
 0xa5f   :  { %v3855_v58 = vadd.f32 1e-05, %v3831_v24 }
 0xa60   :  { %v3773_v30 = vpop.xlane.xlu1 %3772  ;;  %v3770_v12 = vpop.xlane.xlu0 %3769 }
 0xa61   :  { %11484 = vrsqrt.f32 %v3855_v58  ;;  %v3833_v10 = vmul.f32 0.03125, %v3773_v30  ;;  %v3832_v53 = vmul.f32 0.03125, %v3770_v12 }
 0xa63   :  { %v11479_v54 = vpop.eup %11478  ;;  %v3857_v37 = vadd.f32 1e-05, %v3833_v10  ;;  %v3856_v44 = vadd.f32 1e-05, %v3832_v53 }
 0xa64   :  { %v3779_v62 = vpop.xlane.xlu1 %3778  ;;  %v3776_v4 = vpop.xlane.xlu0 %3775  ;;  %v3900_v34 = vmul.f32 %v11479_v54, %v13486_v47 }
 0xa65   :  { %v11481_v63 = vpop.eup %11480  ;;  %11486 = vrsqrt.f32 %v3857_v37  ;;  %v3835_v32 = vmul.f32 0.03125, %v3779_v62  ;;  %v3834_v9 = vmul.f32 0.03125, %v3776_v4 }
 0xa66   :  { %11488 = vrsqrt.f32 %v3856_v44  ;;  %v3901_v50 = vmul.f32 %v11481_v63, %v13489_v8  ;;  %v3930_v20 = vmul.f32 %v13644_v0, %v3900_v34 }
 0xa67   :  { %v11483_v13 = vpop.eup %11482  ;;  %v3859_v61 = vadd.f32 1e-05, %v3835_v32  ;;  %v3858_v31 = vadd.f32 1e-05, %v3834_v9 }
 0xa68   :  { %v3902_v28 = vmul.f32 %v11483_v13, %v13494_v38  ;;  %v3931_v47 = vmul.f32 %v13644_v0, %v3901_v50  ;;  %v13657_v8 = vadd.f32 %v13652_v19, %v3930_v20 }
 0xa69   :  { %11490 = vrsqrt.f32 %v3859_v61  ;;  %v3782_v25 = vpop.xlane.xlu0 %3781 }
 0xa6a   :  { %11492 = vrsqrt.f32 %v3858_v31  ;;  %v3836_v40 = vmul.f32 0.03125, %v3782_v25  ;;  %v13660_v52 = vadd.f32 %v13652_v19, %v3931_v47  ;;  %v3932_v14 = vmul.f32 %v13644_v0, %v3902_v28 }
 0xa6b   :  { %v11485_v51 = vpop.eup %11484  ;;  %v3785_v3 = vpop.xlane.xlu1 %3784 }
 0xa6c   :  { %v3903_v46 = vmul.f32 %v11485_v51, %v13503_v17  ;;  %v3860_v59 = vadd.f32 1e-05, %v3836_v40  ;;  %v3837_v38 = vmul.f32 0.03125, %v3785_v3  ;;  %v3988_v35 = vpack.c.bf16 %v13660_v52, %v13657_v8 }
 0xa6d   :  { %v3788_v56 = vpop.xlane.xlu0 %3787  ;;  %v13669_v57 = vadd.f32 %v13652_v19, %v3932_v14 }
 0xa6e   :  { %v3933_v39 = vmul.f32 %v13644_v0, %v3903_v46  ;;  %11494 = vrsqrt.f32 %v3860_v59  ;;  %v3861_v43 = vadd.f32 1e-05, %v3837_v38  ;;  %v3838_v5 = vmul.f32 0.03125, %v3788_v56  ;;  %10597 = vmatprep.mubr.msk.bf16.mxu1 %vm133_vm0, %v3988_v35 }
 0xa6f   :  { %v11487_v42 = vpop.eup %11486  ;;  %v3791_v49 = vpop.xlane.xlu1 %3790 }
 0xa70   :  { %v11489_v15 = vpop.eup %11488  ;;  %11496 = vrsqrt.f32 %v3861_v43  ;;  %v3862_v17 = vadd.f32 1e-05, %v3838_v5  ;;  %v3839_v24 = vmul.f32 0.03125, %v3791_v49  ;;  %v13672_v58 = vadd.f32 %v13652_v19, %v3933_v39 }
 0xa71   :  { %v3904_v30 = vmul.f32 %v11489_v15, %v13512_v1  ;;  %v3905_v12 = vmul.f32 %v11487_v42, %v13509_v16 }
 0xa72   :  { %11498 = vrsqrt.f32 %v3862_v17  ;;  %v3863_v10 = vadd.f32 1e-05, %v3839_v24  ;;  %v3989_v53 = vpack.c.bf16 %v13672_v58, %v13669_v57 }
 0xa73   :  { %v11491_v54 = vpop.eup %11490  ;;  %v3934_v37 = vmul.f32 %v13644_v0, %v3904_v30  ;;  %v3935_v44 = vmul.f32 %v13644_v0, %v3905_v12 }
 0xa74   :  { %v11493_v62 = vpop.eup %11492  ;;  %11500 = vrsqrt.f32 %v3863_v10  ;;  %10598 = vmatmul.mubr.msk.bf16.vlgmr.msra.gmra.mrb[96].mxu1 %vm133_vm0, %v3989_v53  ;;  %v3907_v4 = vmul.f32 %v11491_v54, %v13520_v41 }
 0xa75   :  { %v13683_v1 = vadd.f32 %v13652_v19, %v3934_v37  ;;  %v13686_v16 = vadd.f32 %v13652_v19, %v3935_v44  ;;  %v3906_v34 = vmul.f32 %v11493_v62, %v13523_v33 }
 0xa76   :  { %v3937_v63 = vmul.f32 %v13644_v0, %v3907_v4 }
 0xa77   :  { %v3990_v32 = vpack.c.bf16 %v13686_v16, %v13683_v1  ;;  %v3936_v9 = vmul.f32 %v13644_v0, %v3906_v34 }
 0xa78   :  { %v11495_v50 = vpop.eup %11494  ;;  %v13694_v20 = vadd.f32 %v13652_v19, %v3937_v63 }
 0xa79   :  { %10601 = vmatprep.mubr.msk.bf16.mxu1 %vm133_vm0, %v3990_v32  ;;  %v13698_v41 = vadd.f32 %v13652_v19, %v3936_v9  ;;  %v3908_v13 = vmul.f32 %v11495_v50, %v13534_v45 }
 0xa7a   :  { %v11497_v61 = vpop.eup %11496 }
 0xa7b   :  { %v3991_v33 = vpack.c.bf16 %v13694_v20, %v13698_v41  ;;  %v3909_v31 = vmul.f32 %v11497_v61, %v13537_v21  ;;  %v3938_v28 = vmul.f32 %v13644_v0, %v3908_v13 }
 0xa7c   :  { %v11499_v47 = vpop.eup %11498 }
 0xa7d   :  { %10602 = vmatmul.mubr.msk.bf16.gmra.mrb[100].mxu1 %vm133_vm0, %v3991_v33  ;;  %v3939_v25 = vmul.f32 %v13644_v0, %v3909_v31  ;;  %v3910_v40 = vmul.f32 %v11499_v47, %v13542_v36  ;;  %v13709_v3 = vadd.f32 %v13652_v19, %v3938_v28 }
 0xa7e   :  { %v11501_v51 = vpop.eup %11500 }
 0xa7f   :  { %v3794_v14 = vpop.xlane.xlu0 %3793  ;;  %v13712_v45 = vadd.f32 %v13652_v19, %v3939_v25  ;;  %v3911_v46 = vmul.f32 %v11501_v51, %v13548_v11  ;;  %v3940_v21 = vmul.f32 %v13644_v0, %v3910_v40 }
 0xa80   :  { %v3840_v59 = vmul.f32 0.03125, %v3794_v14 }
 0xa81   :  { %v3797_v38 = vpop.xlane.xlu1 %3796  ;;  %v3992_v35 = vpack.c.bf16 %v13712_v45, %v13709_v3  ;;  %v3941_v56 = vmul.f32 %v13644_v0, %v3911_v46  ;;  %v13721_v5 = vadd.f32 %v13652_v19, %v3940_v21 }
 0xa82   :  { %v3864_v36 = vadd.f32 1e-05, %v3840_v59  ;;  %v3841_v39 = vmul.f32 0.03125, %v3797_v38 }
 0xa83   :  { %10605 = vmatprep.mubr.msk.bf16.mxu1 %vm133_vm0, %v3992_v35  ;;  %v3800_v43 = vpop.xlane.xlu0 %3799  ;;  %v13724_v42 = vadd.f32 %v13652_v19, %v3941_v56 }
 0xa84   :  { %11502 = vrsqrt.f32 %v3864_v36  ;;  %v3865_v11 = vadd.f32 1e-05, %v3841_v39  ;;  %v3842_v49 = vmul.f32 0.03125, %v3800_v43 }
 0xa85   :  { %v3803_v15 = vpop.xlane.xlu1 %3802  ;;  %v3993_v17 = vpack.c.bf16 %v13724_v42, %v13721_v5 }
 0xa86   :  { %11504 = vrsqrt.f32 %v3865_v11  ;;  %v3866_v24 = vadd.f32 1e-05, %v3842_v49  ;;  %v3843_v30 = vmul.f32 0.03125, %v3803_v15 }
 0xa87   :  { %10606 = vmatmul.mubr.msk.bf16.gmra.mrb[104].mxu1 %vm133_vm0, %v3993_v17  ;;  %v3806_v12 = vpop.xlane.xlu0 %3805 }
 0xa88   :  { %11506 = vrsqrt.f32 %v3866_v24  ;;  %v3867_v10 = vadd.f32 1e-05, %v3843_v30  ;;  %v3844_v53 = vmul.f32 0.03125, %v3806_v12 }
 0xa89   :  { %v3809_v54 = vpop.xlane.xlu1 %3808 }
 0xa8a   :  { %11508 = vrsqrt.f32 %v3867_v10  ;;  %v3868_v37 = vadd.f32 1e-05, %v3844_v53  ;;  %v3845_v44 = vmul.f32 0.03125, %v3809_v54 }
 0xa8b   :  { %v3812_v62 = vpop.xlane.xlu0 %3811 }
 0xa8c   :  { %11510 = vrsqrt.f32 %v3868_v37  ;;  %v3869_v4 = vadd.f32 1e-05, %v3845_v44  ;;  %v3846_v34 = vmul.f32 0.03125, %v3812_v62 }
 0xa8d   :  { %v3815_v63 = vpop.xlane.xlu1 %3814 }
 0xa8e   :  { %v11503_v32 = vpop.eup %11502  ;;  %11512 = vrsqrt.f32 %v3869_v4  ;;  %v3870_v9 = vadd.f32 1e-05, %v3846_v34  ;;  %v3847_v50 = vmul.f32 0.03125, %v3815_v63 }
 0xa8f   :  { %v3818_v13 = vpop.xlane.xlu0 %3817  ;;  %v3912_v61 = vmul.f32 %v11503_v32, %v13561_v29 }
 0xa90   :  { %v11505_v33 = vpop.eup %11504  ;;  %11514 = vrsqrt.f32 %v3870_v9  ;;  %v3871_v31 = vadd.f32 1e-05, %v3847_v50  ;;  %v3848_v28 = vmul.f32 0.03125, %v3818_v13 }
 0xa91   :  { %v3821_v47 = vpop.xlane.xlu1 %3820  ;;  %v3913_v25 = vmul.f32 %v11505_v33, %v13564_v55  ;;  %v3942_v40 = vmul.f32 %v13644_v0, %v3912_v61 }
 0xa92   :  { %v11507_v51 = vpop.eup %11506  ;;  %11516 = vrsqrt.f32 %v3871_v31  ;;  %v3872_v14 = vadd.f32 1e-05, %v3848_v28  ;;  %v3849_v46 = vmul.f32 0.03125, %v3821_v47 }
 0xa93   :  { %v3824_v21 = vpop.xlane.xlu0 %3823  ;;  %v3943_v59 = vmul.f32 %v13644_v0, %v3913_v25  ;;  %v3914_v38 = vmul.f32 %v11507_v51, %v13572_v7  ;;  %v13735_v39 = vadd.f32 %v13652_v19, %v3942_v40 }
 0xa94   :  { %v11509_v35 = vpop.eup %11508  ;;  %11518 = vrsqrt.f32 %v3872_v14  ;;  %v3873_v29 = vadd.f32 1e-05, %v3849_v46  ;;  %v3850_v56 = vmul.f32 0.03125, %v3824_v21 }
 0xa95   :  { %v3827_v36 = vpop.xlane.xlu1 %3826  ;;  %v13738_v55 = vadd.f32 %v13652_v19, %v3943_v59  ;;  %v3915_v43 = vmul.f32 %v11509_v35, %v13578_v6  ;;  %v3944_v11 = vmul.f32 %v13644_v0, %v3914_v38 }
 0xa96   :  { %v11511_v49 = vpop.eup %11510  ;;  %11520 = vrsqrt.f32 %v3873_v29  ;;  %v3874_v15 = vadd.f32 1e-05, %v3850_v56  ;;  %v3851_v17 = vmul.f32 0.03125, %v3827_v36 }
 0xa97   :  { %v3994_v7 = vpack.c.bf16 %v13738_v55, %v13735_v39  ;;  %v3945_v24 = vmul.f32 %v13644_v0, %v3915_v43  ;;  %v3916_v30 = vmul.f32 %v11511_v49, %v13584_v2  ;;  %v13748_v6 = vadd.f32 %v13652_v19, %v3944_v11 }
 0xa98   :  { %v11513_v12 = vpop.eup %11512  ;;  %11522 = vrsqrt.f32 %v3874_v15  ;;  %v3875_v10 = vadd.f32 1e-05, %v3851_v17 }
 0xa99   :  { %10609 = vmatprep.mubr.msk.bf16.mxu1 %vm133_vm0, %v3994_v7  ;;  %v13751_v53 = vadd.f32 %v13652_v19, %v3945_v24  ;;  %v3917_v54 = vmul.f32 %v11513_v12, %v13590_v27  ;;  %v3946_v37 = vmul.f32 %v13644_v0, %v3916_v30 }
 0xa9a   :  { %v11515_v44 = vpop.eup %11514  ;;  %11524 = vrsqrt.f32 %v3875_v10 }
 0xa9b   :  { %v3995_v2 = vpack.c.bf16 %v13751_v53, %v13748_v6  ;;  %v3947_v62 = vmul.f32 %v13644_v0, %v3917_v54  ;;  %v3918_v4 = vmul.f32 %v11515_v44, %v13596_v48  ;;  %v13761_v63 = vadd.f32 %v13652_v19, %v3946_v37 }
 0xa9c   :  { %v11517_v34 = vpop.eup %11516 }
 0xa9d   :  { %10610 = vmatmul.mubr.msk.bf16.gmra.mrb[108].mxu1 %vm133_vm0, %v3995_v2  ;;  %v13764_v32 = vadd.f32 %v13652_v19, %v3947_v62  ;;  %v3919_v27 = vmul.f32 %v11517_v34, %v13602_v18  ;;  %v3948_v9 = vmul.f32 %v13644_v0, %v3918_v4 }
 0xa9e   :  { %v11519_v50 = vpop.eup %11518 }
 0xa9f   :  { %v3996_v13 = vpack.c.bf16 %v13764_v32, %v13761_v63  ;;  %v3949_v61 = vmul.f32 %v13644_v0, %v3919_v27  ;;  %v3920_v48 = vmul.f32 %v11519_v50, %v13608_v26  ;;  %v13774_v31 = vadd.f32 %v13652_v19, %v3948_v9 }
 0xaa0   :  { %v11521_v33 = vpop.eup %11520 }
 0xaa1   :  { %10613 = vmatprep.mubr.msk.bf16.mxu1 %vm133_vm0, %v3996_v13  ;;  %v13777_v28 = vadd.f32 %v13652_v19, %v3949_v61  ;;  %v3921_v18 = vmul.f32 %v11521_v33, %v13614_v22  ;;  %v3950_v47 = vmul.f32 %v13644_v0, %v3920_v48 }
 0xaa2   :  { %v11523_v25 = vpop.eup %11522 }
 0xaa3   :  { %v3997_v40 = vpack.c.bf16 %v13777_v28, %v13774_v31  ;;  %v3951_v51 = vmul.f32 %v13644_v0, %v3921_v18  ;;  %v3922_v26 = vmul.f32 %v11523_v25, %v13620_v23  ;;  %v13787_v46 = vadd.f32 %v13652_v19, %v3950_v47 }
 0xaa4   :  { %v11525_v14 = vpop.eup %11524 }
 0xaa5   :  { %10614 = vmatmul.mubr.msk.bf16.gmra.mrb[112].mxu1 %vm133_vm0, %v3997_v40  ;;  %v13790_v21 = vadd.f32 %v13652_v19, %v3951_v51  ;;  %v3923_v22 = vmul.f32 %v11525_v14, %v13626_v60  ;;  %v3952_v59 = vmul.f32 %v13644_v0, %v3922_v26  ;;  %v11272_v60 = vld [vmem:[%s16416_s12 + $0x10] sm:$0xff]  }
 0xaa6   :  { %10625 = vmatprep.subr.bf16.mxu0 %v11272_v60 }
 0xaa7   :  { %v3998_v38 = vpack.c.bf16 %v13790_v21, %v13787_v46  ;;  %v3953_v35 = vmul.f32 %v13644_v0, %v3923_v22  ;;  %v13799_v23 = vadd.f32 %v13652_v19, %v3952_v59  ;;  %10626 = vmatpush3.bf16.msra.mxu0 %v11272_v60  ;;  %v11273_v0 = vld [vmem:[%s16416_s12 + $0x18] sm:$0xff]  }
 0xaa8   :  { %10627 = vmatprep.subr.bf16.mxu0 %v11273_v0 }
 0xaa9   :  { %10617 = vmatprep.mubr.msk.bf16.mxu1 %vm133_vm0, %v3998_v38  ;;  %v13802_v29 = vadd.f32 %v13652_v19, %v3953_v35  ;;  %v13816_v19 = vld [vmem:[%s16419_s11] ss:$0 sm:$0xff] }
 0xaab   :  { %v3999_v56 = vpack.c.bf16 %v13802_v29, %v13799_v23  ;;  %10628 = vmatpush3.bf16.msra.mxu0 %v11273_v0 }
 0xaad   :  { %10618 = vmatmul.mubr.msk.bf16.gmra.mrb[116].mxu1 %vm133_vm0, %v3999_v56 }
 0xb47   :  { %v10599_v36 = vpop.f32.mrb[96].mxu1 }
 0xb48   :  { %v4098_v43 = vadd.f32 %v10599_v36, %v13816_v19  ;;  %v4089_v11 = vpop.f32.mrb[97].mxu1 }
 0xb49   :  { %v4090_v49 = vadd.f32 %v13816_v19, %v4089_v11  ;;  %v10600_v15 = vpop.f32.mrb[98].mxu1 }
 0xb4a   :  { %v4101_v17 = vadd.f32 %v10600_v15, %v13816_v19  ;;  %v4092_v7 = vpop.f32.mrb[99].mxu1  ;;  %v4186_v30 = vmax.f32 %v4098_v43, 0.0 }
 0xb4b   :  { %v4093_v24 = vadd.f32 %v13816_v19, %v4092_v7  ;;  %v4184_v10 = vmax.f32 %v4090_v49, 0.0 }
 0xb4c   :  { %v4187_v12 = vmax.f32 %v4101_v17, 0.0 }
 0xb4d   :  { %v4185_v54 = vmax.f32 %v4093_v24, 0.0 }
 0xb4e   :  { %v4217_v37 = vpack.c.bf16 %v4187_v12, %v4186_v30 }
 0xb4f   :  { %v4216_v44 = vpack.c.bf16 %v4185_v54, %v4184_v10 }
 0xb50   :  { %v10603_v2 = vpop.f32.mrb[100].mxu1 }
 0xb51   :  { %v4114_v62 = vadd.f32 %v10603_v2, %v13816_v19  ;;  %v4105_v4 = vpop.f32.mrb[101].mxu1  ;;  %10629 = vmatprep.mubr.msk.bf16.mxu0 %vm4259_vm5, %v4216_v44 }
 0xb52   :  { %v4106_v34 = vadd.f32 %v13816_v19, %v4105_v4  ;;  %v10604_v27 = vpop.f32.mrb[102].mxu1  ;;  %10630 = vmatmul.mubr.msk.bf16.vlgmr.msra.gmra.mrb[104].mxu0 %vm4259_vm5, %v4217_v37 }
 0xb53   :  { %v4117_v9 = vadd.f32 %v10604_v27, %v13816_v19  ;;  %v4108_v50 = vpop.f32.mrb[103].mxu1  ;;  %v4190_v61 = vmax.f32 %v4114_v62, 0.0 }
 0xb54   :  { %v4109_v13 = vadd.f32 %v13816_v19, %v4108_v50  ;;  %v4188_v33 = vmax.f32 %v4106_v34, 0.0 }
 0xb55   :  { %v4191_v48 = vmax.f32 %v4117_v9, 0.0 }
 0xb56   :  { %v4189_v18 = vmax.f32 %v4109_v13, 0.0 }
 0xb57   :  { %v4219_v47 = vpack.c.bf16 %v4191_v48, %v4190_v61 }
 0xb58   :  { %v4218_v25 = vpack.c.bf16 %v4189_v18, %v4188_v33 }
 0xb5a   :  { %10633 = vmatprep.mubr.msk.bf16.mxu0 %vm4259_vm5, %v4218_v25  ;;  %v10607_v40 = vpop.f32.mrb[104].mxu1 }
 0xb5b   :  { %v4130_v51 = vadd.f32 %v10607_v40, %v13816_v19  ;;  %10634 = vmatmul.mubr.msk.bf16.gmra.mrb[108].mxu0 %vm4259_vm5, %v4219_v47  ;;  %v4121_v26 = vpop.f32.mrb[105].mxu1 }
 0xb5c   :  { %v4122_v14 = vadd.f32 %v13816_v19, %v4121_v26  ;;  %v10608_v22 = vpop.f32.mrb[106].mxu1 }
 0xb5d   :  { %v4133_v59 = vadd.f32 %v10608_v22, %v13816_v19  ;;  %v4124_v38 = vpop.f32.mrb[107].mxu1  ;;  %v4194_v56 = vmax.f32 %v4130_v51, 0.0 }
 0xb5e   :  { %v4125_v35 = vadd.f32 %v13816_v19, %v4124_v38  ;;  %v4192_v0 = vmax.f32 %v4122_v14, 0.0 }
 0xb5f   :  { %v4195_v60 = vmax.f32 %v4133_v59, 0.0 }
 0xb60   :  { %v4193_v36 = vmax.f32 %v4125_v35, 0.0 }
 0xb61   :  { %v4221_v43 = vpack.c.bf16 %v4195_v60, %v4194_v56 }
 0xb62   :  { %v4220_v11 = vpack.c.bf16 %v4193_v36, %v4192_v0 }
 0xb64   :  { %10637 = vmatprep.mubr.msk.bf16.mxu0 %vm4259_vm5, %v4220_v11 }
 0xb65   :  { %10638 = vmatmul.mubr.msk.bf16.gmra.mrb[112].mxu0 %vm4259_vm5, %v4221_v43 }
 0xb70   :  { %v10611_v49 = vpop.f32.mrb[108].mxu1 }
 0xb71   :  { %v4146_v15 = vadd.f32 %v10611_v49, %v13816_v19  ;;  %v4137_v17 = vpop.f32.mrb[109].mxu1 }
 0xb72   :  { %v4138_v7 = vadd.f32 %v13816_v19, %v4137_v17  ;;  %v10612_v24 = vpop.f32.mrb[110].mxu1 }
 0xb73   :  { %v4149_v30 = vadd.f32 %v10612_v24, %v13816_v19  ;;  %v4140_v12 = vpop.f32.mrb[111].mxu1  ;;  %v4198_v54 = vmax.f32 %v4146_v15, 0.0 }
 0xb74   :  { %v4141_v10 = vadd.f32 %v13816_v19, %v4140_v12  ;;  %v4196_v44 = vmax.f32 %v4138_v7, 0.0  ;;  %v13857_v7 = vld [vmem:[%s16420_s13] ss:$0 sm:$0xff] }
 0xb75   :  { %v4199_v37 = vmax.f32 %v4149_v30, 0.0 }
 0xb76   :  { %v4197_v2 = vmax.f32 %v4141_v10, 0.0 }
 0xb77   :  { %v4223_v62 = vpack.c.bf16 %v4199_v37, %v4198_v54 }
 0xb78   :  { %v4222_v4 = vpack.c.bf16 %v4197_v2, %v4196_v44  ;;  %v10615_v34 = vpop.f32.mrb[112].mxu1 }
 0xb79   :  { %v4162_v27 = vadd.f32 %v10615_v34, %v13816_v19  ;;  %v4153_v9 = vpop.f32.mrb[113].mxu1 }
 0xb7a   :  { %v4154_v50 = vadd.f32 %v13816_v19, %v4153_v9  ;;  %v10616_v13 = vpop.f32.mrb[114].mxu1  ;;  %10641 = vmatprep.mubr.msk.bf16.mxu0 %vm4259_vm5, %v4222_v4 }
 0xb7b   :  { %v4165_v61 = vadd.f32 %v10616_v13, %v13816_v19  ;;  %v4156_v48 = vpop.f32.mrb[115].mxu1  ;;  %10642 = vmatmul.mubr.msk.bf16.gmra.mrb[116].mxu0 %vm4259_vm5, %v4223_v62  ;;  %v4202_v18 = vmax.f32 %v4162_v27, 0.0 }
 0xb7c   :  { %v4157_v33 = vadd.f32 %v13816_v19, %v4156_v48  ;;  %v4200_v25 = vmax.f32 %v4154_v50, 0.0 }
 0xb7d   :  { %v4203_v47 = vmax.f32 %v4165_v61, 0.0 }
 0xb7e   :  { %v4201_v40 = vmax.f32 %v4157_v33, 0.0 }
 0xb7f   :  { %v4225_v51 = vpack.c.bf16 %v4203_v47, %v4202_v18 }
 0xb80   :  { %v4224_v26 = vpack.c.bf16 %v4201_v40, %v4200_v25  ;;  %v10619_v14 = vpop.f32.mrb[116].mxu1 }
 0xb81   :  { %v4178_v22 = vadd.f32 %v10619_v14, %v13816_v19  ;;  %v4169_v59 = vpop.f32.mrb[117].mxu1 }
 0xb82   :  { %v4170_v38 = vadd.f32 %v13816_v19, %v4169_v59  ;;  %v10620_v35 = vpop.f32.mrb[118].mxu1  ;;  %10645 = vmatprep.mubr.msk.bf16.mxu0 %vm4259_vm5, %v4224_v26 }
 0xb83   :  { %v4181_v56 = vadd.f32 %v10620_v35, %v13816_v19  ;;  %v4172_v60 = vpop.f32.mrb[119].mxu1  ;;  %10646 = vmatmul.mubr.msk.bf16.gmra.mrb[120].mxu0 %vm4259_vm5, %v4225_v51  ;;  %v4206_v36 = vmax.f32 %v4178_v22, 0.0 }
 0xb84   :  { %v4173_v0 = vadd.f32 %v13816_v19, %v4172_v60  ;;  %v4204_v11 = vmax.f32 %v4170_v38, 0.0 }
 0xb85   :  { %v4207_v43 = vmax.f32 %v4181_v56, 0.0 }
 0xb86   :  { %v4205_v49 = vmax.f32 %v4173_v0, 0.0 }
 0xb87   :  { %v4227_v15 = vpack.c.bf16 %v4207_v43, %v4206_v36 }
 0xb88   :  { %v4226_v17 = vpack.c.bf16 %v4205_v49, %v4204_v11 }
 0xb8a   :  { %10649 = vmatprep.mubr.msk.bf16.mxu0 %vm4259_vm5, %v4226_v17 }
 0xb8b   :  { %10650 = vmatmul.mubr.msk.bf16.gmra.mrb[124].mxu0 %vm4259_vm5, %v4227_v15 }
 0xc25   :  { %v10631_v24 = vpop.f32.mrb[104].mxu0 }
 0xc26   :  { %v4330_v30 = vpop.f32.mrb[105].mxu0  ;;  %v4339_v12 = vadd.f32 %v10631_v24, %v13857_v7 }
 0xc27   :  { %v4331_v19 = vadd.f32 %v13857_v7, %v4330_v30  ;;  %v10632_v10 = vpop.f32.mrb[106].mxu0 }
 0xc28   :  { %v4333_v54 = vpop.f32.mrb[107].mxu0  ;;  %v4342_v44 = vadd.f32 %v10632_v10, %v13857_v7  ;;  %v13867_v62 = vadd.f32 %v4339_v12, %v13669_v57 }
 0xc29   :  { %v13862_v37 = vadd.f32 %v4331_v19, %v13657_v8  ;;  %v4334_v2 = vadd.f32 %v13857_v7, %v4333_v54 }
 0xc2a   :  { %v13875_v27 = vadd.f32 %v4342_v44, %v13672_v58  ;;  %v4457_v57 = vsel %vm133_vm0, %v13867_v62, 0.0 }
 0xc2b   :  { %v13870_v4 = vadd.f32 %v4334_v2, %v13660_v52  ;;  %v4451_v34 = vsel %vm133_vm0, %v13862_v37, 0.0 }
 0xc2c   :  { %4452 = vadd.xlane.f32.xlu0 %v4451_v34  ;;  %v4460_v58 = vsel %vm133_vm0, %v13875_v27, 0.0 }
 0xc2d   :  { %v4454_v8 = vsel %vm133_vm0, %v13870_v4, 0.0 }
 0xc2e   :  { %v10635_v9 = vpop.f32.mrb[108].mxu0  ;;  %4455 = vadd.xlane.f32.xlu1 %v4454_v8 }
 0xc2f   :  { %v4346_v50 = vpop.f32.mrb[109].mxu0  ;;  %v4355_v13 = vadd.f32 %v10635_v9, %v13857_v7 }
 0xc30   :  { %v4347_v52 = vadd.f32 %v13857_v7, %v4346_v50  ;;  %v10636_v61 = vpop.f32.mrb[110].mxu0  ;;  %4458 = vadd.xlane.f32.xlu0 %v4457_v57 }
 0xc31   :  { %v4349_v48 = vpop.f32.mrb[111].mxu0  ;;  %v4358_v18 = vadd.f32 %v10636_v61, %v13857_v7  ;;  %v13891_v25 = vadd.f32 %v4355_v13, %v13698_v41 }
 0xc32   :  { %v13886_v33 = vadd.f32 %v4347_v52, %v13683_v1  ;;  %v4350_v47 = vadd.f32 %v13857_v7, %v4349_v48  ;;  %4461 = vadd.xlane.f32.xlu1 %v4460_v58 }
 0xc33   :  { %v13899_v26 = vadd.f32 %v4358_v18, %v13694_v20  ;;  %v4469_v14 = vsel %vm133_vm0, %v13891_v25, 0.0 }
 0xc34   :  { %v13894_v40 = vadd.f32 %v4350_v47, %v13686_v16  ;;  %v4463_v51 = vsel %vm133_vm0, %v13886_v33, 0.0 }
 0xc35   :  { %4464 = vadd.xlane.f32.xlu0 %v4463_v51  ;;  %v4472_v38 = vsel %vm133_vm0, %v13899_v26, 0.0 }
 0xc36   :  { %v4466_v1 = vsel %vm133_vm0, %v13894_v40, 0.0 }
 0xc37   :  { %4467 = vadd.xlane.f32.xlu1 %v4466_v1 }
 0xc38   :  { %v10639_v22 = vpop.f32.mrb[112].mxu0 }
 0xc39   :  { %4470 = vadd.xlane.f32.xlu0 %v4469_v14  ;;  %v4362_v41 = vpop.f32.mrb[113].mxu0  ;;  %v4371_v16 = vadd.f32 %v10639_v22, %v13857_v7 }
 0xc3a   :  { %v4363_v59 = vadd.f32 %v13857_v7, %v4362_v41  ;;  %v10640_v35 = vpop.f32.mrb[114].mxu0 }
 0xc3b   :  { %4473 = vadd.xlane.f32.xlu1 %v4472_v38  ;;  %v4365_v20 = vpop.f32.mrb[115].mxu0  ;;  %v4374_v60 = vadd.f32 %v10640_v35, %v13857_v7  ;;  %v13915_v36 = vadd.f32 %v4371_v16, %v13721_v5 }
 0xc3c   :  { %v13910_v56 = vadd.f32 %v4363_v59, %v13709_v3  ;;  %v4366_v0 = vadd.f32 %v13857_v7, %v4365_v20 }
 0xc3d   :  { %v13923_v49 = vadd.f32 %v4374_v60, %v13724_v42  ;;  %v4481_v15 = vsel %vm133_vm0, %v13915_v36, 0.0 }
 0xc3e   :  { %v13918_v43 = vadd.f32 %v4366_v0, %v13712_v45  ;;  %v4475_v11 = vsel %vm133_vm0, %v13910_v56, 0.0 }
 0xc3f   :  { %4476 = vadd.xlane.f32.xlu0 %v4475_v11  ;;  %v4484_v5 = vsel %vm133_vm0, %v13923_v49, 0.0 }
 0xc40   :  { %v4478_v3 = vsel %vm133_vm0, %v13918_v43, 0.0 }
 0xc41   :  { %4479 = vadd.xlane.f32.xlu1 %v4478_v3 }
 0xc43   :  { %4482 = vadd.xlane.f32.xlu0 %v4481_v15 }
 0xc45   :  { %4485 = vadd.xlane.f32.xlu1 %v4484_v5 }
 0xc4e   :  { %v10643_v45 = vpop.f32.mrb[116].mxu0 }
 0xc4f   :  { %v4378_v17 = vpop.f32.mrb[117].mxu0  ;;  %v4387_v24 = vadd.f32 %v10643_v45, %v13857_v7 }
 0xc50   :  { %v4379_v30 = vadd.f32 %v13857_v7, %v4378_v17  ;;  %v10644_v42 = vpop.f32.mrb[118].mxu0 }
 0xc51   :  { %v4381_v12 = vpop.f32.mrb[119].mxu0  ;;  %v4390_v10 = vadd.f32 %v10644_v42, %v13857_v7  ;;  %v13939_v44 = vadd.f32 %v4387_v24, %v13748_v6 }
 0xc52   :  { %v13934_v19 = vadd.f32 %v4379_v30, %v13735_v39  ;;  %v4382_v54 = vadd.f32 %v13857_v7, %v4381_v12 }
 0xc53   :  { %v13947_v8 = vadd.f32 %v4390_v10, %v13751_v53 }
 0xc54   :  { %v13942_v2 = vadd.f32 %v4382_v54, %v13738_v55  ;;  %v4487_v34 = vsel %vm133_vm0, %v13934_v19, 0.0  ;;  %v4493_v55 = vsel %vm133_vm0, %v13939_v44, 0.0 }
 0xc55   :  { %4488 = vadd.xlane.f32.xlu0 %v4487_v34  ;;  %v4496_v58 = vsel %vm133_vm0, %v13947_v8, 0.0 }
 0xc56   :  { %v10647_v9 = vpop.f32.mrb[120].mxu0  ;;  %v4490_v39 = vsel %vm133_vm0, %v13942_v2, 0.0 }
 0xc57   :  { %4491 = vadd.xlane.f32.xlu1 %v4490_v39  ;;  %v4394_v50 = vpop.f32.mrb[121].mxu0  ;;  %v4403_v57 = vadd.f32 %v10647_v9, %v13857_v7 }
 0xc58   :  { %v4395_v6 = vadd.f32 %v13857_v7, %v4394_v50  ;;  %v10648_v13 = vpop.f32.mrb[122].mxu0 }
 0xc59   :  { %4494 = vadd.xlane.f32.xlu0 %v4493_v55  ;;  %v4397_v52 = vpop.f32.mrb[123].mxu0  ;;  %v4406_v53 = vadd.f32 %v10648_v13, %v13857_v7  ;;  %v13963_v18 = vadd.f32 %v4403_v57, %v13774_v31 }
 0xc5a   :  { %v13956_v61 = vadd.f32 %v4395_v6, %v13761_v63  ;;  %v4398_v48 = vadd.f32 %v13857_v7, %v4397_v52 }
 0xc5b   :  { %4497 = vadd.xlane.f32.xlu1 %v4496_v58  ;;  %v13971_v63 = vadd.f32 %v4406_v53, %v13777_v28 }
 0xc5c   :  { %v13966_v47 = vadd.f32 %v4398_v48, %v13764_v32  ;;  %v4499_v51 = vsel %vm133_vm0, %v13956_v61, 0.0  ;;  %v4505_v32 = vsel %vm133_vm0, %v13963_v18, 0.0 }
 0xc5d   :  { %4500 = vadd.xlane.f32.xlu0 %v4499_v51  ;;  %v4508_v20 = vsel %vm133_vm0, %v13971_v63, 0.0 }
 0xc5e   :  { %v10651_v1 = vpop.f32.mrb[124].mxu0  ;;  %v4502_v14 = vsel %vm133_vm0, %v13966_v47, 0.0 }
 0xc5f   :  { %4503 = vadd.xlane.f32.xlu1 %v4502_v14  ;;  %v4410_v22 = vpop.f32.mrb[125].mxu0  ;;  %v4419_v41 = vadd.f32 %v10651_v1, %v13857_v7 }
 0xc60   :  { %v4411_v31 = vadd.f32 %v13857_v7, %v4410_v22  ;;  %v10652_v16 = vpop.f32.mrb[126].mxu0 }
 0xc61   :  { %4506 = vadd.xlane.f32.xlu0 %v4505_v32  ;;  %v4413_v59 = vpop.f32.mrb[127].mxu0  ;;  %v4422_v28 = vadd.f32 %v10652_v16, %v13857_v7  ;;  %v13987_v60 = vadd.f32 %v4419_v41, %v13799_v23 }
 0xc62   :  { %v13980_v38 = vadd.f32 %v4411_v31, %v13787_v46  ;;  %v4414_v35 = vadd.f32 %v13857_v7, %v4413_v59 }
 0xc63   :  { %4509 = vadd.xlane.f32.xlu1 %v4508_v20  ;;  %v13995_v46 = vadd.f32 %v4422_v28, %v13802_v29  ;;  %v4517_v3 = vsel %vm133_vm0, %v13987_v60, 0.0 }
 0xc64   :  { %v13990_v0 = vadd.f32 %v4414_v35, %v13790_v21  ;;  %v4511_v11 = vsel %vm133_vm0, %v13980_v38, 0.0 }
 0xc65   :  { %4512 = vadd.xlane.f32.xlu0 %v4511_v11  ;;  %v4520_v23 = vsel %vm133_vm0, %v13995_v46, 0.0 }
 0xc66   :  { %v4514_v7 = vsel %vm133_vm0, %v13990_v0, 0.0 }
 0xc67   :  { %4515 = vadd.xlane.f32.xlu1 %v4514_v7 }
 0xc69   :  { %4518 = vadd.xlane.f32.xlu0 %v4517_v3 }
 0xc6b   :  { %4521 = vadd.xlane.f32.xlu1 %v4520_v23 }
 0xcb9   :  { %v4453_v21 = vpop.xlane.xlu0 %4452 }
 0xcba   :  { %v4523_v15 = vmul.f32 0.03125, %v4453_v21 }
 0xcbb   :  { %v4456_v5 = vpop.xlane.xlu1 %4455 }
 0xcbc   :  { %v14004_v45 = vsub.f32 %v13862_v37, %v4523_v15  ;;  %v4524_v29 = vmul.f32 0.03125, %v4456_v5 }
 0xcbd   :  { %v4459_v17 = vpop.xlane.xlu0 %4458 }
 0xcbe   :  { %v14007_v24 = vsub.f32 %v13870_v4, %v4524_v29  ;;  %v4525_v30 = vmul.f32 0.03125, %v4459_v17  ;;  %v4571_v42 = vmul.f32 %v14004_v45, %v14004_v45 }
 0xcbf   :  { %v4462_v12 = vpop.xlane.xlu1 %4461 }
 0xcc0   :  { %v14012_v10 = vsub.f32 %v13867_v62, %v4525_v30  ;;  %v4526_v54 = vmul.f32 0.03125, %v4462_v12  ;;  %v4595_v34 = vsel %vm133_vm0, %v4571_v42, 0.0  ;;  %v4572_v37 = vmul.f32 %v14007_v24, %v14007_v24 }
 0xcc1   :  { %4596 = vadd.xlane.f32.xlu0 %v4595_v34 }
 0xcc2   :  { %v14018_v9 = vsub.f32 %v13875_v27, %v4526_v54  ;;  %v4465_v4 = vpop.xlane.xlu0 %4464  ;;  %v4598_v39 = vsel %vm133_vm0, %v4572_v37, 0.0  ;;  %v4573_v50 = vmul.f32 %v14012_v10, %v14012_v10 }
 0xcc3   :  { %v4527_v57 = vmul.f32 0.03125, %v4465_v4  ;;  %4599 = vadd.xlane.f32.xlu1 %v4598_v39 }
 0xcc4   :  { %v4468_v62 = vpop.xlane.xlu1 %4467  ;;  %v4601_v6 = vsel %vm133_vm0, %v4573_v50, 0.0  ;;  %v4574_v13 = vmul.f32 %v14018_v9, %v14018_v9 }
 0xcc5   :  { %v14027_v55 = vsub.f32 %v13886_v33, %v4527_v57  ;;  %v4528_v52 = vmul.f32 0.03125, %v4468_v62  ;;  %4602 = vadd.xlane.f32.xlu0 %v4601_v6 }
 0xcc6   :  { %v4471_v27 = vpop.xlane.xlu0 %4470  ;;  %v4604_v53 = vsel %vm133_vm0, %v4574_v13, 0.0 }
 0xcc7   :  { %v14031_v48 = vsub.f32 %v13894_v40, %v4528_v52  ;;  %v4529_v58 = vmul.f32 0.03125, %v4471_v27  ;;  %4605 = vadd.xlane.f32.xlu1 %v4604_v53  ;;  %v4575_v51 = vmul.f32 %v14027_v55, %v14027_v55  ;;  %v11275_v27 = vld [vmem:[%s16488_s26 + $0x18] sm:$0xff]  }
 0xcc8   :  { %v4474_v1 = vpop.xlane.xlu1 %4473 }
 0xcc9   :  { %v14036_v14 = vsub.f32 %v13891_v25, %v4529_v58  ;;  %v4530_v22 = vmul.f32 0.03125, %v4474_v1  ;;  %v4607_v33 = vsel %vm133_vm0, %v4575_v51, 0.0  ;;  %v4576_v41 = vmul.f32 %v14031_v48, %v14031_v48 }
 0xcca   :  { %4608 = vadd.xlane.f32.xlu0 %v4607_v33 }
 0xccb   :  { %v14042_v31 = vsub.f32 %v13899_v26, %v4530_v22  ;;  %v4610_v40 = vsel %vm133_vm0, %v4576_v41, 0.0  ;;  %v4577_v16 = vmul.f32 %v14036_v14, %v14036_v14 }
 0xccc   :  { %4611 = vadd.xlane.f32.xlu1 %v4610_v40  ;;  %v4477_v32 = vpop.xlane.xlu0 %4476 }
 0xccd   :  { %v4531_v59 = vmul.f32 0.03125, %v4477_v32  ;;  %v4613_v25 = vsel %vm133_vm0, %v4577_v16, 0.0  ;;  %v4578_v28 = vmul.f32 %v14042_v31, %v14042_v31 }
 0xcce   :  { %4614 = vadd.xlane.f32.xlu0 %v4613_v25  ;;  %v4480_v35 = vpop.xlane.xlu1 %4479 }
 0xccf   :  { %v14051_v20 = vsub.f32 %v13910_v56, %v4531_v59  ;;  %v4532_v26 = vmul.f32 0.03125, %v4480_v35  ;;  %v4616_v11 = vsel %vm133_vm0, %v4578_v28, 0.0 }
 0xcd0   :  { %4617 = vadd.xlane.f32.xlu1 %v4616_v11  ;;  %v4483_v7 = vpop.xlane.xlu0 %4482 }
 0xcd1   :  { %v14055_v3 = vsub.f32 %v13918_v43, %v4532_v26  ;;  %v4533_v23 = vmul.f32 0.03125, %v4483_v7  ;;  %v4579_v21 = vmul.f32 %v14051_v20, %v14051_v20 }
 0xcd2   :  { %v4486_v15 = vpop.xlane.xlu1 %4485 }
 0xcd3   :  { %v14060_v5 = vsub.f32 %v13915_v36, %v4533_v23  ;;  %v4534_v29 = vmul.f32 0.03125, %v4486_v15  ;;  %v4619_v56 = vsel %vm133_vm0, %v4579_v21, 0.0  ;;  %v4580_v17 = vmul.f32 %v14055_v3, %v14055_v3 }
 0xcd4   :  { %4620 = vadd.xlane.f32.xlu0 %v4619_v56 }
 0xcd5   :  { %v14066_v30 = vsub.f32 %v13923_v49, %v4534_v29  ;;  %v4622_v43 = vsel %vm133_vm0, %v4580_v17, 0.0  ;;  %v4581_v42 = vmul.f32 %v14060_v5, %v14060_v5  ;;  %v11274_v49 = vld [vmem:[%s16488_s26 + $0x10] sm:$0xff]  }
 0xcd6   :  { %4623 = vadd.xlane.f32.xlu1 %v4622_v43  ;;  %10653 = vmatprep.subr.bf16.mxu1 %v11274_v49 }
 0xcd7   :  { %v4625_v12 = vsel %vm133_vm0, %v4581_v42, 0.0  ;;  %v4582_v36 = vmul.f32 %v14066_v30, %v14066_v30  ;;  %10654 = vmatpush3.bf16.msra.mxu1 %v11274_v49 }
 0xcd8   :  { %4626 = vadd.xlane.f32.xlu0 %v4625_v12  ;;  %10655 = vmatprep.subr.bf16.mxu1 %v11275_v27 }
 0xcd9   :  { %v4628_v54 = vsel %vm133_vm0, %v4582_v36, 0.0 }
 0xcda   :  { %4629 = vadd.xlane.f32.xlu1 %v4628_v54 }
 0xcdb   :  { %10656 = vmatpush3.bf16.msra.mxu1 %v11275_v27 }
 0xce2   :  { %v4489_v34 = vpop.xlane.xlu0 %4488 }
 0xce3   :  { %v4535_v37 = vmul.f32 0.03125, %v4489_v34 }
 0xce4   :  { %v4492_v4 = vpop.xlane.xlu1 %4491 }
 0xce5   :  { %v14079_v39 = vsub.f32 %v13934_v19, %v4535_v37  ;;  %v4536_v50 = vmul.f32 0.03125, %v4492_v4 }
 0xce6   :  { %v4495_v57 = vpop.xlane.xlu0 %4494 }
 0xce7   :  { %v14082_v62 = vsub.f32 %v13942_v2, %v4536_v50  ;;  %v4537_v6 = vmul.f32 0.03125, %v4495_v57  ;;  %v4583_v13 = vmul.f32 %v14079_v39, %v14079_v39 }
 0xce8   :  { %v4498_v52 = vpop.xlane.xlu1 %4497 }
 0xce9   :  { %v14090_v53 = vsub.f32 %v13939_v44, %v4537_v6  ;;  %v4538_v19 = vmul.f32 0.03125, %v4498_v52  ;;  %v4631_v58 = vsel %vm133_vm0, %v4583_v13, 0.0  ;;  %v4584_v2 = vmul.f32 %v14082_v62, %v14082_v62 }
 0xcea   :  { %4632 = vadd.xlane.f32.xlu0 %v4631_v58  ;;  %v4501_v51 = vpop.xlane.xlu0 %4500 }
 0xceb   :  { %v14096_v1 = vsub.f32 %v13947_v8, %v4538_v19  ;;  %v4539_v22 = vmul.f32 0.03125, %v4501_v51  ;;  %v4634_v33 = vsel %vm133_vm0, %v4584_v2, 0.0  ;;  %v4585_v41 = vmul.f32 %v14090_v53, %v14090_v53 }
 0xcec   :  { %v4504_v44 = vpop.xlane.xlu1 %4503  ;;  %4635 = vadd.xlane.f32.xlu1 %v4634_v33 }
 0xced   :  { %v14102_v40 = vsub.f32 %v13956_v61, %v4539_v22  ;;  %v4540_v16 = vmul.f32 0.03125, %v4504_v44  ;;  %v4637_v32 = vsel %vm133_vm0, %v4585_v41, 0.0  ;;  %v4586_v59 = vmul.f32 %v14096_v1, %v14096_v1 }
 0xcee   :  { %4638 = vadd.xlane.f32.xlu0 %v4637_v32  ;;  %v4507_v8 = vpop.xlane.xlu0 %4506 }
 0xcef   :  { %v14108_v25 = vsub.f32 %v13966_v47, %v4540_v16  ;;  %v4541_v28 = vmul.f32 0.03125, %v4507_v8  ;;  %v4640_v35 = vsel %vm133_vm0, %v4586_v59, 0.0  ;;  %v4587_v26 = vmul.f32 %v14102_v40, %v14102_v40 }
 0xcf0   :  { %v4510_v11 = vpop.xlane.xlu1 %4509  ;;  %4641 = vadd.xlane.f32.xlu1 %v4640_v35 }
 0xcf1   :  { %v14114_v61 = vsub.f32 %v13963_v18, %v4541_v28  ;;  %v4542_v7 = vmul.f32 0.03125, %v4510_v11  ;;  %v4643_v23 = vsel %vm133_vm0, %v4587_v26, 0.0  ;;  %v4588_v21 = vmul.f32 %v14108_v25, %v14108_v25 }
 0xcf2   :  { %4644 = vadd.xlane.f32.xlu0 %v4643_v23  ;;  %v4513_v47 = vpop.xlane.xlu0 %4512 }
 0xcf3   :  { %v14120_v15 = vsub.f32 %v13971_v63, %v4542_v7  ;;  %v4543_v29 = vmul.f32 0.03125, %v4513_v47  ;;  %v4646_v56 = vsel %vm133_vm0, %v4588_v21, 0.0  ;;  %v4589_v17 = vmul.f32 %v14114_v61, %v14114_v61 }
 0xcf4   :  { %4647 = vadd.xlane.f32.xlu1 %v4646_v56  ;;  %v4516_v18 = vpop.xlane.xlu1 %4515 }
 0xcf5   :  { %v14126_v43 = vsub.f32 %v13980_v38, %v4543_v29  ;;  %v4544_v42 = vmul.f32 0.03125, %v4516_v18  ;;  %v4649_v12 = vsel %vm133_vm0, %v4589_v17, 0.0  ;;  %v4590_v36 = vmul.f32 %v14120_v15, %v14120_v15  ;;  %v14156_v17 = vld [vmem:[%s16421_s14] ss:$0 sm:$0xff] }
 0xcf6   :  { %4650 = vadd.xlane.f32.xlu0 %v4649_v12  ;;  %v4519_v63 = vpop.xlane.xlu0 %4518 }
 0xcf7   :  { %v14132_v54 = vsub.f32 %v13990_v0, %v4544_v42  ;;  %v4545_v34 = vmul.f32 0.03125, %v4519_v63  ;;  %v4652_v37 = vsel %vm133_vm0, %v4590_v36, 0.0  ;;  %v4591_v4 = vmul.f32 %v14126_v43, %v14126_v43 }
 0xcf8   :  { %4653 = vadd.xlane.f32.xlu1 %v4652_v37  ;;  %v4522_v38 = vpop.xlane.xlu1 %4521 }
 0xcf9   :  { %v14138_v49 = vsub.f32 %v13987_v60, %v4545_v34  ;;  %v4546_v50 = vmul.f32 0.03125, %v4522_v38  ;;  %v4655_v57 = vsel %vm133_vm0, %v4591_v4, 0.0  ;;  %v4592_v6 = vmul.f32 %v14132_v54, %v14132_v54 }
 0xcfa   :  { %4656 = vadd.xlane.f32.xlu0 %v4655_v57 }
 0xcfb   :  { %v14144_v0 = vsub.f32 %v13995_v46, %v4546_v50  ;;  %v4658_v13 = vsel %vm133_vm0, %v4592_v6, 0.0  ;;  %v4593_v52 = vmul.f32 %v14138_v49, %v14138_v49  ;;  %v14164_v50 = vld [vmem:[%s16422_s15] ss:$0 sm:$0xff] }
 0xcfc   :  { %4659 = vadd.xlane.f32.xlu1 %v4658_v13 }
 0xcfd   :  { %v4661_v27 = vsel %vm133_vm0, %v4593_v52, 0.0  ;;  %v4594_v60 = vmul.f32 %v14144_v0, %v14144_v0 }
 0xcfe   :  { %4662 = vadd.xlane.f32.xlu0 %v4661_v27 }
 0xcff   :  { %v4664_v19 = vsel %vm133_vm0, %v4594_v60, 0.0 }
 0xd00   :  { %4665 = vadd.xlane.f32.xlu1 %v4664_v19 }
 0xd4e   :  { %v4597_v58 = vpop.xlane.xlu0 %4596 }
 0xd4f   :  { %v4667_v2 = vmul.f32 0.03125, %v4597_v58 }
 0xd50   :  { %v4600_v51 = vpop.xlane.xlu1 %4599 }
 0xd51   :  { %v4691_v46 = vadd.f32 1e-05, %v4667_v2  ;;  %v4668_v22 = vmul.f32 0.03125, %v4600_v51 }
 0xd52   :  { %v4603_v33 = vpop.xlane.xlu0 %4602 }
 0xd53   :  { %11526 = vrsqrt.f32 %v4691_v46  ;;  %v4692_v41 = vadd.f32 1e-05, %v4668_v22  ;;  %v4669_v44 = vmul.f32 0.03125, %v4603_v33 }
 0xd54   :  { %v4606_v16 = vpop.xlane.xlu1 %4605 }
 0xd55   :  { %11528 = vrsqrt.f32 %v4692_v41  ;;  %v4693_v32 = vadd.f32 1e-05, %v4669_v44  ;;  %v4670_v59 = vmul.f32 0.03125, %v4606_v16 }
 0xd57   :  { %11530 = vrsqrt.f32 %v4693_v32  ;;  %v4694_v8 = vadd.f32 1e-05, %v4670_v59  ;;  %v4609_v28 = vpop.xlane.xlu0 %4608 }
 0xd58   :  { %v4671_v35 = vmul.f32 0.03125, %v4609_v28 }
 0xd59   :  { %11532 = vrsqrt.f32 %v4694_v8  ;;  %v4612_v26 = vpop.xlane.xlu1 %4611 }
 0xd5a   :  { %v4695_v11 = vadd.f32 1e-05, %v4671_v35  ;;  %v4672_v7 = vmul.f32 0.03125, %v4612_v26 }
 0xd5b   :  { %v4615_v23 = vpop.xlane.xlu0 %4614 }
 0xd5c   :  { %11534 = vrsqrt.f32 %v4695_v11  ;;  %v4696_v21 = vadd.f32 1e-05, %v4672_v7  ;;  %v4673_v47 = vmul.f32 0.03125, %v4615_v23 }
 0xd5d   :  { %v11527_v29 = vpop.eup %11526  ;;  %v4618_v56 = vpop.xlane.xlu1 %4617 }
 0xd5e   :  { %11536 = vrsqrt.f32 %v4696_v21  ;;  %v4697_v18 = vadd.f32 1e-05, %v4673_v47  ;;  %v4674_v42 = vmul.f32 0.03125, %v4618_v56  ;;  %v4739_v12 = vmul.f32 %v11527_v29, %v14004_v45 }
 0xd5f   :  { %v11529_v36 = vpop.eup %11528 }
 0xd60   :  { %11538 = vrsqrt.f32 %v4697_v18  ;;  %v4698_v63 = vadd.f32 1e-05, %v4674_v42  ;;  %v4740_v34 = vmul.f32 %v11529_v36, %v14007_v24  ;;  %v4769_v38 = vmul.f32 %v14156_v17, %v4739_v12 }
 0xd61   :  { %v11531_v37 = vpop.eup %11530  ;;  %v4621_v4 = vpop.xlane.xlu0 %4620 }
 0xd62   :  { %v4741_v57 = vmul.f32 %v11531_v37, %v14012_v10  ;;  %11540 = vrsqrt.f32 %v4698_v63  ;;  %v4675_v6 = vmul.f32 0.03125, %v4621_v4  ;;  %v4770_v45 = vmul.f32 %v14156_v17, %v4740_v34 }
 0xd63   :  { %v11533_v13 = vpop.eup %11532  ;;  %v4624_v52 = vpop.xlane.xlu1 %4623  ;;  %v14171_v2 = vadd.f32 %v14164_v50, %v4769_v38 }
 0xd64   :  { %v4771_v27 = vmul.f32 %v14156_v17, %v4741_v57  ;;  %v4742_v24 = vmul.f32 %v11533_v13, %v14018_v9  ;;  %v4699_v60 = vadd.f32 1e-05, %v4675_v6  ;;  %v4676_v19 = vmul.f32 0.03125, %v4624_v52 }
 0xd65   :  { %v4627_v58 = vpop.xlane.xlu0 %4626  ;;  %16552 = vst [vmem:[#allocation27_spill] sm:$0xff] %v14171_v2  ;;  %v14174_v51 = vadd.f32 %v14164_v50, %v4770_v45 }
 0xd66   :  { %v11535_v10 = vpop.eup %11534  ;;  %v4772_v46 = vmul.f32 %v14156_v17, %v4742_v24  ;;  %11542 = vrsqrt.f32 %v4699_v60  ;;  %v4700_v22 = vadd.f32 1e-05, %v4676_v19  ;;  %v4677_v33 = vmul.f32 0.03125, %v4627_v58 }
 0xd67   :  { %16553 = vst [vmem:[#allocation30_spill] sm:$0xff] %v14174_v51  ;;  %v4630_v41 = vpop.xlane.xlu1 %4629  ;;  %v4828_v44 = vpack.c.bf16 %v14174_v51, %v14171_v2  ;;  %v4743_v9 = vmul.f32 %v11535_v10, %v14027_v55  ;;  %v14181_v32 = vadd.f32 %v14164_v50, %v4771_v27 }
 0xd68   :  { %v11537_v16 = vpop.eup %11536  ;;  %v14184_v59 = vadd.f32 %v14164_v50, %v4772_v46  ;;  %11544 = vrsqrt.f32 %v4700_v22  ;;  %v4678_v8 = vmul.f32 0.03125, %v4630_v41  ;;  %v4701_v28 = vadd.f32 1e-05, %v4677_v33 }
 0xd69   :  { %16554 = vst [vmem:[#allocation29_spill] sm:$0xff] %v14181_v32  ;;  %10657 = vmatprep.mubr.msk.bf16.mxu1 %vm133_vm0, %v4828_v44  ;;  %v4744_v35 = vmul.f32 %v11537_v16, %v14031_v48  ;;  %v4773_v26 = vmul.f32 %v14156_v17, %v4743_v9 }
 0xd6a   :  { %16555 = vst [vmem:[#allocation32_spill] sm:$0xff] %v14184_v59  ;;  %v11539_v11 = vpop.eup %11538  ;;  %v4702_v7 = vadd.f32 1e-05, %v4678_v8  ;;  %v4829_v55 = vpack.c.bf16 %v14184_v59, %v14181_v32  ;;  %11546 = vrsqrt.f32 %v4701_v28 }
 0xd6b   :  { %v4774_v23 = vmul.f32 %v14156_v17, %v4744_v35  ;;  %v4745_v21 = vmul.f32 %v11539_v11, %v14036_v14  ;;  %v14195_v29 = vadd.f32 %v14164_v50, %v4773_v26 }
 0xd6c   :  { %v11541_v47 = vpop.eup %11540  ;;  %11548 = vrsqrt.f32 %v4702_v7  ;;  %10658 = vmatmul.mubr.msk.bf16.vlgmr.msra.gmra.mrb[120].mxu1 %vm133_vm0, %v4829_v55 }
 0xd6d   :  { %16556 = vst [vmem:[#allocation28_spill] sm:$0xff] %v14195_v29  ;;  %v14198_v48 = vadd.f32 %v14164_v50, %v4774_v23  ;;  %v4746_v56 = vmul.f32 %v11541_v47, %v14042_v31  ;;  %v4775_v18 = vmul.f32 %v14156_v17, %v4745_v21 }
 0xd6f   :  { %16557 = vst [vmem:[#allocation31_spill] sm:$0xff] %v14198_v48  ;;  %v4830_v42 = vpack.c.bf16 %v14198_v48, %v14195_v29  ;;  %v4776_v12 = vmul.f32 %v14156_v17, %v4746_v56  ;;  %v14207_v36 = vadd.f32 %v14164_v50, %v4775_v18 }
 0xd70   :  { %v11543_v14 = vpop.eup %11542 }
 0xd71   :  { %10661 = vmatprep.mubr.msk.bf16.mxu1 %vm133_vm0, %v4830_v42  ;;  %16558 = vst [vmem:[#allocation33_spill] sm:$0xff] %v14207_v36  ;;  %v14210_v63 = vadd.f32 %v14164_v50, %v4776_v12  ;;  %v4747_v34 = vmul.f32 %v11543_v14, %v14051_v20 }
 0xd72   :  { %v11545_v37 = vpop.eup %11544 }
 0xd73   :  { %16559 = vst [vmem:[#allocation3_spill] sm:$0xff] %v14210_v63  ;;  %v4831_v31 = vpack.c.bf16 %v14210_v63, %v14207_v36  ;;  %v4748_v4 = vmul.f32 %v11545_v37, %v14055_v3  ;;  %v4777_v38 = vmul.f32 %v14156_v17, %v4747_v34 }
 0xd74   :  { %v11547_v57 = vpop.eup %11546 }
 0xd75   :  { %10662 = vmatmul.mubr.msk.bf16.gmra.mrb[124].mxu1 %vm133_vm0, %v4831_v31  ;;  %v4778_v6 = vmul.f32 %v14156_v17, %v4748_v4  ;;  %v4749_v13 = vmul.f32 %v11547_v57, %v14060_v5  ;;  %v14221_v27 = vadd.f32 %v14164_v50, %v4777_v38 }
 0xd76   :  { %v11549_v45 = vpop.eup %11548 }
 0xd77   :  { %v4633_v52 = vpop.xlane.xlu0 %4632  ;;  %16560 = vst [vmem:[#allocation5_spill] sm:$0xff] %v14221_v27  ;;  %v14224_v20 = vadd.f32 %v14164_v50, %v4778_v6  ;;  %v4750_v24 = vmul.f32 %v11549_v45, %v14066_v30  ;;  %v4779_v60 = vmul.f32 %v14156_v17, %v4749_v13 }
 0xd78   :  { %v4679_v3 = vmul.f32 0.03125, %v4633_v52 }
 0xd79   :  { %16561 = vst [vmem:[#allocation4_spill] sm:$0xff] %v14224_v20  ;;  %v4636_v19 = vpop.xlane.xlu1 %4635  ;;  %v4832_v58 = vpack.c.bf16 %v14224_v20, %v14221_v27  ;;  %v4780_v10 = vmul.f32 %v14156_v17, %v4750_v24  ;;  %v14233_v33 = vadd.f32 %v14164_v50, %v4779_v60 }
 0xd7a   :  { %v4703_v46 = vadd.f32 1e-05, %v4679_v3  ;;  %v4680_v5 = vmul.f32 0.03125, %v4636_v19 }
 0xd7b   :  { %10665 = vmatprep.mubr.msk.bf16.mxu1 %vm133_vm0, %v4832_v58  ;;  %v4639_v22 = vpop.xlane.xlu0 %4638  ;;  %16562 = vst [vmem:[#allocation2_spill] sm:$0xff] %v14233_v33  ;;  %v14236_v41 = vadd.f32 %v14164_v50, %v4780_v10 }
 0xd7c   :  { %11550 = vrsqrt.f32 %v4703_v46  ;;  %v4704_v30 = vadd.f32 1e-05, %v4680_v5  ;;  %v4681_v44 = vmul.f32 0.03125, %v4639_v22 }
 0xd7d   :  { %16563 = vst [vmem:[#allocation7_spill] sm:$0xff] %v14236_v41  ;;  %v4642_v9 = vpop.xlane.xlu1 %4641  ;;  %v4833_v16 = vpack.c.bf16 %v14236_v41, %v14233_v33 }
 0xd7e   :  { %11552 = vrsqrt.f32 %v4704_v30  ;;  %v4705_v8 = vadd.f32 1e-05, %v4681_v44  ;;  %v4682_v28 = vmul.f32 0.03125, %v4642_v9 }
 0xd7f   :  { %10666 = vmatmul.mubr.msk.bf16.gmra.mrb[128].mxu1 %vm133_vm0, %v4833_v16  ;;  %v4645_v35 = vpop.xlane.xlu0 %4644 }
 0xd80   :  { %11554 = vrsqrt.f32 %v4705_v8  ;;  %v4706_v26 = vadd.f32 1e-05, %v4682_v28  ;;  %v4683_v11 = vmul.f32 0.03125, %v4645_v35 }
 0xd81   :  { %v4648_v7 = vpop.xlane.xlu1 %4647 }
 0xd82   :  { %11556 = vrsqrt.f32 %v4706_v26  ;;  %v4707_v55 = vadd.f32 1e-05, %v4683_v11  ;;  %v4684_v23 = vmul.f32 0.03125, %v4648_v7 }
 0xd83   :  { %v4651_v21 = vpop.xlane.xlu0 %4650 }
 0xd84   :  { %11558 = vrsqrt.f32 %v4707_v55  ;;  %v4708_v47 = vadd.f32 1e-05, %v4684_v23  ;;  %v4685_v56 = vmul.f32 0.03125, %v4651_v21 }
 0xd85   :  { %v4654_v18 = vpop.xlane.xlu1 %4653 }
 0xd86   :  { %v11551_v42 = vpop.eup %11550  ;;  %11560 = vrsqrt.f32 %v4708_v47  ;;  %v4709_v12 = vadd.f32 1e-05, %v4685_v56  ;;  %v4686_v14 = vmul.f32 0.03125, %v4654_v18 }
 0xd87   :  { %v4657_v34 = vpop.xlane.xlu0 %4656  ;;  %v4751_v37 = vmul.f32 %v11551_v42, %v14079_v39 }
 0xd88   :  { %v11553_v31 = vpop.eup %11552  ;;  %11562 = vrsqrt.f32 %v4709_v12  ;;  %v4710_v4 = vadd.f32 1e-05, %v4686_v14  ;;  %v4687_v38 = vmul.f32 0.03125, %v4657_v34 }
 0xd89   :  { %v4660_v57 = vpop.xlane.xlu1 %4659  ;;  %v4752_v6 = vmul.f32 %v11553_v31, %v14082_v62  ;;  %v4781_v45 = vmul.f32 %v14156_v17, %v4751_v37 }
 0xd8a   :  { %v11555_v13 = vpop.eup %11554  ;;  %11564 = vrsqrt.f32 %v4710_v4  ;;  %v4711_v52 = vadd.f32 1e-05, %v4687_v38  ;;  %v4688_v24 = vmul.f32 0.03125, %v4660_v57 }
 0xd8b   :  { %v4663_v3 = vpop.xlane.xlu0 %4662  ;;  %v4782_v60 = vmul.f32 %v14156_v17, %v4752_v6  ;;  %v4753_v19 = vmul.f32 %v11555_v13, %v14090_v53  ;;  %v14247_v5 = vadd.f32 %v14164_v50, %v4781_v45 }
 0xd8c   :  { %v11557_v58 = vpop.eup %11556  ;;  %11566 = vrsqrt.f32 %v4711_v52  ;;  %v4712_v39 = vadd.f32 1e-05, %v4688_v24  ;;  %v4689_v10 = vmul.f32 0.03125, %v4663_v3 }
 0xd8d   :  { %v4666_v46 = vpop.xlane.xlu1 %4665  ;;  %16564 = vst [vmem:[#allocation9_spill] sm:$0xff] %v14247_v5  ;;  %v14250_v62 = vadd.f32 %v14164_v50, %v4782_v60  ;;  %v4754_v22 = vmul.f32 %v11557_v58, %v14096_v1  ;;  %v4783_v30 = vmul.f32 %v14156_v17, %v4753_v19 }
 0xd8e   :  { %v11559_v44 = vpop.eup %11558  ;;  %11568 = vrsqrt.f32 %v4712_v39  ;;  %v4713_v9 = vadd.f32 1e-05, %v4689_v10  ;;  %v4690_v16 = vmul.f32 0.03125, %v4666_v46 }
 0xd8f   :  { %16565 = vst [vmem:[#allocation6_spill] sm:$0xff] %v14250_v62  ;;  %v4834_v53 = vpack.c.bf16 %v14250_v62, %v14247_v5  ;;  %v4784_v8 = vmul.f32 %v14156_v17, %v4754_v22  ;;  %v4755_v28 = vmul.f32 %v11559_v44, %v14102_v40  ;;  %v14260_v1 = vadd.f32 %v14164_v50, %v4783_v30 }
 0xd90   :  { %v11561_v35 = vpop.eup %11560  ;;  %11570 = vrsqrt.f32 %v4713_v9  ;;  %v4714_v26 = vadd.f32 1e-05, %v4690_v16 }
 0xd91   :  { %10669 = vmatprep.mubr.msk.bf16.mxu1 %vm133_vm0, %v4834_v53  ;;  %16566 = vst [vmem:[#allocation8_spill] sm:$0xff] %v14260_v1  ;;  %v14263_v11 = vadd.f32 %v14164_v50, %v4784_v8  ;;  %v4756_v7 = vmul.f32 %v11561_v35, %v14108_v25  ;;  %v4785_v55 = vmul.f32 %v14156_v17, %v4755_v28 }
 0xd92   :  { %v11563_v23 = vpop.eup %11562  ;;  %11572 = vrsqrt.f32 %v4714_v26 }
 0xd93   :  { %16567 = vst [vmem:[#allocation11_spill] sm:$0xff] %v14263_v11  ;;  %v4835_v40 = vpack.c.bf16 %v14263_v11, %v14260_v1  ;;  %v4786_v21 = vmul.f32 %v14156_v17, %v4756_v7  ;;  %v4757_v47 = vmul.f32 %v11563_v23, %v14114_v61  ;;  %v14273_v18 = vadd.f32 %v14164_v50, %v4785_v55 }
 0xd94   :  { %v11565_v56 = vpop.eup %11564 }
 0xd95   :  { %10670 = vmatmul.mubr.msk.bf16.gmra.mrb[132].mxu1 %vm133_vm0, %v4835_v40  ;;  %16568 = vst [vmem:[#allocation10_spill] sm:$0xff] %v14273_v18  ;;  %v14276_v42 = vadd.f32 %v14164_v50, %v4786_v21  ;;  %v4758_v25 = vmul.f32 %v11565_v56, %v14120_v15  ;;  %v4787_v12 = vmul.f32 %v14156_v17, %v4757_v47 }
 0xd96   :  { %v11567_v14 = vpop.eup %11566 }
 0xd97   :  { %16569 = vst [vmem:[#allocation13_spill] sm:$0xff] %v14276_v42  ;;  %v4836_v34 = vpack.c.bf16 %v14276_v42, %v14273_v18  ;;  %v4788_v37 = vmul.f32 %v14156_v17, %v4758_v25  ;;  %v4759_v61 = vmul.f32 %v11567_v14, %v14126_v43  ;;  %v14286_v4 = vadd.f32 %v14164_v50, %v4787_v12 }
 0xd98   :  { %v11569_v31 = vpop.eup %11568 }
 0xd99   :  { %10673 = vmatprep.mubr.msk.bf16.mxu1 %vm133_vm0, %v4836_v34  ;;  %16570 = vst [vmem:[#allocation12_spill] sm:$0xff] %v14286_v4  ;;  %v14289_v38 = vadd.f32 %v14164_v50, %v4788_v37  ;;  %v4760_v15 = vmul.f32 %v11569_v31, %v14132_v54  ;;  %v4789_v57 = vmul.f32 %v14156_v17, %v4759_v61 }
 0xd9a   :  { %v11571_v6 = vpop.eup %11570 }
 0xd9b   :  { %16571 = vst [vmem:[#allocation15_spill] sm:$0xff] %v14289_v38  ;;  %v4837_v45 = vpack.c.bf16 %v14289_v38, %v14286_v4  ;;  %v4790_v13 = vmul.f32 %v14156_v17, %v4760_v15  ;;  %v4761_v43 = vmul.f32 %v11571_v6, %v14138_v49  ;;  %v14299_v24 = vadd.f32 %v14164_v50, %v4789_v57 }
 0xd9c   :  { %v11573_v52 = vpop.eup %11572 }
 0xd9d   :  { %10674 = vmatmul.mubr.msk.bf16.gmra.mrb[136].mxu1 %vm133_vm0, %v4837_v45  ;;  %16572 = vst [vmem:[#allocation14_spill] sm:$0xff] %v14299_v24  ;;  %v14302_v3 = vadd.f32 %v14164_v50, %v4790_v13  ;;  %v4762_v54 = vmul.f32 %v11573_v52, %v14144_v0  ;;  %v4791_v60 = vmul.f32 %v14156_v17, %v4761_v43  ;;  %v14322_v0 = vld [vmem:[%s16412_s5 + $0x1] ss:$0 sm:$0xff] }
 0xd9f   :  { %16573 = vst [vmem:[#allocation19_spill] sm:$0xff] %v14302_v3  ;;  %v4838_v19 = vpack.c.bf16 %v14302_v3, %v14299_v24  ;;  %v4792_v58 = vmul.f32 %v14156_v17, %v4762_v54  ;;  %v14311_v49 = vadd.f32 %v14164_v50, %v4791_v60 }
 0xda1   :  { %10677 = vmatprep.mubr.msk.bf16.mxu1 %vm133_vm0, %v4838_v19  ;;  %16574 = vst [vmem:[#allocation18_spill] sm:$0xff] %v14311_v49  ;;  %v14314_v39 = vadd.f32 %v14164_v50, %v4792_v58 }
 0xda3   :  { %16575 = vst [vmem:[#allocation16_spill] sm:$0xff] %v14314_v39  ;;  %v4839_v10 = vpack.c.bf16 %v14314_v39, %v14311_v49 }
 0xda5   :  { %10678 = vmatmul.mubr.msk.bf16.gmra.mrb[140].mxu1 %vm133_vm0, %v4839_v10 }
 0xe3f   :  { %v10659_v46 = vpop.f32.mrb[120].mxu1 }
 0xe40   :  { %v4939_v17 = vadd.f32 %v10659_v46, %v14322_v0  ;;  %v4930_v22 = vpop.f32.mrb[121].mxu1 }
 0xe41   :  { %v10660_v30 = vpop.f32.mrb[122].mxu1  ;;  %v4931_v50 = vadd.f32 %v14322_v0, %v4930_v22 }
 0xe42   :  { %v14325_v44 = vpack.c.bf16 %v4939_v17, %v4939_v17  ;;  %v4933_v9 = vpop.f32.mrb[123].mxu1  ;;  %v4942_v35 = vadd.f32 %v10660_v30, %v14322_v0 }
 0xe43   :  { %v4934_v16 = vadd.f32 %v14322_v0, %v4933_v9 }
 0xe44   :  { %5045 = vrot.lane.b32.xlu1 %v14325_v44, %s11862_s4 }
 0xe45   :  { %v14331_v53 = vpack.c.bf16 %v4934_v16, %v4931_v50 }
 0xe47   :  { %5043 = vrot.lane.b32.xlu0 %v14331_v53, %s11862_s4  ;;  %10685 = vmatprep.mubr.msk.bf16.mxu0 %vm548_vm1, %v14331_v53 }
 0xe48   :  { %v10663_v8 = vpop.f32.mrb[124].mxu1 }
 0xe49   :  { %v4946_v28 = vpop.f32.mrb[125].mxu1  ;;  %v4955_v55 = vadd.f32 %v10663_v8, %v14322_v0 }
 0xe4a   :  { %v4947_v26 = vadd.f32 %v14322_v0, %v4946_v28  ;;  %v10664_v7 = vpop.f32.mrb[126].mxu1 }
 0xe4b   :  { %v4958_v23 = vadd.f32 %v10664_v7, %v14322_v0  ;;  %v4949_v40 = vpop.f32.mrb[127].mxu1 }
 0xe4c   :  { %v14341_v21 = vpack.c.bf16 %v4947_v26, %v4942_v35  ;;  %v4950_v47 = vadd.f32 %v14322_v0, %v4949_v40 }
 0xe4d   :  { %v14344_v56 = vpack.c.bf16 %v4958_v23, %v4955_v55 }
 0xe4e   :  { %5109 = vrot.lane.b32.xlu1 %v14341_v21, %s11862_s4  ;;  %10693 = vmatprep.mubr.msk.bf16.mxu1 %vm548_vm1, %v14341_v21  ;;  %v14352_v25 = vpack.c.bf16 %v4950_v47, %v4950_v47 }
 0xe4f   :  { %5175 = vrot.lane.b32.xlu0 %v14344_v56, %s11862_s4 }
 0xe52   :  { %5111 = vrot.lane.b32.xlu1 %v14352_v25, %s11862_s4  ;;  %v10667_v12 = vpop.f32.mrb[128].mxu1 }
 0xe53   :  { %v4962_v14 = vpop.f32.mrb[129].mxu1  ;;  %v4971_v31 = vadd.f32 %v10667_v12, %v14322_v0 }
 0xe54   :  { %v4963_v34 = vadd.f32 %v14322_v0, %v4962_v14  ;;  %v10668_v37 = vpop.f32.mrb[130].mxu1 }
 0xe55   :  { %v4965_v61 = vpop.f32.mrb[131].mxu1  ;;  %v4974_v57 = vadd.f32 %v10668_v37, %v14322_v0 }
 0xe56   :  { %v14358_v15 = vpack.c.bf16 %v4963_v34, %v4963_v34  ;;  %v4966_v6 = vadd.f32 %v14322_v0, %v4965_v61 }
 0xe57   :  { %v14366_v13 = vpack.c.bf16 %v4974_v57, %v4974_v57 }
 0xe58   :  { %v14362_v45 = vpack.c.bf16 %v4971_v31, %v4966_v6  ;;  %5177 = vrot.lane.b32.xlu1 %v14358_v15, %s11862_s4 }
 0xe5a   :  { %5241 = vrot.lane.b32.xlu0 %v14362_v45, %s11862_s4 }
 0xe5c   :  { %5243 = vrot.lane.b32.xlu1 %v14366_v13, %s11862_s4 }
 0xe68   :  { %v10671_v43 = vpop.f32.mrb[132].mxu1 }
 0xe69   :  { %v4987_v52 = vadd.f32 %v10671_v43, %v14322_v0  ;;  %v4978_v54 = vpop.f32.mrb[133].mxu1 }
 0xe6a   :  { %v10672_v60 = vpop.f32.mrb[134].mxu1  ;;  %v4979_v10 = vadd.f32 %v14322_v0, %v4978_v54 }
 0xe6b   :  { %v14373_v19 = vpack.c.bf16 %v4987_v52, %v4987_v52  ;;  %v4981_v58 = vpop.f32.mrb[135].mxu1  ;;  %v4990_v9 = vadd.f32 %v10672_v60, %v14322_v0 }
 0xe6c   :  { %v4982_v46 = vadd.f32 %v14322_v0, %v4981_v58 }
 0xe6d   :  { %5309 = vrot.lane.b32.xlu1 %v14373_v19, %s11862_s4 }
 0xe6e   :  { %v14379_v17 = vpack.c.bf16 %v4982_v46, %v4979_v10 }
 0xe70   :  { %5307 = vrot.lane.b32.xlu0 %v14379_v17, %s11862_s4  ;;  %v10675_v22 = vpop.f32.mrb[136].mxu1 }
 0xe71   :  { %v4994_v30 = vpop.f32.mrb[137].mxu1  ;;  %v5003_v8 = vadd.f32 %v10675_v22, %v14322_v0 }
 0xe72   :  { %v4995_v50 = vadd.f32 %v14322_v0, %v4994_v30  ;;  %v10676_v16 = vpop.f32.mrb[138].mxu1 }
 0xe73   :  { %v5006_v28 = vadd.f32 %v10676_v16, %v14322_v0  ;;  %v4997_v35 = vpop.f32.mrb[139].mxu1 }
 0xe74   :  { %v14387_v26 = vpack.c.bf16 %v4995_v50, %v4990_v9  ;;  %v4998_v7 = vadd.f32 %v14322_v0, %v4997_v35 }
 0xe75   :  { %v14390_v55 = vpack.c.bf16 %v5006_v28, %v5003_v8 }
 0xe76   :  { %v14392_v23 = vpack.c.bf16 %v4998_v7, %v4998_v7  ;;  %5373 = vrot.lane.b32.xlu0 %v14387_v26, %s11862_s4 }
 0xe78   :  { %5375 = vrot.lane.b32.xlu1 %v14392_v23, %s11862_s4  ;;  %v10679_v40 = vpop.f32.mrb[140].mxu1 }
 0xe79   :  { %v5010_v47 = vpop.f32.mrb[141].mxu1  ;;  %v5019_v37 = vadd.f32 %v10679_v40, %v14322_v0 }
 0xe7a   :  { %v5011_v12 = vadd.f32 %v14322_v0, %v5010_v47  ;;  %5439 = vrot.lane.b32.xlu0 %v14390_v55, %s11862_s4  ;;  %v10680_v14 = vpop.f32.mrb[142].mxu1 }
 0xe7b   :  { %v5013_v34 = vpop.f32.mrb[143].mxu1  ;;  %v5022_v31 = vadd.f32 %v10680_v14, %v14322_v0 }
 0xe7c   :  { %v14402_v61 = vpack.c.bf16 %v5011_v12, %v5011_v12  ;;  %v5014_v57 = vadd.f32 %v14322_v0, %v5013_v34 }
 0xe7d   :  { %v14410_v43 = vpack.c.bf16 %v5022_v31, %v5022_v31 }
 0xe7e   :  { %v14406_v6 = vpack.c.bf16 %v5019_v37, %v5014_v57  ;;  %5441 = vrot.lane.b32.xlu1 %v14402_v61, %s11862_s4 }
 0xe80   :  { %5505 = vrot.lane.b32.xlu0 %v14406_v6, %s11862_s4 }
 0xe82   :  { %5507 = vrot.lane.b32.xlu1 %v14410_v43, %s11862_s4 }
 0xe84   :  { %5899 = vrot.lane.b32.xlu0 %v14325_v44, %s11863_s23 }
 0xe86   :  { %5897 = vrot.lane.b32.xlu1 %v14331_v53, %s11863_s23 }
 0xe88   :  { %6021 = vrot.lane.b32.xlu0 %v14344_v56, %s11863_s23 }
 0xe8a   :  { %5959 = vrot.lane.b32.xlu1 %v14341_v21, %s11863_s23 }
 0xe8c   :  { %5961 = vrot.lane.b32.xlu0 %v14352_v25, %s11863_s23 }
 0xe8e   :  { %6083 = vrot.lane.b32.xlu1 %v14362_v45, %s11863_s23 }
 0xe90   :  { %6023 = vrot.lane.b32.xlu0 %v14358_v15, %s11863_s23 }
 0xe92   :  { %6145 = vrot.lane.b32.xlu1 %v14379_v17, %s11863_s23 }
 0xe94   :  { %6147 = vrot.lane.b32.xlu0 %v14373_v19, %s11863_s23 }
 0xe96   :  { %6085 = vrot.lane.b32.xlu1 %v14366_v13, %s11863_s23 }
 0xe9a   :  { %6207 = vrot.lane.b32.xlu1 %v14387_v26, %s11863_s23 }
 0xe9e   :  { %6269 = vrot.lane.b32.xlu1 %v14390_v55, %s11863_s23 }
 0xea2   :  { %6209 = vrot.lane.b32.xlu1 %v14392_v23, %s11863_s23 }
 0xea6   :  { %6271 = vrot.lane.b32.xlu1 %v14402_v61, %s11863_s23 }
 0xeaa   :  { %6333 = vrot.lane.b32.xlu1 %v14410_v43, %s11863_s23 }
 0xeae   :  { %6331 = vrot.lane.b32.xlu1 %v14406_v6, %s11863_s23 }
 0xeb6   :  { %v5046_v54 = vpop.permute.xlu1 %5045 }
 0xeb7   :  { %v5057_v10 = vsel %vm548_vm1, %v5046_v54, 0 }
 0xeb9   :  { %v5044_v0 = vpop.permute.xlu0 %5043 }
 0xeba   :  { %11085 = vmatprep.subr.msk.bf16.mxu0 %vm548_vm1, %v5044_v0  ;;  %v5054_v52 = vsel %vm548_vm1, %v5044_v0, 0 }
 0xebb   :  { %10682 = vmatpush3.bf16.xpose.msra.mxu0 %v5054_v52 }
 0xebc   :  { %11086 = vmatprep.subr.msk.bf16.mxu0 %vm548_vm1, %v5046_v54 }
 0xec0   :  { %v5110_v60 = vpop.permute.xlu1 %5109 }
 0xec1   :  { %11087 = vmatprep.subr.msk.bf16.mxu1 %vm548_vm1, %v5110_v60  ;;  %v5120_v58 = vsel %vm548_vm1, %v5110_v60, 0  ;;  %v5176_v46 = vpop.permute.xlu0 %5175 }
 0xec2   :  { %10690 = vmatpush3.bf16.xpose.msra.mxu1 %v5120_v58  ;;  %v5186_v50 = vsel %vm548_vm1, %v5176_v46, 0 }
 0xec3   :  { %10684 = vmatpush3.bf16.xpose.msra.mxu0 %v5057_v10 }
 0xec4   :  { %v5112_v22 = vpop.permute.xlu1 %5111  ;;  %11089 = vmatprep.subr.msk.bf16.mxu0 %vm548_vm1, %v5176_v46 }
 0xec5   :  { %11088 = vmatprep.subr.msk.bf16.mxu1 %vm548_vm1, %v5112_v22  ;;  %v5123_v30 = vsel %vm548_vm1, %v5112_v22, 0 }
 0xeca   :  { %10692 = vmatpush3.bf16.xpose.msra.mxu1 %v5123_v30  ;;  %v5178_v9 = vpop.permute.xlu1 %5177  ;;  %10686 = vmatmul.mubr.msk.bf16.vlgmr.msra.gmra.mrb[128].mxu0 %vm548_vm1, %v14325_v44 }
 0xecb   :  { %10698 = vmatpush3.bf16.xpose.msra.mxu0 %v5186_v50  ;;  %10701 = vmatprep.mubr.msk.bf16.mxu0 %vm548_vm1, %v14344_v56  ;;  %v5189_v35 = vsel %vm548_vm1, %v5178_v9, 0 }
 0xecc   :  { %11090 = vmatprep.subr.msk.bf16.mxu0 %vm548_vm1, %v5178_v9  ;;  %v5242_v16 = vpop.permute.xlu0 %5241 }
 0xecd   :  { %11091 = vmatprep.subr.msk.bf16.mxu1 %vm548_vm1, %v5242_v16  ;;  %v5252_v8 = vsel %vm548_vm1, %v5242_v16, 0 }
 0xece   :  { %v5244_v28 = vpop.permute.xlu1 %5243 }
 0xecf   :  { %v5255_v7 = vsel %vm548_vm1, %v5244_v28, 0 }
 0xed1   :  { %10694 = vmatmul.mubr.msk.bf16.vlgmr.msra.gmra.mrb[144].mxu1 %vm548_vm1, %v14352_v25 }
 0xed2   :  { %10706 = vmatpush3.bf16.xpose.msra.mxu1 %v5252_v8  ;;  %10709 = vmatprep.mubr.msk.bf16.mxu1 %vm548_vm1, %v14362_v45 }
 0xed3   :  { %11092 = vmatprep.subr.msk.bf16.mxu1 %vm548_vm1, %v5244_v28  ;;  %10700 = vmatpush3.bf16.xpose.msra.mxu0 %v5189_v35 }
 0xeda   :  { %10708 = vmatpush3.bf16.xpose.msra.mxu1 %v5255_v7  ;;  %10702 = vmatmul.mubr.msk.bf16.vlgmr.msra.gmra.mrb[132].mxu0 %vm548_vm1, %v14358_v15 }
 0xedb   :  { %10717 = vmatprep.mubr.msk.bf16.mxu0 %vm548_vm1, %v14379_v17 }
 0xedf   :  { %v5310_v12 = vpop.permute.xlu1 %5309 }
 0xee0   :  { %v5321_v31 = vsel %vm548_vm1, %v5310_v12, 0 }
 0xee1   :  { %10710 = vmatmul.mubr.msk.bf16.vlgmr.msra.gmra.mrb[148].mxu1 %vm548_vm1, %v14366_v13 }
 0xee2   :  { %10725 = vmatprep.mubr.msk.bf16.mxu1 %vm548_vm1, %v14387_v26  ;;  %v5308_v40 = vpop.permute.xlu0 %5307 }
 0xee3   :  { %11093 = vmatprep.subr.msk.bf16.mxu0 %vm548_vm1, %v5308_v40  ;;  %v5318_v47 = vsel %vm548_vm1, %v5308_v40, 0 }
 0xee4   :  { %10714 = vmatpush3.bf16.xpose.msra.mxu0 %v5318_v47 }
 0xee5   :  { %11094 = vmatprep.subr.msk.bf16.mxu0 %vm548_vm1, %v5310_v12 }
 0xee8   :  { %v5374_v14 = vpop.permute.xlu0 %5373 }
 0xee9   :  { %11095 = vmatprep.subr.msk.bf16.mxu1 %vm548_vm1, %v5374_v14  ;;  %v5384_v34 = vsel %vm548_vm1, %v5374_v14, 0 }
 0xeea   :  { %v5376_v37 = vpop.permute.xlu1 %5375  ;;  %10722 = vmatpush3.bf16.xpose.msra.mxu1 %v5384_v34 }
 0xeeb   :  { %11096 = vmatprep.subr.msk.bf16.mxu1 %vm548_vm1, %v5376_v37  ;;  %v5387_v52 = vsel %vm548_vm1, %v5376_v37, 0  ;;  %v16576_v37 = vld [vmem:[#allocation26_spill] sm:$0xff] }
 0xeec   :  { %10716 = vmatpush3.bf16.xpose.msra.mxu0 %v5321_v31  ;;  %v5440_v57 = vpop.permute.xlu0 %5439 }
 0xeed   :  { %11097 = vmatprep.subr.msk.bf16.mxu0 %vm548_vm1, %v5440_v57  ;;  %v5450_v60 = vsel %vm548_vm1, %v5440_v57, 0 }
 0xef0   :  { %v5442_v0 = vpop.permute.xlu1 %5441 }
 0xef1   :  { %v5453_v46 = vsel %vm548_vm1, %v5442_v0, 0 }
 0xef2   :  { %10724 = vmatpush3.bf16.xpose.msra.mxu1 %v5387_v52  ;;  %v5506_v54 = vpop.permute.xlu0 %5505 }
 0xef3   :  { %10718 = vmatmul.mubr.msk.bf16.vlgmr.msra.gmra.mrb[136].mxu0 %vm548_vm1, %v14373_v19  ;;  %11099 = vmatprep.subr.msk.bf16.mxu1 %vm548_vm1, %v5506_v54  ;;  %v5516_v10 = vsel %vm548_vm1, %v5506_v54, 0 }
 0xef4   :  { %10730 = vmatpush3.bf16.xpose.msra.mxu0 %v5450_v60  ;;  %10733 = vmatprep.mubr.msk.bf16.mxu0 %vm548_vm1, %v14390_v55  ;;  %v5508_v58 = vpop.permute.xlu1 %5507 }
 0xef5   :  { %11098 = vmatprep.subr.msk.bf16.mxu0 %vm548_vm1, %v5442_v0  ;;  %v5519_v9 = vsel %vm548_vm1, %v5508_v58, 0 }
 0xef6   :  { %v5900_v30 = vpop.permute.xlu0 %5899 }
 0xef7   :  { %v5909_v8 = vsel %vm1411_vm2, %v5900_v30, 0 }
 0xef8   :  { %v5898_v22 = vpop.permute.xlu1 %5897 }
 0xef9   :  { %10726 = vmatmul.mubr.msk.bf16.vlgmr.msra.gmra.mrb[152].mxu1 %vm548_vm1, %v14392_v23 }
 0xefa   :  { %10738 = vmatpush3.bf16.xpose.msra.mxu1 %v5516_v10  ;;  %10741 = vmatprep.mubr.msk.bf16.mxu1 %vm548_vm1, %v14406_v6  ;;  %v14506_v16 = vpop.permute.xlu0 %6021 }
 0xefb   :  { %11100 = vmatprep.subr.msk.bf16.mxu1 %vm548_vm1, %v5508_v58 }
 0xefc   :  { %10732 = vmatpush3.bf16.xpose.msra.mxu0 %v5453_v46  ;;  %v5960_v50 = vpop.permute.xlu1 %5959 }
 0xefd   :  { %10745 = vmatprep.subr.bf16.mxu0 %v5898_v22 }
 0xefe   :  { %v5962_v28 = vpop.permute.xlu0 %5961 }
 0xeff   :  { %v5971_v35 = vsel %vm1411_vm2, %v5962_v28, 0 }
 0xf00   :  { %v14515_v7 = vpop.permute.xlu1 %6083 }
 0xf02   :  { %10740 = vmatpush3.bf16.xpose.msra.mxu1 %v5519_v9 }
 0xf03   :  { %10734 = vmatmul.mubr.msk.bf16.vlgmr.msra.gmra.mrb[140].mxu0 %vm548_vm1, %v14402_v61  ;;  %10753 = vmatprep.subr.bf16.mxu1 %v5960_v50 }
 0xf04   :  { %10746 = vmatpush3.bf16.msra.mxu0 %v5898_v22 }
 0xf05   :  { %11101 = vmatprep.subr.msk.bf16.mxu0 %vm1411_vm2, %v5900_v30 }
 0xf08   :  { %10748 = vmatpush3.bf16.msra.mxu0 %v5909_v8 }
 0xf09   :  { %10742 = vmatmul.mubr.msk.bf16.vlgmr.msra.gmra.mrb[156].mxu1 %vm548_vm1, %v14410_v43  ;;  %10761 = vmatprep.subr.bf16.mxu0 %v14506_v16 }
 0xf0a   :  { %10754 = vmatpush3.bf16.msra.mxu1 %v5960_v50 }
 0xf0b   :  { %11102 = vmatprep.subr.msk.bf16.mxu1 %vm1411_vm2, %v5962_v28 }
 0xf0e   :  { %10756 = vmatpush3.bf16.msra.mxu1 %v5971_v35 }
 0xf0f   :  { %10769 = vmatprep.subr.bf16.mxu1 %v14515_v7 }
 0xf9d   :  { %v10687_v40 = vpop.f32.mrb[128].mxu0 }
 0xf9e   :  { %v5571_v47 = vmul.f32 0.25, %v10687_v40  ;;  %v5093_v12 = vpop.f32.mrb[129].mxu0 }
 0xf9f   :  { %v5569_v14 = vmul.f32 0.25, %v5093_v12  ;;  %v10688_v34 = vpop.f32.mrb[130].mxu0 }
 0xfa0   :  { %v14519_v31 = vadd.f32 %v5571_v47, %v16576_v37  ;;  %v5096_v57 = vpop.f32.mrb[131].mxu0 }
 0xfa1   :  { %v5570_v0 = vmul.f32 0.25, %v5096_v57  ;;  %v14522_v52 = vadd.f32 %v5569_v14, %v16576_v37 }
 0xfa2   :  { %v5623_v54 = vsel %vm1119_vm4, %v14519_v31, -inf }
 0xfa3   :  { %v14527_v60 = vadd.f32 %v5570_v0, %v16576_v37  ;;  %5624 = vmax.xlane.f32.xlu0 %v5623_v54  ;;  %v5617_v50 = vsel %vm1119_vm4, %v14522_v52, -inf }
 0xfa4   :  { %v10695_v58 = vpop.f32.mrb[144].mxu1 }
 0xfa5   :  { %v5574_v10 = vmul.f32 0.25, %v10695_v58  ;;  %v5159_v46 = vpop.f32.mrb[145].mxu1  ;;  %v5620_v22 = vsel %vm1119_vm4, %v14527_v60, -inf }
 0xfa6   :  { %v5572_v30 = vmul.f32 0.25, %v5159_v46  ;;  %v10696_v9 = vpop.f32.mrb[146].mxu1  ;;  %5621 = vmax.xlane.f32.xlu1 %v5620_v22 }
 0xfa7   :  { %v14534_v8 = vadd.f32 %v5574_v10, %v16576_v37  ;;  %v5162_v28 = vpop.f32.mrb[147].mxu1  ;;  %5618 = vmax.xlane.f32.xlu0 %v5617_v50 }
 0xfa8   :  { %v14537_v35 = vadd.f32 %v5572_v30, %v16576_v37  ;;  %v5573_v40 = vmul.f32 0.25, %v5162_v28 }
 0xfa9   :  { %v5632_v47 = vsel %vm1119_vm4, %v14534_v8, -inf }
 0xfaa   :  { %v14542_v12 = vadd.f32 %v5573_v40, %v16576_v37  ;;  %5633 = vmax.xlane.f32.xlu1 %v5632_v47  ;;  %v5626_v14 = vsel %vm1119_vm4, %v14537_v35, -inf }
 0xfab   :  { %5627 = vmax.xlane.f32.xlu0 %v5626_v14 }
 0xfac   :  { %v5629_v54 = vsel %vm1119_vm4, %v14542_v12, -inf }
 0xfad   :  { %v10703_v34 = vpop.f32.mrb[132].mxu0 }
 0xfae   :  { %v5577_v57 = vmul.f32 0.25, %v10703_v34  ;;  %v5225_v0 = vpop.f32.mrb[133].mxu0 }
 0xfaf   :  { %v5575_v58 = vmul.f32 0.25, %v5225_v0  ;;  %5630 = vmax.xlane.f32.xlu0 %v5629_v54  ;;  %v10704_v10 = vpop.f32.mrb[134].mxu0 }
 0xfb0   :  { %v14549_v46 = vadd.f32 %v5577_v57, %v16576_v37  ;;  %v5228_v22 = vpop.f32.mrb[135].mxu0 }
 0xfb1   :  { %v14552_v30 = vadd.f32 %v5575_v58, %v16576_v37  ;;  %v5576_v9 = vmul.f32 0.25, %v5228_v22 }
 0xfb2   :  { %v5641_v50 = vsel %vm1119_vm4, %v14549_v46, -inf }
 0xfb3   :  { %v14557_v28 = vadd.f32 %v5576_v9, %v16576_v37  ;;  %5642 = vmax.xlane.f32.xlu0 %v5641_v50  ;;  %v5635_v40 = vsel %vm1119_vm4, %v14552_v30, -inf }
 0xfb4   :  { %v10711_v47 = vpop.f32.mrb[148].mxu1  ;;  %5636 = vmax.xlane.f32.xlu1 %v5635_v40 }
 0xfb5   :  { %v5580_v14 = vmul.f32 0.25, %v10711_v47  ;;  %v5291_v34 = vpop.f32.mrb[149].mxu1  ;;  %v5638_v57 = vsel %vm1119_vm4, %v14557_v28, -inf }
 0xfb6   :  { %v5578_v0 = vmul.f32 0.25, %v5291_v34  ;;  %v10712_v54 = vpop.f32.mrb[150].mxu1 }
 0xfb7   :  { %v14564_v58 = vadd.f32 %v5580_v14, %v16576_v37  ;;  %v5294_v10 = vpop.f32.mrb[151].mxu1  ;;  %5639 = vmax.xlane.f32.xlu0 %v5638_v57 }
 0xfb8   :  { %v5579_v22 = vmul.f32 0.25, %v5294_v10  ;;  %v14567_v9 = vadd.f32 %v5578_v0, %v16576_v37 }
 0xfb9   :  { %v5650_v50 = vsel %vm1119_vm4, %v14564_v58, -inf }
 0xfba   :  { %v14572_v40 = vadd.f32 %v5579_v22, %v16576_v37  ;;  %5651 = vmax.xlane.f32.xlu1 %v5650_v50  ;;  %v5644_v14 = vsel %vm1119_vm4, %v14567_v9, -inf }
 0xfbc   :  { %v5647_v47 = vsel %vm1119_vm4, %v14572_v40, -inf }
 0xfbd   :  { %5648 = vmax.xlane.f32.xlu0 %v5647_v47 }
 0xfbe   :  { %5645 = vmax.xlane.f32.xlu1 %v5644_v14 }
 0xfc6   :  { %v10719_v34 = vpop.f32.mrb[136].mxu0 }
 0xfc7   :  { %v5583_v57 = vmul.f32 0.25, %v10719_v34  ;;  %v5357_v54 = vpop.f32.mrb[137].mxu0 }
 0xfc8   :  { %v5581_v0 = vmul.f32 0.25, %v5357_v54  ;;  %v10720_v10 = vpop.f32.mrb[138].mxu0 }
 0xfc9   :  { %v14579_v39 = vadd.f32 %v5583_v57, %v16576_v37  ;;  %v5360_v3 = vpop.f32.mrb[139].mxu0 }
 0xfca   :  { %v14582_v22 = vadd.f32 %v5581_v0, %v16576_v37  ;;  %v5582_v50 = vmul.f32 0.25, %v5360_v3 }
 0xfcb   :  { %v5659_v47 = vsel %vm1119_vm4, %v14579_v39, -inf }
 0xfcc   :  { %v14587_v49 = vadd.f32 %v5582_v50, %v16576_v37  ;;  %5660 = vmax.xlane.f32.xlu0 %v5659_v47  ;;  %v10727_v14 = vpop.f32.mrb[152].mxu1  ;;  %v5653_v34 = vsel %vm1119_vm4, %v14582_v22, -inf }
 0xfcd   :  { %v5586_v54 = vmul.f32 0.25, %v10727_v14  ;;  %5654 = vmax.xlane.f32.xlu1 %v5653_v34  ;;  %v5423_v57 = vpop.f32.mrb[153].mxu1 }
 0xfce   :  { %v5584_v10 = vmul.f32 0.25, %v5423_v57  ;;  %v10728_v24 = vpop.f32.mrb[154].mxu1  ;;  %v5656_v0 = vsel %vm1119_vm4, %v14587_v49, -inf }
 0xfcf   :  { %v14594_v3 = vadd.f32 %v5586_v54, %v16576_v37  ;;  %v5426_v38 = vpop.f32.mrb[155].mxu1 }
 0xfd0   :  { %v5585_v42 = vmul.f32 0.25, %v5426_v38  ;;  %5657 = vmax.xlane.f32.xlu0 %v5656_v0  ;;  %v14597_v50 = vadd.f32 %v5584_v10, %v16576_v37 }
 0xfd1   :  { %v5668_v47 = vsel %vm1119_vm4, %v14594_v3, -inf }
 0xfd2   :  { %v14602_v14 = vadd.f32 %v5585_v42, %v16576_v37  ;;  %5669 = vmax.xlane.f32.xlu1 %v5668_v47  ;;  %v5662_v34 = vsel %vm1119_vm4, %v14597_v50, -inf }
 0xfd4   :  { %v5665_v24 = vsel %vm1119_vm4, %v14602_v14, -inf }
 0xfd5   :  { %5666 = vmax.xlane.f32.xlu0 %v5665_v24 }
 0xfd6   :  { %5663 = vmax.xlane.f32.xlu1 %v5662_v34  ;;  %v10735_v38 = vpop.f32.mrb[140].mxu0 }
 0xfd7   :  { %v5589_v54 = vmul.f32 0.25, %v10735_v38  ;;  %v5489_v57 = vpop.f32.mrb[141].mxu0 }
 0xfd8   :  { %v5587_v10 = vmul.f32 0.25, %v5489_v57  ;;  %v10736_v0 = vpop.f32.mrb[142].mxu0 }
 0xfd9   :  { %v14609_v4 = vadd.f32 %v5589_v54, %v16576_v37  ;;  %v5492_v18 = vpop.f32.mrb[143].mxu0 }
 0xfda   :  { %v5588_v42 = vmul.f32 0.25, %v5492_v18  ;;  %v14612_v47 = vadd.f32 %v5587_v10, %v16576_v37 }
 0xfdb   :  { %v5677_v24 = vsel %vm1119_vm4, %v14609_v4, -inf }
 0xfdc   :  { %v14617_v11 = vadd.f32 %v5588_v42, %v16576_v37  ;;  %5678 = vmax.xlane.f32.xlu0 %v5677_v24  ;;  %v10743_v34 = vpop.f32.mrb[156].mxu1  ;;  %v5671_v1 = vsel %vm1119_vm4, %v14612_v47, -inf }
 0xfdd   :  { %v5592_v38 = vmul.f32 0.25, %v10743_v34  ;;  %v5555_v62 = vpop.f32.mrb[157].mxu1 }
 0xfde   :  { %v5590_v57 = vmul.f32 0.25, %v5555_v62  ;;  %v10744_v0 = vpop.f32.mrb[158].mxu1  ;;  %v5674_v54 = vsel %vm1119_vm4, %v14617_v11, -inf }
 0xfdf   :  { %v14622_v18 = vadd.f32 %v5592_v38, %v16576_v37  ;;  %5675 = vmax.xlane.f32.xlu1 %v5674_v54  ;;  %v5558_v10 = vpop.f32.mrb[159].mxu1 }
 0xfe0   :  { %v5591_v5 = vmul.f32 0.25, %v5558_v10  ;;  %5672 = vmax.xlane.f32.xlu0 %v5671_v1  ;;  %v14629_v24 = vadd.f32 %v5590_v57, %v16576_v37  ;;  %v14640_v1 = vpop.permute.xlu1 %6145 }
 0xfe1   :  { %v5686_v42 = vsel %vm1119_vm4, %v14622_v18, -inf }
 0xfe2   :  { %v14632_v62 = vadd.f32 %v5591_v5, %v16576_v37  ;;  %v5680_v38 = vsel %vm1119_vm4, %v14629_v24, -inf }
 0xfe3   :  { %5687 = vmax.xlane.f32.xlu1 %v5686_v42  ;;  %v14652_v42 = vpop.permute.xlu0 %6023 }
 0xfe4   :  { %v5683_v34 = vsel %vm1119_vm4, %v14632_v62, -inf  ;;  %v14642_v0 = vpop.permute.xlu1 %6085 }
 0xfe5   :  { %5684 = vmax.xlane.f32.xlu0 %v5683_v34 }
 0xfe7   :  { %5681 = vmax.xlane.f32.xlu1 %v5680_v38  ;;  %v14656_v38 = vpop.permute.xlu0 %6147 }
 0xfe8   :  { %v14644_v57 = vpop.permute.xlu1 %6207 }
 0xfec   :  { %v14646_v5 = vpop.permute.xlu1 %6269 }
 0xff0   :  { %v14648_v54 = vpop.permute.xlu1 %6209 }
 0xff4   :  { %v14650_v10 = vpop.permute.xlu1 %6271 }
 0xff5   :  { %16577 = vst [vmem:[#allocation20_spill] sm:$0xff] %v14650_v10 }
 0xff8   :  { %v14654_v34 = vpop.permute.xlu1 %6333 }
 0xff9   :  { %16578 = vst [vmem:[#allocation17_spill] sm:$0xff] %v14654_v34 }
 0xffb   :  { %6397 = vrot.lane.b32.xlu0 %v14331_v53, %s11865_s24 }
 0xffc   :  { %v14658_v41 = vpop.permute.xlu1 %6331 }
0x1030   :  { %v5625_v33 = vpop.xlane.xlu0 %5624 }
0x1031   :  { %v5691_v20 = vsub.f32 %v14519_v31, %v5625_v33 }
0x1033   :  { %v5717_v27 = vmul.f32 1.442695, %v5691_v20  ;;  %v5622_v63 = vpop.xlane.xlu1 %5621 }
0x1034   :  { %v5690_v36 = vsub.f32 %v14527_v60, %v5622_v63  ;;  %v5619_v48 = vpop.xlane.xlu0 %5618 }
0x1035   :  { %11574 = vpow2.f32 %v5717_v27  ;;  %v5689_v29 = vsub.f32 %v14522_v52, %v5619_v48 }
0x1036   :  { %v5715_v59 = vmul.f32 1.442695, %v5690_v36 }
0x1037   :  { %v5713_v51 = vmul.f32 1.442695, %v5689_v29  ;;  %v5634_v32 = vpop.xlane.xlu1 %5633 }
0x1038   :  { %11576 = vpow2.f32 %v5715_v59  ;;  %v5694_v2 = vsub.f32 %v14534_v8, %v5634_v32  ;;  %v5628_v37 = vpop.xlane.xlu0 %5627 }
0x1039   :  { %11578 = vpow2.f32 %v5713_v51  ;;  %v5692_v34 = vsub.f32 %v14537_v35, %v5628_v37 }
0x103a   :  { %v5723_v10 = vmul.f32 1.442695, %v5694_v2 }
0x103b   :  { %v5719_v33 = vmul.f32 1.442695, %v5692_v34 }
0x103c   :  { %11580 = vpow2.f32 %v5723_v10  ;;  %v5631_v20 = vpop.xlane.xlu0 %5630 }
0x103d   :  { %v5693_v63 = vsub.f32 %v14542_v12, %v5631_v20  ;;  %11582 = vpow2.f32 %v5719_v33 }
0x103f   :  { %v14666_v27 = vpop.eup %11574  ;;  %v5721_v48 = vmul.f32 1.442695, %v5693_v63 }
0x1040   :  { %v5643_v36 = vpop.xlane.xlu0 %5642  ;;  %v5767_v59 = vsel %vm1119_vm4, %v14666_v27, 0.0 }
0x1041   :  { %11584 = vpow2.f32 %v5721_v48  ;;  %v5697_v32 = vsub.f32 %v14549_v46, %v5643_v36  ;;  %v5637_v51 = vpop.xlane.xlu1 %5636  ;;  %5768 = vadd.xlane.f32.xlu0 %v5767_v59 }
0x1042   :  { %v14671_v29 = vpop.eup %11576  ;;  %v5695_v2 = vsub.f32 %v14552_v30, %v5637_v51 }
0x1043   :  { %v14674_v37 = vpop.eup %11578  ;;  %v5729_v31 = vmul.f32 1.442695, %v5697_v32  ;;  %v5764_v52 = vsel %vm1119_vm4, %v14671_v29, 0.0 }
0x1044   :  { %v5725_v60 = vmul.f32 1.442695, %v5695_v2  ;;  %5765 = vadd.xlane.f32.xlu1 %v5764_v52  ;;  %v5640_v8 = vpop.xlane.xlu0 %5639  ;;  %v5761_v35 = vsel %vm1119_vm4, %v14674_v37, 0.0 }
0x1045   :  { %11586 = vpow2.f32 %v5729_v31  ;;  %v5696_v12 = vsub.f32 %v14557_v28, %v5640_v8  ;;  %5762 = vadd.xlane.f32.xlu0 %v5761_v35 }
0x1046   :  { %v14681_v46 = vpop.eup %11580  ;;  %11588 = vpow2.f32 %v5725_v60 }
0x1047   :  { %v5727_v30 = vmul.f32 1.442695, %v5696_v12  ;;  %v5652_v10 = vpop.xlane.xlu1 %5651  ;;  %v5776_v34 = vsel %vm1119_vm4, %v14681_v46, 0.0  ;;  %v14685_v33 = vpop.eup %11582 }
0x1048   :  { %v5700_v20 = vsub.f32 %v14564_v58, %v5652_v10  ;;  %5777 = vadd.xlane.f32.xlu1 %v5776_v34  ;;  %v5770_v32 = vsel %vm1119_vm4, %v14685_v33, 0.0 }
0x1049   :  { %11590 = vpow2.f32 %v5727_v30 }
0x104a   :  { %v5735_v63 = vmul.f32 1.442695, %v5700_v20  ;;  %v5649_v48 = vpop.xlane.xlu0 %5648 }
0x104b   :  { %v14688_v36 = vpop.eup %11584  ;;  %v5699_v28 = vsub.f32 %v14572_v40, %v5649_v48  ;;  %v5646_v59 = vpop.xlane.xlu1 %5645 }
0x104c   :  { %11592 = vpow2.f32 %v5735_v63  ;;  %v5698_v51 = vsub.f32 %v14567_v9, %v5646_v59  ;;  %5771 = vadd.xlane.f32.xlu1 %v5770_v32  ;;  %v5773_v2 = vsel %vm1119_vm4, %v14688_v36, 0.0 }
0x104d   :  { %v5733_v58 = vmul.f32 1.442695, %v5699_v28  ;;  %5774 = vadd.xlane.f32.xlu0 %v5773_v2 }
0x104e   :  { %v5731_v31 = vmul.f32 1.442695, %v5698_v51 }
0x104f   :  { %v14696_v52 = vpop.eup %11586  ;;  %11594 = vpow2.f32 %v5733_v58 }
0x1050   :  { %v14698_v60 = vpop.eup %11588  ;;  %11596 = vpow2.f32 %v5731_v31  ;;  %v5785_v40 = vsel %vm1119_vm4, %v14696_v52, 0.0 }
0x1051   :  { %5786 = vadd.xlane.f32.xlu0 %v5785_v40  ;;  %v5779_v9 = vsel %vm1119_vm4, %v14698_v60, 0.0 }
0x1052   :  { %5780 = vadd.xlane.f32.xlu1 %v5779_v9 }
0x1053   :  { %v14704_v8 = vpop.eup %11590 }
0x1054   :  { %v5782_v35 = vsel %vm1119_vm4, %v14704_v8, 0.0 }
0x1055   :  { %5783 = vadd.xlane.f32.xlu0 %v5782_v35 }
0x1056   :  { %v14708_v12 = vpop.eup %11592 }
0x1057   :  { %v5794_v30 = vsel %vm1119_vm4, %v14708_v12, 0.0 }
0x1058   :  { %5795 = vadd.xlane.f32.xlu1 %v5794_v30 }
0x1059   :  { %v14712_v10 = vpop.eup %11594  ;;  %v5661_v34 = vpop.xlane.xlu0 %5660 }
0x105a   :  { %v14714_v20 = vpop.eup %11596  ;;  %v5703_v63 = vsub.f32 %v14579_v39, %v5661_v34  ;;  %v5655_v48 = vpop.xlane.xlu1 %5654  ;;  %v5791_v28 = vsel %vm1119_vm4, %v14712_v10, 0.0 }
0x105b   :  { %v5701_v59 = vsub.f32 %v14582_v22, %v5655_v48  ;;  %5792 = vadd.xlane.f32.xlu0 %v5791_v28  ;;  %v5788_v32 = vsel %vm1119_vm4, %v14714_v20, 0.0 }
0x105c   :  { %v5741_v51 = vmul.f32 1.442695, %v5703_v63  ;;  %5789 = vadd.xlane.f32.xlu1 %v5788_v32 }
0x105d   :  { %v5737_v2 = vmul.f32 1.442695, %v5701_v59  ;;  %v5658_v58 = vpop.xlane.xlu0 %5657 }
0x105e   :  { %11598 = vpow2.f32 %v5741_v51  ;;  %v5702_v31 = vsub.f32 %v14587_v49, %v5658_v58 }
0x105f   :  { %11600 = vpow2.f32 %v5737_v2  ;;  %v5670_v40 = vpop.xlane.xlu1 %5669 }
0x1060   :  { %v5739_v39 = vmul.f32 1.442695, %v5702_v31  ;;  %v5706_v9 = vsub.f32 %v14594_v3, %v5670_v40 }
0x1062   :  { %11602 = vpow2.f32 %v5739_v39  ;;  %v5747_v35 = vmul.f32 1.442695, %v5706_v9  ;;  %v5667_v30 = vpop.xlane.xlu0 %5666 }
0x1063   :  { %v5664_v22 = vpop.xlane.xlu1 %5663  ;;  %v5705_v34 = vsub.f32 %v14602_v14, %v5667_v30 }
0x1064   :  { %11604 = vpow2.f32 %v5747_v35  ;;  %v5704_v63 = vsub.f32 %v14597_v50, %v5664_v22 }
0x1065   :  { %v5745_v59 = vmul.f32 1.442695, %v5705_v34 }
0x1066   :  { %v5743_v48 = vmul.f32 1.442695, %v5704_v63 }
0x1068   :  { %v14726_v28 = vpop.eup %11598  ;;  %11606 = vpow2.f32 %v5743_v48 }
0x1069   :  { %v14728_v49 = vpop.eup %11600  ;;  %v5679_v32 = vpop.xlane.xlu0 %5678  ;;  %v5803_v3 = vsel %vm1119_vm4, %v14726_v28, 0.0  ;;  %11608 = vpow2.f32 %v5745_v59 }
0x106a   :  { %v5709_v51 = vsub.f32 %v14609_v4, %v5679_v32  ;;  %5804 = vadd.xlane.f32.xlu0 %v5803_v3  ;;  %v5797_v2 = vsel %vm1119_vm4, %v14728_v49, 0.0 }
0x106b   :  { %5798 = vadd.xlane.f32.xlu1 %v5797_v2 }
0x106c   :  { %v14735_v14 = vpop.eup %11602  ;;  %v5753_v50 = vmul.f32 1.442695, %v5709_v51  ;;  %v5676_v58 = vpop.xlane.xlu1 %5675 }
0x106d   :  { %v5708_v31 = vsub.f32 %v14617_v11, %v5676_v58  ;;  %v5673_v40 = vpop.xlane.xlu0 %5672  ;;  %v5800_v39 = vsel %vm1119_vm4, %v14735_v14, 0.0 }
0x106e   :  { %v14740_v9 = vpop.eup %11604  ;;  %11610 = vpow2.f32 %v5753_v50  ;;  %v5707_v4 = vsub.f32 %v14612_v47, %v5673_v40  ;;  %5801 = vadd.xlane.f32.xlu0 %v5800_v39 }
0x106f   :  { %v5751_v35 = vmul.f32 1.442695, %v5708_v31  ;;  %v5812_v63 = vsel %vm1119_vm4, %v14740_v9, 0.0 }
0x1070   :  { %v5749_v30 = vmul.f32 1.442695, %v5707_v4  ;;  %v5688_v22 = vpop.xlane.xlu1 %5687 }
0x1071   :  { %11612 = vpow2.f32 %v5751_v35  ;;  %v5712_v34 = vsub.f32 %v14622_v18, %v5688_v22 }
0x1072   :  { %v14746_v11 = vpop.eup %11606  ;;  %11614 = vpow2.f32 %v5749_v30  ;;  %5813 = vadd.xlane.f32.xlu0 %v5812_v63  ;;  %v5685_v22 = vpop.xlane.xlu0 %5684 }
0x1073   :  { %v5759_v48 = vmul.f32 1.442695, %v5712_v34  ;;  %v5806_v47 = vsel %vm1119_vm4, %v14746_v11, 0.0  ;;  %v14751_v3 = vpop.eup %11608  ;;  %v5711_v34 = vsub.f32 %v14632_v62, %v5685_v22 }
0x1074   :  { %v5682_v59 = vpop.xlane.xlu1 %5681  ;;  %v5809_v2 = vsel %vm1119_vm4, %v14751_v3, 0.0 }
0x1075   :  { %11616 = vpow2.f32 %v5759_v48  ;;  %v5710_v32 = vsub.f32 %v14629_v24, %v5682_v59  ;;  %v5757_v63 = vmul.f32 1.442695, %v5711_v34 }
0x1076   :  { %5807 = vadd.xlane.f32.xlu0 %v5806_v47  ;;  %v14810_v59 = vpop.permute.xlu0 %6397 }
0x1077   :  { %v5755_v51 = vmul.f32 1.442695, %v5710_v32 }
0x1078   :  { %v14753_v18 = vpop.eup %11610 }
0x1079   :  { %11618 = vpow2.f32 %v5755_v51  ;;  %v5821_v50 = vsel %vm1119_vm4, %v14753_v18, 0.0 }
0x107a   :  { %5810 = vadd.xlane.f32.xlu0 %v5809_v2  ;;  %5822 = vadd.xlane.f32.xlu1 %v5821_v50  ;;  %11620 = vpow2.f32 %v5757_v63 }
0x107b   :  { %v14759_v58 = vpop.eup %11612 }
0x107c   :  { %v14761_v24 = vpop.eup %11614  ;;  %v5818_v31 = vsel %vm1119_vm4, %v14759_v58, 0.0 }
0x107d   :  { %v5815_v40 = vsel %vm1119_vm4, %v14761_v24, 0.0 }
0x107e   :  { %5819 = vadd.xlane.f32.xlu0 %v5818_v31  ;;  %5816 = vadd.xlane.f32.xlu1 %v5815_v40 }
0x107f   :  { %v14767_v39 = vpop.eup %11616 }
0x1080   :  { %v5830_v4 = vsel %vm1119_vm4, %v14767_v39, 0.0 }
0x1082   :  { %5831 = vadd.xlane.f32.xlu0 %v5830_v4 }
0x1083   :  { %v14771_v35 = vpop.eup %11618 }
0x1084   :  { %v5824_v30 = vsel %vm1119_vm4, %v14771_v35, 0.0  ;;  %v14788_v48 = vpop.eup %11620 }
0x1085   :  { %v5827_v62 = vsel %vm1119_vm4, %v14788_v48, 0.0 }
0x1086   :  { %5825 = vadd.xlane.f32.xlu0 %v5824_v30 }
0x108f   :  { %6399 = vrot.lane.b32.xlu1 %v14325_v44, %s11865_s24 }
0x109c   :  { %6465 = vrot.lane.b32.xlu0 %v14341_v21, %s11865_s24 }
0x10a0   :  { %6467 = vrot.lane.b32.xlu0 %v14352_v25, %s11865_s24 }
0x10a4   :  { %6395 = vrot.lane.b32.xlu0 %v14325_v44, %s11866_s25 }
0x10a8   :  { %6535 = vrot.lane.b32.xlu0 %v14358_v15, %s11865_s24 }
0x10ac   :  { %6463 = vrot.lane.b32.xlu0 %v14352_v25, %s11866_s25 }
0x10b0   :  { %6603 = vrot.lane.b32.xlu0 %v14366_v13, %s11865_s24 }
0x10b3   :  { %5828 = vadd.xlane.f32.xlu1 %v5827_v62 }
0x10b4   :  { %6531 = vrot.lane.b32.xlu0 %v14358_v15, %s11866_s25 }
0x10b8   :  { %6671 = vrot.lane.b32.xlu0 %v14373_v19, %s11865_s24 }
0x10bc   :  { %6599 = vrot.lane.b32.xlu0 %v14366_v13, %s11866_s25 }
0x10c0   :  { %6739 = vrot.lane.b32.xlu0 %v14392_v23, %s11865_s24 }
0x10c4   :  { %6667 = vrot.lane.b32.xlu0 %v14373_v19, %s11866_s25  ;;  %6393 = vrot.lane.b32.xlu1 %v14331_v53, %s11866_s25 }
0x10c8   :  { %6807 = vrot.lane.b32.xlu0 %v14402_v61, %s11865_s24  ;;  %6533 = vrot.lane.b32.xlu1 %v14344_v56, %s11865_s24 }
0x10cc   :  { %6735 = vrot.lane.b32.xlu0 %v14392_v23, %s11866_s25  ;;  %6461 = vrot.lane.b32.xlu1 %v14341_v21, %s11866_s25 }
0x10ce   :  { %v5769_v32 = vpop.xlane.xlu0 %5768 }
0x10cf   :  { %11622 = vrcp.f32 %v5769_v32 }
0x10d0   :  { %6803 = vrot.lane.b32.xlu0 %v14402_v61, %s11866_s25  ;;  %6601 = vrot.lane.b32.xlu1 %v14362_v45, %s11865_s24 }
0x10d1   :  { %v5766_v47 = vpop.xlane.xlu1 %5765 }
0x10d2   :  { %11624 = vrcp.f32 %v5766_v47  ;;  %v5763_v51 = vpop.xlane.xlu0 %5762 }
0x10d3   :  { %11626 = vrcp.f32 %v5763_v51 }
0x10d4   :  { %6869 = vrot.lane.b32.xlu0 %v14406_v6, %s11866_s25  ;;  %6529 = vrot.lane.b32.xlu1 %v14344_v56, %s11866_s25 }
0x10d5   :  { %v5778_v2 = vpop.xlane.xlu1 %5777 }
0x10d6   :  { %11628 = vrcp.f32 %v5778_v2 }
0x10d8   :  { %7265 = vrot.lane.b32.xlu0 %v14331_v53, %s11867_s27  ;;  %6669 = vrot.lane.b32.xlu1 %v14379_v17, %s11865_s24 }
0x10d9   :  { %v5772_v50 = vpop.xlane.xlu1 %5771  ;;  %v11623_v31 = vpop.eup %11622 }
0x10da   :  { %11630 = vrcp.f32 %v5772_v50  ;;  %v5775_v40 = vpop.xlane.xlu0 %5774  ;;  %v5859_v53 = vmul.f32 %v11623_v31, %v14666_v27 }
0x10db   :  { %11632 = vrcp.f32 %v5775_v40 }
0x10dc   :  { %v11625_v4 = vpop.eup %11624  ;;  %7267 = vrot.lane.b32.xlu0 %v14325_v44, %s11867_s27  ;;  %6597 = vrot.lane.b32.xlu1 %v14362_v45, %s11866_s25  ;;  %v5882_v32 = vpack.c.bf16 %v5859_v53, %v5859_v53 }
0x10dd   :  { %v11627_v30 = vpop.eup %11626  ;;  %v5858_v22 = vmul.f32 %v11625_v4, %v14671_v29 }
0x10de   :  { %v5787_v34 = vpop.xlane.xlu0 %5786  ;;  %v5857_v63 = vmul.f32 %v11627_v30, %v14674_v37 }
0x10df   :  { %v5781_v62 = vpop.xlane.xlu1 %5780  ;;  %11634 = vrcp.f32 %v5787_v34 }
0x10e0   :  { %7329 = vrot.lane.b32.xlu0 %v14352_v25, %s11867_s27  ;;  %6737 = vrot.lane.b32.xlu1 %v14387_v26, %s11865_s24  ;;  %v5881_v44 = vpack.c.bf16 %v5858_v22, %v5857_v63  ;;  %11636 = vrcp.f32 %v5781_v62  ;;  %v11629_v47 = vpop.eup %11628  ;;  %v6095_v22 = vsel %vm1411_vm2, %v14642_v0, 0  ;;  %v6157_v62 = vsel %vm1411_vm2, %v14656_v38, 0 }
0x10e1   :  { %v5862_v2 = vmul.f32 %v11629_v47, %v14681_v46 }
0x10e2   :  { %10749 = vmatprep.mubr.msk.bf16.mxu0 %vm1119_vm4, %v5881_v44  ;;  %v5784_v29 = vpop.xlane.xlu0 %5783 }
0x10e3   :  { %11638 = vrcp.f32 %v5784_v29  ;;  %10750 = vmatmul.mubr.msk.bf16.vlgmr.msra.gmra.mrb[144].mxu0 %vm1119_vm4, %v5882_v32  ;;  %v5884_v46 = vpack.c.bf16 %v5862_v2, %v5862_v2 }
0x10e4   :  { %v11631_v27 = vpop.eup %11630  ;;  %10762 = vmatpush3.bf16.msra.mxu0 %v14506_v16  ;;  %7391 = vrot.lane.b32.xlu0 %v14358_v15, %s11867_s27  ;;  %v6033_v16 = vsel %vm1411_vm2, %v14652_v42, 0 }
0x10e5   :  { %v11633_v25 = vpop.eup %11632  ;;  %v5796_v37 = vpop.xlane.xlu1 %5795  ;;  %6665 = vrot.lane.b32.xlu1 %v14379_v17, %s11866_s25  ;;  %11103 = vmatprep.subr.msk.bf16.mxu0 %vm1411_vm2, %v14652_v42  ;;  %v5860_v51 = vmul.f32 %v11631_v27, %v14685_v33 }
0x10e6   :  { %v5861_v50 = vmul.f32 %v11633_v25, %v14688_v36  ;;  %11640 = vrcp.f32 %v5796_v37 }
0x10e8   :  { %10764 = vmatpush3.bf16.msra.mxu0 %v6033_v16  ;;  %v5793_v15 = vpop.xlane.xlu0 %5792  ;;  %7513 = vrot.lane.b32.xlu0 %v14379_v17, %s11867_s27  ;;  %v5883_v31 = vpack.c.bf16 %v5861_v50, %v5860_v51 }
0x10e9   :  { %11642 = vrcp.f32 %v5793_v15  ;;  %v5790_v40 = vpop.xlane.xlu1 %5789  ;;  %6805 = vrot.lane.b32.xlu1 %v14390_v55, %s11865_s24  ;;  %10777 = vmatprep.subr.bf16.mxu0 %v14640_v1  ;;  %v11635_v33 = vpop.eup %11634 }
0x10ea   :  { %11644 = vrcp.f32 %v5790_v40  ;;  %10757 = vmatprep.mubr.msk.bf16.mxu1 %vm1119_vm4, %v5883_v31  ;;  %v11637_v36 = vpop.eup %11636  ;;  %v5865_v17 = vmul.f32 %v11635_v33, %v14696_v52 }
0x10eb   :  { %10758 = vmatmul.mubr.msk.bf16.vlgmr.msra.gmra.mrb[160].mxu1 %vm1119_vm4, %v5884_v46  ;;  %v5863_v4 = vmul.f32 %v11637_v36, %v14698_v60 }
0x10ec   :  { %10770 = vmatpush3.bf16.msra.mxu1 %v14515_v7  ;;  %v5886_v7 = vpack.c.bf16 %v5865_v17, %v5865_v17 }
0x10ed   :  { %v11639_v42 = vpop.eup %11638  ;;  %6733 = vrot.lane.b32.xlu1 %v14387_v26, %s11866_s25  ;;  %11104 = vmatprep.subr.msk.bf16.mxu1 %vm1411_vm2, %v14642_v0 }
0x10ee   :  { %v5864_v30 = vmul.f32 %v11639_v42, %v14704_v8 }
0x10f0   :  { %10772 = vmatpush3.bf16.msra.mxu1 %v6095_v22  ;;  %v5885_v53 = vpack.c.bf16 %v5864_v30, %v5863_v4  ;;  %v11641_v34 = vpop.eup %11640 }
0x10f1   :  { %6873 = vrot.lane.b32.xlu1 %v14406_v6, %s11865_s24  ;;  %10785 = vmatprep.subr.bf16.mxu1 %v14644_v57  ;;  %v5868_v0 = vmul.f32 %v11641_v34, %v14708_v12 }
0x10f2   :  { %10765 = vmatprep.mubr.msk.bf16.mxu0 %vm1119_vm4, %v5885_v53 }
0x10f3   :  { %v11643_v63 = vpop.eup %11642  ;;  %10766 = vmatmul.mubr.msk.bf16.vlgmr.msra.gmra.mrb[148].mxu0 %vm1119_vm4, %v5886_v7 }
0x10f4   :  { %v11645_v52 = vpop.eup %11644  ;;  %10778 = vmatpush3.bf16.msra.mxu0 %v14640_v1  ;;  %v5867_v60 = vmul.f32 %v11643_v63, %v14712_v10  ;;  %v5888_v1 = vpack.c.bf16 %v5868_v0, %v5868_v0 }
0x10f5   :  { %6801 = vrot.lane.b32.xlu1 %v14390_v55, %s11866_s25  ;;  %11105 = vmatprep.subr.msk.bf16.mxu0 %vm1411_vm2, %v14656_v38  ;;  %v5866_v8 = vmul.f32 %v11645_v52, %v14714_v20  ;;  %v6219_v38 = vsel %vm1411_vm2, %v14648_v54, 0 }
0x10f7   :  { %v5805_v44 = vpop.xlane.xlu0 %5804  ;;  %v5887_v32 = vpack.c.bf16 %v5867_v60, %v5866_v8 }
0x10f8   :  { %10780 = vmatpush3.bf16.msra.mxu0 %v6157_v62  ;;  %v5799_v47 = vpop.xlane.xlu1 %5798  ;;  %11646 = vrcp.f32 %v5805_v44 }
0x10f9   :  { %6875 = vrot.lane.b32.xlu1 %v14410_v43, %s11865_s24  ;;  %10773 = vmatprep.mubr.msk.bf16.mxu1 %vm1119_vm4, %v5887_v32  ;;  %11648 = vrcp.f32 %v5799_v47 }
0x10fa   :  { %10793 = vmatprep.subr.bf16.mxu0 %v14646_v5  ;;  %10774 = vmatmul.mubr.msk.bf16.vlgmr.msra.gmra.mrb[164].mxu1 %vm1119_vm4, %v5888_v1 }
0x10fb   :  { %10786 = vmatpush3.bf16.msra.mxu1 %v14644_v57  ;;  %v5802_v12 = vpop.xlane.xlu0 %5801 }
0x10fc   :  { %11106 = vmatprep.subr.msk.bf16.mxu1 %vm1411_vm2, %v14648_v54  ;;  %11650 = vrcp.f32 %v5802_v12 }
0x10fd   :  { %6871 = vrot.lane.b32.xlu1 %v14410_v43, %s11866_s25 }
0x10ff   :  { %10788 = vmatpush3.bf16.msra.mxu1 %v6219_v38  ;;  %v5814_v10 = vpop.xlane.xlu0 %5813 }
0x1100   :  { %10801 = vmatprep.subr.bf16.mxu1 %v14658_v41  ;;  %11652 = vrcp.f32 %v5814_v10 }
0x1101   :  { %7327 = vrot.lane.b32.xlu1 %v14341_v21, %s11867_s27 }
0x1102   :  { %v11647_v20 = vpop.eup %11646 }
0x1103   :  { %v5808_v57 = vpop.xlane.xlu0 %5807  ;;  %v11649_v29 = vpop.eup %11648  ;;  %v5871_v25 = vmul.f32 %v11647_v20, %v14726_v28  ;;  %v16579_v28 = vld [vmem:[#allocation20_spill] sm:$0xff] }
0x1104   :  { %11654 = vrcp.f32 %v5808_v57  ;;  %v5869_v51 = vmul.f32 %v11649_v29, %v14728_v49 }
0x1105   :  { %7389 = vrot.lane.b32.xlu1 %v14344_v56, %s11867_s27  ;;  %v5890_v50 = vpack.c.bf16 %v5871_v25, %v5871_v25 }
0x1106   :  { %v11651_v27 = vpop.eup %11650 }
0x1107   :  { %v5823_v37 = vpop.xlane.xlu1 %5822  ;;  %v5811_v54 = vpop.xlane.xlu0 %5810  ;;  %v5870_v2 = vmul.f32 %v11651_v27, %v14735_v14  ;;  %v6281_v14 = vsel %vm1411_vm2, %v16579_v28, 0 }
0x1108   :  { %11656 = vrcp.f32 %v5811_v54 }
0x1109   :  { %7451 = vrot.lane.b32.xlu1 %v14362_v45, %s11867_s27  ;;  %v5889_v21 = vpack.c.bf16 %v5870_v2, %v5869_v51  ;;  %11658 = vrcp.f32 %v5823_v37 }
0x110a   :  { %v11653_v49 = vpop.eup %11652 }
0x110b   :  { %v5817_v16 = vpop.xlane.xlu1 %5816  ;;  %10781 = vmatprep.mubr.msk.bf16.mxu0 %vm1119_vm4, %v5889_v21  ;;  %v5820_v56 = vpop.xlane.xlu0 %5819 }
0x110c   :  { %11660 = vrcp.f32 %v5817_v16  ;;  %10782 = vmatmul.mubr.msk.bf16.vlgmr.msra.gmra.mrb[152].mxu0 %vm1119_vm4, %v5890_v50 }
0x110d   :  { %11662 = vrcp.f32 %v5820_v56  ;;  %7453 = vrot.lane.b32.xlu1 %v14366_v13, %s11867_s27  ;;  %10794 = vmatpush3.bf16.msra.mxu0 %v14646_v5  ;;  %v5874_v5 = vmul.f32 %v11653_v49, %v14740_v9 }
0x110e   :  { %11107 = vmatprep.subr.msk.bf16.mxu0 %vm1411_vm2, %v16579_v28  ;;  %v11655_v15 = vpop.eup %11654 }
0x110f   :  { %v5832_v45 = vpop.xlane.xlu0 %5831  ;;  %v5872_v46 = vmul.f32 %v11655_v15, %v14746_v11  ;;  %v16580_v11 = vld [vmem:[#allocation17_spill] sm:$0xff] }
0x1110   :  { %11664 = vrcp.f32 %v5832_v45 }
0x1111   :  { %7575 = vrot.lane.b32.xlu1 %v14387_v26, %s11867_s27  ;;  %10796 = vmatpush3.bf16.msra.mxu0 %v6281_v14  ;;  %v5892_v26 = vpack.c.bf16 %v5874_v5, %v5874_v5 }
0x1112   :  { %11109 = vmatprep.subr.msk.bf16.mxu0 %vm548_vm1, %v14810_v59  ;;  %v11657_v31 = vpop.eup %11656 }
0x1113   :  { %v5826_v13 = vpop.xlane.xlu0 %5825  ;;  %v11659_v40 = vpop.eup %11658  ;;  %v5873_v33 = vmul.f32 %v11657_v31, %v14751_v3 }
0x1114   :  { %v5877_v30 = vmul.f32 %v11659_v40, %v14753_v18  ;;  %v6343_v18 = vsel %vm1411_vm2, %v16580_v11, 0  ;;  %11666 = vrcp.f32 %v5826_v13 }
0x1115   :  { %7515 = vrot.lane.b32.xlu1 %v14373_v19, %s11867_s27  ;;  %v5891_v42 = vpack.c.bf16 %v5873_v33, %v5872_v46 }
0x1116   :  { %v11661_v36 = vpop.eup %11660  ;;  %v5894_v3 = vpack.c.bf16 %v5877_v30, %v5877_v30 }
0x1117   :  { %v11663_v17 = vpop.eup %11662  ;;  %v5875_v4 = vmul.f32 %v11661_v36, %v14761_v24  ;;  %10789 = vmatprep.mubr.msk.bf16.mxu1 %vm1119_vm4, %v5891_v42  ;;  %v6466_v22 = vpop.permute.xlu0 %6465 }
0x1118   :  { %v5876_v9 = vmul.f32 %v11663_v17, %v14759_v58  ;;  %10790 = vmatmul.mubr.msk.bf16.vlgmr.msra.gmra.mrb[168].mxu1 %vm1119_vm4, %v5892_v26  ;;  %v6408_v58 = vsel %vm548_vm1, %v14810_v59, 0  ;;  %v6476_v37 = vsel %vm548_vm1, %v6466_v22, 0 }
0x1119   :  { %7577 = vrot.lane.b32.xlu1 %v14392_v23, %s11867_s27  ;;  %10802 = vmatpush3.bf16.msra.mxu1 %v14658_v41  ;;  %v6400_v23 = vpop.permute.xlu1 %6399 }
0x111a   :  { %v5893_v19 = vpack.c.bf16 %v5876_v9, %v5875_v4  ;;  %11108 = vmatprep.subr.msk.bf16.mxu1 %vm1411_vm2, %v16580_v11  ;;  %v6411_v53 = vsel %vm548_vm1, %v6400_v23, 0  ;;  %v11665_v8 = vpop.eup %11664 }
0x111b   :  { %v6468_v24 = vpop.permute.xlu0 %6467  ;;  %v5880_v12 = vmul.f32 %v11665_v8, %v14767_v39 }
0x111c   :  { %10797 = vmatprep.mubr.msk.bf16.mxu0 %vm1119_vm4, %v5893_v19  ;;  %v6479_v51 = vsel %vm548_vm1, %v6468_v24, 0 }
0x111d   :  { %10798 = vmatmul.mubr.msk.bf16.vlgmr.msra.gmra.mrb[156].mxu0 %vm1119_vm4, %v5894_v3  ;;  %10804 = vmatpush3.bf16.msra.mxu1 %v6343_v18  ;;  %v5896_v27 = vpack.c.bf16 %v5880_v12, %v5880_v12 }
0x111e   :  { %10810 = vmatpush3.bf16.xpose.msra.mxu0 %v6408_v58  ;;  %11111 = vmatprep.subr.msk.bf16.mxu1 %vm548_vm1, %v6466_v22  ;;  %v11667_v44 = vpop.eup %11666 }
0x111f   :  { %11110 = vmatprep.subr.msk.bf16.mxu0 %vm548_vm1, %v6400_v23  ;;  %v6396_v41 = vpop.permute.xlu0 %6395  ;;  %v5878_v10 = vmul.f32 %v11667_v44, %v14771_v35 }
0x1123   :  { %v6536_v34 = vpop.permute.xlu0 %6535 }
0x1124   :  { %v6547_v39 = vsel %vm548_vm1, %v6536_v34, 0 }
0x1126   :  { %10812 = vmatpush3.bf16.xpose.msra.mxu0 %v6411_v53 }
0x1127   :  { %v6464_v7 = vpop.permute.xlu0 %6463 }
0x112b   :  { %v6604_v63 = vpop.permute.xlu0 %6603 }
0x112c   :  { %v6615_v31 = vsel %vm548_vm1, %v6604_v63, 0 }
0x112f   :  { %v6532_v52 = vpop.permute.xlu0 %6531 }
0x1133   :  { %v6672_v59 = vpop.permute.xlu0 %6671 }
0x1134   :  { %v6683_v45 = vsel %vm548_vm1, %v6672_v59, 0 }
0x1137   :  { %v6600_v32 = vpop.permute.xlu0 %6599 }
0x113b   :  { %v6740_v29 = vpop.permute.xlu0 %6739 }
0x113c   :  { %v6751_v4 = vsel %vm548_vm1, %v6740_v29, 0 }
0x1140   :  { %v5829_v60 = vpop.xlane.xlu1 %5828 }
0x1141   :  { %11668 = vrcp.f32 %v5829_v60 }
0x1144   :  { %v6394_v0 = vpop.permute.xlu1 %6393 }
0x1145   :  { %10813 = vmatprep.mubr.msk.bf16.mxu0 %vm548_vm1, %v6394_v0 }
0x1146   :  { %10814 = vmatmul.mubr.msk.bf16.vlgmr.msra.gmra.mrb[160].mxu0 %vm548_vm1, %v6396_v41 }
0x1148   :  { %v6534_v62 = vpop.permute.xlu1 %6533 }
0x1149   :  { %11113 = vmatprep.subr.msk.bf16.mxu0 %vm548_vm1, %v6534_v62  ;;  %v6544_v47 = vsel %vm548_vm1, %v6534_v62, 0 }
0x114a   :  { %10826 = vmatpush3.bf16.xpose.msra.mxu0 %v6544_v47 }
0x114b   :  { %v11669_v1 = vpop.eup %11668  ;;  %11114 = vmatprep.subr.msk.bf16.mxu0 %vm548_vm1, %v6536_v34 }
0x114c   :  { %v6462_v38 = vpop.permute.xlu1 %6461  ;;  %v5879_v20 = vmul.f32 %v11669_v1, %v14788_v48  ;;  %v6668_v48 = vpop.permute.xlu0 %6667 }
0x114e   :  { %v5895_v57 = vpack.c.bf16 %v5879_v20, %v5878_v10 }
0x1150   :  { %v6602_v25 = vpop.permute.xlu1 %6601  ;;  %10805 = vmatprep.mubr.msk.bf16.mxu1 %vm1119_vm4, %v5895_v57  ;;  %v6808_v21 = vpop.permute.xlu0 %6807 }
0x1151   :  { %10806 = vmatmul.mubr.msk.bf16.vlgmr.msra.gmra.mrb[172].mxu1 %vm1119_vm4, %v5896_v27  ;;  %v6612_v28 = vsel %vm548_vm1, %v6602_v25, 0  ;;  %v6819_v36 = vsel %vm548_vm1, %v6808_v21, 0 }
0x1152   :  { %10818 = vmatpush3.bf16.xpose.msra.mxu1 %v6476_v37  ;;  %10821 = vmatprep.mubr.msk.bf16.mxu1 %vm548_vm1, %v6462_v38 }
0x1153   :  { %11112 = vmatprep.subr.msk.bf16.mxu1 %vm548_vm1, %v6468_v24  ;;  %10828 = vmatpush3.bf16.xpose.msra.mxu0 %v6547_v39 }
0x1154   :  { %v6530_v35 = vpop.permute.xlu1 %6529  ;;  %v6736_v56 = vpop.permute.xlu0 %6735 }
0x1155   :  { %10829 = vmatprep.mubr.msk.bf16.mxu0 %vm548_vm1, %v6530_v35 }
0x1158   :  { %v6670_v54 = vpop.permute.xlu1 %6669  ;;  %v6804_v14 = vpop.permute.xlu0 %6803 }
0x1159   :  { %11117 = vmatprep.subr.msk.bf16.mxu0 %vm548_vm1, %v6670_v54  ;;  %v6680_v2 = vsel %vm548_vm1, %v6670_v54, 0 }
0x115a   :  { %10820 = vmatpush3.bf16.xpose.msra.mxu1 %v6479_v51  ;;  %10830 = vmatmul.mubr.msk.bf16.vlgmr.msra.gmra.mrb[164].mxu0 %vm548_vm1, %v6532_v52 }
0x115b   :  { %11115 = vmatprep.subr.msk.bf16.mxu1 %vm548_vm1, %v6602_v25  ;;  %10842 = vmatpush3.bf16.xpose.msra.mxu0 %v6680_v2 }
0x115c   :  { %11118 = vmatprep.subr.msk.bf16.mxu0 %vm548_vm1, %v6672_v59  ;;  %v6598_v50 = vpop.permute.xlu1 %6597  ;;  %v6870_v40 = vpop.permute.xlu0 %6869 }
0x1160   :  { %v6738_v16 = vpop.permute.xlu1 %6737  ;;  %v7266_v42 = vpop.permute.xlu0 %7265 }
0x1161   :  { %10822 = vmatmul.mubr.msk.bf16.vlgmr.msra.gmra.mrb[176].mxu1 %vm548_vm1, %v6464_v7  ;;  %v6748_v33 = vsel %vm548_vm1, %v6738_v16, 0 }
0x1162   :  { %10834 = vmatpush3.bf16.xpose.msra.mxu1 %v6612_v28  ;;  %10837 = vmatprep.mubr.msk.bf16.mxu1 %vm548_vm1, %v6598_v50 }
0x1163   :  { %11116 = vmatprep.subr.msk.bf16.mxu1 %vm548_vm1, %v6604_v63  ;;  %10844 = vmatpush3.bf16.xpose.msra.mxu0 %v6683_v45 }
0x1164   :  { %v6666_v49 = vpop.permute.xlu1 %6665  ;;  %v7268_v30 = vpop.permute.xlu0 %7267 }
0x1165   :  { %10845 = vmatprep.mubr.msk.bf16.mxu0 %vm548_vm1, %v6666_v49  ;;  %v7277_v22 = vsel %vm1411_vm2, %v7268_v30, 0 }
0x1168   :  { %v6806_v15 = vpop.permute.xlu1 %6805  ;;  %v7330_v58 = vpop.permute.xlu0 %7329 }
0x1169   :  { %11121 = vmatprep.subr.msk.bf16.mxu0 %vm548_vm1, %v6806_v15  ;;  %v6816_v13 = vsel %vm548_vm1, %v6806_v15, 0  ;;  %v7339_v23 = vsel %vm1411_vm2, %v7330_v58, 0 }
0x116a   :  { %10836 = vmatpush3.bf16.xpose.msra.mxu1 %v6615_v31  ;;  %10846 = vmatmul.mubr.msk.bf16.vlgmr.msra.gmra.mrb[168].mxu0 %vm548_vm1, %v6668_v48 }
0x116b   :  { %11119 = vmatprep.subr.msk.bf16.mxu1 %vm548_vm1, %v6738_v16  ;;  %10858 = vmatpush3.bf16.xpose.msra.mxu0 %v6816_v13 }
0x116c   :  { %11122 = vmatprep.subr.msk.bf16.mxu0 %vm548_vm1, %v6808_v21  ;;  %v6734_v5 = vpop.permute.xlu1 %6733 }
0x1170   :  { %v6874_v46 = vpop.permute.xlu1 %6873 }
0x1171   :  { %10838 = vmatmul.mubr.msk.bf16.vlgmr.msra.gmra.mrb[180].mxu1 %vm548_vm1, %v6600_v32  ;;  %v6884_v11 = vsel %vm548_vm1, %v6874_v46, 0 }
0x1172   :  { %10850 = vmatpush3.bf16.xpose.msra.mxu1 %v6748_v33  ;;  %10853 = vmatprep.mubr.msk.bf16.mxu1 %vm548_vm1, %v6734_v5 }
0x1173   :  { %11120 = vmatprep.subr.msk.bf16.mxu1 %vm548_vm1, %v6740_v29  ;;  %10860 = vmatpush3.bf16.xpose.msra.mxu0 %v6819_v36 }
0x1174   :  { %10873 = vmatprep.subr.bf16.mxu0 %v7266_v42  ;;  %v6802_v17 = vpop.permute.xlu1 %6801 }
0x1175   :  { %10861 = vmatprep.mubr.msk.bf16.mxu0 %vm548_vm1, %v6802_v17 }
0x1178   :  { %v6876_v26 = vpop.permute.xlu1 %6875 }
0x1179   :  { %v6887_v18 = vsel %vm548_vm1, %v6876_v26, 0 }
0x117a   :  { %10852 = vmatpush3.bf16.xpose.msra.mxu1 %v6751_v4  ;;  %10862 = vmatmul.mubr.msk.bf16.vlgmr.msra.gmra.mrb[172].mxu0 %vm548_vm1, %v6804_v14 }
0x117b   :  { %11123 = vmatprep.subr.msk.bf16.mxu1 %vm548_vm1, %v6874_v46  ;;  %10874 = vmatpush3.bf16.msra.mxu0 %v7266_v42 }
0x117c   :  { %11125 = vmatprep.subr.msk.bf16.mxu0 %vm1411_vm2, %v7268_v30  ;;  %v6872_v9 = vpop.permute.xlu1 %6871 }
0x117f   :  { %10876 = vmatpush3.bf16.msra.mxu0 %v7277_v22 }
0x1180   :  { %v7328_v19 = vpop.permute.xlu1 %7327 }
0x1181   :  { %10854 = vmatmul.mubr.msk.bf16.vlgmr.msra.gmra.mrb[184].mxu1 %vm548_vm1, %v6736_v56  ;;  %v16586_v56 = vld [vmem:[#allocation26_spill] sm:$0xff] }
0x1182   :  { %10866 = vmatpush3.bf16.xpose.msra.mxu1 %v6884_v11  ;;  %10869 = vmatprep.mubr.msk.bf16.mxu1 %vm548_vm1, %v6870_v40 }
0x1183   :  { %11124 = vmatprep.subr.msk.bf16.mxu1 %vm548_vm1, %v6876_v26 }
0x1184   :  { %v14992_v3 = vpop.permute.xlu1 %7389 }
0x1185   :  { %10889 = vmatprep.subr.bf16.mxu0 %v14992_v3 }
0x1188   :  { %v14999_v24 = vpop.permute.xlu1 %7451 }
0x118a   :  { %10868 = vmatpush3.bf16.xpose.msra.mxu1 %v6887_v18 }
0x118b   :  { %10881 = vmatprep.subr.bf16.mxu1 %v7328_v19 }
0x1191   :  { %10870 = vmatmul.mubr.msk.bf16.vlgmr.msra.gmra.mrb[188].mxu1 %vm548_vm1, %v6872_v9 }
0x1192   :  { %10882 = vmatpush3.bf16.msra.mxu1 %v7328_v19 }
0x1193   :  { %11126 = vmatprep.subr.msk.bf16.mxu1 %vm1411_vm2, %v7330_v58 }
0x1196   :  { %10884 = vmatpush3.bf16.msra.mxu1 %v7339_v23 }
0x1197   :  { %10897 = vmatprep.subr.bf16.mxu1 %v14999_v24 }
0x11b6   :  { %v15002_v41 = vpop.f32.mrb[144].mxu0 }
0x11b7   :  { %v15004_v53 = vpop.f32.mrb[145].mxu0 }
0x11b8   :  { %v10752_v34 = vpop.f32.mrb[146].mxu0 }
0x11b9   :  { %v15006_v7 = vpop.f32.mrb[147].mxu0 }
0x11be   :  { %v15008_v63 = vpop.f32.mrb[160].mxu1 }
0x11bf   :  { %v15010_v52 = vpop.f32.mrb[161].mxu1 }
0x11c0   :  { %v10760_v60 = vpop.f32.mrb[162].mxu1 }
0x11c1   :  { %v15012_v59 = vpop.f32.mrb[163].mxu1 }
0x11c6   :  { %v15014_v0 = vpop.f32.mrb[148].mxu0 }
0x11c7   :  { %v15016_v8 = vpop.f32.mrb[149].mxu0 }
0x11c8   :  { %v10768_v62 = vpop.f32.mrb[150].mxu0 }
0x11c9   :  { %v15018_v44 = vpop.f32.mrb[151].mxu0 }
0x11cd   :  { %v15020_v32 = vpop.f32.mrb[164].mxu1 }
0x11ce   :  { %v15022_v47 = vpop.f32.mrb[165].mxu1 }
0x11cf   :  { %v10776_v1 = vpop.f32.mrb[166].mxu1 }
0x11d0   :  { %v15024_v12 = vpop.f32.mrb[167].mxu1 }
0x11df   :  { %v15026_v38 = vpop.f32.mrb[152].mxu0 }
0x11e0   :  { %v15028_v10 = vpop.f32.mrb[153].mxu0 }
0x11e1   :  { %v10784_v20 = vpop.f32.mrb[154].mxu0 }
0x11e2   :  { %v15030_v57 = vpop.f32.mrb[155].mxu0 }
0x11eb   :  { %v15032_v29 = vpop.f32.mrb[168].mxu1 }
0x11ec   :  { %16581 = vst [vmem:[#allocation21_spill] sm:$0xff] %v15032_v29  ;;  %v15034_v27 = vpop.f32.mrb[169].mxu1 }
0x11ed   :  { %v10792_v25 = vpop.f32.mrb[170].mxu1 }
0x11ee   :  { %v15036_v37 = vpop.f32.mrb[171].mxu1 }
0x11ef   :  { %16582 = vst [vmem:[#allocation22_spill] sm:$0xff] %v15036_v37 }
0x11f0   :  { %v15038_v39 = vpop.f32.mrb[156].mxu0 }
0x11f1   :  { %16583 = vst [vmem:[#allocation24_spill] sm:$0xff] %v15038_v39  ;;  %v15040_v35 = vpop.f32.mrb[157].mxu0 }
0x11f2   :  { %16584 = vst [vmem:[#allocation23_spill] sm:$0xff] %v15040_v35  ;;  %v10800_v48 = vpop.f32.mrb[158].mxu0 }
0x11f3   :  { %v15042_v54 = vpop.f32.mrb[159].mxu0 }
0x11f4   :  { %16585 = vst [vmem:[#allocation25_spill] sm:$0xff] %v15042_v54 }
0x1219   :  { %v10815_v51 = vpop.f32.mrb[160].mxu0 }
0x121a   :  { %v6939_v2 = vmul.f32 0.25, %v10815_v51  ;;  %v6447_v21 = vpop.f32.mrb[161].mxu0 }
0x121b   :  { %v6937_v50 = vmul.f32 0.25, %v6447_v21  ;;  %v10816_v16 = vpop.f32.mrb[162].mxu0 }
0x121c   :  { %v15045_v28 = vadd.f32 %v6939_v2, %v16586_v56  ;;  %v6450_v45 = vpop.f32.mrb[163].mxu0 }
0x121d   :  { %v6938_v49 = vmul.f32 0.25, %v6450_v45  ;;  %v15048_v14 = vadd.f32 %v6937_v50, %v16586_v56 }
0x121e   :  { %v6991_v15 = vsel %vm1119_vm4, %v15045_v28, -inf }
0x121f   :  { %v15053_v31 = vadd.f32 %v6938_v49, %v16586_v56  ;;  %6992 = vmax.xlane.f32.xlu0 %v6991_v15  ;;  %v6985_v5 = vsel %vm1119_vm4, %v15048_v14, -inf }
0x1221   :  { %v6988_v13 = vsel %vm1119_vm4, %v15053_v31, -inf }
0x1222   :  { %6989 = vmax.xlane.f32.xlu1 %v6988_v13 }
0x1223   :  { %6986 = vmax.xlane.f32.xlu0 %v6985_v5 }
0x1224   :  { %v15059_v40 = vpop.f32.mrb[172].mxu1 }
0x1225   :  { %16587 = vst [vmem:[#allocation20_spill] sm:$0xff] %v15059_v40  ;;  %v15061_v46 = vpop.f32.mrb[173].mxu1 }
0x1226   :  { %16588 = vst [vmem:[#allocation17_spill] sm:$0xff] %v15061_v46  ;;  %v10808_v33 = vpop.f32.mrb[174].mxu1 }
0x1227   :  { %v15063_v36 = vpop.f32.mrb[175].mxu1 }
0x1228   :  { %16589 = vst [vmem:[#allocation26_spill] sm:$0xff] %v15063_v36 }
0x122d   :  { %v10831_v42 = vpop.f32.mrb[164].mxu0 }
0x122e   :  { %v6583_v17 = vpop.f32.mrb[165].mxu0  ;;  %v6945_v20 = vmul.f32 0.25, %v10831_v42 }
0x122f   :  { %v10832_v26 = vpop.f32.mrb[166].mxu0  ;;  %v6943_v50 = vmul.f32 0.25, %v6583_v17 }
0x1230   :  { %v6586_v4 = vpop.f32.mrb[167].mxu0  ;;  %v15084_v21 = vadd.f32 %v6945_v20, %v16586_v56 }
0x1231   :  { %v6944_v9 = vmul.f32 0.25, %v6586_v4  ;;  %v15089_v13 = vadd.f32 %v6943_v50, %v16586_v56 }
0x1232   :  { %v7009_v5 = vsel %vm1119_vm4, %v15084_v21, -inf }
0x1233   :  { %v15072_v62 = vadd.f32 %v6944_v9, %v16586_v56 }
0x1234   :  { %v10823_v30 = vpop.f32.mrb[176].mxu1 }
0x1235   :  { %v6942_v22 = vmul.f32 0.25, %v10823_v30  ;;  %v6515_v19 = vpop.f32.mrb[177].mxu1  ;;  %v7006_v2 = vsel %vm1119_vm4, %v15072_v62, -inf  ;;  %v7003_v30 = vsel %vm1119_vm4, %v15089_v13, -inf }
0x1236   :  { %v6940_v11 = vmul.f32 0.25, %v6515_v19  ;;  %v10824_v18 = vpop.f32.mrb[178].mxu1 }
0x1237   :  { %v15066_v58 = vadd.f32 %v6942_v22, %v16586_v56  ;;  %v6518_v23 = vpop.f32.mrb[179].mxu1 }
0x1238   :  { %v15069_v34 = vadd.f32 %v6940_v11, %v16586_v56  ;;  %v6941_v60 = vmul.f32 0.25, %v6518_v23 }
0x1239   :  { %v7000_v1 = vsel %vm1119_vm4, %v15066_v58, -inf }
0x123a   :  { %v15077_v25 = vadd.f32 %v6941_v60, %v16586_v56  ;;  %7001 = vmax.xlane.f32.xlu1 %v7000_v1  ;;  %v6994_v48 = vsel %vm1119_vm4, %v15069_v34, -inf }
0x123b   :  { %6995 = vmax.xlane.f32.xlu0 %v6994_v48 }
0x123c   :  { %v6997_v45 = vsel %vm1119_vm4, %v15077_v25, -inf }
0x123d   :  { %v10847_v51 = vpop.f32.mrb[168].mxu0 }
0x123e   :  { %7007 = vmax.xlane.f32.xlu1 %v7006_v2  ;;  %v6719_v16 = vpop.f32.mrb[169].mxu0  ;;  %v6951_v19 = vmul.f32 0.25, %v10847_v51 }
0x123f   :  { %6998 = vmax.xlane.f32.xlu0 %v6997_v45  ;;  %v10848_v49 = vpop.f32.mrb[170].mxu0  ;;  %v6949_v48 = vmul.f32 0.25, %v6719_v16 }
0x1240   :  { %v6722_v15 = vpop.f32.mrb[171].mxu0  ;;  %v15107_v20 = vadd.f32 %v6951_v19, %v16586_v56 }
0x1241   :  { %v6950_v18 = vmul.f32 0.25, %v6722_v15 }
0x1242   :  { %v7027_v16 = vsel %vm1119_vm4, %v15107_v20, -inf }
0x1243   :  { %7010 = vmax.xlane.f32.xlu0 %v7009_v5  ;;  %v15112_v51 = vadd.f32 %v6950_v18, %v16586_v56  ;;  %v15117_v5 = vadd.f32 %v6949_v48, %v16586_v56 }
0x1244   :  { %v10839_v33 = vpop.f32.mrb[180].mxu1 }
0x1245   :  { %v6948_v42 = vmul.f32 0.25, %v10839_v33  ;;  %v6651_v26 = vpop.f32.mrb[181].mxu1 }
0x1246   :  { %v6946_v4 = vmul.f32 0.25, %v6651_v26  ;;  %v10840_v17 = vpop.f32.mrb[182].mxu1 }
0x1247   :  { %v15096_v9 = vadd.f32 %v6948_v42, %v16586_v56  ;;  %7004 = vmax.xlane.f32.xlu0 %v7003_v30  ;;  %v6654_v22 = vpop.f32.mrb[183].mxu1  ;;  %v7024_v42 = vsel %vm1119_vm4, %v15112_v51, -inf }
0x1248   :  { %v6947_v11 = vmul.f32 0.25, %v6654_v22  ;;  %v15099_v23 = vadd.f32 %v6946_v4, %v16586_v56  ;;  %v7021_v4 = vsel %vm1119_vm4, %v15117_v5, -inf }
0x1249   :  { %v7018_v60 = vsel %vm1119_vm4, %v15096_v9, -inf }
0x124a   :  { %v15104_v1 = vadd.f32 %v6947_v11, %v16586_v56  ;;  %7019 = vmax.xlane.f32.xlu1 %v7018_v60  ;;  %v7012_v45 = vsel %vm1119_vm4, %v15099_v23, -inf }
0x124c   :  { %v7015_v2 = vsel %vm1119_vm4, %v15104_v1, -inf }
0x124d   :  { %7016 = vmax.xlane.f32.xlu0 %v7015_v2  ;;  %v10863_v50 = vpop.f32.mrb[172].mxu0 }
0x124e   :  { %7013 = vmax.xlane.f32.xlu1 %v7012_v45  ;;  %v6855_v49 = vpop.f32.mrb[173].mxu0  ;;  %v6957_v60 = vmul.f32 0.25, %v10863_v50 }
0x124f   :  { %v10864_v15 = vpop.f32.mrb[174].mxu0 }
0x1250   :  { %v6858_v33 = vpop.f32.mrb[175].mxu0 }
0x1251   :  { %7028 = vmax.xlane.f32.xlu0 %v7027_v16  ;;  %v6956_v2 = vmul.f32 0.25, %v6858_v33 }
0x1252   :  { %7025 = vmax.xlane.f32.xlu1 %v7024_v42  ;;  %v15137_v42 = vadd.f32 %v6957_v60, %v16586_v56 }
0x1253   :  { %v15142_v50 = vadd.f32 %v6956_v2, %v16586_v56 }
0x1254   :  { %v10855_v26 = vpop.f32.mrb[184].mxu1 }
0x1255   :  { %v6954_v17 = vmul.f32 0.25, %v10855_v26  ;;  %7022 = vmax.xlane.f32.xlu0 %v7021_v4  ;;  %v6787_v30 = vpop.f32.mrb[185].mxu1  ;;  %v6955_v26 = vmul.f32 0.25, %v6855_v49  ;;  %v7042_v49 = vsel %vm1119_vm4, %v15142_v50, -inf }
0x1256   :  { %v6952_v22 = vmul.f32 0.25, %v6787_v30  ;;  %v10856_v19 = vpop.f32.mrb[186].mxu1  ;;  %v7045_v30 = vsel %vm1119_vm4, %v15137_v42, -inf }
0x1257   :  { %v15126_v11 = vadd.f32 %v6954_v17, %v16586_v56  ;;  %v6790_v18 = vpop.f32.mrb[187].mxu1  ;;  %v15147_v17 = vadd.f32 %v6955_v26, %v16586_v56 }
0x1258   :  { %v6953_v48 = vmul.f32 0.25, %v6790_v18  ;;  %v15129_v45 = vadd.f32 %v6952_v22, %v16586_v56 }
0x1259   :  { %v7036_v15 = vsel %vm1119_vm4, %v15126_v11, -inf  ;;  %v7039_v19 = vsel %vm1119_vm4, %v15147_v17, -inf }
0x125a   :  { %v15134_v16 = vadd.f32 %v6953_v48, %v16586_v56  ;;  %7037 = vmax.xlane.f32.xlu1 %v7036_v15  ;;  %v7030_v33 = vsel %vm1119_vm4, %v15129_v45, -inf }
0x125c   :  { %v7033_v4 = vsel %vm1119_vm4, %v15134_v16, -inf }
0x125d   :  { %7034 = vmax.xlane.f32.xlu0 %v7033_v4 }
0x125e   :  { %7031 = vmax.xlane.f32.xlu1 %v7030_v33 }
0x1261   :  { %7046 = vmax.xlane.f32.xlu0 %v7045_v30 }
0x1262   :  { %7043 = vmax.xlane.f32.xlu1 %v7042_v49 }
0x1264   :  { %v10871_v22 = vpop.f32.mrb[188].mxu1 }
0x1265   :  { %v6960_v18 = vmul.f32 0.25, %v10871_v22  ;;  %7040 = vmax.xlane.f32.xlu0 %v7039_v19  ;;  %v6923_v60 = vpop.f32.mrb[189].mxu1 }
0x1266   :  { %v6958_v48 = vmul.f32 0.25, %v6923_v60  ;;  %v10872_v2 = vpop.f32.mrb[190].mxu1 }
0x1267   :  { %v15156_v15 = vadd.f32 %v6960_v18, %v16586_v56  ;;  %v6926_v26 = vpop.f32.mrb[191].mxu1  ;;  %v15174_v18 = vpop.permute.xlu1 %7453 }
0x1268   :  { %v6959_v4 = vmul.f32 0.25, %v6926_v26  ;;  %v15159_v33 = vadd.f32 %v6958_v48, %v16586_v56 }
0x1269   :  { %v7054_v30 = vsel %vm1119_vm4, %v15156_v15, -inf }
0x126a   :  { %v15164_v49 = vadd.f32 %v6959_v4, %v16586_v56  ;;  %7055 = vmax.xlane.f32.xlu1 %v7054_v30  ;;  %v7048_v19 = vsel %vm1119_vm4, %v15159_v33, -inf  ;;  %v15178_v56 = vpop.permute.xlu0 %7391 }
0x126b   :  { %v15176_v60 = vpop.permute.xlu1 %7575 }
0x126c   :  { %v7051_v22 = vsel %vm1119_vm4, %v15164_v49, -inf }
0x126d   :  { %7052 = vmax.xlane.f32.xlu0 %v7051_v22 }
0x126e   :  { %7049 = vmax.xlane.f32.xlu1 %v7048_v19  ;;  %v15182_v2 = vpop.permute.xlu0 %7513 }
0x126f   :  { %v15180_v48 = vpop.permute.xlu1 %7515 }
0x1273   :  { %v15184_v26 = vpop.permute.xlu1 %7577 }
0x127f   :  { %7639 = vrot.lane.b32.xlu1 %v14402_v61, %s11867_s27 }
0x1283   :  { %7637 = vrot.lane.b32.xlu0 %v14390_v55, %s11867_s27 }
0x12ac   :  { %v6993_v4 = vpop.xlane.xlu0 %6992 }
0x12ad   :  { %v7059_v30 = vsub.f32 %v15045_v28, %v6993_v4 }
0x12af   :  { %v7085_v22 = vmul.f32 1.442695, %v7059_v30  ;;  %v6990_v61 = vpop.xlane.xlu1 %6989 }
0x12b0   :  { %v7058_v19 = vsub.f32 %v15053_v31, %v6990_v61  ;;  %v6987_v55 = vpop.xlane.xlu0 %6986 }
0x12b1   :  { %11670 = vpow2.f32 %v7085_v22  ;;  %v7057_v36 = vsub.f32 %v15048_v14, %v6987_v55 }
0x12b2   :  { %v7083_v40 = vmul.f32 1.442695, %v7058_v19 }
0x12b3   :  { %v7081_v39 = vmul.f32 1.442695, %v7057_v36 }
0x12b4   :  { %11672 = vpow2.f32 %v7083_v40 }
0x12b5   :  { %11674 = vpow2.f32 %v7081_v39 }
0x12bb   :  { %v15189_v46 = vpop.eup %11670 }
0x12bc   :  { %v7135_v35 = vsel %vm1119_vm4, %v15189_v46, 0.0 }
0x12bd   :  { %7136 = vadd.xlane.f32.xlu0 %v7135_v35 }
0x12be   :  { %v15193_v54 = vpop.eup %11672 }
0x12bf   :  { %v15195_v28 = vpop.eup %11674  ;;  %v7132_v31 = vsel %vm1119_vm4, %v15193_v54, 0.0 }
0x12c0   :  { %7133 = vadd.xlane.f32.xlu1 %v7132_v31  ;;  %v7129_v14 = vsel %vm1119_vm4, %v15195_v28, 0.0 }
0x12c1   :  { %7130 = vadd.xlane.f32.xlu0 %v7129_v14 }
0x12c7   :  { %v7002_v40 = vpop.xlane.xlu1 %7001 }
0x12c8   :  { %v7062_v39 = vsub.f32 %v15066_v58, %v7002_v40  ;;  %v6996_v36 = vpop.xlane.xlu0 %6995 }
0x12c9   :  { %v7060_v4 = vsub.f32 %v15069_v34, %v6996_v36 }
0x12ca   :  { %v7091_v30 = vmul.f32 1.442695, %v7062_v39 }
0x12cb   :  { %v7087_v35 = vmul.f32 1.442695, %v7060_v4  ;;  %v7008_v22 = vpop.xlane.xlu1 %7007 }
0x12cc   :  { %11676 = vpow2.f32 %v7091_v30  ;;  %v7064_v61 = vsub.f32 %v15072_v62, %v7008_v22  ;;  %v6999_v19 = vpop.xlane.xlu0 %6998 }
0x12cd   :  { %v7061_v55 = vsub.f32 %v15077_v25, %v6999_v19  ;;  %11678 = vpow2.f32 %v7087_v35 }
0x12ce   :  { %v7095_v31 = vmul.f32 1.442695, %v7064_v61 }
0x12cf   :  { %v7089_v37 = vmul.f32 1.442695, %v7061_v55 }
0x12d0   :  { %v7011_v29 = vpop.xlane.xlu0 %7010 }
0x12d1   :  { %11680 = vpow2.f32 %v7089_v37  ;;  %v7065_v14 = vsub.f32 %v15084_v21, %v7011_v29 }
0x12d2   :  { %11682 = vpow2.f32 %v7095_v31 }
0x12d3   :  { %v7097_v58 = vmul.f32 1.442695, %v7065_v14 }
0x12d4   :  { %v7005_v40 = vpop.xlane.xlu0 %7004 }
0x12d5   :  { %11684 = vpow2.f32 %v7097_v58  ;;  %v7063_v34 = vsub.f32 %v15089_v13, %v7005_v40 }
0x12d6   :  { %v15207_v39 = vpop.eup %11676 }
0x12d7   :  { %v7093_v36 = vmul.f32 1.442695, %v7063_v34  ;;  %v7020_v62 = vpop.xlane.xlu1 %7019  ;;  %v7144_v25 = vsel %vm1119_vm4, %v15207_v39, 0.0  ;;  %v15211_v4 = vpop.eup %11678 }
0x12d8   :  { %v7068_v30 = vsub.f32 %v15096_v9, %v7020_v62  ;;  %7145 = vadd.xlane.f32.xlu1 %v7144_v25  ;;  %v7138_v22 = vsel %vm1119_vm4, %v15211_v4, 0.0 }
0x12d9   :  { %11686 = vpow2.f32 %v7093_v36 }
0x12da   :  { %v7103_v29 = vmul.f32 1.442695, %v7068_v30  ;;  %v7017_v37 = vpop.xlane.xlu0 %7016 }
0x12db   :  { %v15214_v21 = vpop.eup %11680  ;;  %v7067_v35 = vsub.f32 %v15104_v1, %v7017_v37  ;;  %v7014_v13 = vpop.xlane.xlu1 %7013 }
0x12dc   :  { %v15219_v61 = vpop.eup %11682  ;;  %11688 = vpow2.f32 %v7103_v29  ;;  %v7066_v19 = vsub.f32 %v15099_v23, %v7014_v13  ;;  %7139 = vadd.xlane.f32.xlu1 %v7138_v22  ;;  %v7141_v9 = vsel %vm1119_vm4, %v15214_v21, 0.0 }
0x12dd   :  { %v7101_v55 = vmul.f32 1.442695, %v7067_v35  ;;  %7142 = vadd.xlane.f32.xlu0 %v7141_v9  ;;  %v7150_v34 = vsel %vm1119_vm4, %v15219_v61, 0.0 }
0x12de   :  { %v7099_v31 = vmul.f32 1.442695, %v7066_v19  ;;  %v7029_v14 = vpop.xlane.xlu0 %7028 }
0x12df   :  { %v15224_v58 = vpop.eup %11684  ;;  %11690 = vpow2.f32 %v7101_v55  ;;  %v7071_v1 = vsub.f32 %v15107_v20, %v7029_v14  ;;  %v7026_v40 = vpop.xlane.xlu1 %7025 }
0x12e0   :  { %11692 = vpow2.f32 %v7099_v31  ;;  %7151 = vadd.xlane.f32.xlu1 %v7150_v34  ;;  %v7153_v23 = vsel %vm1119_vm4, %v15224_v58, 0.0  ;;  %v7070_v62 = vsub.f32 %v15112_v51, %v7026_v40 }
0x12e1   :  { %v7109_v36 = vmul.f32 1.442695, %v7071_v1  ;;  %7154 = vadd.xlane.f32.xlu0 %v7153_v23 }
0x12e2   :  { %v7023_v25 = vpop.xlane.xlu0 %7022  ;;  %v7107_v13 = vmul.f32 1.442695, %v7070_v62 }
0x12e3   :  { %v15232_v30 = vpop.eup %11686  ;;  %11694 = vpow2.f32 %v7109_v36  ;;  %v7069_v29 = vsub.f32 %v15117_v5, %v7023_v25 }
0x12e4   :  { %v7147_v20 = vsel %vm1119_vm4, %v15232_v30, 0.0 }
0x12e5   :  { %v7105_v37 = vmul.f32 1.442695, %v7069_v29  ;;  %7148 = vadd.xlane.f32.xlu0 %v7147_v20 }
0x12e6   :  { %v15237_v35 = vpop.eup %11688 }
0x12e7   :  { %11696 = vpow2.f32 %v7105_v37  ;;  %v7038_v22 = vpop.xlane.xlu1 %7037  ;;  %v7162_v19 = vsel %vm1119_vm4, %v15237_v35, 0.0 }
0x12e8   :  { %v7074_v51 = vsub.f32 %v15126_v11, %v7038_v22  ;;  %7163 = vadd.xlane.f32.xlu1 %v7162_v19  ;;  %11698 = vpow2.f32 %v7107_v13 }
0x12e9   :  { %v15242_v9 = vpop.eup %11690 }
0x12ea   :  { %v15244_v55 = vpop.eup %11692  ;;  %v7115_v5 = vmul.f32 1.442695, %v7074_v51  ;;  %v7035_v31 = vpop.xlane.xlu0 %7034  ;;  %v7159_v14 = vsel %vm1119_vm4, %v15242_v9, 0.0 }
0x12eb   :  { %v7073_v1 = vsub.f32 %v15134_v16, %v7035_v31  ;;  %v7032_v40 = vpop.xlane.xlu1 %7031  ;;  %7160 = vadd.xlane.f32.xlu0 %v7159_v14  ;;  %v7156_v34 = vsel %vm1119_vm4, %v15244_v55, 0.0 }
0x12ec   :  { %11700 = vpow2.f32 %v7115_v5  ;;  %v7072_v11 = vsub.f32 %v15129_v45, %v7032_v40  ;;  %7157 = vadd.xlane.f32.xlu1 %v7156_v34 }
0x12ed   :  { %v15252_v23 = vpop.eup %11694  ;;  %v7113_v36 = vmul.f32 1.442695, %v7073_v1 }
0x12ee   :  { %v7111_v62 = vmul.f32 1.442695, %v7072_v11  ;;  %v7047_v25 = vpop.xlane.xlu0 %7046  ;;  %v7171_v29 = vsel %vm1119_vm4, %v15252_v23, 0.0 }
0x12ef   :  { %11702 = vpow2.f32 %v7113_v36  ;;  %v7077_v16 = vsub.f32 %v15137_v42, %v7047_v25  ;;  %v7044_v20 = vpop.xlane.xlu1 %7043 }
0x12f0   :  { %11704 = vpow2.f32 %v7111_v62  ;;  %v7076_v37 = vsub.f32 %v15142_v50, %v7044_v20  ;;  %7172 = vadd.xlane.f32.xlu1 %v7171_v29 }
0x12f1   :  { %v15258_v13 = vpop.eup %11696  ;;  %v7121_v45 = vmul.f32 1.442695, %v7077_v16 }
0x12f2   :  { %v7119_v22 = vmul.f32 1.442695, %v7076_v37  ;;  %v7041_v19 = vpop.xlane.xlu0 %7040  ;;  %v7165_v51 = vsel %vm1119_vm4, %v15258_v13, 0.0  ;;  %v15263_v31 = vpop.eup %11698 }
0x12f3   :  { %11706 = vpow2.f32 %v7121_v45  ;;  %v7075_v5 = vsub.f32 %v15147_v17, %v7041_v19  ;;  %v7168_v40 = vsel %vm1119_vm4, %v15263_v31, 0.0 }
0x12f4   :  { %7166 = vadd.xlane.f32.xlu1 %v7165_v51  ;;  %11708 = vpow2.f32 %v7119_v22 }
0x12f5   :  { %v7117_v42 = vmul.f32 1.442695, %v7075_v5 }
0x12f6   :  { %v15265_v14 = vpop.eup %11700 }
0x12f7   :  { %11710 = vpow2.f32 %v7117_v42  ;;  %v7056_v50 = vpop.xlane.xlu1 %7055  ;;  %v7180_v1 = vsel %vm1119_vm4, %v15265_v14, 0.0 }
0x12f8   :  { %v7080_v34 = vsub.f32 %v15156_v15, %v7056_v50  ;;  %7181 = vadd.xlane.f32.xlu0 %v7180_v1  ;;  %7169 = vadd.xlane.f32.xlu1 %v7168_v40 }
0x12f9   :  { %v15272_v17 = vpop.eup %11702 }
0x12fa   :  { %v15274_v11 = vpop.eup %11704  ;;  %v7127_v36 = vmul.f32 1.442695, %v7080_v34  ;;  %v7053_v62 = vpop.xlane.xlu0 %7052  ;;  %v7177_v25 = vsel %vm1119_vm4, %v15272_v17, 0.0 }
0x12fb   :  { %v7079_v29 = vsub.f32 %v15164_v49, %v7053_v62  ;;  %v7050_v16 = vpop.xlane.xlu1 %7049  ;;  %v7174_v20 = vsel %vm1119_vm4, %v15274_v11, 0.0 }
0x12fc   :  { %11712 = vpow2.f32 %v7127_v36  ;;  %v7078_v15 = vsub.f32 %v15159_v33, %v7050_v16  ;;  %7175 = vadd.xlane.f32.xlu0 %v7174_v20  ;;  %7178 = vadd.xlane.f32.xlu1 %v7177_v25 }
0x12fd   :  { %v15282_v37 = vpop.eup %11706  ;;  %v7125_v45 = vmul.f32 1.442695, %v7079_v29 }
0x12fe   :  { %v7123_v22 = vmul.f32 1.442695, %v7078_v15  ;;  %v7189_v19 = vsel %vm1119_vm4, %v15282_v37, 0.0  ;;  %v15286_v51 = vpop.eup %11708  ;;  %v15310_v62 = vpop.permute.xlu0 %7637 }
0x12ff   :  { %11714 = vpow2.f32 %v7125_v45  ;;  %v7186_v33 = vsel %vm1119_vm4, %v15286_v51, 0.0  ;;  %v15312_v25 = vpop.permute.xlu1 %7639 }
0x1300   :  { %11716 = vpow2.f32 %v7123_v22  ;;  %7190 = vadd.xlane.f32.xlu0 %v7189_v19 }
0x1301   :  { %v15288_v49 = vpop.eup %11710 }
0x1302   :  { %v7183_v5 = vsel %vm1119_vm4, %v15288_v49, 0.0 }
0x1303   :  { %7184 = vadd.xlane.f32.xlu1 %v7183_v5 }
0x1304   :  { %7187 = vadd.xlane.f32.xlu0 %v7186_v33 }
0x1306   :  { %v15294_v42 = vpop.eup %11712 }
0x1307   :  { %v7198_v50 = vsel %vm1119_vm4, %v15294_v42, 0.0 }
0x1308   :  { %7199 = vadd.xlane.f32.xlu0 %v7198_v50  ;;  %v7401_v50 = vsel %vm1411_vm2, %v15178_v56, 0 }
0x1309   :  { %v15298_v1 = vpop.eup %11714 }
0x130a   :  { %v15300_v40 = vpop.eup %11716  ;;  %v7195_v34 = vsel %vm1119_vm4, %v15298_v1, 0.0 }
0x130b   :  { %v7192_v36 = vsel %vm1119_vm4, %v15300_v40, 0.0 }
0x130c   :  { %7193 = vadd.xlane.f32.xlu1 %v7192_v36  ;;  %7196 = vadd.xlane.f32.xlu0 %v7195_v34 }
0x131d   :  { %7701 = vrot.lane.b32.xlu1 %v14410_v43, %s11867_s27 }
0x1322   :  { %7699 = vrot.lane.b32.xlu0 %v14406_v6, %s11867_s27 }
0x134a   :  { %v7137_v29 = vpop.xlane.xlu0 %7136 }
0x134b   :  { %11718 = vrcp.f32 %v7137_v29 }
0x134d   :  { %v7134_v16 = vpop.xlane.xlu1 %7133 }
0x134e   :  { %11720 = vrcp.f32 %v7134_v16  ;;  %v7131_v20 = vpop.xlane.xlu0 %7130 }
0x134f   :  { %11722 = vrcp.f32 %v7131_v20 }
0x1355   :  { %v11719_v15 = vpop.eup %11718 }
0x1356   :  { %v7227_v43 = vmul.f32 %v11719_v15, %v15189_v46 }
0x1358   :  { %v11721_v45 = vpop.eup %11720  ;;  %v7250_v33 = vpack.c.bf16 %v7227_v43, %v7227_v43 }
0x1359   :  { %v11723_v22 = vpop.eup %11722  ;;  %v7226_v19 = vmul.f32 %v11721_v45, %v15193_v54 }
0x135a   :  { %v7225_v5 = vmul.f32 %v11723_v22, %v15195_v28 }
0x135c   :  { %v7249_v6 = vpack.c.bf16 %v7226_v19, %v7225_v5 }
0x135e   :  { %10877 = vmatprep.mubr.msk.bf16.mxu0 %vm1119_vm4, %v7249_v6 }
0x135f   :  { %10878 = vmatmul.mubr.msk.bf16.vlgmr.msra.gmra.mrb[176].mxu0 %vm1119_vm4, %v7250_v33 }
0x1360   :  { %10890 = vmatpush3.bf16.msra.mxu0 %v14992_v3 }
0x1361   :  { %11127 = vmatprep.subr.msk.bf16.mxu0 %vm1411_vm2, %v15178_v56 }
0x1364   :  { %10892 = vmatpush3.bf16.msra.mxu0 %v7401_v50 }
0x1365   :  { %v7146_v54 = vpop.xlane.xlu1 %7145  ;;  %10905 = vmatprep.subr.bf16.mxu0 %v15182_v2 }
0x1366   :  { %11724 = vrcp.f32 %v7146_v54 }
0x1369   :  { %v7140_v46 = vpop.xlane.xlu1 %7139 }
0x136a   :  { %11726 = vrcp.f32 %v7140_v46  ;;  %v7143_v28 = vpop.xlane.xlu0 %7142 }
0x136b   :  { %11728 = vrcp.f32 %v7143_v28  ;;  %v7463_v28 = vsel %vm1411_vm2, %v15174_v18, 0 }
0x136d   :  { %v7152_v34 = vpop.xlane.xlu1 %7151 }
0x136e   :  { %v7155_v36 = vpop.xlane.xlu0 %7154 }
0x136f   :  { %11730 = vrcp.f32 %v7155_v36 }
0x1370   :  { %11732 = vrcp.f32 %v7152_v34  ;;  %v11725_v3 = vpop.eup %11724 }
0x1371   :  { %v7230_v45 = vmul.f32 %v11725_v3, %v15207_v39 }
0x1372   :  { %v7149_v29 = vpop.xlane.xlu0 %7148 }
0x1373   :  { %11734 = vrcp.f32 %v7149_v29  ;;  %v7252_v6 = vpack.c.bf16 %v7230_v45, %v7230_v45 }
0x1374   :  { %v11727_v16 = vpop.eup %11726 }
0x1375   :  { %v11729_v20 = vpop.eup %11728  ;;  %v7164_v15 = vpop.xlane.xlu1 %7163  ;;  %v7228_v56 = vmul.f32 %v11727_v16, %v15211_v4 }
0x1376   :  { %v7229_v22 = vmul.f32 %v11729_v20, %v15214_v21  ;;  %11736 = vrcp.f32 %v7164_v15  ;;  %v7525_v15 = vsel %vm1411_vm2, %v15180_v48, 0 }
0x1378   :  { %v7161_v19 = vpop.xlane.xlu0 %7160  ;;  %v7251_v43 = vpack.c.bf16 %v7229_v22, %v7228_v56  ;;  %v7587_v22 = vsel %vm1411_vm2, %v15184_v26, 0 }
0x1379   :  { %11738 = vrcp.f32 %v7161_v19  ;;  %v7158_v5 = vpop.xlane.xlu1 %7157  ;;  %v11731_v33 = vpop.eup %11730 }
0x137a   :  { %11740 = vrcp.f32 %v7158_v5  ;;  %10885 = vmatprep.mubr.msk.bf16.mxu1 %vm1119_vm4, %v7251_v43  ;;  %v11733_v50 = vpop.eup %11732  ;;  %v7233_v21 = vmul.f32 %v11731_v33, %v15224_v58 }
0x137b   :  { %10886 = vmatmul.mubr.msk.bf16.vlgmr.msra.gmra.mrb[192].mxu1 %vm1119_vm4, %v7252_v6  ;;  %v7232_v46 = vmul.f32 %v11733_v50, %v15219_v61 }
0x137c   :  { %10898 = vmatpush3.bf16.msra.mxu1 %v14999_v24  ;;  %v7254_v3 = vpack.c.bf16 %v7233_v21, %v7233_v21 }
0x137d   :  { %v11735_v4 = vpop.eup %11734  ;;  %11128 = vmatprep.subr.msk.bf16.mxu1 %vm1411_vm2, %v15174_v18  ;;  %v7173_v39 = vpop.xlane.xlu1 %7172 }
0x137e   :  { %v7231_v54 = vmul.f32 %v11735_v4, %v15232_v30  ;;  %11742 = vrcp.f32 %v7173_v39 }
0x1380   :  { %10900 = vmatpush3.bf16.msra.mxu1 %v7463_v28  ;;  %v7253_v34 = vpack.c.bf16 %v7232_v46, %v7231_v54  ;;  %v11737_v36 = vpop.eup %11736 }
0x1381   :  { %10913 = vmatprep.subr.bf16.mxu1 %v15176_v60  ;;  %v7167_v24 = vpop.xlane.xlu1 %7166  ;;  %v7236_v18 = vmul.f32 %v11737_v36, %v15237_v35 }
0x1382   :  { %10893 = vmatprep.mubr.msk.bf16.mxu0 %vm1119_vm4, %v7253_v34  ;;  %11744 = vrcp.f32 %v7167_v24 }
0x1383   :  { %v11739_v29 = vpop.eup %11738  ;;  %10894 = vmatmul.mubr.msk.bf16.vlgmr.msra.gmra.mrb[180].mxu0 %vm1119_vm4, %v7254_v3  ;;  %v7256_v45 = vpack.c.bf16 %v7236_v18, %v7236_v18 }
0x1384   :  { %v11741_v58 = vpop.eup %11740  ;;  %10906 = vmatpush3.bf16.msra.mxu0 %v15182_v2  ;;  %v7235_v61 = vmul.f32 %v11739_v29, %v15242_v9 }
0x1385   :  { %11129 = vmatprep.subr.msk.bf16.mxu0 %vm1411_vm2, %v15180_v48  ;;  %v7170_v30 = vpop.xlane.xlu1 %7169  ;;  %v7182_v16 = vpop.xlane.xlu0 %7181  ;;  %v7234_v20 = vmul.f32 %v11741_v58, %v15244_v55 }
0x1386   :  { %11746 = vrcp.f32 %v7170_v30 }
0x1387   :  { %v7255_v56 = vpack.c.bf16 %v7235_v61, %v7234_v20  ;;  %11748 = vrcp.f32 %v7182_v16 }
0x1388   :  { %10908 = vmatpush3.bf16.msra.mxu0 %v7525_v15  ;;  %v11743_v48 = vpop.eup %11742 }
0x1389   :  { %10921 = vmatprep.subr.bf16.mxu0 %v15310_v62  ;;  %v7179_v2 = vpop.xlane.xlu1 %7178  ;;  %10901 = vmatprep.mubr.msk.bf16.mxu1 %vm1119_vm4, %v7255_v56  ;;  %v7176_v35 = vpop.xlane.xlu0 %7175  ;;  %v7239_v5 = vmul.f32 %v11743_v48, %v15252_v23 }
0x138a   :  { %11750 = vrcp.f32 %v7179_v2  ;;  %10902 = vmatmul.mubr.msk.bf16.vlgmr.msra.gmra.mrb[196].mxu1 %vm1119_vm4, %v7256_v45  ;;  %v11276_v2 = vld [vmem:[%s16413_s6 + $0x10] sm:$0xff]  }
0x138b   :  { %11752 = vrcp.f32 %v7176_v35  ;;  %10914 = vmatpush3.bf16.msra.mxu1 %v15176_v60  ;;  %v7258_v21 = vpack.c.bf16 %v7239_v5, %v7239_v5 }
0x138c   :  { %11130 = vmatprep.subr.msk.bf16.mxu1 %vm1411_vm2, %v15184_v26  ;;  %v11745_v55 = vpop.eup %11744 }
0x138d   :  { %v7191_v9 = vpop.xlane.xlu0 %7190  ;;  %v7237_v33 = vmul.f32 %v11745_v55, %v15258_v13 }
0x138e   :  { %11754 = vrcp.f32 %v7191_v9 }
0x138f   :  { %10916 = vmatpush3.bf16.msra.mxu1 %v7587_v22 }
0x1390   :  { %v11747_v19 = vpop.eup %11746  ;;  %v7185_v43 = vpop.xlane.xlu1 %7184 }
0x1391   :  { %11756 = vrcp.f32 %v7185_v43  ;;  %v7188_v6 = vpop.xlane.xlu0 %7187  ;;  %v7238_v60 = vmul.f32 %v11747_v19, %v15263_v31  ;;  %v11749_v50 = vpop.eup %11748 }
0x1392   :  { %11758 = vrcp.f32 %v7188_v6  ;;  %v7242_v28 = vmul.f32 %v11749_v50, %v15265_v14  ;;  %v7649_v14 = vsel %vm1411_vm2, %v15312_v25, 0 }
0x1393   :  { %v7257_v4 = vpack.c.bf16 %v7238_v60, %v7237_v33 }
0x1394   :  { %v11751_v39 = vpop.eup %11750  ;;  %v7260_v24 = vpack.c.bf16 %v7242_v28, %v7242_v28 }
0x1395   :  { %v11753_v54 = vpop.eup %11752  ;;  %10909 = vmatprep.mubr.msk.bf16.mxu0 %vm1119_vm4, %v7257_v4  ;;  %v7200_v26 = vpop.xlane.xlu0 %7199  ;;  %v7241_v46 = vmul.f32 %v11751_v39, %v15272_v17 }
0x1396   :  { %10910 = vmatmul.mubr.msk.bf16.vlgmr.msra.gmra.mrb[184].mxu0 %vm1119_vm4, %v7258_v21  ;;  %v7240_v23 = vmul.f32 %v11753_v54, %v15274_v11  ;;  %11760 = vrcp.f32 %v7200_v26 }
0x1397   :  { %10922 = vmatpush3.bf16.msra.mxu0 %v15310_v62 }
0x1398   :  { %11131 = vmatprep.subr.msk.bf16.mxu0 %vm1411_vm2, %v15312_v25  ;;  %v7259_v13 = vpack.c.bf16 %v7241_v46, %v7240_v23  ;;  %v11755_v31 = vpop.eup %11754 }
0x1399   :  { %v7194_v34 = vpop.xlane.xlu1 %7193  ;;  %v7197_v36 = vpop.xlane.xlu0 %7196  ;;  %v7245_v3 = vmul.f32 %v11755_v31, %v15282_v37 }
0x139a   :  { %11762 = vrcp.f32 %v7194_v34  ;;  %10917 = vmatprep.mubr.msk.bf16.mxu1 %vm1119_vm4, %v7259_v13 }
0x139b   :  { %v11757_v17 = vpop.eup %11756  ;;  %11764 = vrcp.f32 %v7197_v36  ;;  %10918 = vmatmul.mubr.msk.bf16.vlgmr.msra.gmra.mrb[200].mxu1 %vm1119_vm4, %v7260_v24  ;;  %10924 = vmatpush3.bf16.msra.mxu0 %v7649_v14  ;;  %v7262_v25 = vpack.c.bf16 %v7245_v3, %v7245_v3 }
0x139c   :  { %v11759_v11 = vpop.eup %11758  ;;  %v7243_v62 = vmul.f32 %v11757_v17, %v15288_v49  ;;  %10937 = vmatprep.subr.bf16.mxu0 %v11276_v2 }
0x139d   :  { %v7700_v29 = vpop.permute.xlu0 %7699  ;;  %v7244_v58 = vmul.f32 %v11759_v11, %v15286_v51  ;;  %v7702_v61 = vpop.permute.xlu1 %7701 }
0x139e   :  { %10929 = vmatprep.subr.bf16.mxu1 %v7700_v29  ;;  %v7711_v16 = vsel %vm1411_vm2, %v7702_v61, 0 }
0x139f   :  { %10930 = vmatpush3.bf16.msra.mxu1 %v7700_v29  ;;  %v7261_v18 = vpack.c.bf16 %v7244_v58, %v7243_v62 }
0x13a0   :  { %11132 = vmatprep.subr.msk.bf16.mxu1 %vm1411_vm2, %v7702_v61  ;;  %v11761_v30 = vpop.eup %11760 }
0x13a1   :  { %10925 = vmatprep.mubr.msk.bf16.mxu0 %vm1119_vm4, %v7261_v18  ;;  %v7248_v51 = vmul.f32 %v11761_v30, %v15294_v42  ;;  %v11277_v42 = vld [vmem:[%s16413_s6 + $0x18] sm:$0xff]  }
0x13a2   :  { %10926 = vmatmul.mubr.msk.bf16.vlgmr.msra.gmra.mrb[188].mxu0 %vm1119_vm4, %v7262_v25 }
0x13a3   :  { %10932 = vmatpush3.bf16.msra.mxu1 %v7711_v16  ;;  %v7264_v45 = vpack.c.bf16 %v7248_v51, %v7248_v51  ;;  %10938 = vmatpush3.bf16.msra.mxu0 %v11276_v2 }
0x13a4   :  { %v11763_v49 = vpop.eup %11762  ;;  %10939 = vmatprep.subr.bf16.mxu0 %v11277_v42 }
0x13a5   :  { %v11765_v37 = vpop.eup %11764  ;;  %v7246_v20 = vmul.f32 %v11763_v49, %v15300_v40 }
0x13a6   :  { %v7247_v15 = vmul.f32 %v11765_v37, %v15298_v1 }
0x13a7   :  { %10940 = vmatpush3.bf16.msra.mxu0 %v11277_v42 }
0x13a8   :  { %v7263_v56 = vpack.c.bf16 %v7247_v15, %v7246_v20 }
0x13aa   :  { %10933 = vmatprep.mubr.msk.bf16.mxu1 %vm1119_vm4, %v7263_v56 }
0x13ab   :  { %10934 = vmatmul.mubr.msk.bf16.vlgmr.msra.gmra.mrb[204].mxu1 %vm1119_vm4, %v7264_v45 }
0x1432   :  { %v10879_v35 = vpop.f32.mrb[176].mxu0 }
0x1433   :  { %v7313_v48 = vpop.f32.mrb[177].mxu0 }
0x1434   :  { %v10880_v9 = vpop.f32.mrb[178].mxu0 }
0x1435   :  { %v7316_v40 = vpop.f32.mrb[179].mxu0 }
0x1436   :  { %v11202_v55 = vpack.i.bf16 %v7316_v40, %v7313_v48 }
0x1438   :  { %11203 = vrot.lane.b32.xlu0 %v11202_v55, %s11868_s1 }
0x144e   :  { %v10887_v1 = vpop.f32.mrb[192].mxu1 }
0x144f   :  { %v7375_v22 = vpop.f32.mrb[193].mxu1 }
0x1450   :  { %v11207_v19 = vpack.i.bf16 %v7375_v22, %v10879_v35  ;;  %v10888_v43 = vpop.f32.mrb[194].mxu1 }
0x1451   :  { %v7378_v5 = vpop.f32.mrb[195].mxu1 }
0x1452   :  { %v11212_v6 = vpack.i.bf16 %v10887_v1, %v7378_v5  ;;  %11208 = vrot.lane.b32.xlu1 %v11207_v19, %s11868_s1 }
0x1454   :  { %11213 = vrot.lane.b32.xlu0 %v11212_v6, %s11868_s1 }
0x1456   :  { %v10895_v33 = vpop.f32.mrb[180].mxu0 }
0x1457   :  { %v7437_v60 = vpop.f32.mrb[181].mxu0 }
0x1458   :  { %v10896_v50 = vpop.f32.mrb[182].mxu0 }
0x1459   :  { %v7440_v4 = vpop.f32.mrb[183].mxu0 }
0x145a   :  { %v11217_v39 = vpack.i.bf16 %v7440_v4, %v7437_v60 }
0x145c   :  { %11218 = vrot.lane.b32.xlu1 %v11217_v39, %s11868_s1 }
0x145d   :  { %v10903_v21 = vpop.f32.mrb[196].mxu1 }
0x145e   :  { %v7499_v54 = vpop.f32.mrb[197].mxu1 }
0x145f   :  { %v11222_v26 = vpack.i.bf16 %v7499_v54, %v10895_v33  ;;  %v10904_v46 = vpop.f32.mrb[198].mxu1 }
0x1460   :  { %v7502_v28 = vpop.f32.mrb[199].mxu1 }
0x1461   :  { %v11227_v23 = vpack.i.bf16 %v10903_v21, %v7502_v28  ;;  %11223 = vrot.lane.b32.xlu0 %v11222_v26, %s11868_s1 }
0x1463   :  { %11228 = vrot.lane.b32.xlu1 %v11227_v23, %s11868_s1 }
0x1469   :  { %v10911_v13 = vpop.f32.mrb[184].mxu0 }
0x146a   :  { %v7561_v31 = vpop.f32.mrb[185].mxu0 }
0x146b   :  { %v10912_v34 = vpop.f32.mrb[186].mxu0 }
0x146c   :  { %v7564_v36 = vpop.f32.mrb[187].mxu0 }
0x146d   :  { %v11232_v24 = vpack.i.bf16 %v7564_v36, %v7561_v31 }
0x146e   :  { %v10919_v14 = vpop.f32.mrb[200].mxu1 }
0x146f   :  { %v7623_v17 = vpop.f32.mrb[201].mxu1  ;;  %11233 = vrot.lane.b32.xlu0 %v11232_v24, %s11868_s1 }
0x1470   :  { %v11237_v11 = vpack.i.bf16 %v7623_v17, %v10911_v13  ;;  %v10920_v62 = vpop.f32.mrb[202].mxu1 }
0x1471   :  { %v7626_v3 = vpop.f32.mrb[203].mxu1 }
0x1472   :  { %v11242_v29 = vpack.i.bf16 %v10919_v14, %v7626_v3  ;;  %11238 = vrot.lane.b32.xlu1 %v11237_v11, %s11868_s1 }
0x1474   :  { %11243 = vrot.lane.b32.xlu0 %v11242_v29, %s11868_s1 }
0x1475   :  { %v10927_v58 = vpop.f32.mrb[188].mxu0 }
0x1476   :  { %v7685_v61 = vpop.f32.mrb[189].mxu0 }
0x1477   :  { %v10928_v18 = vpop.f32.mrb[190].mxu0 }
0x1478   :  { %v7688_v25 = vpop.f32.mrb[191].mxu0 }
0x1479   :  { %v11247_v30 = vpack.i.bf16 %v7688_v25, %v7685_v61 }
0x147b   :  { %11248 = vrot.lane.b32.xlu1 %v11247_v30, %s11868_s1 }
0x147e   :  { %v10935_v16 = vpop.f32.mrb[204].mxu1 }
0x147f   :  { %v7747_v49 = vpop.f32.mrb[205].mxu1 }
0x1480   :  { %v11252_v37 = vpack.i.bf16 %v7747_v49, %v10927_v58  ;;  %v10936_v20 = vpop.f32.mrb[206].mxu1 }
0x1481   :  { %v7750_v51 = vpop.f32.mrb[207].mxu1  ;;  %v16593_v20 = vld [vmem:[#allocation23_spill] sm:$0xff] }
0x1482   :  { %v11257_v15 = vpack.i.bf16 %v10935_v16, %v7750_v51  ;;  %11253 = vrot.lane.b32.xlu0 %v11252_v37, %s11868_s1 }
0x1484   :  { %11258 = vrot.lane.b32.xlu1 %v11257_v15, %s11868_s1 }
0x14aa   :  { %v11204_v56 = vpop.permute.xlu0 %11203 }
0x14ab   :  { %v11206_v45 = vunpack.i.h.bf16 %v11204_v56  ;;  %v11205_v2 = vunpack.i.l.bf16 %v11204_v56 }
0x14ad   :  { %v7858_v35 = vsel %vm548_vm1, %v15006_v7, %v11206_v45  ;;  %v7857_v48 = vsel %vm548_vm1, %v15004_v53, %v11205_v2 }
0x14ae   :  { %v7886_v9 = vpack.c.bf16 %v7858_v35, %v7857_v48  ;;  %v16594_v48 = vld [vmem:[#allocation17_spill] sm:$0xff] }
0x14b0   :  { %10941 = vmatprep.mubr.msk.bf16.mxu0 %vm133_vm0, %v7886_v9 }
0x14c4   :  { %v11209_v40 = vpop.permute.xlu1 %11208 }
0x14c5   :  { %v11211_v55 = vunpack.i.h.bf16 %v11209_v40  ;;  %v11210_v42 = vunpack.i.l.bf16 %v11209_v40  ;;  %v16595_v40 = vld [vmem:[#allocation24_spill] sm:$0xff] }
0x14c6   :  { %v11214_v1 = vpop.permute.xlu0 %11213 }
0x14c7   :  { %v7860_v22 = vsel %vm548_vm1, %v15010_v52, %v11211_v55  ;;  %v7859_v19 = vsel %vm548_vm1, %v15002_v41, %v11210_v42  ;;  %v11216_v43 = vunpack.i.h.bf16 %v11214_v1  ;;  %v11215_v5 = vunpack.i.l.bf16 %v11214_v1 }
0x14c8   :  { %v7887_v6 = vpack.c.bf16 %v7860_v22, %v7859_v19  ;;  %v16596_v19 = vld [vmem:[#allocation20_spill] sm:$0xff] }
0x14c9   :  { %v7862_v7 = vsel %vm548_vm1, %v15008_v63, %v11216_v43  ;;  %v7861_v53 = vsel %vm548_vm1, %v15012_v59, %v11215_v5  ;;  %v16597_v5 = vld [vmem:[#allocation26_spill] sm:$0xff] }
0x14ca   :  { %10942 = vmatmul.mubr.msk.bf16.vlgmr.msra.gmra.mrb[192].mxu0 %vm133_vm0, %v7887_v6  ;;  %v7888_v33 = vpack.c.bf16 %v7862_v7, %v7861_v53  ;;  %v15465_v53 = vld [vmem:[%s16414_s7 + $0x1] ss:$0 sm:$0xff] }
0x14cc   :  { %10945 = vmatprep.mubr.msk.bf16.mxu0 %vm133_vm0, %v7888_v33 }
0x14ce   :  { %v11219_v60 = vpop.permute.xlu1 %11218 }
0x14cf   :  { %v11221_v50 = vunpack.i.h.bf16 %v11219_v60  ;;  %v11220_v52 = vunpack.i.l.bf16 %v11219_v60 }
0x14d1   :  { %v7864_v41 = vsel %vm548_vm1, %v15018_v44, %v11221_v50  ;;  %v7863_v4 = vsel %vm548_vm1, %v15016_v8, %v11220_v52 }
0x14d2   :  { %v7889_v39 = vpack.c.bf16 %v7864_v41, %v7863_v4 }
0x14d3   :  { %v11224_v21 = vpop.permute.xlu0 %11223 }
0x14d4   :  { %v11226_v63 = vunpack.i.h.bf16 %v11224_v21  ;;  %v11225_v54 = vunpack.i.l.bf16 %v11224_v21  ;;  %10946 = vmatmul.mubr.msk.bf16.gmra.mrb[196].mxu0 %vm133_vm0, %v7889_v39  ;;  %v16598_v39 = vld [vmem:[#allocation27_spill] sm:$0xff] }
0x14d5   :  { %v11229_v59 = vpop.permute.xlu1 %11228 }
0x14d6   :  { %v7866_v26 = vsel %vm548_vm1, %v15022_v47, %v11226_v63  ;;  %v7865_v46 = vsel %vm548_vm1, %v15014_v0, %v11225_v54  ;;  %v11231_v28 = vunpack.i.h.bf16 %v11229_v59  ;;  %v11230_v23 = vunpack.i.l.bf16 %v11229_v59  ;;  %v16599_v54 = vld [vmem:[#allocation29_spill] sm:$0xff] }
0x14d7   :  { %v7890_v13 = vpack.c.bf16 %v7866_v26, %v7865_v46  ;;  %v16600_v46 = vld [vmem:[#allocation30_spill] sm:$0xff] }
0x14d8   :  { %v7868_v44 = vsel %vm548_vm1, %v15020_v32, %v11231_v28  ;;  %v7867_v8 = vsel %vm548_vm1, %v15024_v12, %v11230_v23 }
0x14d9   :  { %10949 = vmatprep.mubr.msk.bf16.mxu0 %vm133_vm0, %v7890_v13  ;;  %v7891_v31 = vpack.c.bf16 %v7868_v44, %v7867_v8  ;;  %v16601_v44 = vld [vmem:[#allocation32_spill] sm:$0xff] }
0x14dc   :  { %10950 = vmatmul.mubr.msk.bf16.gmra.mrb[200].mxu0 %vm133_vm0, %v7891_v31 }
0x14e1   :  { %v11234_v34 = vpop.permute.xlu0 %11233 }
0x14e2   :  { %v11236_v36 = vunpack.i.h.bf16 %v11234_v34  ;;  %v11235_v47 = vunpack.i.l.bf16 %v11234_v34 }
0x14e4   :  { %v7870_v0 = vsel %vm548_vm1, %v15030_v57, %v11236_v36  ;;  %v7869_v24 = vsel %vm548_vm1, %v15028_v10, %v11235_v47  ;;  %v11239_v14 = vpop.permute.xlu1 %11238  ;;  %v16590_v57 = vld [vmem:[#allocation21_spill] sm:$0xff]  ;;  %v16591_v10 = vld [vmem:[#allocation22_spill] sm:$0xff] }
0x14e5   :  { %v11241_v17 = vunpack.i.h.bf16 %v11239_v14  ;;  %v11240_v32 = vunpack.i.l.bf16 %v11239_v14  ;;  %v7892_v11 = vpack.c.bf16 %v7870_v0, %v7869_v24 }
0x14e6   :  { %v11244_v62 = vpop.permute.xlu0 %11243 }
0x14e7   :  { %v7872_v12 = vsel %vm548_vm1, %v15034_v27, %v11241_v17  ;;  %v7871_v3 = vsel %vm548_vm1, %v15026_v38, %v11240_v32  ;;  %v11246_v29 = vunpack.i.h.bf16 %v11244_v62  ;;  %v11245_v58 = vunpack.i.l.bf16 %v11244_v62  ;;  %10953 = vmatprep.mubr.msk.bf16.mxu0 %vm133_vm0, %v7892_v11  ;;  %v16592_v38 = vld [vmem:[#allocation25_spill] sm:$0xff]  ;;  %v16602_v32 = vld [vmem:[#allocation28_spill] sm:$0xff] }
0x14e8   :  { %v7893_v61 = vpack.c.bf16 %v7872_v12, %v7871_v3  ;;  %v16603_v3 = vld [vmem:[#allocation31_spill] sm:$0xff] }
0x14e9   :  { %v7874_v18 = vsel %vm548_vm1, %v16590_v57, %v11246_v29  ;;  %v7873_v25 = vsel %vm548_vm1, %v16591_v10, %v11245_v58  ;;  %v16604_v58 = vld [vmem:[#allocation33_spill] sm:$0xff]  ;;  %v16605_v57 = vld [vmem:[#allocation3_spill] sm:$0xff] }
0x14ea   :  { %10954 = vmatmul.mubr.msk.bf16.gmra.mrb[204].mxu0 %vm133_vm0, %v7893_v61  ;;  %v7894_v30 = vpack.c.bf16 %v7874_v18, %v7873_v25 }
0x14ec   :  { %10957 = vmatprep.mubr.msk.bf16.mxu0 %vm133_vm0, %v7894_v30 }
0x14ed   :  { %v11249_v27 = vpop.permute.xlu1 %11248 }
0x14ee   :  { %v11251_v16 = vunpack.i.h.bf16 %v11249_v27  ;;  %v11250_v49 = vunpack.i.l.bf16 %v11249_v27 }
0x14f0   :  { %v7876_v37 = vsel %vm548_vm1, %v16592_v38, %v11251_v16  ;;  %v7875_v51 = vsel %vm548_vm1, %v16593_v20, %v11250_v49 }
0x14f1   :  { %v7895_v15 = vpack.c.bf16 %v7876_v37, %v7875_v51 }
0x14f3   :  { %10958 = vmatmul.mubr.msk.bf16.gmra.mrb[208].mxu0 %vm133_vm0, %v7895_v15  ;;  %v16606_v15 = vld [vmem:[#allocation5_spill] sm:$0xff] }
0x14f4   :  { %v11254_v56 = vpop.permute.xlu0 %11253 }
0x14f5   :  { %v11256_v45 = vunpack.i.h.bf16 %v11254_v56  ;;  %v11255_v2 = vunpack.i.l.bf16 %v11254_v56 }
0x14f6   :  { %v11259_v35 = vpop.permute.xlu1 %11258 }
0x14f7   :  { %v7878_v9 = vsel %vm548_vm1, %v16594_v48, %v11256_v45  ;;  %v7877_v55 = vsel %vm548_vm1, %v16595_v40, %v11255_v2  ;;  %v11261_v42 = vunpack.i.h.bf16 %v11259_v35  ;;  %v11260_v1 = vunpack.i.l.bf16 %v11259_v35  ;;  %v16607_v35 = vld [vmem:[#allocation4_spill] sm:$0xff] }
0x14f8   :  { %v7896_v22 = vpack.c.bf16 %v7878_v9, %v7877_v55  ;;  %v16608_v9 = vld [vmem:[#allocation2_spill] sm:$0xff]  ;;  %v16609_v55 = vld [vmem:[#allocation7_spill] sm:$0xff] }
0x14f9   :  { %v7880_v43 = vsel %vm548_vm1, %v16596_v19, %v11261_v42  ;;  %v7879_v6 = vsel %vm548_vm1, %v16597_v5, %v11260_v1 }
0x14fa   :  { %v7897_v7 = vpack.c.bf16 %v7880_v43, %v7879_v6  ;;  %10961 = vmatprep.mubr.msk.bf16.mxu0 %vm133_vm0, %v7896_v22 }
0x14fc   :  { %10962 = vmatmul.mubr.msk.bf16.gmra.mrb[212].mxu0 %vm133_vm0, %v7897_v7 }
0x159d   :  { %v10943_v33 = vpop.f32.mrb[192].mxu0 }
0x159e   :  { %v7988_v60 = vpop.f32.mrb[193].mxu0  ;;  %v7997_v50 = vadd.f32 %v10943_v33, %v15465_v53 }
0x159f   :  { %v7989_v52 = vadd.f32 %v15465_v53, %v7988_v60  ;;  %v10944_v41 = vpop.f32.mrb[194].mxu0 }
0x15a0   :  { %v7991_v4 = vpop.f32.mrb[195].mxu0  ;;  %v15474_v59 = vadd.f32 %v7997_v50, %v16599_v54  ;;  %v8000_v26 = vadd.f32 %v10944_v41, %v15465_v53 }
0x15a1   :  { %v15470_v21 = vadd.f32 %v7989_v52, %v16598_v39  ;;  %v7992_v63 = vadd.f32 %v15465_v53, %v7991_v4  ;;  %v16610_v52 = vld [vmem:[#allocation9_spill] sm:$0xff] }
0x15a2   :  { %v15485_v8 = vadd.f32 %v8000_v26, %v16601_v44  ;;  %v8117_v34 = vsel %vm133_vm0, %v15474_v59, 0.0  ;;  %v16612_v26 = vld [vmem:[#allocation6_spill] sm:$0xff] }
0x15a3   :  { %v15478_v28 = vadd.f32 %v7992_v63, %v16600_v46  ;;  %v8111_v23 = vsel %vm133_vm0, %v15470_v21, 0.0  ;;  %v16611_v63 = vld [vmem:[#allocation8_spill] sm:$0xff] }
0x15a4   :  { %8112 = vadd.xlane.f32.xlu0 %v8111_v23  ;;  %v8120_v12 = vsel %vm133_vm0, %v15485_v8, 0.0 }
0x15a5   :  { %v8114_v13 = vsel %vm133_vm0, %v15478_v28, 0.0 }
0x15a6   :  { %8115 = vadd.xlane.f32.xlu1 %v8114_v13  ;;  %v16613_v13 = vld [vmem:[#allocation11_spill] sm:$0xff] }
0x15a7   :  { %v10947_v31 = vpop.f32.mrb[196].mxu0 }
0x15a8   :  { %v8004_v36 = vpop.f32.mrb[197].mxu0  ;;  %8118 = vadd.xlane.f32.xlu0 %v8117_v34  ;;  %v8013_v24 = vadd.f32 %v10947_v31, %v15465_v53 }
0x15a9   :  { %v8005_v47 = vadd.f32 %v15465_v53, %v8004_v36  ;;  %v10948_v0 = vpop.f32.mrb[198].mxu0 }
0x15aa   :  { %v8016_v14 = vadd.f32 %v10948_v0, %v15465_v53  ;;  %v8007_v17 = vpop.f32.mrb[199].mxu0  ;;  %v15502_v61 = vadd.f32 %v8013_v24, %v16604_v58 }
0x15ab   :  { %v15493_v11 = vadd.f32 %v8005_v47, %v16602_v32  ;;  %v8008_v62 = vadd.f32 %v15465_v53, %v8007_v17 }
0x15ac   :  { %8121 = vadd.xlane.f32.xlu0 %v8120_v12  ;;  %v15505_v18 = vadd.f32 %v8016_v14, %v16605_v57  ;;  %v8129_v20 = vsel %vm133_vm0, %v15502_v61, 0.0  ;;  %v16615_v57 = vld [vmem:[#allocation12_spill] sm:$0xff] }
0x15ad   :  { %v15499_v29 = vadd.f32 %v8008_v62, %v16603_v3  ;;  %v8123_v30 = vsel %vm133_vm0, %v15493_v11, 0.0  ;;  %v16614_v62 = vld [vmem:[#allocation10_spill] sm:$0xff] }
0x15ae   :  { %v8132_v37 = vsel %vm133_vm0, %v15505_v18, 0.0 }
0x15af   :  { %v10951_v10 = vpop.f32.mrb[200].mxu0  ;;  %v8126_v25 = vsel %vm133_vm0, %v15499_v29, 0.0 }
0x15b0   :  { %v8020_v27 = vpop.f32.mrb[201].mxu0  ;;  %8127 = vadd.xlane.f32.xlu1 %v8126_v25  ;;  %8124 = vadd.xlane.f32.xlu0 %v8123_v30  ;;  %v8029_v51 = vadd.f32 %v10951_v10, %v15465_v53  ;;  %v16616_v25 = vld [vmem:[#allocation13_spill] sm:$0xff] }
0x15b1   :  { %v8021_v16 = vadd.f32 %v15465_v53, %v8020_v27  ;;  %v10952_v49 = vpop.f32.mrb[202].mxu0 }
0x15b2   :  { %v8023_v38 = vpop.f32.mrb[203].mxu0  ;;  %v8032_v45 = vadd.f32 %v10952_v49, %v15465_v53  ;;  %v15526_v40 = vadd.f32 %v8029_v51, %v16608_v9 }
0x15b3   :  { %v15518_v56 = vadd.f32 %v8021_v16, %v16606_v15  ;;  %v8024_v2 = vadd.f32 %v15465_v53, %v8023_v38  ;;  %v16617_v16 = vld [vmem:[#allocation15_spill] sm:$0xff] }
0x15b4   :  { %8133 = vadd.xlane.f32.xlu1 %v8132_v37  ;;  %8130 = vadd.xlane.f32.xlu0 %v8129_v20  ;;  %v15529_v42 = vadd.f32 %v8032_v45, %v16609_v55  ;;  %v8141_v43 = vsel %vm133_vm0, %v15526_v40, 0.0  ;;  %v16618_v55 = vld [vmem:[#allocation14_spill] sm:$0xff] }
0x15b5   :  { %v15523_v48 = vadd.f32 %v8024_v2, %v16607_v35  ;;  %v8135_v22 = vsel %vm133_vm0, %v15518_v56, 0.0 }
0x15b6   :  { %v8144_v19 = vsel %vm133_vm0, %v15529_v42, 0.0 }
0x15b7   :  { %v8138_v1 = vsel %vm133_vm0, %v15523_v48, 0.0 }
0x15b8   :  { %8139 = vadd.xlane.f32.xlu1 %v8138_v1  ;;  %8136 = vadd.xlane.f32.xlu0 %v8135_v22 }
0x15bc   :  { %8145 = vadd.xlane.f32.xlu1 %v8144_v19  ;;  %8142 = vadd.xlane.f32.xlu0 %v8141_v43  ;;  %v16619_v43 = vld [vmem:[#allocation18_spill] sm:$0xff] }
0x15bd   :  { %v10955_v5 = vpop.f32.mrb[204].mxu0 }
0x15be   :  { %v8036_v6 = vpop.f32.mrb[205].mxu0  ;;  %v8045_v7 = vadd.f32 %v10955_v5, %v15465_v53 }
0x15bf   :  { %v8037_v33 = vadd.f32 %v15465_v53, %v8036_v6  ;;  %v10956_v60 = vpop.f32.mrb[206].mxu0  ;;  %v16620_v6 = vld [vmem:[#allocation19_spill] sm:$0xff] }
0x15c0   :  { %v8039_v50 = vpop.f32.mrb[207].mxu0  ;;  %v8048_v4 = vadd.f32 %v10956_v60, %v15465_v53  ;;  %v15547_v54 = vadd.f32 %v8045_v7, %v16611_v63  ;;  %v16621_v60 = vld [vmem:[#allocation16_spill] sm:$0xff] }
0x15c1   :  { %v15542_v41 = vadd.f32 %v8037_v33, %v16610_v52  ;;  %v8040_v39 = vadd.f32 %v15465_v53, %v8039_v50 }
0x15c2   :  { %v15555_v44 = vadd.f32 %v8048_v4, %v16613_v13  ;;  %v8153_v47 = vsel %vm133_vm0, %v15547_v54, 0.0 }
0x15c3   :  { %v15550_v46 = vadd.f32 %v8040_v39, %v16612_v26  ;;  %v8147_v23 = vsel %vm133_vm0, %v15542_v41, 0.0 }
0x15c4   :  { %8148 = vadd.xlane.f32.xlu0 %v8147_v23  ;;  %v8156_v32 = vsel %vm133_vm0, %v15555_v44, 0.0 }
0x15c5   :  { %v8150_v31 = vsel %vm133_vm0, %v15550_v46, 0.0 }
0x15c6   :  { %8151 = vadd.xlane.f32.xlu1 %v8150_v31  ;;  %v10959_v34 = vpop.f32.mrb[208].mxu0 }
0x15c7   :  { %v8052_v36 = vpop.f32.mrb[209].mxu0  ;;  %v8061_v0 = vadd.f32 %v10959_v34, %v15465_v53 }
0x15c8   :  { %v8053_v24 = vadd.f32 %v15465_v53, %v8052_v36  ;;  %8154 = vadd.xlane.f32.xlu0 %v8153_v47  ;;  %v10960_v14 = vpop.f32.mrb[210].mxu0 }
0x15c9   :  { %v8055_v17 = vpop.f32.mrb[211].mxu0  ;;  %v8064_v3 = vadd.f32 %v10960_v14, %v15465_v53  ;;  %v15571_v10 = vadd.f32 %v8061_v0, %v16615_v57 }
0x15ca   :  { %v15566_v12 = vadd.f32 %v8053_v24, %v16614_v62  ;;  %v8056_v58 = vadd.f32 %v15465_v53, %v8055_v17  ;;  %8157 = vadd.xlane.f32.xlu1 %v8156_v32 }
0x15cb   :  { %v15579_v49 = vadd.f32 %v8064_v3, %v16617_v16  ;;  %v8165_v51 = vsel %vm133_vm0, %v15571_v10, 0.0 }
0x15cc   :  { %v15574_v30 = vadd.f32 %v8056_v58, %v16616_v25  ;;  %v8159_v27 = vsel %vm133_vm0, %v15566_v12, 0.0 }
0x15cd   :  { %8160 = vadd.xlane.f32.xlu0 %v8159_v27  ;;  %v8168_v9 = vsel %vm133_vm0, %v15579_v49, 0.0 }
0x15ce   :  { %v8162_v38 = vsel %vm133_vm0, %v15574_v30, 0.0 }
0x15cf   :  { %v10963_v37 = vpop.f32.mrb[212].mxu0  ;;  %8163 = vadd.xlane.f32.xlu1 %v8162_v38 }
0x15d0   :  { %v8068_v20 = vpop.f32.mrb[213].mxu0  ;;  %v8077_v15 = vadd.f32 %v10963_v37, %v15465_v53 }
0x15d1   :  { %v8069_v45 = vadd.f32 %v15465_v53, %v8068_v20  ;;  %v10964_v2 = vpop.f32.mrb[214].mxu0  ;;  %8166 = vadd.xlane.f32.xlu0 %v8165_v51 }
0x15d2   :  { %v8071_v35 = vpop.f32.mrb[215].mxu0  ;;  %v8080_v22 = vadd.f32 %v10964_v2, %v15465_v53  ;;  %v15595_v5 = vadd.f32 %v8077_v15, %v16619_v43 }
0x15d3   :  { %v15590_v1 = vadd.f32 %v8069_v45, %v16618_v55  ;;  %v8072_v19 = vadd.f32 %v15465_v53, %v8071_v35  ;;  %8169 = vadd.xlane.f32.xlu1 %v8168_v9 }
0x15d4   :  { %v15603_v50 = vadd.f32 %v8080_v22, %v16621_v60  ;;  %v8177_v53 = vsel %vm133_vm0, %v15595_v5, 0.0 }
0x15d5   :  { %v15598_v7 = vadd.f32 %v8072_v19, %v16620_v6  ;;  %v8171_v33 = vsel %vm133_vm0, %v15590_v1, 0.0 }
0x15d6   :  { %8172 = vadd.xlane.f32.xlu0 %v8171_v33  ;;  %v8180_v4 = vsel %vm133_vm0, %v15603_v50, 0.0 }
0x15d7   :  { %v8174_v52 = vsel %vm133_vm0, %v15598_v7, 0.0 }
0x15d8   :  { %8175 = vadd.xlane.f32.xlu1 %v8174_v52 }
0x15da   :  { %8178 = vadd.xlane.f32.xlu0 %v8177_v53 }
0x15dc   :  { %8181 = vadd.xlane.f32.xlu1 %v8180_v4 }
0x1631   :  { %v8113_v39 = vpop.xlane.xlu0 %8112 }
0x1632   :  { %v8183_v63 = vmul.f32 0.03125, %v8113_v39 }
0x1633   :  { %v8116_v26 = vpop.xlane.xlu1 %8115 }
0x1634   :  { %v15612_v23 = vsub.f32 %v15470_v21, %v8183_v63  ;;  %v8184_v13 = vmul.f32 0.03125, %v8116_v26 }
0x1635   :  { %v8119_v31 = vpop.xlane.xlu0 %8118 }
0x1636   :  { %v15615_v34 = vsub.f32 %v15478_v28, %v8184_v13  ;;  %v8185_v36 = vmul.f32 0.03125, %v8119_v31  ;;  %v8231_v47 = vmul.f32 %v15612_v23, %v15612_v23 }
0x1638   :  { %v15620_v0 = vsub.f32 %v15474_v59, %v8185_v36  ;;  %v8255_v24 = vsel %vm133_vm0, %v8231_v47, 0.0  ;;  %v8232_v14 = vmul.f32 %v15615_v34, %v15615_v34 }
0x1639   :  { %8256 = vadd.xlane.f32.xlu0 %v8255_v24  ;;  %v8122_v21 = vpop.xlane.xlu0 %8121 }
0x163a   :  { %v8186_v17 = vmul.f32 0.03125, %v8122_v21  ;;  %v8258_v32 = vsel %vm133_vm0, %v8232_v14, 0.0  ;;  %v8233_v28 = vmul.f32 %v15620_v0, %v15620_v0 }
0x163b   :  { %8259 = vadd.xlane.f32.xlu1 %v8258_v32 }
0x163c   :  { %v15629_v62 = vsub.f32 %v15485_v8, %v8186_v17  ;;  %v8261_v59 = vsel %vm133_vm0, %v8233_v28, 0.0 }
0x163d   :  { %v8128_v3 = vpop.xlane.xlu1 %8127  ;;  %8262 = vadd.xlane.f32.xlu0 %v8261_v59  ;;  %v8125_v58 = vpop.xlane.xlu0 %8124 }
0x163e   :  { %v8188_v57 = vmul.f32 0.03125, %v8128_v3  ;;  %v8187_v25 = vmul.f32 0.03125, %v8125_v58  ;;  %v8234_v27 = vmul.f32 %v15629_v62, %v15629_v62 }
0x1640   :  { %v15635_v16 = vsub.f32 %v15499_v29, %v8188_v57  ;;  %v15638_v38 = vsub.f32 %v15493_v11, %v8187_v25  ;;  %v8264_v37 = vsel %vm133_vm0, %v8234_v27, 0.0 }
0x1641   :  { %v8134_v8 = vpop.xlane.xlu1 %8133  ;;  %8265 = vadd.xlane.f32.xlu1 %v8264_v37  ;;  %v8131_v20 = vpop.xlane.xlu0 %8130 }
0x1642   :  { %v8190_v51 = vmul.f32 0.03125, %v8134_v8  ;;  %v8189_v15 = vmul.f32 0.03125, %v8131_v20  ;;  %v8236_v45 = vmul.f32 %v15635_v16, %v15635_v16  ;;  %v8235_v2 = vmul.f32 %v15638_v38, %v15638_v38 }
0x1644   :  { %v15646_v35 = vsub.f32 %v15505_v18, %v8190_v51  ;;  %v15649_v29 = vsub.f32 %v15502_v61, %v8189_v15  ;;  %v8270_v11 = vsel %vm133_vm0, %v8236_v45, 0.0  ;;  %v8267_v9 = vsel %vm133_vm0, %v8235_v2, 0.0 }
0x1645   :  { %v8140_v55 = vpop.xlane.xlu1 %8139  ;;  %8271 = vadd.xlane.f32.xlu1 %v8270_v11  ;;  %8268 = vadd.xlane.f32.xlu0 %v8267_v9  ;;  %v8137_v22 = vpop.xlane.xlu0 %8136 }
0x1646   :  { %v8192_v19 = vmul.f32 0.03125, %v8140_v55  ;;  %v8191_v43 = vmul.f32 0.03125, %v8137_v22  ;;  %v8238_v6 = vmul.f32 %v15646_v35, %v15646_v35  ;;  %v8237_v18 = vmul.f32 %v15649_v29, %v15649_v29 }
0x1648   :  { %v15658_v33 = vsub.f32 %v15523_v48, %v8192_v19  ;;  %v15661_v61 = vsub.f32 %v15518_v56, %v8191_v43  ;;  %v8276_v60 = vsel %vm133_vm0, %v8238_v6, 0.0  ;;  %v8273_v52 = vsel %vm133_vm0, %v8237_v18, 0.0 }
0x1649   :  { %v8146_v53 = vpop.xlane.xlu1 %8145  ;;  %8277 = vadd.xlane.f32.xlu1 %v8276_v60  ;;  %8274 = vadd.xlane.f32.xlu0 %v8273_v52  ;;  %v8143_v4 = vpop.xlane.xlu0 %8142 }
0x164a   :  { %v8194_v39 = vmul.f32 0.03125, %v8146_v53  ;;  %v8193_v63 = vmul.f32 0.03125, %v8143_v4  ;;  %v8240_v26 = vmul.f32 %v15658_v33, %v15658_v33  ;;  %v8239_v48 = vmul.f32 %v15661_v61, %v15661_v61 }
0x164c   :  { %v15670_v13 = vsub.f32 %v15529_v42, %v8194_v39  ;;  %v15673_v56 = vsub.f32 %v15526_v40, %v8193_v63  ;;  %v8282_v31 = vsel %vm133_vm0, %v8240_v26, 0.0  ;;  %v8279_v36 = vsel %vm133_vm0, %v8239_v48, 0.0 }
0x164d   :  { %8283 = vadd.xlane.f32.xlu1 %v8282_v31  ;;  %8280 = vadd.xlane.f32.xlu0 %v8279_v36 }
0x164e   :  { %v8242_v47 = vmul.f32 %v15670_v13, %v15670_v13  ;;  %v8241_v24 = vmul.f32 %v15673_v56, %v15673_v56 }
0x1650   :  { %v8288_v14 = vsel %vm133_vm0, %v8242_v47, 0.0  ;;  %v8285_v42 = vsel %vm133_vm0, %v8241_v24, 0.0 }
0x1651   :  { %v8149_v21 = vpop.xlane.xlu0 %8148  ;;  %8289 = vadd.xlane.f32.xlu1 %v8288_v14  ;;  %8286 = vadd.xlane.f32.xlu0 %v8285_v42 }
0x1652   :  { %v8195_v40 = vmul.f32 0.03125, %v8149_v21 }
0x1653   :  { %v8152_v17 = vpop.xlane.xlu1 %8151 }
0x1654   :  { %v15684_v32 = vsub.f32 %v15542_v41, %v8195_v40  ;;  %v8196_v28 = vmul.f32 0.03125, %v8152_v17 }
0x1655   :  { %v8155_v59 = vpop.xlane.xlu0 %8154 }
0x1656   :  { %v15687_v3 = vsub.f32 %v15550_v46, %v8196_v28  ;;  %v8197_v58 = vmul.f32 0.03125, %v8155_v59  ;;  %v8243_v57 = vmul.f32 %v15684_v32, %v15684_v32 }
0x1657   :  { %v8158_v25 = vpop.xlane.xlu1 %8157 }
0x1658   :  { %v15692_v27 = vsub.f32 %v15547_v54, %v8197_v58  ;;  %v8198_v37 = vmul.f32 0.03125, %v8158_v25  ;;  %v8291_v8 = vsel %vm133_vm0, %v8243_v57, 0.0  ;;  %v8244_v41 = vmul.f32 %v15687_v3, %v15687_v3 }
0x1659   :  { %8292 = vadd.xlane.f32.xlu0 %v8291_v8 }
0x165a   :  { %v15698_v20 = vsub.f32 %v15555_v44, %v8198_v37  ;;  %v8294_v46 = vsel %vm133_vm0, %v8244_v41, 0.0  ;;  %v8161_v51 = vpop.xlane.xlu0 %8160  ;;  %v8245_v15 = vmul.f32 %v15692_v27, %v15692_v27  ;;  %v11278_v44 = vld [vmem:[%s16415_s10 + $0x10] sm:$0xff]  }
0x165b   :  { %8295 = vadd.xlane.f32.xlu1 %v8294_v46  ;;  %v8199_v45 = vmul.f32 0.03125, %v8161_v51  ;;  %10965 = vmatprep.subr.bf16.mxu1 %v11278_v44  ;;  %v11281_v46 = vld [vmem:[%s16416_s12 + $0x28] sm:$0xff]  }
0x165c   :  { %v8164_v54 = vpop.xlane.xlu1 %8163  ;;  %v8297_v2 = vsel %vm133_vm0, %v8245_v15, 0.0  ;;  %v8246_v11 = vmul.f32 %v15698_v20, %v15698_v20  ;;  %10966 = vmatpush3.bf16.msra.mxu1 %v11278_v44 }
0x165d   :  { %v15707_v9 = vsub.f32 %v15566_v12, %v8199_v45  ;;  %v8200_v55 = vmul.f32 0.03125, %v8164_v54  ;;  %8298 = vadd.xlane.f32.xlu0 %v8297_v2 }
0x165e   :  { %v8300_v22 = vsel %vm133_vm0, %v8246_v11, 0.0  ;;  %v8167_v19 = vpop.xlane.xlu0 %8166 }
0x165f   :  { %v15714_v43 = vsub.f32 %v15574_v30, %v8200_v55  ;;  %8301 = vadd.xlane.f32.xlu1 %v8300_v22  ;;  %v8201_v6 = vmul.f32 0.03125, %v8167_v19  ;;  %v8247_v18 = vmul.f32 %v15707_v9, %v15707_v9  ;;  %v11279_v30 = vld [vmem:[%s16415_s10 + $0x18] sm:$0xff]  }
0x1660   :  { %v8170_v12 = vpop.xlane.xlu1 %8169  ;;  %10967 = vmatprep.subr.bf16.mxu1 %v11279_v30 }
0x1661   :  { %v15719_v60 = vsub.f32 %v15571_v10, %v8201_v6  ;;  %v8202_v52 = vmul.f32 0.03125, %v8170_v12  ;;  %v8303_v53 = vsel %vm133_vm0, %v8247_v18, 0.0  ;;  %v8248_v4 = vmul.f32 %v15714_v43, %v15714_v43  ;;  %10968 = vmatpush3.bf16.msra.mxu1 %v11279_v30 }
0x1662   :  { %8304 = vadd.xlane.f32.xlu0 %v8303_v53 }
0x1663   :  { %v15728_v39 = vsub.f32 %v15579_v49, %v8202_v52  ;;  %v8173_v63 = vpop.xlane.xlu0 %8172  ;;  %v8306_v26 = vsel %vm133_vm0, %v8248_v4, 0.0  ;;  %v8249_v10 = vmul.f32 %v15719_v60, %v15719_v60 }
0x1664   :  { %v8203_v48 = vmul.f32 0.03125, %v8173_v63  ;;  %8307 = vadd.xlane.f32.xlu1 %v8306_v26  ;;  %v15770_v63 = vld [vmem:[%s16417_s8 + $0x1] ss:$0 sm:$0xff] }
0x1665   :  { %v8176_v31 = vpop.xlane.xlu1 %8175  ;;  %v8309_v36 = vsel %vm133_vm0, %v8249_v10, 0.0  ;;  %v8250_v47 = vmul.f32 %v15728_v39, %v15728_v39 }
0x1666   :  { %v15737_v24 = vsub.f32 %v15590_v1, %v8203_v48  ;;  %v8204_v49 = vmul.f32 0.03125, %v8176_v31  ;;  %8310 = vadd.xlane.f32.xlu0 %v8309_v36 }
0x1667   :  { %v8179_v14 = vpop.xlane.xlu0 %8178  ;;  %v8312_v42 = vsel %vm133_vm0, %v8250_v47, 0.0 }
0x1668   :  { %v15741_v21 = vsub.f32 %v15598_v7, %v8204_v49  ;;  %v8205_v40 = vmul.f32 0.03125, %v8179_v14  ;;  %8313 = vadd.xlane.f32.xlu1 %v8312_v42  ;;  %v8251_v17 = vmul.f32 %v15737_v24, %v15737_v24 }
0x1669   :  { %v8182_v28 = vpop.xlane.xlu1 %8181 }
0x166a   :  { %v15746_v59 = vsub.f32 %v15595_v5, %v8205_v40  ;;  %v8206_v58 = vmul.f32 0.03125, %v8182_v28  ;;  %v8315_v1 = vsel %vm133_vm0, %v8251_v17, 0.0  ;;  %v8252_v57 = vmul.f32 %v15741_v21, %v15741_v21 }
0x166b   :  { %8316 = vadd.xlane.f32.xlu0 %v8315_v1  ;;  %v15778_v1 = vld [vmem:[%s16418_s9 + $0x1] ss:$0 sm:$0xff] }
0x166c   :  { %v15752_v25 = vsub.f32 %v15603_v50, %v8206_v58  ;;  %v8318_v7 = vsel %vm133_vm0, %v8252_v57, 0.0  ;;  %v8253_v37 = vmul.f32 %v15746_v59, %v15746_v59  ;;  %v11280_v50 = vld [vmem:[%s16416_s12 + $0x20] sm:$0xff]  }
0x166d   :  { %8319 = vadd.xlane.f32.xlu1 %v8318_v7  ;;  %10993 = vmatprep.subr.bf16.mxu0 %v11280_v50 }
0x166e   :  { %v8321_v8 = vsel %vm133_vm0, %v8253_v37, 0.0  ;;  %v8254_v5 = vmul.f32 %v15752_v25, %v15752_v25  ;;  %10994 = vmatpush3.bf16.msra.mxu0 %v11280_v50 }
0x166f   :  { %8322 = vadd.xlane.f32.xlu0 %v8321_v8  ;;  %10995 = vmatprep.subr.bf16.mxu0 %v11281_v46 }
0x1670   :  { %v8324_v41 = vsel %vm133_vm0, %v8254_v5, 0.0 }
0x1671   :  { %8325 = vadd.xlane.f32.xlu1 %v8324_v41 }
0x1672   :  { %10996 = vmatpush3.bf16.msra.mxu0 %v11281_v46 }
0x16c6   :  { %v8257_v51 = vpop.xlane.xlu0 %8256 }
0x16c7   :  { %v8327_v15 = vmul.f32 0.03125, %v8257_v51 }
0x16c8   :  { %v8260_v45 = vpop.xlane.xlu1 %8259 }
0x16c9   :  { %v8351_v54 = vadd.f32 1e-05, %v8327_v15  ;;  %v8328_v2 = vmul.f32 0.03125, %v8260_v45 }
0x16ca   :  { %v8263_v11 = vpop.xlane.xlu0 %8262 }
0x16cb   :  { %11766 = vrsqrt.f32 %v8351_v54  ;;  %v8352_v55 = vadd.f32 1e-05, %v8328_v2  ;;  %v8329_v44 = vmul.f32 0.03125, %v8263_v11 }
0x16cd   :  { %11768 = vrsqrt.f32 %v8352_v55  ;;  %v8353_v22 = vadd.f32 1e-05, %v8329_v44 }
0x16ce   :  { %v8266_v19 = vpop.xlane.xlu1 %8265 }
0x16cf   :  { %11770 = vrsqrt.f32 %v8353_v22  ;;  %v8330_v6 = vmul.f32 0.03125, %v8266_v19 }
0x16d1   :  { %v8354_v18 = vadd.f32 1e-05, %v8330_v6 }
0x16d2   :  { %v8272_v12 = vpop.xlane.xlu1 %8271  ;;  %v8269_v52 = vpop.xlane.xlu0 %8268 }
0x16d3   :  { %11772 = vrsqrt.f32 %v8354_v18  ;;  %v8332_v53 = vmul.f32 0.03125, %v8272_v12  ;;  %v8331_v4 = vmul.f32 0.03125, %v8269_v52 }
0x16d5   :  { %v11767_v30 = vpop.eup %11766  ;;  %v8356_v26 = vadd.f32 1e-05, %v8332_v53  ;;  %v8355_v10 = vadd.f32 1e-05, %v8331_v4 }
0x16d6   :  { %v8399_v48 = vmul.f32 %v11767_v30, %v15612_v23  ;;  %v8278_v31 = vpop.xlane.xlu1 %8277  ;;  %v8275_v36 = vpop.xlane.xlu0 %8274 }
0x16d7   :  { %v11769_v47 = vpop.eup %11768  ;;  %11774 = vrsqrt.f32 %v8356_v26  ;;  %v8334_v49 = vmul.f32 0.03125, %v8278_v31  ;;  %v8333_v14 = vmul.f32 0.03125, %v8275_v36 }
0x16d8   :  { %v8400_v42 = vmul.f32 %v11769_v47, %v15615_v34  ;;  %11776 = vrsqrt.f32 %v8355_v10  ;;  %v8429_v40 = vmul.f32 %v15770_v63, %v8399_v48 }
0x16d9   :  { %v11771_v17 = vpop.eup %11770  ;;  %v8358_v28 = vadd.f32 1e-05, %v8334_v49  ;;  %v8357_v58 = vadd.f32 1e-05, %v8333_v14 }
0x16da   :  { %v8401_v23 = vmul.f32 %v11771_v17, %v15620_v0  ;;  %v8284_v57 = vpop.xlane.xlu1 %8283  ;;  %v8281_v7 = vpop.xlane.xlu0 %8280  ;;  %v8430_v37 = vmul.f32 %v15770_v63, %v8400_v42  ;;  %v15783_v5 = vadd.f32 %v15778_v1, %v8429_v40 }
0x16db   :  { %11778 = vrsqrt.f32 %v8358_v28  ;;  %v8336_v8 = vmul.f32 0.03125, %v8284_v57  ;;  %v8335_v34 = vmul.f32 0.03125, %v8281_v7 }
0x16dc   :  { %11780 = vrsqrt.f32 %v8357_v58  ;;  %v15786_v41 = vadd.f32 %v15778_v1, %v8430_v37  ;;  %v8431_v15 = vmul.f32 %v15770_v63, %v8401_v23 }
0x16dd   :  { %v11773_v50 = vpop.eup %11772  ;;  %v8360_v46 = vadd.f32 1e-05, %v8336_v8  ;;  %v8359_v51 = vadd.f32 1e-05, %v8335_v34 }
0x16de   :  { %v8402_v0 = vmul.f32 %v11773_v50, %v15629_v62  ;;  %v8290_v45 = vpop.xlane.xlu1 %8289  ;;  %v8287_v54 = vpop.xlane.xlu0 %8286  ;;  %v8488_v2 = vpack.c.bf16 %v15786_v41, %v15783_v5  ;;  %v15796_v62 = vadd.f32 %v15778_v1, %v8431_v15 }
0x16df   :  { %11782 = vrsqrt.f32 %v8360_v46  ;;  %v8338_v11 = vmul.f32 0.03125, %v8290_v45  ;;  %v8337_v55 = vmul.f32 0.03125, %v8287_v54 }
0x16e0   :  { %v8432_v44 = vmul.f32 %v15770_v63, %v8402_v0  ;;  %11784 = vrsqrt.f32 %v8359_v51  ;;  %10969 = vmatprep.mubr.msk.bf16.mxu1 %vm133_vm0, %v8488_v2 }
0x16e1   :  { %v11775_v22 = vpop.eup %11774  ;;  %v8362_v19 = vadd.f32 1e-05, %v8338_v11  ;;  %v8361_v6 = vadd.f32 1e-05, %v8337_v55 }
0x16e2   :  { %v11777_v18 = vpop.eup %11776  ;;  %v8404_v12 = vmul.f32 %v11775_v22, %v15635_v16  ;;  %v15799_v52 = vadd.f32 %v15778_v1, %v8432_v44 }
0x16e3   :  { %v8403_v53 = vmul.f32 %v11777_v18, %v15638_v38  ;;  %11786 = vrsqrt.f32 %v8362_v19 }
0x16e4   :  { %11788 = vrsqrt.f32 %v8361_v6  ;;  %v8489_v4 = vpack.c.bf16 %v15799_v52, %v15796_v62  ;;  %v8434_v30 = vmul.f32 %v15770_v63, %v8404_v12 }
0x16e5   :  { %v11779_v26 = vpop.eup %11778  ;;  %v8433_v10 = vmul.f32 %v15770_v63, %v8403_v53 }
0x16e6   :  { %v11781_v48 = vpop.eup %11780  ;;  %v8406_v16 = vmul.f32 %v11779_v26, %v15646_v35  ;;  %v8293_v31 = vpop.xlane.xlu0 %8292  ;;  %10970 = vmatmul.mubr.msk.bf16.vlgmr.msra.gmra.mrb[208].mxu1 %vm133_vm0, %v8489_v4  ;;  %v15809_v36 = vadd.f32 %v15778_v1, %v8434_v30 }
0x16e7   :  { %v8405_v38 = vmul.f32 %v11781_v48, %v15649_v29  ;;  %v8339_v47 = vmul.f32 0.03125, %v8293_v31  ;;  %v15813_v49 = vadd.f32 %v15778_v1, %v8433_v10 }
0x16e8   :  { %v8296_v14 = vpop.xlane.xlu1 %8295  ;;  %v8436_v42 = vmul.f32 %v15770_v63, %v8406_v16 }
0x16e9   :  { %v11783_v40 = vpop.eup %11782  ;;  %v8363_v17 = vadd.f32 1e-05, %v8339_v47  ;;  %v8340_v28 = vmul.f32 0.03125, %v8296_v14  ;;  %v8490_v35 = vpack.c.bf16 %v15809_v36, %v15813_v49  ;;  %v8435_v58 = vmul.f32 %v15770_v63, %v8405_v38 }
0x16ea   :  { %v11785_v23 = vpop.eup %11784  ;;  %v8408_v57 = vmul.f32 %v11783_v40, %v15658_v33  ;;  %v8299_v7 = vpop.xlane.xlu0 %8298  ;;  %v15821_v29 = vadd.f32 %v15778_v1, %v8436_v42 }
0x16eb   :  { %v8407_v37 = vmul.f32 %v11785_v23, %v15661_v61  ;;  %11790 = vrsqrt.f32 %v8363_v17  ;;  %v8364_v8 = vadd.f32 1e-05, %v8340_v28  ;;  %v8341_v34 = vmul.f32 0.03125, %v8299_v7  ;;  %10973 = vmatprep.mubr.msk.bf16.mxu1 %vm133_vm0, %v8490_v35 }
0x16ec   :  { %v8302_v50 = vpop.xlane.xlu1 %8301  ;;  %v15826_v46 = vadd.f32 %v15778_v1, %v8435_v58  ;;  %v8438_v51 = vmul.f32 %v15770_v63, %v8408_v57 }
0x16ed   :  { %v11787_v15 = vpop.eup %11786  ;;  %11792 = vrsqrt.f32 %v8364_v8  ;;  %v8365_v33 = vadd.f32 1e-05, %v8341_v34  ;;  %v8342_v0 = vmul.f32 0.03125, %v8302_v50  ;;  %v8437_v45 = vmul.f32 %v15770_v63, %v8407_v37 }
0x16ee   :  { %v11789_v54 = vpop.eup %11788  ;;  %v8410_v61 = vmul.f32 %v11787_v15, %v15670_v13  ;;  %v8491_v2 = vpack.c.bf16 %v15821_v29, %v15826_v46  ;;  %v15834_v11 = vadd.f32 %v15778_v1, %v8438_v51 }
0x16ef   :  { %v8409_v55 = vmul.f32 %v11789_v54, %v15673_v56  ;;  %11794 = vrsqrt.f32 %v8365_v33  ;;  %v8366_v44 = vadd.f32 1e-05, %v8342_v0  ;;  %v8305_v22 = vpop.xlane.xlu0 %8304  ;;  %v15838_v19 = vadd.f32 %v15778_v1, %v8437_v45 }
0x16f0   :  { %10974 = vmatmul.mubr.msk.bf16.gmra.mrb[212].mxu1 %vm133_vm0, %v8491_v2  ;;  %v8343_v6 = vmul.f32 0.03125, %v8305_v22  ;;  %v8440_v18 = vmul.f32 %v15770_v63, %v8410_v61 }
0x16f1   :  { %11796 = vrsqrt.f32 %v8366_v44  ;;  %v8308_v13 = vpop.xlane.xlu1 %8307  ;;  %v8492_v12 = vpack.c.bf16 %v15834_v11, %v15838_v19  ;;  %v8439_v53 = vmul.f32 %v15770_v63, %v8409_v55 }
0x16f2   :  { %v8367_v4 = vadd.f32 1e-05, %v8343_v6  ;;  %v8344_v56 = vmul.f32 0.03125, %v8308_v13  ;;  %v15846_v30 = vadd.f32 %v15778_v1, %v8440_v18 }
0x16f3   :  { %10977 = vmatprep.mubr.msk.bf16.mxu1 %vm133_vm0, %v8492_v12  ;;  %v8311_v26 = vpop.xlane.xlu0 %8310  ;;  %v15850_v10 = vadd.f32 %v15778_v1, %v8439_v53 }
0x16f4   :  { %11798 = vrsqrt.f32 %v8367_v4  ;;  %v8368_v48 = vadd.f32 1e-05, %v8344_v56  ;;  %v8345_v16 = vmul.f32 0.03125, %v8311_v26 }
0x16f5   :  { %v11791_v31 = vpop.eup %11790  ;;  %v8314_v38 = vpop.xlane.xlu1 %8313  ;;  %v8493_v47 = vpack.c.bf16 %v15846_v30, %v15850_v10 }
0x16f6   :  { %v8411_v14 = vmul.f32 %v11791_v31, %v15684_v32  ;;  %11800 = vrsqrt.f32 %v8368_v48  ;;  %v8369_v42 = vadd.f32 1e-05, %v8345_v16  ;;  %v8346_v40 = vmul.f32 0.03125, %v8314_v38 }
0x16f7   :  { %v11793_v17 = vpop.eup %11792 }
0x16f8   :  { %v8412_v28 = vmul.f32 %v11793_v17, %v15687_v3  ;;  %11802 = vrsqrt.f32 %v8369_v42  ;;  %v8370_v35 = vadd.f32 1e-05, %v8346_v40  ;;  %10978 = vmatmul.mubr.msk.bf16.gmra.mrb[216].mxu1 %vm133_vm0, %v8493_v47  ;;  %v8317_v58 = vpop.xlane.xlu0 %8316  ;;  %v8441_v23 = vmul.f32 %v15770_v63, %v8411_v14 }
0x16f9   :  { %v11795_v57 = vpop.eup %11794  ;;  %v8347_v7 = vmul.f32 0.03125, %v8317_v58 }
0x16fa   :  { %v8413_v37 = vmul.f32 %v11795_v57, %v15692_v27  ;;  %11804 = vrsqrt.f32 %v8370_v35  ;;  %v8320_v8 = vpop.xlane.xlu1 %8319  ;;  %v8442_v32 = vmul.f32 %v15770_v63, %v8412_v28  ;;  %v15862_v33 = vadd.f32 %v15778_v1, %v8441_v23 }
0x16fb   :  { %v11797_v34 = vpop.eup %11796  ;;  %v8371_v50 = vadd.f32 1e-05, %v8347_v7  ;;  %v8348_v51 = vmul.f32 0.03125, %v8320_v8 }
0x16fc   :  { %v8414_v3 = vmul.f32 %v11797_v34, %v15698_v20  ;;  %v8323_v15 = vpop.xlane.xlu0 %8322  ;;  %v15865_v0 = vadd.f32 %v15778_v1, %v8442_v32  ;;  %v8443_v45 = vmul.f32 %v15770_v63, %v8413_v37 }
0x16fd   :  { %11806 = vrsqrt.f32 %v8371_v50  ;;  %v8372_v27 = vadd.f32 1e-05, %v8348_v51  ;;  %v8349_v54 = vmul.f32 0.03125, %v8323_v15 }
0x16fe   :  { %v11799_v61 = vpop.eup %11798  ;;  %v8326_v2 = vpop.xlane.xlu1 %8325  ;;  %v8494_v55 = vpack.c.bf16 %v15865_v0, %v15862_v33  ;;  %v8444_v44 = vmul.f32 %v15770_v63, %v8414_v3  ;;  %v15874_v13 = vadd.f32 %v15778_v1, %v8443_v45  ;;  %v11282_v45 = vld [vmem:[%s16416_s12 + $0x30] sm:$0xff]  }
0x16ff   :  { %v8415_v20 = vmul.f32 %v11799_v61, %v15707_v9  ;;  %11808 = vrsqrt.f32 %v8372_v27  ;;  %v8373_v22 = vadd.f32 1e-05, %v8349_v54  ;;  %v8350_v6 = vmul.f32 0.03125, %v8326_v2  ;;  %10997 = vmatprep.subr.bf16.mxu0 %v11282_v45 }
0x1700   :  { %v11801_v18 = vpop.eup %11800  ;;  %10981 = vmatprep.mubr.msk.bf16.mxu1 %vm133_vm0, %v8494_v55  ;;  %v15877_v12 = vadd.f32 %v15778_v1, %v8444_v44  ;;  %10998 = vmatpush3.bf16.msra.mxu0 %v11282_v45 }
0x1701   :  { %v8416_v53 = vmul.f32 %v11801_v18, %v15714_v43  ;;  %11810 = vrsqrt.f32 %v8373_v22  ;;  %v8374_v4 = vadd.f32 1e-05, %v8350_v6  ;;  %v8445_v56 = vmul.f32 %v15770_v63, %v8415_v20 }
0x1702   :  { %v11803_v26 = vpop.eup %11802  ;;  %v8495_v9 = vpack.c.bf16 %v15877_v12, %v15874_v13 }
0x1703   :  { %v8417_v48 = vmul.f32 %v11803_v26, %v15719_v60  ;;  %11812 = vrsqrt.f32 %v8374_v4  ;;  %v8446_v16 = vmul.f32 %v15770_v63, %v8416_v53  ;;  %v15888_v43 = vadd.f32 %v15778_v1, %v8445_v56 }
0x1704   :  { %v11805_v31 = vpop.eup %11804  ;;  %10982 = vmatmul.mubr.msk.bf16.gmra.mrb[220].mxu1 %vm133_vm0, %v8495_v9 }
0x1705   :  { %v8418_v38 = vmul.f32 %v11805_v31, %v15728_v39  ;;  %v15891_v47 = vadd.f32 %v15778_v1, %v8446_v16  ;;  %v8447_v14 = vmul.f32 %v15770_v63, %v8417_v48 }
0x1707   :  { %v11807_v42 = vpop.eup %11806  ;;  %v8496_v60 = vpack.c.bf16 %v15891_v47, %v15888_v43  ;;  %v8448_v40 = vmul.f32 %v15770_v63, %v8418_v38  ;;  %v15900_v39 = vadd.f32 %v15778_v1, %v8447_v14 }
0x1708   :  { %v8419_v17 = vmul.f32 %v11807_v42, %v15737_v24 }
0x1709   :  { %v11809_v28 = vpop.eup %11808  ;;  %10985 = vmatprep.mubr.msk.bf16.mxu1 %vm133_vm0, %v8496_v60  ;;  %v15903_v35 = vadd.f32 %v15778_v1, %v8448_v40 }
0x170a   :  { %v8420_v58 = vmul.f32 %v11809_v28, %v15741_v21  ;;  %v8449_v23 = vmul.f32 %v15770_v63, %v8419_v17 }
0x170b   :  { %v11811_v57 = vpop.eup %11810  ;;  %v8497_v7 = vpack.c.bf16 %v15903_v35, %v15900_v39 }
0x170c   :  { %v8421_v37 = vmul.f32 %v11811_v57, %v15746_v59  ;;  %v8450_v24 = vmul.f32 %v15770_v63, %v8420_v58  ;;  %v15914_v34 = vadd.f32 %v15778_v1, %v8449_v23 }
0x170d   :  { %v11813_v8 = vpop.eup %11812  ;;  %10986 = vmatmul.mubr.msk.bf16.gmra.mrb[224].mxu1 %vm133_vm0, %v8497_v7 }
0x170e   :  { %v8422_v32 = vmul.f32 %v11813_v8, %v15752_v25  ;;  %v15917_v21 = vadd.f32 %v15778_v1, %v8450_v24  ;;  %v8451_v50 = vmul.f32 %v15770_v63, %v8421_v37 }
0x1710   :  { %v8498_v51 = vpack.c.bf16 %v15917_v21, %v15914_v34  ;;  %v8452_v59 = vmul.f32 %v15770_v63, %v8422_v32  ;;  %v15925_v3 = vadd.f32 %v15778_v1, %v8451_v50  ;;  %v11283_v63 = vld [vmem:[%s16416_s12 + $0x38] sm:$0xff]  }
0x1711   :  { %10999 = vmatprep.subr.bf16.mxu0 %v11283_v63 }
0x1712   :  { %10989 = vmatprep.mubr.msk.bf16.mxu1 %vm133_vm0, %v8498_v51  ;;  %v15928_v25 = vadd.f32 %v15778_v1, %v8452_v59  ;;  %11000 = vmatpush3.bf16.msra.mxu0 %v11283_v63  ;;  %v15942_v1 = vld [vmem:[%s16419_s11 + $0x1] ss:$0 sm:$0xff] }
0x1714   :  { %v8499_v15 = vpack.c.bf16 %v15928_v25, %v15925_v3 }
0x1716   :  { %10990 = vmatmul.mubr.msk.bf16.gmra.mrb[228].mxu1 %vm133_vm0, %v8499_v15 }
0x17b9   :  { %v10971_v27 = vpop.f32.mrb[208].mxu1 }
0x17ba   :  { %v8599_v54 = vadd.f32 %v10971_v27, %v15942_v1  ;;  %v8590_v61 = vpop.f32.mrb[209].mxu1 }
0x17bb   :  { %v8591_v2 = vadd.f32 %v15942_v1, %v8590_v61  ;;  %v10972_v55 = vpop.f32.mrb[210].mxu1 }
0x17bc   :  { %v8602_v44 = vadd.f32 %v10972_v55, %v15942_v1  ;;  %v8593_v20 = vpop.f32.mrb[211].mxu1  ;;  %v8687_v6 = vmax.f32 %v8599_v54, 0.0 }
0x17bd   :  { %v8594_v22 = vadd.f32 %v15942_v1, %v8593_v20  ;;  %v8685_v53 = vmax.f32 %v8591_v2, 0.0 }
0x17be   :  { %v8688_v18 = vmax.f32 %v8602_v44, 0.0 }
0x17bf   :  { %v8686_v4 = vmax.f32 %v8594_v22, 0.0 }
0x17c0   :  { %v8719_v56 = vpack.c.bf16 %v8688_v18, %v8687_v6 }
0x17c1   :  { %v8718_v26 = vpack.c.bf16 %v8686_v4, %v8685_v53 }
0x17c3   :  { %v10975_v9 = vpop.f32.mrb[212].mxu1  ;;  %11001 = vmatprep.mubr.msk.bf16.mxu0 %vm4259_vm5, %v8718_v26 }
0x17c4   :  { %v8615_v48 = vadd.f32 %v10975_v9, %v15942_v1  ;;  %v8606_v16 = vpop.f32.mrb[213].mxu1  ;;  %11002 = vmatmul.mubr.msk.bf16.vlgmr.msra.gmra.mrb[216].mxu0 %vm4259_vm5, %v8719_v56 }
0x17c5   :  { %v8607_v31 = vadd.f32 %v15942_v1, %v8606_v16  ;;  %v10976_v38 = vpop.f32.mrb[214].mxu1 }
0x17c6   :  { %v8618_v14 = vadd.f32 %v10976_v38, %v15942_v1  ;;  %v8609_v42 = vpop.f32.mrb[215].mxu1  ;;  %v8691_v40 = vmax.f32 %v8615_v48, 0.0 }
0x17c7   :  { %v8610_v60 = vadd.f32 %v15942_v1, %v8609_v42  ;;  %v8689_v28 = vmax.f32 %v8607_v31, 0.0 }
0x17c8   :  { %v8692_v17 = vmax.f32 %v8618_v14, 0.0 }
0x17c9   :  { %v8690_v58 = vmax.f32 %v8610_v60, 0.0 }
0x17ca   :  { %v8721_v23 = vpack.c.bf16 %v8692_v17, %v8691_v40 }
0x17cb   :  { %v8720_v57 = vpack.c.bf16 %v8690_v58, %v8689_v28  ;;  %v10979_v7 = vpop.f32.mrb[216].mxu1 }
0x17cc   :  { %v8631_v37 = vadd.f32 %v10979_v7, %v15942_v1  ;;  %v8622_v24 = vpop.f32.mrb[217].mxu1 }
0x17cd   :  { %v8623_v8 = vadd.f32 %v15942_v1, %v8622_v24  ;;  %v10980_v32 = vpop.f32.mrb[218].mxu1  ;;  %11005 = vmatprep.mubr.msk.bf16.mxu0 %vm4259_vm5, %v8720_v57 }
0x17ce   :  { %v8634_v50 = vadd.f32 %v10980_v32, %v15942_v1  ;;  %v8625_v51 = vpop.f32.mrb[219].mxu1  ;;  %11006 = vmatmul.mubr.msk.bf16.gmra.mrb[220].mxu0 %vm4259_vm5, %v8721_v23  ;;  %v8695_v15 = vmax.f32 %v8631_v37, 0.0 }
0x17cf   :  { %v8626_v59 = vadd.f32 %v15942_v1, %v8625_v51  ;;  %v8693_v63 = vmax.f32 %v8623_v8, 0.0 }
0x17d0   :  { %v8696_v45 = vmax.f32 %v8634_v50, 0.0 }
0x17d1   :  { %v8694_v27 = vmax.f32 %v8626_v59, 0.0 }
0x17d2   :  { %v8723_v54 = vpack.c.bf16 %v8696_v45, %v8695_v15 }
0x17d3   :  { %v8722_v61 = vpack.c.bf16 %v8694_v27, %v8693_v63 }
0x17d5   :  { %11009 = vmatprep.mubr.msk.bf16.mxu0 %vm4259_vm5, %v8722_v61 }
0x17d6   :  { %11010 = vmatmul.mubr.msk.bf16.gmra.mrb[224].mxu0 %vm4259_vm5, %v8723_v54 }
0x17d7   :  { %v10983_v2 = vpop.f32.mrb[220].mxu1 }
0x17d8   :  { %v8647_v55 = vadd.f32 %v10983_v2, %v15942_v1  ;;  %v8638_v44 = vpop.f32.mrb[221].mxu1 }
0x17d9   :  { %v8639_v20 = vadd.f32 %v15942_v1, %v8638_v44  ;;  %v10984_v22 = vpop.f32.mrb[222].mxu1 }
0x17da   :  { %v8650_v6 = vadd.f32 %v10984_v22, %v15942_v1  ;;  %v8641_v18 = vpop.f32.mrb[223].mxu1  ;;  %v8699_v4 = vmax.f32 %v8647_v55, 0.0 }
0x17db   :  { %v8642_v53 = vadd.f32 %v15942_v1, %v8641_v18  ;;  %v8697_v26 = vmax.f32 %v8639_v20, 0.0  ;;  %v15983_v20 = vld [vmem:[%s16420_s13 + $0x1] ss:$0 sm:$0xff] }
0x17dc   :  { %v8700_v56 = vmax.f32 %v8650_v6, 0.0 }
0x17dd   :  { %v8698_v9 = vmax.f32 %v8642_v53, 0.0 }
0x17de   :  { %v8725_v48 = vpack.c.bf16 %v8700_v56, %v8699_v4 }
0x17df   :  { %v8724_v16 = vpack.c.bf16 %v8698_v9, %v8697_v26 }
0x17e0   :  { %v10987_v31 = vpop.f32.mrb[224].mxu1 }
0x17e1   :  { %v8663_v38 = vadd.f32 %v10987_v31, %v15942_v1  ;;  %11013 = vmatprep.mubr.msk.bf16.mxu0 %vm4259_vm5, %v8724_v16  ;;  %v8654_v14 = vpop.f32.mrb[225].mxu1 }
0x17e2   :  { %v8655_v42 = vadd.f32 %v15942_v1, %v8654_v14  ;;  %11014 = vmatmul.mubr.msk.bf16.gmra.mrb[228].mxu0 %vm4259_vm5, %v8725_v48  ;;  %v10988_v60 = vpop.f32.mrb[226].mxu1 }
0x17e3   :  { %v8666_v40 = vadd.f32 %v10988_v60, %v15942_v1  ;;  %v8657_v17 = vpop.f32.mrb[227].mxu1  ;;  %v8703_v58 = vmax.f32 %v8663_v38, 0.0 }
0x17e4   :  { %v8658_v28 = vadd.f32 %v15942_v1, %v8657_v17  ;;  %v8701_v57 = vmax.f32 %v8655_v42, 0.0 }
0x17e5   :  { %v8704_v23 = vmax.f32 %v8666_v40, 0.0 }
0x17e6   :  { %v8702_v7 = vmax.f32 %v8658_v28, 0.0 }
0x17e7   :  { %v8727_v37 = vpack.c.bf16 %v8704_v23, %v8703_v58 }
0x17e8   :  { %v8726_v24 = vpack.c.bf16 %v8702_v7, %v8701_v57 }
0x17e9   :  { %v10991_v8 = vpop.f32.mrb[228].mxu1 }
0x17ea   :  { %v8679_v32 = vadd.f32 %v10991_v8, %v15942_v1  ;;  %v8670_v50 = vpop.f32.mrb[229].mxu1  ;;  %11017 = vmatprep.mubr.msk.bf16.mxu0 %vm4259_vm5, %v8726_v24 }
0x17eb   :  { %v8671_v51 = vadd.f32 %v15942_v1, %v8670_v50  ;;  %v10992_v59 = vpop.f32.mrb[230].mxu1  ;;  %11018 = vmatmul.mubr.msk.bf16.gmra.mrb[232].mxu0 %vm4259_vm5, %v8727_v37 }
0x17ec   :  { %v8682_v15 = vadd.f32 %v10992_v59, %v15942_v1  ;;  %v8673_v45 = vpop.f32.mrb[231].mxu1  ;;  %v8707_v27 = vmax.f32 %v8679_v32, 0.0 }
0x17ed   :  { %v8674_v63 = vadd.f32 %v15942_v1, %v8673_v45  ;;  %v8705_v61 = vmax.f32 %v8671_v51, 0.0 }
0x17ee   :  { %v8708_v54 = vmax.f32 %v8682_v15, 0.0 }
0x17ef   :  { %v8706_v2 = vmax.f32 %v8674_v63, 0.0 }
0x17f0   :  { %v8729_v55 = vpack.c.bf16 %v8708_v54, %v8707_v27 }
0x17f1   :  { %v8728_v44 = vpack.c.bf16 %v8706_v2, %v8705_v61 }
0x17f3   :  { %11021 = vmatprep.mubr.msk.bf16.mxu0 %vm4259_vm5, %v8728_v44 }
0x17f4   :  { %11022 = vmatmul.mubr.msk.bf16.gmra.mrb[236].mxu0 %vm4259_vm5, %v8729_v55 }
0x1897   :  { %v11003_v22 = vpop.f32.mrb[216].mxu0 }
0x1898   :  { %v8841_v6 = vadd.f32 %v11003_v22, %v15983_v20  ;;  %v8832_v18 = vpop.f32.mrb[217].mxu0 }
0x1899   :  { %v8833_v1 = vadd.f32 %v15983_v20, %v8832_v18  ;;  %v11004_v53 = vpop.f32.mrb[218].mxu0 }
0x189a   :  { %v15988_v4 = vadd.f32 %v8841_v6, %v15796_v62  ;;  %v8844_v56 = vadd.f32 %v11004_v53, %v15983_v20  ;;  %v8835_v26 = vpop.f32.mrb[219].mxu0 }
0x189b   :  { %v8836_v9 = vadd.f32 %v15983_v20, %v8835_v26  ;;  %v15993_v48 = vadd.f32 %v8833_v1, %v15783_v5 }
0x189c   :  { %v15996_v16 = vadd.f32 %v8844_v56, %v15799_v52  ;;  %v8961_v31 = vsel %vm133_vm0, %v15988_v4, 0.0 }
0x189d   :  { %8962 = vadd.xlane.f32.xlu0 %v8961_v31  ;;  %v16001_v38 = vadd.f32 %v8836_v9, %v15786_v41  ;;  %v8955_v14 = vsel %vm133_vm0, %v15993_v48, 0.0 }
0x189e   :  { %v8964_v62 = vsel %vm133_vm0, %v15996_v16, 0.0 }
0x189f   :  { %8965 = vadd.xlane.f32.xlu1 %v8964_v62  ;;  %v8958_v60 = vsel %vm133_vm0, %v16001_v38, 0.0 }
0x18a1   :  { %v11007_v42 = vpop.f32.mrb[220].mxu0  ;;  %8956 = vadd.xlane.f32.xlu0 %v8955_v14 }
0x18a2   :  { %v8857_v5 = vadd.f32 %v11007_v42, %v15983_v20  ;;  %v8848_v52 = vpop.f32.mrb[221].mxu0 }
0x18a3   :  { %v8849_v40 = vadd.f32 %v15983_v20, %v8848_v52  ;;  %v11008_v17 = vpop.f32.mrb[222].mxu0  ;;  %8959 = vadd.xlane.f32.xlu1 %v8958_v60 }
0x18a4   :  { %v16012_v41 = vadd.f32 %v8857_v5, %v15826_v46  ;;  %v8860_v28 = vadd.f32 %v11008_v17, %v15983_v20  ;;  %v8851_v58 = vpop.f32.mrb[223].mxu0 }
0x18a5   :  { %v8852_v23 = vadd.f32 %v15983_v20, %v8851_v58  ;;  %v16017_v57 = vadd.f32 %v8849_v40, %v15813_v49 }
0x18a6   :  { %v16020_v7 = vadd.f32 %v8860_v28, %v15821_v29  ;;  %v8973_v37 = vsel %vm133_vm0, %v16012_v41, 0.0 }
0x18a7   :  { %8974 = vadd.xlane.f32.xlu0 %v8973_v37  ;;  %v16025_v24 = vadd.f32 %v8852_v23, %v15809_v36  ;;  %v8967_v49 = vsel %vm133_vm0, %v16017_v57, 0.0 }
0x18a8   :  { %v8976_v46 = vsel %vm133_vm0, %v16020_v7, 0.0 }
0x18a9   :  { %8977 = vadd.xlane.f32.xlu1 %v8976_v46  ;;  %v11011_v8 = vpop.f32.mrb[224].mxu0  ;;  %v8970_v45 = vsel %vm133_vm0, %v16025_v24, 0.0 }
0x18aa   :  { %v8873_v32 = vadd.f32 %v11011_v8, %v15983_v20  ;;  %v8864_v50 = vpop.f32.mrb[225].mxu0 }
0x18ab   :  { %v8865_v29 = vadd.f32 %v15983_v20, %v8864_v50  ;;  %8968 = vadd.xlane.f32.xlu0 %v8967_v49  ;;  %v11012_v51 = vpop.f32.mrb[226].mxu0 }
0x18ac   :  { %v16034_v59 = vadd.f32 %v8873_v32, %v15850_v10  ;;  %v8876_v36 = vadd.f32 %v11012_v51, %v15983_v20  ;;  %v8867_v15 = vpop.f32.mrb[227].mxu0 }
0x18ad   :  { %v8868_v63 = vadd.f32 %v15983_v20, %v8867_v15  ;;  %8971 = vadd.xlane.f32.xlu1 %v8970_v45  ;;  %v16041_v27 = vadd.f32 %v8865_v29, %v15838_v19 }
0x18ae   :  { %v16044_v54 = vadd.f32 %v8876_v36, %v15846_v30  ;;  %v8985_v61 = vsel %vm133_vm0, %v16034_v59, 0.0 }
0x18af   :  { %8986 = vadd.xlane.f32.xlu0 %v8985_v61  ;;  %v16049_v10 = vadd.f32 %v8868_v63, %v15834_v11  ;;  %v8979_v55 = vsel %vm133_vm0, %v16041_v27, 0.0 }
0x18b0   :  { %v8988_v2 = vsel %vm133_vm0, %v16044_v54, 0.0 }
0x18b1   :  { %8989 = vadd.xlane.f32.xlu1 %v8988_v2  ;;  %v8982_v19 = vsel %vm133_vm0, %v16049_v10, 0.0 }
0x18b3   :  { %8980 = vadd.xlane.f32.xlu0 %v8979_v55 }
0x18b5   :  { %8983 = vadd.xlane.f32.xlu1 %v8982_v19  ;;  %v11015_v30 = vpop.f32.mrb[228].mxu0 }
0x18b6   :  { %v8889_v44 = vadd.f32 %v11015_v30, %v15983_v20  ;;  %v8880_v22 = vpop.f32.mrb[229].mxu0 }
0x18b7   :  { %v8881_v6 = vadd.f32 %v15983_v20, %v8880_v22  ;;  %v11016_v11 = vpop.f32.mrb[230].mxu0 }
0x18b8   :  { %v16060_v18 = vadd.f32 %v8889_v44, %v15874_v13  ;;  %v8892_v1 = vadd.f32 %v11016_v11, %v15983_v20  ;;  %v8883_v53 = vpop.f32.mrb[231].mxu0 }
0x18b9   :  { %v8884_v56 = vadd.f32 %v15983_v20, %v8883_v53  ;;  %v16065_v26 = vadd.f32 %v8881_v6, %v15862_v33 }
0x18ba   :  { %v16068_v9 = vadd.f32 %v8892_v1, %v15877_v12  ;;  %v8997_v31 = vsel %vm133_vm0, %v16060_v18, 0.0 }
0x18bb   :  { %8998 = vadd.xlane.f32.xlu0 %v8997_v31  ;;  %v16073_v62 = vadd.f32 %v8884_v56, %v15865_v0  ;;  %v8991_v14 = vsel %vm133_vm0, %v16065_v26, 0.0 }
0x18bc   :  { %v9000_v13 = vsel %vm133_vm0, %v16068_v9, 0.0 }
0x18bd   :  { %9001 = vadd.xlane.f32.xlu1 %v9000_v13  ;;  %v8994_v52 = vsel %vm133_vm0, %v16073_v62, 0.0 }
0x18be   :  { %v11019_v42 = vpop.f32.mrb[232].mxu0 }
0x18bf   :  { %8992 = vadd.xlane.f32.xlu0 %v8991_v14  ;;  %v8905_v33 = vadd.f32 %v11019_v42, %v15983_v20  ;;  %v8896_v12 = vpop.f32.mrb[233].mxu0 }
0x18c0   :  { %v8897_v5 = vadd.f32 %v15983_v20, %v8896_v12  ;;  %v11020_v60 = vpop.f32.mrb[234].mxu0 }
0x18c1   :  { %v16084_v0 = vadd.f32 %v8905_v33, %v15900_v39  ;;  %8995 = vadd.xlane.f32.xlu1 %v8994_v52  ;;  %v8908_v40 = vadd.f32 %v11020_v60, %v15983_v20  ;;  %v8899_v17 = vpop.f32.mrb[235].mxu0 }
0x18c2   :  { %v8900_v28 = vadd.f32 %v15983_v20, %v8899_v17  ;;  %v16089_v58 = vadd.f32 %v8897_v5, %v15888_v43 }
0x18c3   :  { %v16092_v23 = vadd.f32 %v8908_v40, %v15903_v35  ;;  %v9009_v37 = vsel %vm133_vm0, %v16084_v0, 0.0 }
0x18c4   :  { %9010 = vadd.xlane.f32.xlu0 %v9009_v37  ;;  %v16097_v46 = vadd.f32 %v8900_v28, %v15891_v47  ;;  %v9003_v32 = vsel %vm133_vm0, %v16089_v58, 0.0 }
0x18c5   :  { %v9012_v39 = vsel %vm133_vm0, %v16092_v23, 0.0 }
0x18c6   :  { %9013 = vadd.xlane.f32.xlu1 %v9012_v39  ;;  %v9006_v29 = vsel %vm133_vm0, %v16097_v46, 0.0 }
0x18c7   :  { %v11023_v8 = vpop.f32.mrb[236].mxu0 }
0x18c8   :  { %v8912_v43 = vpop.f32.mrb[237].mxu0  ;;  %9004 = vadd.xlane.f32.xlu0 %v9003_v32  ;;  %v8921_v35 = vadd.f32 %v11023_v8, %v15983_v20 }
0x18c9   :  { %v8913_v50 = vadd.f32 %v15983_v20, %v8912_v43  ;;  %v11024_v49 = vpop.f32.mrb[238].mxu0 }
0x18ca   :  { %v8915_v47 = vpop.f32.mrb[239].mxu0  ;;  %9007 = vadd.xlane.f32.xlu1 %v9006_v29  ;;  %v8924_v36 = vadd.f32 %v11024_v49, %v15983_v20  ;;  %v16113_v45 = vadd.f32 %v8921_v35, %v15925_v3 }
0x18cb   :  { %v16108_v51 = vadd.f32 %v8913_v50, %v15914_v34  ;;  %v8916_v15 = vadd.f32 %v15983_v20, %v8915_v47 }
0x18cc   :  { %v16121_v2 = vadd.f32 %v8924_v36, %v15928_v25  ;;  %v9021_v20 = vsel %vm133_vm0, %v16113_v45, 0.0 }
0x18cd   :  { %v16116_v63 = vadd.f32 %v8916_v15, %v15917_v21  ;;  %v9015_v61 = vsel %vm133_vm0, %v16108_v51, 0.0 }
0x18ce   :  { %9016 = vadd.xlane.f32.xlu0 %v9015_v61  ;;  %v9024_v3 = vsel %vm133_vm0, %v16121_v2, 0.0 }
0x18cf   :  { %v9018_v34 = vsel %vm133_vm0, %v16116_v63, 0.0 }
0x18d0   :  { %9019 = vadd.xlane.f32.xlu1 %v9018_v34 }
0x18d2   :  { %9022 = vadd.xlane.f32.xlu0 %v9021_v20 }
0x18d4   :  { %9025 = vadd.xlane.f32.xlu1 %v9024_v3 }
0x192a   :  { %v8963_v21 = vpop.xlane.xlu0 %8962 }
0x192b   :  { %v9029_v55 = vmul.f32 0.03125, %v8963_v21 }
0x192c   :  { %v8966_v19 = vpop.xlane.xlu1 %8965 }
0x192d   :  { %v16130_v30 = vsub.f32 %v15988_v4, %v9029_v55  ;;  %v9030_v25 = vmul.f32 0.03125, %v8966_v19 }
0x192e   :  { %v8957_v44 = vpop.xlane.xlu0 %8956 }
0x192f   :  { %v16133_v22 = vsub.f32 %v15996_v16, %v9030_v25  ;;  %v9027_v6 = vmul.f32 0.03125, %v8957_v44  ;;  %v9077_v11 = vmul.f32 %v16130_v30, %v16130_v30 }
0x1930   :  { %v8960_v1 = vpop.xlane.xlu1 %8959 }
0x1931   :  { %v16138_v53 = vsub.f32 %v15993_v48, %v9027_v6  ;;  %v9028_v56 = vmul.f32 0.03125, %v8960_v1  ;;  %v9105_v31 = vsel %vm133_vm0, %v9077_v11, 0.0  ;;  %v9078_v4 = vmul.f32 %v16133_v22, %v16133_v22 }
0x1932   :  { %9106 = vadd.xlane.f32.xlu0 %v9105_v31 }
0x1933   :  { %v16144_v13 = vsub.f32 %v16001_v38, %v9028_v56  ;;  %v9108_v16 = vsel %vm133_vm0, %v9078_v4, 0.0  ;;  %v9075_v14 = vmul.f32 %v16138_v53, %v16138_v53 }
0x1934   :  { %v8975_v42 = vpop.xlane.xlu0 %8974  ;;  %9109 = vadd.xlane.f32.xlu1 %v9108_v16 }
0x1935   :  { %v9033_v33 = vmul.f32 0.03125, %v8975_v42  ;;  %v9099_v48 = vsel %vm133_vm0, %v9075_v14, 0.0  ;;  %v9076_v12 = vmul.f32 %v16144_v13, %v16144_v13 }
0x1936   :  { %v8978_v5 = vpop.xlane.xlu1 %8977  ;;  %9100 = vadd.xlane.f32.xlu0 %v9099_v48 }
0x1937   :  { %v16153_v52 = vsub.f32 %v16012_v41, %v9033_v33  ;;  %v9034_v38 = vmul.f32 0.03125, %v8978_v5  ;;  %v9102_v60 = vsel %vm133_vm0, %v9076_v12, 0.0 }
0x1938   :  { %v8969_v40 = vpop.xlane.xlu0 %8968  ;;  %9103 = vadd.xlane.f32.xlu1 %v9102_v60 }
0x1939   :  { %v16157_v17 = vsub.f32 %v16020_v7, %v9034_v38  ;;  %v9031_v28 = vmul.f32 0.03125, %v8969_v40  ;;  %v9081_v37 = vmul.f32 %v16153_v52, %v16153_v52 }
0x193a   :  { %v8972_v39 = vpop.xlane.xlu1 %8971 }
0x193b   :  { %v16162_v8 = vsub.f32 %v16017_v57, %v9031_v28  ;;  %v9032_v32 = vmul.f32 0.03125, %v8972_v39  ;;  %v9117_v41 = vsel %vm133_vm0, %v9081_v37, 0.0  ;;  %v9082_v43 = vmul.f32 %v16157_v17, %v16157_v17 }
0x193c   :  { %9118 = vadd.xlane.f32.xlu0 %v9117_v41  ;;  %v8987_v35 = vpop.xlane.xlu0 %8986 }
0x193d   :  { %v16168_v50 = vsub.f32 %v16025_v24, %v9032_v32  ;;  %v9037_v7 = vmul.f32 0.03125, %v8987_v35  ;;  %v9120_v49 = vsel %vm133_vm0, %v9082_v43, 0.0  ;;  %v9079_v29 = vmul.f32 %v16162_v8, %v16162_v8 }
0x193e   :  { %v8990_v47 = vpop.xlane.xlu1 %8989  ;;  %9121 = vadd.xlane.f32.xlu1 %v9120_v49 }
0x193f   :  { %v16174_v57 = vsub.f32 %v16034_v59, %v9037_v7  ;;  %v9038_v36 = vmul.f32 0.03125, %v8990_v47  ;;  %v9111_v15 = vsel %vm133_vm0, %v9079_v29, 0.0  ;;  %v9080_v61 = vmul.f32 %v16168_v50, %v16168_v50 }
0x1940   :  { %9112 = vadd.xlane.f32.xlu0 %v9111_v15  ;;  %v8981_v24 = vpop.xlane.xlu0 %8980  ;;  %v11869_v15 = vmov 0.0  }
0x1941   :  { %v16180_v34 = vsub.f32 %v16044_v54, %v9038_v36  ;;  %v9035_v20 = vmul.f32 0.03125, %v8981_v24  ;;  %v9114_v3 = vsel %vm133_vm0, %v9080_v61, 0.0  ;;  %v9085_v21 = vmul.f32 %v16174_v57, %v16174_v57  ;;  %11025 = vmatprep.subr.bf16.mxu1 %v11869_v15  ;;  %11029 = vmatprep.mubr.msk.bf16.mxu1 %vm11870_vm6, %v11869_v15 }
0x1942   :  { %v8984_v55 = vpop.xlane.xlu1 %8983  ;;  %9115 = vadd.xlane.f32.xlu1 %v9114_v3 }
0x1943   :  { %v16186_v59 = vsub.f32 %v16041_v27, %v9035_v20  ;;  %v9036_v19 = vmul.f32 0.03125, %v8984_v55  ;;  %v9129_v25 = vsel %vm133_vm0, %v9085_v21, 0.0  ;;  %v9086_v44 = vmul.f32 %v16180_v34, %v16180_v34 }
0x1944   :  { %9130 = vadd.xlane.f32.xlu0 %v9129_v25 }
0x1945   :  { %v16192_v54 = vsub.f32 %v16049_v10, %v9036_v19  ;;  %v9132_v6 = vsel %vm133_vm0, %v9086_v44, 0.0  ;;  %v9083_v11 = vmul.f32 %v16186_v59, %v16186_v59 }
0x1946   :  { %9133 = vadd.xlane.f32.xlu1 %v9132_v6 }
0x1947   :  { %v9123_v1 = vsel %vm133_vm0, %v9083_v11, 0.0  ;;  %v9084_v27 = vmul.f32 %v16192_v54, %v16192_v54 }
0x1948   :  { %9124 = vadd.xlane.f32.xlu0 %v9123_v1  ;;  %v8999_v56 = vpop.xlane.xlu0 %8998 }
0x1949   :  { %v9041_v31 = vmul.f32 0.03125, %v8999_v56  ;;  %v9126_v4 = vsel %vm133_vm0, %v9084_v27, 0.0 }
0x194a   :  { %9127 = vadd.xlane.f32.xlu1 %v9126_v4  ;;  %v9002_v16 = vpop.xlane.xlu1 %9001 }
0x194b   :  { %v16202_v10 = vsub.f32 %v16060_v18, %v9041_v31  ;;  %v9042_v14 = vmul.f32 0.03125, %v9002_v16 }
0x194c   :  { %v8993_v42 = vpop.xlane.xlu0 %8992 }
0x194d   :  { %v16205_v33 = vsub.f32 %v16068_v9, %v9042_v14  ;;  %v9039_v48 = vmul.f32 0.03125, %v8993_v42  ;;  %v9089_v12 = vmul.f32 %v16202_v10, %v16202_v10 }
0x194e   :  { %v8996_v5 = vpop.xlane.xlu1 %8995 }
0x194f   :  { %v16210_v38 = vsub.f32 %v16065_v26, %v9039_v48  ;;  %v9040_v60 = vmul.f32 0.03125, %v8996_v5  ;;  %v9141_v40 = vsel %vm133_vm0, %v9089_v12, 0.0  ;;  %v9090_v18 = vmul.f32 %v16205_v33, %v16205_v33 }
0x1950   :  { %9142 = vadd.xlane.f32.xlu0 %v9141_v40 }
0x1951   :  { %v16216_v28 = vsub.f32 %v16073_v62, %v9040_v60  ;;  %v9144_v9 = vsel %vm133_vm0, %v9090_v18, 0.0  ;;  %v9011_v37 = vpop.xlane.xlu0 %9010  ;;  %v9087_v39 = vmul.f32 %v16210_v38, %v16210_v38  ;;  %v11285_v18 = vld [vmem:[%s16423_s16 + $0x8] sm:$0xff]  }
0x1952   :  { %9145 = vadd.xlane.f32.xlu1 %v9144_v9  ;;  %v9045_v32 = vmul.f32 0.03125, %v9011_v37 }
0x1953   :  { %v9014_v26 = vpop.xlane.xlu1 %9013  ;;  %v9135_v41 = vsel %vm133_vm0, %v9087_v39, 0.0  ;;  %v9088_v43 = vmul.f32 %v16216_v28, %v16216_v28 }
0x1954   :  { %v16225_v35 = vsub.f32 %v16084_v0, %v9045_v32  ;;  %v9046_v7 = vmul.f32 0.03125, %v9014_v26  ;;  %9136 = vadd.xlane.f32.xlu0 %v9135_v41 }
0x1955   :  { %v9138_v62 = vsel %vm133_vm0, %v9088_v43, 0.0  ;;  %v9005_v49 = vpop.xlane.xlu0 %9004 }
0x1956   :  { %v16229_v29 = vsub.f32 %v16092_v23, %v9046_v7  ;;  %9139 = vadd.xlane.f32.xlu1 %v9138_v62  ;;  %v9043_v47 = vmul.f32 0.03125, %v9005_v49  ;;  %v9093_v36 = vmul.f32 %v16225_v35, %v16225_v35 }
0x1957   :  { %v9008_v61 = vpop.xlane.xlu1 %9007 }
0x1958   :  { %v16235_v0 = vsub.f32 %v16089_v58, %v9043_v47  ;;  %v9044_v24 = vmul.f32 0.03125, %v9008_v61  ;;  %v9153_v20 = vsel %vm133_vm0, %v9093_v36, 0.0  ;;  %v9094_v3 = vmul.f32 %v16229_v29, %v16229_v29 }
0x1959   :  { %9154 = vadd.xlane.f32.xlu0 %v9153_v20 }
0x195a   :  { %v16241_v23 = vsub.f32 %v16097_v46, %v9044_v24  ;;  %v9156_v21 = vsel %vm133_vm0, %v9094_v3, 0.0  ;;  %v9091_v55 = vmul.f32 %v16235_v0, %v16235_v0 }
0x195b   :  { %v9017_v19 = vpop.xlane.xlu0 %9016  ;;  %9157 = vadd.xlane.f32.xlu1 %v9156_v21 }
0x195c   :  { %v9047_v25 = vmul.f32 0.03125, %v9017_v19  ;;  %v9147_v58 = vsel %vm133_vm0, %v9091_v55, 0.0  ;;  %v9092_v44 = vmul.f32 %v16241_v23, %v16241_v23 }
0x195d   :  { %v9020_v6 = vpop.xlane.xlu1 %9019  ;;  %9148 = vadd.xlane.f32.xlu0 %v9147_v58 }
0x195e   :  { %v16250_v11 = vsub.f32 %v16108_v51, %v9047_v25  ;;  %v9048_v46 = vmul.f32 0.03125, %v9020_v6  ;;  %v9150_v1 = vsel %vm133_vm0, %v9092_v44, 0.0 }
0x195f   :  { %v9023_v27 = vpop.xlane.xlu0 %9022  ;;  %9151 = vadd.xlane.f32.xlu1 %v9150_v1 }
0x1960   :  { %v16254_v56 = vsub.f32 %v16116_v63, %v9048_v46  ;;  %v9049_v31 = vmul.f32 0.03125, %v9023_v27  ;;  %v9095_v4 = vmul.f32 %v16250_v11, %v16250_v11  ;;  %v16622_v27 = vlaneseq }
0x1961   :  { %v9026_v16 = vpop.xlane.xlu1 %9025 }
0x1962   :  { %v16259_v14 = vsub.f32 %v16113_v45, %v9049_v31  ;;  %v9050_v42 = vmul.f32 0.03125, %v9026_v16  ;;  %v9159_v51 = vsel %vm133_vm0, %v9095_v4, 0.0  ;;  %v9096_v48 = vmul.f32 %v16254_v56, %v16254_v56 }
0x1963   :  { %9160 = vadd.xlane.f32.xlu0 %v9159_v51  ;;  %v65_v31 = vshrl.u32 %v16622_v27, 7 }
0x1964   :  { %v16265_v12 = vsub.f32 %v16121_v2, %v9050_v42  ;;  %v9162_v63 = vsel %vm133_vm0, %v9096_v48, 0.0  ;;  %v9097_v5 = vmul.f32 %v16259_v14, %v16259_v14  ;;  %v11284_v2 = vld [vmem:[%s16423_s16] sm:$0xff]  }
0x1965   :  { %9163 = vadd.xlane.f32.xlu1 %v9162_v63  ;;  %11026 = vmatpush3.bf16.msra.mxu1 %v11284_v2 }
0x1966   :  { %v9165_v60 = vsel %vm133_vm0, %v9097_v5, 0.0  ;;  %v9098_v45 = vmul.f32 %v16265_v12, %v16265_v12  ;;  %11027 = vmatprep.subr.bf16.mxu1 %v11869_v15 }
0x1967   :  { %9166 = vadd.xlane.f32.xlu0 %v9165_v60 }
0x1968   :  { %v9168_v40 = vsel %vm133_vm0, %v9098_v45, 0.0 }
0x1969   :  { %9169 = vadd.xlane.f32.xlu1 %v9168_v40  ;;  %11028 = vmatpush3.bf16.msra.mxu1 %v11285_v18  ;;  %v16287_v40 = vld [vmem:[%s16421_s14 + $0x1] ss:$0 sm:$0xff] }
0x19bf   :  { %v9107_v9 = vpop.xlane.xlu0 %9106 }
0x19c0   :  { %v9173_v37 = vmul.f32 0.03125, %v9107_v9  ;;  %v67_v9 = vadd.s32 16, %v65_v31 }
0x19c1   :  { %v9110_v39 = vpop.xlane.xlu1 %9109 }
0x19c2   :  { %v9174_v32 = vmul.f32 0.03125, %v9110_v39  ;;  %v9197_v26 = vadd.f32 1e-05, %v9173_v37  ;;  %vm70_vm7 = vcmp.lt.s32.totalorder %v67_v9, 20 }
0x19c3   :  { %v9101_v41 = vpop.xlane.xlu0 %9100 }
0x19c4   :  { %v9198_v43 = vadd.f32 1e-05, %v9174_v32  ;;  %v9171_v7 = vmul.f32 0.03125, %v9101_v41  ;;  %11814 = vrsqrt.f32 %v9197_v26 }
0x19c5   :  { %v9104_v62 = vpop.xlane.xlu1 %9103 }
0x19c6   :  { %v9195_v49 = vadd.f32 1e-05, %v9171_v7  ;;  %v9172_v47 = vmul.f32 0.03125, %v9104_v62  ;;  %11816 = vrsqrt.f32 %v9198_v43  ;;  %v16296_v62 = vld [vmem:[%s16422_s15 + $0x1] ss:$0 sm:$0xff] }
0x19c8   :  { %v9196_v36 = vadd.f32 1e-05, %v9172_v47  ;;  %11818 = vrsqrt.f32 %v9195_v49 }
0x19c9   :  { %v9119_v61 = vpop.xlane.xlu0 %9118 }
0x19ca   :  { %11820 = vrsqrt.f32 %v9196_v36  ;;  %v9177_v24 = vmul.f32 0.03125, %v9119_v61 }
0x19cb   :  { %v9122_v20 = vpop.xlane.xlu1 %9121 }
0x19cc   :  { %v9201_v3 = vadd.f32 1e-05, %v9177_v24  ;;  %v9178_v21 = vmul.f32 0.03125, %v9122_v20 }
0x19cd   :  { %v9113_v55 = vpop.xlane.xlu0 %9112 }
0x19ce   :  { %v9202_v19 = vadd.f32 1e-05, %v9178_v21  ;;  %v9175_v25 = vmul.f32 0.03125, %v9113_v55  ;;  %11822 = vrsqrt.f32 %v9201_v3  ;;  %v11815_v46 = vpop.eup %11814  ;;  %v16305_v55 = vsel %vm70_vm7, 1.0, %v11869_v15 }
0x19cf   :  { %v9116_v58 = vpop.xlane.xlu1 %9115  ;;  %v9245_v5 = vmul.f32 %v11815_v46, %v16130_v30 }
0x19d0   :  { %v9199_v44 = vadd.f32 1e-05, %v9175_v25  ;;  %v9176_v6 = vmul.f32 0.03125, %v9116_v58  ;;  %11824 = vrsqrt.f32 %v9202_v19  ;;  %v11817_v4 = vpop.eup %11816 }
0x19d1   :  { %v9131_v1 = vpop.xlane.xlu0 %9130  ;;  %v9246_v37 = vmul.f32 %v11817_v4, %v16133_v22  ;;  %v9275_v41 = vmul.f32 %v16287_v40, %v9245_v5 }
0x19d2   :  { %11826 = vrsqrt.f32 %v9199_v44  ;;  %v9200_v16 = vadd.f32 1e-05, %v9176_v6  ;;  %v9181_v42 = vmul.f32 0.03125, %v9131_v1  ;;  %v11819_v51 = vpop.eup %11818 }
0x19d3   :  { %v9134_v48 = vpop.xlane.xlu1 %9133  ;;  %v9243_v26 = vmul.f32 %v11819_v51, %v16138_v53  ;;  %v9276_v22 = vmul.f32 %v16287_v40, %v9246_v37  ;;  %v9305_v24 = vadd.f32 %v16296_v62, %v9275_v41 }
0x19d4   :  { %v11821_v63 = vpop.eup %11820  ;;  %11828 = vrsqrt.f32 %v9200_v16  ;;  %v9205_v60 = vadd.f32 1e-05, %v9181_v42  ;;  %v9182_v45 = vmul.f32 0.03125, %v9134_v48 }
0x19d5   :  { %v9244_v2 = vmul.f32 %v11821_v63, %v16144_v13  ;;  %v9125_v18 = vpop.xlane.xlu0 %9124  ;;  %v9273_v36 = vmul.f32 %v16287_v40, %v9243_v26  ;;  %v9306_v25 = vadd.f32 %v16296_v62, %v9276_v22  ;;  %v9329_v15 = vmul.f32 %v9305_v24, %v16305_v55 }
0x19d6   :  { %11830 = vrsqrt.f32 %v9205_v60  ;;  %v9206_v39 = vadd.f32 1e-05, %v9182_v45  ;;  %v9179_v32 = vmul.f32 0.03125, %v9125_v18 }
0x19d7   :  { %v9128_v30 = vpop.xlane.xlu1 %9127  ;;  %v9274_v13 = vmul.f32 %v16287_v40, %v9244_v2  ;;  %v9303_v6 = vadd.f32 %v16296_v62, %v9273_v36  ;;  %v9362_v63 = vsel %vm133_vm0, %v9306_v25, 0.0 }
0x19d8   :  { %v9203_v43 = vadd.f32 1e-05, %v9179_v32  ;;  %v9180_v7 = vmul.f32 0.03125, %v9128_v30  ;;  %11832 = vrsqrt.f32 %v9206_v39  ;;  %v11823_v49 = vpop.eup %11822  ;;  %v9354_v30 = vsel %vm133_vm0, %v9329_v15, 0.0 }
0x19d9   :  { %v9304_v20 = vadd.f32 %v16296_v62, %v9274_v13  ;;  %v9249_v46 = vmul.f32 %v11823_v49, %v16153_v52  ;;  %v9351_v60 = vsel %vm133_vm0, %v9303_v6, 0.0 }
0x19da   :  { %11834 = vrsqrt.f32 %v9203_v43  ;;  %v9204_v47 = vadd.f32 1e-05, %v9180_v7  ;;  %v11825_v53 = vpop.eup %11824 }
0x19db   :  { %v9250_v58 = vmul.f32 %v11825_v53, %v16157_v17  ;;  %v9352_v16 = vsel %vm133_vm0, %v9304_v20, 0.0  ;;  %v9279_v45 = vmul.f32 %v16287_v40, %v9249_v46 }
0x19dc   :  { %v11827_v61 = vpop.eup %11826  ;;  %11836 = vrsqrt.f32 %v9204_v47  ;;  %v9353_v39 = vadd.f32 %v9352_v16, %v9351_v60 }
0x19dd   :  { %v9247_v3 = vmul.f32 %v11827_v61, %v16162_v8  ;;  %v9143_v21 = vpop.xlane.xlu0 %9142  ;;  %v9280_v52 = vmul.f32 %v16287_v40, %v9250_v58  ;;  %v9309_v36 = vadd.f32 %v16296_v62, %v9279_v45 }
0x19de   :  { %v11829_v19 = vpop.eup %11828  ;;  %v9185_v44 = vmul.f32 0.03125, %v9143_v21 }
0x19df   :  { %v9277_v1 = vmul.f32 %v16287_v40, %v9247_v3  ;;  %v9248_v27 = vmul.f32 %v11829_v19, %v16168_v50  ;;  %v9146_v31 = vpop.xlane.xlu1 %9145  ;;  %v9310_v22 = vadd.f32 %v16296_v62, %v9280_v52  ;;  %v9373_v16 = vsel %vm133_vm0, %v9309_v36, 0.0 }
0x19e0   :  { %v11831_v8 = vpop.eup %11830  ;;  %v9209_v4 = vadd.f32 1e-05, %v9185_v44  ;;  %v9186_v51 = vmul.f32 0.03125, %v9146_v31 }
0x19e1   :  { %v9307_v42 = vadd.f32 %v16296_v62, %v9277_v1  ;;  %v9278_v17 = vmul.f32 %v16287_v40, %v9248_v27  ;;  %v9137_v48 = vpop.xlane.xlu0 %9136  ;;  %v9253_v18 = vmul.f32 %v11831_v8, %v16174_v57  ;;  %v9374_v44 = vsel %vm133_vm0, %v9310_v22, 0.0 }
0x19e2   :  { %11838 = vrsqrt.f32 %v9209_v4  ;;  %v9183_v5 = vmul.f32 0.03125, %v9137_v48  ;;  %v11833_v50 = vpop.eup %11832  ;;  %v9210_v7 = vadd.f32 1e-05, %v9186_v51  ;;  %v9375_v52 = vadd.f32 %v9374_v44, %v9373_v16 }
0x19e3   :  { %v9308_v2 = vadd.f32 %v16296_v62, %v9278_v17  ;;  %v9140_v9 = vpop.xlane.xlu1 %9139  ;;  %v9363_v41 = vsel %vm133_vm0, %v9307_v42, 0.0  ;;  %v9254_v47 = vmul.f32 %v11833_v50, %v16180_v34  ;;  %v9283_v61 = vmul.f32 %v16287_v40, %v9253_v18 }
0x19e4   :  { %v11835_v37 = vpop.eup %11834  ;;  %v9207_v32 = vadd.f32 1e-05, %v9183_v5  ;;  %v9184_v26 = vmul.f32 0.03125, %v9140_v9  ;;  %v9355_v17 = vadd.f32 %v9354_v30, %v9353_v39 }
0x19e5   :  { %v9251_v43 = vmul.f32 %v11835_v37, %v16186_v59  ;;  %v9332_v13 = vmul.f32 %v9308_v2, %v16305_v55  ;;  %v9364_v59 = vadd.f32 %v9363_v41, %v9362_v63  ;;  %v9284_v6 = vmul.f32 %v16287_v40, %v9254_v47 }
0x19e6   :  { %v11837_v49 = vpop.eup %11836  ;;  %11840 = vrsqrt.f32 %v9207_v32  ;;  %v9208_v57 = vadd.f32 1e-05, %v9184_v26  ;;  %v9155_v53 = vpop.xlane.xlu0 %9154  ;;  %v9313_v51 = vadd.f32 %v16296_v62, %v9283_v61  ;;  %v9356_v32 = vrot.slane %v9355_v17, 4 }
0x19e7   :  { %v9281_v24 = vmul.f32 %v16287_v40, %v9251_v43  ;;  %v9252_v20 = vmul.f32 %v11837_v49, %v16192_v54  ;;  %v9189_v3 = vmul.f32 0.03125, %v9155_v53  ;;  %v9365_v19 = vsel %vm133_vm0, %v9332_v13, 0.0 }
0x19e8   :  { %11842 = vrsqrt.f32 %v9208_v57  ;;  %v9158_v21 = vpop.xlane.xlu1 %9157  ;;  %v9366_v27 = vadd.f32 %v9365_v19, %v9364_v59  ;;  %v9314_v5 = vadd.f32 %v16296_v62, %v9284_v6 }
0x19e9   :  { %v9311_v25 = vadd.f32 %v16296_v62, %v9281_v24  ;;  %v9282_v34 = vmul.f32 %v16287_v40, %v9252_v20  ;;  %11844 = vrsqrt.f32 %v9210_v7  ;;  %v9190_v58 = vmul.f32 0.03125, %v9158_v21 }
0x19ea   :  { %v9213_v46 = vadd.f32 1e-05, %v9189_v3  ;;  %v9149_v1 = vpop.xlane.xlu0 %9148  ;;  %v9367_v45 = vrot.slane %v9366_v27, 4  ;;  %v9338_v49 = vmul.f32 %v9314_v5, %v16305_v55 }
0x19eb   :  { %v9312_v54 = vadd.f32 %v16296_v62, %v9282_v34  ;;  %v9214_v31 = vadd.f32 1e-05, %v9190_v58  ;;  %v9187_v8 = vmul.f32 0.03125, %v9149_v1  ;;  %v9335_v4 = vmul.f32 %v9311_v25, %v16305_v55 }
0x19ec   :  { %v11839_v15 = vpop.eup %11838  ;;  %11846 = vrsqrt.f32 %v9213_v46  ;;  %v9152_v42 = vpop.xlane.xlu1 %9151  ;;  %v9368_v36 = vadd.f32 %v9367_v45, %v9366_v27 }
0x19ed   :  { %v9257_v48 = vmul.f32 %v11839_v15, %v16202_v10  ;;  %11848 = vrsqrt.f32 %v9214_v31  ;;  %v9211_v63 = vadd.f32 1e-05, %v9187_v8  ;;  %v9188_v50 = vmul.f32 0.03125, %v9152_v42 }
0x19ee   :  { %v9384_v60 = vsel %vm133_vm0, %v9312_v54, 0.0  ;;  %v9376_v2 = vsel %vm133_vm0, %v9335_v4, 0.0  ;;  %v9385_v10 = vsel %vm133_vm0, %v9313_v51, 0.0  ;;  %v9369_v27 = vrot.slane %v9368_v36, 2 }
0x19ef   :  { %11850 = vrsqrt.f32 %v9211_v63  ;;  %v9287_v9 = vmul.f32 %v16287_v40, %v9257_v48  ;;  %v9212_v37 = vadd.f32 1e-05, %v9188_v50  ;;  %v9377_v41 = vadd.f32 %v9376_v2, %v9375_v52 }
0x19f0   :  { %v11841_v18 = vpop.eup %11840  ;;  %v9161_v39 = vpop.xlane.xlu0 %9160  ;;  %v9386_v7 = vadd.f32 %v9385_v10, %v9384_v60 }
0x19f1   :  { %v9255_v26 = vmul.f32 %v11841_v18, %v16210_v38  ;;  %v9191_v30 = vmul.f32 0.03125, %v9161_v39  ;;  %11852 = vrsqrt.f32 %v9212_v37  ;;  %v9317_v61 = vadd.f32 %v16296_v62, %v9287_v9 }
0x19f2   :  { %v11843_v43 = vpop.eup %11842  ;;  %v9164_v13 = vpop.xlane.xlu1 %9163  ;;  %v9357_v38 = vadd.f32 %v9356_v32, %v9355_v17  ;;  %v9378_v21 = vrot.slane %v9377_v41, 4  ;;  %v9370_v37 = vadd.f32 %v9369_v27, %v9368_v36 }
0x19f3   :  { %v11845_v22 = vpop.eup %11844  ;;  %v9285_v47 = vmul.f32 %v16287_v40, %v9255_v26  ;;  %v9256_v57 = vmul.f32 %v11843_v43, %v16216_v28  ;;  %v9215_v53 = vadd.f32 1e-05, %v9191_v30  ;;  %v9192_v24 = vmul.f32 0.03125, %v9164_v13 }
0x19f4   :  { %v9167_v20 = vpop.xlane.xlu0 %9166  ;;  %v9258_v25 = vmul.f32 %v11845_v22, %v16205_v33  ;;  %v9387_v28 = vsel %vm133_vm0, %v9338_v49, 0.0  ;;  %v9341_v4 = vmul.f32 %v9317_v61, %v16305_v55  ;;  %v9379_v17 = vadd.f32 %v9378_v21, %v9377_v41 }
0x19f5   :  { %v9315_v59 = vadd.f32 %v16296_v62, %v9285_v47  ;;  %v9286_v3 = vmul.f32 %v16287_v40, %v9256_v57  ;;  %11854 = vrsqrt.f32 %v9215_v53  ;;  %v9216_v34 = vadd.f32 1e-05, %v9192_v24 }
0x19f6   :  { %v11847_v19 = vpop.eup %11846  ;;  %v9193_v58 = vmul.f32 0.03125, %v9167_v20  ;;  %v9170_v44 = vpop.xlane.xlu1 %9169  ;;  %v9388_v54 = vadd.f32 %v9387_v28, %v9386_v7  ;;  %v9288_v52 = vmul.f32 %v16287_v40, %v9258_v25  ;;  %v9358_v2 = vrot.slane %v9357_v38, 2 }
0x19f7   :  { %v11849_v6 = vpop.eup %11848  ;;  %v9316_v46 = vadd.f32 %v16296_v62, %v9286_v3  ;;  %v9194_v1 = vmul.f32 0.03125, %v9170_v44  ;;  %11856 = vrsqrt.f32 %v9216_v34  ;;  %v9395_v33 = vsel %vm133_vm0, %v9315_v59, 0.0 }
0x19f8   :  { %v9262_v31 = vmul.f32 %v11849_v6, %v16229_v29  ;;  %v9217_v8 = vadd.f32 1e-05, %v9193_v58  ;;  %v9261_v48 = vmul.f32 %v11847_v19, %v16225_v35  ;;  %v9389_v29 = vrot.slane %v9388_v54, 4 }
0x19f9   :  { %v11851_v15 = vpop.eup %11850  ;;  %v9396_v16 = vsel %vm133_vm0, %v9316_v46, 0.0  ;;  %v9218_v42 = vadd.f32 1e-05, %v9194_v1  ;;  %v9380_v18 = vrot.slane %v9379_v17, 2  ;;  %v9398_v9 = vsel %vm133_vm0, %v9341_v4, 0.0 }
0x19fa   :  { %v9397_v51 = vadd.f32 %v9396_v16, %v9395_v33  ;;  %v9259_v63 = vmul.f32 %v11851_v15, %v16235_v0  ;;  %11858 = vrsqrt.f32 %v9217_v8  ;;  %v9292_v50 = vmul.f32 %v16287_v40, %v9262_v31 }
0x19fb   :  { %11860 = vrsqrt.f32 %v9218_v42  ;;  %v11853_v5 = vpop.eup %11852  ;;  %v9291_v35 = vmul.f32 %v16287_v40, %v9261_v48  ;;  %v9318_v10 = vadd.f32 %v16296_v62, %v9288_v52  ;;  %v9390_v30 = vadd.f32 %v9389_v29, %v9388_v54 }
0x19fc   :  { %v9289_v60 = vmul.f32 %v16287_v40, %v9259_v63  ;;  %v9260_v45 = vmul.f32 %v11853_v5, %v16241_v23  ;;  %v9399_v39 = vadd.f32 %v9398_v9, %v9397_v51  ;;  %v9322_v41 = vadd.f32 %v16296_v62, %v9292_v50 }
0x19fd   :  { %v9359_v49 = vadd.f32 %v9358_v2, %v9357_v38  ;;  %v9381_v22 = vadd.f32 %v9380_v18, %v9379_v17  ;;  %v9321_v57 = vadd.f32 %v16296_v62, %v9291_v35  ;;  %v9371_v36 = vrot.slane %v9370_v37, 1 }
0x19fe   :  { %v9319_v0 = vadd.f32 %v16296_v62, %v9289_v60  ;;  %v9290_v26 = vmul.f32 %v16287_v40, %v9260_v45  ;;  %v9400_v43 = vrot.slane %v9399_v39, 4  ;;  %v9406_v24 = vsel %vm133_vm0, %v9318_v10, 0.0 }
0x19ff   :  { %v11855_v32 = vpop.eup %11854  ;;  %v9391_v59 = vrot.slane %v9390_v30, 2  ;;  %v9418_v21 = vsel %vm133_vm0, %v9322_v41, 0.0  ;;  %v9382_v28 = vrot.slane %v9381_v22, 1  ;;  %v9360_v17 = vrot.slane %v9359_v49, 1 }
0x1a00   :  { %v9263_v23 = vmul.f32 %v11855_v32, %v16250_v11  ;;  %v9407_v7 = vsel %vm133_vm0, %v9319_v0, 0.0  ;;  %v9320_v13 = vadd.f32 %v16296_v62, %v9290_v26  ;;  %v9401_v61 = vadd.f32 %v9400_v43, %v9399_v39 }
0x1a01   :  { %v11857_v47 = vpop.eup %11856  ;;  %v9408_v19 = vadd.f32 %v9407_v7, %v9406_v24  ;;  %v9392_v8 = vadd.f32 %v9391_v59, %v9390_v30  ;;  %v9372_v48 = vadd.f32 %v9371_v36, %v9370_v37  ;;  %v9383_v29 = vadd.f32 %v9382_v28, %v9381_v22 }
0x1a02   :  { %v9293_v53 = vmul.f32 %v16287_v40, %v9263_v23  ;;  %v9264_v20 = vmul.f32 %v11857_v47, %v16254_v56  ;;  %v9344_v11 = vmul.f32 %v9320_v13, %v16305_v55  ;;  %v9402_v25 = vrot.slane %v9401_v61, 2 }
0x1a03   :  { %v9417_v56 = vsel %vm133_vm0, %v9321_v57, 0.0  ;;  %v9393_v5 = vrot.slane %v9392_v8, 1  ;;  %v9361_v9 = vadd.f32 %v9360_v17, %v9359_v49  ;;  %v9440_v32 = vmul.f32 0.05, %v9372_v48 }
0x1a04   :  { %v11859_v3 = vpop.eup %11858  ;;  %v9323_v38 = vadd.f32 %v16296_v62, %v9293_v53  ;;  %v9294_v58 = vmul.f32 %v16287_v40, %v9264_v20  ;;  %v9409_v6 = vsel %vm133_vm0, %v9344_v11, 0.0  ;;  %v9419_v54 = vadd.f32 %v9418_v21, %v9417_v56 }
0x1a05   :  { %v11861_v34 = vpop.eup %11860  ;;  %v9265_v44 = vmul.f32 %v11859_v3, %v16259_v14  ;;  %v9410_v27 = vadd.f32 %v9409_v6, %v9408_v19  ;;  %v9403_v4 = vadd.f32 %v9402_v25, %v9401_v61  ;;  %v9441_v26 = vmul.f32 0.05, %v9383_v29 }
0x1a06   :  { %v9266_v46 = vmul.f32 %v11861_v34, %v16265_v12  ;;  %v9347_v1 = vmul.f32 %v9323_v38, %v16305_v55  ;;  %v9324_v15 = vadd.f32 %v16296_v62, %v9294_v58  ;;  %v9439_v43 = vmul.f32 0.05, %v9361_v9 }
0x1a07   :  { %v9295_v31 = vmul.f32 %v16287_v40, %v9265_v44  ;;  %v9411_v14 = vrot.slane %v9410_v27, 4  ;;  %v9404_v2 = vrot.slane %v9403_v4, 1  ;;  %v9453_v49 = vpack.c.bf16 %v9441_v26, %v9441_v26 }
0x1a08   :  { %v9296_v33 = vmul.f32 %v16287_v40, %v9266_v46  ;;  %v9420_v16 = vsel %vm133_vm0, %v9347_v1, 0.0  ;;  %v9428_v60 = vsel %vm133_vm0, %v9324_v15, 0.0  ;;  %v9451_v36 = vpack.c.bf16 %v9439_v43, %v9439_v43 }
0x1a09   :  { %v9325_v42 = vadd.f32 %v16296_v62, %v9295_v31  ;;  %v9421_v51 = vadd.f32 %v9420_v16, %v9419_v54  ;;  %v9412_v63 = vadd.f32 %v9411_v14, %v9410_v27  ;;  %v9405_v30 = vadd.f32 %v9404_v2, %v9403_v4 }
0x1a0a   :  { %v9326_v12 = vadd.f32 %v16296_v62, %v9296_v33  ;;  %v9394_v62 = vadd.f32 %v9393_v5, %v9392_v8  ;;  %v9476_v38 = vunpack.c.l.b16 %v9453_v49  ;;  %v9474_v25 = vunpack.c.l.b16 %v9451_v36 }
0x1a0b   :  { %v9429_v52 = vsel %vm133_vm0, %v9325_v42, 0.0  ;;  %v9422_v50 = vrot.slane %v9421_v51, 4  ;;  %v9413_v45 = vrot.slane %v9412_v63, 2  ;;  %v9443_v53 = vmul.f32 0.05, %v9405_v30 }
0x1a0c   :  { %v9350_v40 = vmul.f32 %v9326_v12, %v16305_v55  ;;  %v9430_v18 = vadd.f32 %v9429_v52, %v9428_v60  ;;  %v9452_v55 = vpack.c.bf16 %v9440_v32, %v9440_v32  ;;  %v9442_v57 = vmul.f32 0.05, %v9394_v62 }
0x1a0d   :  { %v9423_v35 = vadd.f32 %v9422_v50, %v9421_v51  ;;  %v9414_v39 = vadd.f32 %v9413_v45, %v9412_v63  ;;  %v9455_v19 = vpack.c.bf16 %v9443_v53, %v9443_v53  ;;  %v9860_v51 = vld [vmem:[%s16424_s17] ss:$0 sm:$0xff] }
0x1a0e   :  { %v9431_v0 = vsel %vm133_vm0, %v9350_v40, 0.0  ;;  %v9475_v11 = vunpack.c.l.b16 %v9452_v55  ;;  %v9454_v21 = vpack.c.bf16 %v9442_v57, %v9442_v57 }
0x1a0f   :  { %v9432_v37 = vadd.f32 %v9431_v0, %v9430_v18  ;;  %v9424_v10 = vrot.slane %v9423_v35, 2  ;;  %v9415_v41 = vrot.slane %v9414_v39, 1  ;;  %v9478_v46 = vunpack.c.l.b16 %v9455_v19 }
0x1a10   :  { %v9477_v6 = vunpack.c.l.b16 %v9454_v21  ;;  %v9483_v56 = vsel %vm9482_vm8, %v9475_v11, %v9474_v25 }
0x1a11   :  { %v9433_v23 = vrot.slane %v9432_v37, 4  ;;  %v9425_v7 = vadd.f32 %v9424_v10, %v9423_v35  ;;  %v9416_v13 = vadd.f32 %v9415_v41, %v9414_v39  ;;  %v9485_v1 = vsel %vm9484_vm9, %v9476_v38, %v9483_v56 }
0x1a12   :  { %v9487_v4 = vsel %vm9486_vm10, %v9477_v6, %v9485_v1 }
0x1a13   :  { %v9426_v22 = vrot.slane %v9425_v7, 1  ;;  %v9434_v47 = vadd.f32 %v9433_v23, %v9432_v37  ;;  %v9444_v20 = vmul.f32 0.05, %v9416_v13  ;;  %v9489_v15 = vsel %vm9488_vm11, %v9478_v46, %v9487_v4 }
0x1a15   :  { %v9427_v61 = vadd.f32 %v9426_v22, %v9425_v7  ;;  %v9435_v24 = vrot.slane %v9434_v47, 2  ;;  %v9456_v58 = vpack.c.bf16 %v9444_v20, %v9444_v20 }
0x1a17   :  { %v9436_v59 = vadd.f32 %v9435_v24, %v9434_v47  ;;  %v9445_v3 = vmul.f32 0.05, %v9427_v61  ;;  %v9479_v54 = vunpack.c.l.b16 %v9456_v58 }
0x1a19   :  { %v9437_v34 = vrot.slane %v9436_v59, 1  ;;  %v9457_v44 = vpack.c.bf16 %v9445_v3, %v9445_v3  ;;  %v9491_v14 = vsel %vm9490_vm12, %v9479_v54, %v9489_v15 }
0x1a1b   :  { %v9438_v28 = vadd.f32 %v9437_v34, %v9436_v59  ;;  %v9480_v31 = vunpack.c.l.b16 %v9457_v44 }
0x1a1d   :  { %v9446_v27 = vmul.f32 0.05, %v9438_v28  ;;  %v9493_v16 = vsel %vm9492_vm13, %v9480_v31, %v9491_v14 }
0x1a1f   :  { %v9458_v8 = vpack.c.bf16 %v9446_v27, %v9446_v27 }
0x1a21   :  { %v9481_v33 = vunpack.c.l.b16 %v9458_v8 }
0x1a23   :  { %v9495_v42 = vsel %vm9494_vm14, %v9481_v33, %v9493_v16 }
0x1a24   :  { %v9496_v17 = vpack.c.b16 %v9495_v42, %v9495_v42 }
0x1a26   :  { %11030 = vmatmul.mubr.msk.bf16.vlgmr.msra.gmra.mrb[232].mxu1 %vm133_vm0, %v9496_v17 }
0x1af9   :  { %v9546_v12 = vpop.f32.mrb[232].mxu1 }
0x1afa   :  { %v9547_v48 = vadd.f32 %v9860_v51, %v9546_v12  ;;  %v11031_v63 = vpop.f32.mrb[233].mxu1 }
0x1afb   :  { %v9549_v52 = vpop.f32.mrb[234].mxu1 }
0x1afc   :  { %9552 = vst [vmem:[%s16425_s18] sm:$0xff] %v9547_v48  ;;  %v11032_v29 = vpop.f32.mrb[235].mxu1 }

</bundles_post_ra>
